<compile_context>
chip_gen: v7x
topology: tpu7x:2x2x1
jax: 0.10.0
libtpu: 0.0.40
codegen_flags: <defaults>
</compile_context>

<pallas_src>
import numpy as np
import jax
import jax.numpy as jnp
from jax import lax
from jax.experimental import pallas as pl
from jax.experimental.pallas import tpu as pltpu

EPS = 1e-5     # BatchNorm2d default eps
LANE = 128     # TPU lane width


def _round_up(x, m):
    return (x + m - 1) // m * m


# ----------------------------- Pallas kernel ------------------------------ #

def _build_fused_kernel(layers, BB):
    """Fused kernel processing BB images per grid step.

    `layers[i]` static config:
      H, W          : input spatial size of structure i
      kh, kw        : conv kernel ('same' padding, stride 1)
      plh, plw      : low-side padding ((k-1)//2), matching torch padding='same'
      pool          : (pkh, pkw) AvgPool2d size, or None -> global average pool
      flat_input    : True iff kh == kw == 1 (input buffer is flat (BB*H*W, C))
      cpin, cpout   : per-layer lane-padded channel counts
    """
    n = len(layers)

    def store_padded(buf, b, data3d, L):
        """Write an (H, W, C) value into padded buffer buf[b]; zero only the
        halo strips (the interior is fully overwritten)."""
        H, W, kh, kw = L["H"], L["W"], L["kh"], L["kw"]
        plh, plw = L["plh"], L["plw"]
        phh, pww = kh - 1 - plh, kw - 1 - plw
        Hp, Wp = H + kh - 1, W + kw - 1
        C = L["cpin"]
        dt = buf.dtype
        if plh:
            buf[b, 0:plh, :, :] = jnp.zeros((plh, Wp, C), dt)
        if phh:
            buf[b, plh + H:Hp, :, :] = jnp.zeros((phh, Wp, C), dt)
        if plw:
            buf[b, plh:plh + H, 0:plw, :] = jnp.zeros((H, plw, C), dt)
        if pww:
            buf[b, plh:plh + H, plw + W:Wp, :] = jnp.zeros((H, pww, C), dt)
        buf[b, plh:plh + H, plw:plw + W, :] = data3d.astype(dt)

    def kernel(*refs):
        x_ref = refs[0]
        w_refs = [refs[1 + 2 * i] for i in range(n)]   # (kh*kw*cpin, cpout) bf16
        s_refs = [refs[2 + 2 * i] for i in range(n)]   # (1, cpout) f32 folded shift
        o_ref = refs[1 + 2 * n]                        # (BB, 1, cpout_last) f32
        scratch = list(refs[2 + 2 * n:])

        inbufs, cols, accs = [], [], []
        k = 0
        for L in layers:
            inbufs.append(scratch[k]); k += 1
            if not L["flat_input"]:
                cols.append(scratch[k]); k += 1
            else:
                cols.append(None)
            if L["pool"] is not None:
                accs.append(scratch[k]); k += 1
            else:
                accs.append(None)

        # ---- load this block of images into structure 0's input buffer -----
        L0 = layers[0]
        if L0["flat_input"]:
            M0 = L0["H"] * L0["W"]
            for b in range(BB):
                inbufs[0][pl.ds(b * M0, M0), :] = x_ref[b].reshape(M0, L0["cpin"])
        else:
            for b in range(BB):
                store_padded(inbufs[0], b, x_ref[b], L0)

        for i, L in enumerate(layers):
            H, W, kh, kw = L["H"], L["W"], L["kh"], L["kw"]
            cpin, cpout = L["cpin"], L["cpout"]
            M = BB * H * W

            # ---- in-kernel im2col staging (bf16), kw strided reads only ----
            if L["flat_input"]:
                lhs = inbufs[i]                          # (M, cpin) bf16
            else:
                for dj in range(kw):
                    colslab = inbufs[i][:, :, dj:dj + W, :]    # (BB, Hp, W, C)
                    for di in range(kh):
                        t = di * kw + dj
                        cols[i][:, t * cpin:(t + 1) * cpin] = (
                            colslab[:, di:di + H, :, :].reshape(M, cpin))
                lhs = cols[i]                            # (M, kh*kw*cpin) bf16

            # ---- one long-K MXU matmul; fused folded-BN shift + ReLU -------
            act = jnp.dot(lhs[...], w_refs[i][...],
                          preferred_element_type=jnp.float32)
            act = jnp.maximum(act + s_refs[i][...], 0.0)          # (M, cpout) f32

            if L["pool"] is None:
                # ---- AdaptiveAvgPool2d(1): per-image mean over H*W ---------
                HW = H * W
                inv = 1.0 / HW
                for b in range(BB):
                    seg = act[b * HW:(b + 1) * HW]
                    o_ref[b:b + 1, :, :] = (
                        jnp.sum(seg, axis=0, keepdims=True) * inv
                    ).reshape(1, 1, cpout)
            else:
                accs[i][...] = act        # single store (epilogue already fused)
                pkh, pkw = L["pool"]
                Ho, Wo = H // pkh, W // pkw
                inv = 1.0 / (pkh * pkw)
                HWo = H * Wo

                # pool along W: sublane-strided reads of the flat activation
                hw = accs[i][pl.ds(0, BB * HWo, stride=pkw), :]
                for dw in range(1, pkw):
                    hw = hw + accs[i][pl.ds(dw, BB * HWo, stride=pkw), :]

                # pool along H: lane-preserving regroup + slice adds (in regs)
                hwr = hw.reshape(BB * Ho, pkh * Wo, cpout)
                pooled = hwr[:, 0:Wo, :]
                for dh in range(1, pkh):
                    pooled = pooled + hwr[:, dh * Wo:(dh + 1) * Wo, :]
                pooled = pooled * inv                       # (BB*Ho, Wo, C) f32

                # write into the next structure's (zero-halo) input buffer
                nxt = layers[i + 1]
                nb = inbufs[i + 1]
                if nxt["flat_input"]:
                    nb[...] = pooled.reshape(BB * Ho * Wo, cpout).astype(nb.dtype)
                else:
                    for b in range(BB):
                        store_padded(nb, b, pooled[b * Ho:(b + 1) * Ho], nxt)

    return kernel


# ------------------------------- JAX glue --------------------------------- #

def init_params(key, in_channels, n_structures, kernel_size, conv_channel_sizes):
    """Deterministic synthetic parameters matching nn.Conv2d / nn.BatchNorm2d."""
    params = []
    cin = in_channels
    for i in range(n_structures):
        cout = conv_channel_sizes[i]
        kh, kw = kernel_size if i != n_structures - 1 else (1, 1)
        key, k1, k2, k3, k4, k5, k6 = jax.random.split(key, 7)
        bound = 1.0 / np.sqrt(cin * kh * kw)
        params.append(dict(
            w=jax.random.uniform(k1, (cout, cin, kh, kw), jnp.float32, -bound, bound),
            b=jax.random.uniform(k2, (cout,), jnp.float32, -bound, bound),
            gamma=jax.random.uniform(k3, (cout,), jnp.float32, 0.5, 1.5),
            beta=jax.random.uniform(k4, (cout,), jnp.float32, -0.5, 0.5),
            mean=jax.random.uniform(k5, (cout,), jnp.float32, -0.5, 0.5),
            var=jax.random.uniform(k6, (cout,), jnp.float32, 0.5, 1.5),
            k=(kh, kw),
        ))
        cin = cout
    return params


def feature_learning_forward(x_nchw, params, avg_pool_sizes):
    """Forward pass of Feature_Learning; input NCHW, output (N, C_last, 1, 1)."""
    n_struct = len(params)
    N, Cin, H0, W0 = x_nchw.shape

    # batch block per grid step (amortizes per-step overhead, fattens matmuls)
    BB = 1
    for cand in (8, 4, 2, 1):
        if N % cand == 0:
            BB = cand
            break

    # ---- static per-structure config (per-layer lane padding) ----
    layers = []
    H, W = H0, W0
    cin = Cin
    for i, p in enumerate(params):
        kh, kw = p["k"]
        cout = int(p["w"].shape[0])
        pool = tuple(avg_pool_sizes[i]) if i != n_struct - 1 else None
        if pool is not None:
            # TODO(synk): support floor-mode AvgPool when spatial dims don't divide evenly.
            assert H % pool[0] == 0 and W % pool[1] == 0
        layers.append(dict(H=H, W=W, kh=kh, kw=kw,
                           plh=(kh - 1) // 2, plw=(kw - 1) // 2,
                           pool=pool, flat_input=(kh == 1 and kw == 1),
                           cpin=_round_up(cin, LANE), cpout=_round_up(cout, LANE)))
        if pool is not None:
            H, W = H // pool[0], W // pool[1]
        cin = cout

    # ---- one-time host-side folding / im2col weight slab construction ----
    ops = []  # interleaved (w_i, shift_i)
    for p, L in zip(params, layers):
        kh, kw = p["k"]
        cout, cin_l = int(p["w"].shape[0]), int(p["w"].shape[1])
        cpin, cpout = L["cpin"], L["cpout"]
        scale = p["gamma"] / jnp.sqrt(p["var"] + EPS)              # BN scale
        w_eff = p["w"] * scale[:, None, None, None]                # fold scale into w
        w_mat = jnp.transpose(w_eff, (2, 3, 1, 0))                 # (kh, kw, cin, cout)
        w_mat = jnp.pad(w_mat, ((0, 0), (0, 0),
                                (0, cpin - cin_l), (0, cpout - cout)))
        w_mat = w_mat.reshape(kh * kw * cpin, cpout).astype(jnp.bfloat16)
        shift = p["beta"] + (p["b"] - p["mean"]) * scale           # fold bias+BN shift
        shift = jnp.pad(shift, (0, cpout - cout)).reshape(1, cpout).astype(jnp.float32)
        ops += [w_mat, shift]

    # ---- NCHW -> NHWC, pad channels to a lane-dense slab, cast to bf16 ----
    x = jnp.transpose(x_nchw, (0, 2, 3, 1))
    x = jnp.pad(x, ((0, 0), (0, 0), (0, 0), (0, layers[0]["cpin"] - Cin)))
    x = x.astype(jnp.bfloat16)

    # ---- VMEM scratch: padded input buffer (+ im2col slab) (+ f32 acc) ----
    scratch_shapes = []
    for L in layers:
        cpin, cpout = L["cpin"], L["cpout"]
        if L["flat_input"]:
            scratch_shapes.append(pltpu.VMEM((BB * L["H"] * L["W"], cpin), jnp.bfloat16))
        else:
            scratch_shapes.append(pltpu.VMEM(
                (BB, L["H"] + L["kh"] - 1, L["W"] + L["kw"] - 1, cpin), jnp.bfloat16))
            scratch_shapes.append(pltpu.VMEM(
                (BB * L["H"] * L["W"], L["kh"] * L["kw"] * cpin), jnp.bfloat16))
        if L["pool"] is not None:
            scratch_shapes.append(pltpu.VMEM((BB * L["H"] * L["W"], cpout), jnp.float32))

    in_specs = [pl.BlockSpec((BB, H0, W0, layers[0]["cpin"]), lambda g: (g, 0, 0, 0))]
    for i in range(n_struct):
        in_specs.append(pl.BlockSpec(ops[2 * i].shape, lambda g: (0, 0)))
        in_specs.append(pl.BlockSpec(ops[2 * i + 1].shape, lambda g: (0, 0)))

    cpout_last = layers[-1]["cpout"]
    kernel = _build_fused_kernel(layers, BB)
    out = pl.pallas_call(
        kernel,
        out_shape=jax.ShapeDtypeStruct((N, 1, cpout_last), jnp.float32),
        grid_spec=pltpu.PrefetchScalarGridSpec(
            num_scalar_prefetch=0,
            grid=(N // BB,),                              # BB images per grid step
            in_specs=in_specs,
            out_specs=pl.BlockSpec((BB, 1, cpout_last), lambda g: (g, 0, 0)),
            scratch_shapes=scratch_shapes),
        compiler_params=pltpu.CompilerParams(
            dimension_semantics=("parallel",),            # shards over v7x's 2 TCs
            vmem_limit_bytes=32 * 1024 * 1024),
    )(x, *ops)

    cout_last = int(params[-1]["w"].shape[0])
    return out[:, 0, :cout_last].reshape(N, cout_last, 1, 1)


# --------------------------- pure-JAX reference ---------------------------- #

def reference_forward(x_nchw, params, avg_pool_sizes):
    x = x_nchw
    n_structures = len(params)
    for i, p in enumerate(params):
        kh, kw = p["k"]
        pad_h = ((kh - 1) // 2, kh - 1 - (kh - 1) // 2)
        pad_w = ((kw - 1) // 2, kw - 1 - (kw - 1) // 2)
        x = lax.conv_general_dilated(
            x, p["w"], window_strides=(1, 1), padding=(pad_h, pad_w),
            dimension_numbers=("NCHW", "OIHW", "NCHW"))
        x = x + p["b"].reshape(1, -1, 1, 1)
        x = (x - p["mean"].reshape(1, -1, 1, 1)) / jnp.sqrt(
            p["var"].reshape(1, -1, 1, 1) + EPS)
        x = x * p["gamma"].reshape(1, -1, 1, 1) + p["beta"].reshape(1, -1, 1, 1)
        x = jnp.maximum(x, 0.0)
        if i != n_structures - 1:
            pkh, pkw = avg_pool_sizes[i]
            n, c, h, w = x.shape
            x = x.reshape(n, c, h // pkh, pkh, w // pkw, pkw).mean(axis=(3, 5))
        else:
            x = x.mean(axis=(2, 3), keepdims=True)
    return x


# --------------------------------- main ------------------------------------ #

if __name__ == "__main__":
    key = jax.random.PRNGKey(0)

    in_channels = 4
    n_structures = 3
    kernel_size = (3, 3)
    conv_channel_sizes = [8, 16, 32]
    avg_pool_sizes = [(2, 2), (2, 2)]

    key, kx, kp = jax.random.split(key, 3)
    x = jax.random.normal(kx, (2, in_channels, 16, 16), jnp.float32)  # NCHW input
    params = init_params(kp, in_channels, n_structures, kernel_size, conv_channel_sizes)

    out = feature_learning_forward(x, params, avg_pool_sizes)
    out = jax.block_until_ready(out)

    ref = reference_forward(x, params, avg_pool_sizes)
    assert out.shape == (2, conv_channel_sizes[-1], 1, 1), out.shape
    # Tolerance relaxed because conv operands (activations + weights) are bf16
    # on the MXU (f32 accumulation); shift/ReLU/pooling are f32.
    np.testing.assert_allclose(np.asarray(out), np.asarray(ref), rtol=5e-2, atol=5e-2)

    print("KERNEL_OK")
</pallas_src>

<mosaic_0001>
module attributes {stable_mosaic.version = 11 : i64} {
  func.func @kernel(%arg0: i32, %arg1: memref<2x16x16x128xbf16, #tpu.memory_space<vmem>>, %arg2: memref<1152x128xbf16, #tpu.memory_space<vmem>>, %arg3: memref<1x128xf32, #tpu.memory_space<vmem>>, %arg4: memref<1152x128xbf16, #tpu.memory_space<vmem>>, %arg5: memref<1x128xf32, #tpu.memory_space<vmem>>, %arg6: memref<128x128xbf16, #tpu.memory_space<vmem>>, %arg7: memref<1x128xf32, #tpu.memory_space<vmem>>, %arg8: memref<2x1x128xf32, #tpu.memory_space<vmem>>, %arg9: memref<2x18x18x128xbf16, #tpu.memory_space<vmem>>, %arg10: memref<512x1152xbf16, #tpu.memory_space<vmem>>, %arg11: memref<512x128xf32, #tpu.memory_space<vmem>>, %arg12: memref<2x10x10x128xbf16, #tpu.memory_space<vmem>>, %arg13: memref<128x1152xbf16, #tpu.memory_space<vmem>>, %arg14: memref<128x128xf32, #tpu.memory_space<vmem>>, %arg15: memref<32x128xbf16, #tpu.memory_space<vmem>>) attributes {dimension_semantics = [#tpu.dimension_semantics<parallel>], iteration_bounds = array<i64: 1>, scalar_prefetch = 0 : i64, scratch_operands = 7 : i64, tpu.core_type = #tpu.core_type<tc>, window_params = [{transform_indices = @transform_0, window_bounds = array<i64: 2, 16, 16, 128>}, {pipeline_mode = #tpu.pipeline_mode<synchronous>, transform_indices = @transform_1, window_bounds = array<i64: 1152, 128>}, {pipeline_mode = #tpu.pipeline_mode<synchronous>, transform_indices = @transform_2, window_bounds = array<i64: 1, 128>}, {pipeline_mode = #tpu.pipeline_mode<synchronous>, transform_indices = @transform_3, window_bounds = array<i64: 1152, 128>}, {pipeline_mode = #tpu.pipeline_mode<synchronous>, transform_indices = @transform_4, window_bounds = array<i64: 1, 128>}, {pipeline_mode = #tpu.pipeline_mode<synchronous>, transform_indices = @transform_5, window_bounds = array<i64: 128, 128>}, {pipeline_mode = #tpu.pipeline_mode<synchronous>, transform_indices = @transform_6, window_bounds = array<i64: 1, 128>}, {transform_indices = @transform_7, window_bounds = array<i64: 2, 1, 128>}]} {
    %c0 = arith.constant 0 : index
    %c0_0 = arith.constant 0 : index
    %c0_1 = arith.constant 0 : index
    %c0_2 = arith.constant 0 : index
    %0 = vector.load %arg1[%c0, %c0_0, %c0_1, %c0_2] : memref<2x16x16x128xbf16, #tpu.memory_space<vmem>>, vector<1x16x16x128xbf16>
    %1 = vector.shape_cast %0 : vector<1x16x16x128xbf16> to vector<16x16x128xbf16>
    %cst = arith.constant 0.000000e+00 : bf16
    %2 = vector.broadcast %cst : bf16 to vector<1x18x128xbf16>
    %c0_3 = arith.constant 0 : index
    %c0_4 = arith.constant 0 : index
    %c0_5 = arith.constant 0 : index
    %c0_6 = arith.constant 0 : index
    %3 = vector.load %arg9[%c0_3, %c0_4, %c0_5, %c0_6] : memref<2x18x18x128xbf16, #tpu.memory_space<vmem>>, vector<1x1x18x128xbf16>
    %4 = vector.shape_cast %3 : vector<1x1x18x128xbf16> to vector<1x18x128xbf16>
    %5 = vector.shape_cast %2 : vector<1x18x128xbf16> to vector<1x1x18x128xbf16>
    tpu.vector_store %arg9[%c0_3, %c0_4, %c0_5, %c0_6], %5 {strides = array<i32>} : memref<2x18x18x128xbf16, #tpu.memory_space<vmem>>, vector<1x1x18x128xbf16>,
    %cst_7 = arith.constant 0.000000e+00 : bf16
    %6 = vector.broadcast %cst_7 : bf16 to vector<1x18x128xbf16>
    %c0_8 = arith.constant 0 : index
    %c17 = arith.constant 17 : index
    %c0_9 = arith.constant 0 : index
    %c0_10 = arith.constant 0 : index
    %7 = vector.load %arg9[%c0_8, %c17, %c0_9, %c0_10] : memref<2x18x18x128xbf16, #tpu.memory_space<vmem>>, vector<1x1x18x128xbf16>
    %8 = vector.shape_cast %7 : vector<1x1x18x128xbf16> to vector<1x18x128xbf16>
    %9 = vector.shape_cast %6 : vector<1x18x128xbf16> to vector<1x1x18x128xbf16>
    tpu.vector_store %arg9[%c0_8, %c17, %c0_9, %c0_10], %9 {strides = array<i32>} : memref<2x18x18x128xbf16, #tpu.memory_space<vmem>>, vector<1x1x18x128xbf16>,
    %cst_11 = arith.constant 0.000000e+00 : bf16
    %10 = vector.broadcast %cst_11 : bf16 to vector<16x1x128xbf16>
    %c0_12 = arith.constant 0 : index
    %c1 = arith.constant 1 : index
    %c0_13 = arith.constant 0 : index
    %c0_14 = arith.constant 0 : index
    %11 = vector.load %arg9[%c0_12, %c1, %c0_13, %c0_14] : memref<2x18x18x128xbf16, #tpu.memory_space<vmem>>, vector<1x16x1x128xbf16>
    %12 = vector.shape_cast %11 : vector<1x16x1x128xbf16> to vector<16x1x128xbf16>
    %13 = vector.shape_cast %10 : vector<16x1x128xbf16> to vector<1x16x1x128xbf16>
    tpu.vector_store %arg9[%c0_12, %c1, %c0_13, %c0_14], %13 {strides = array<i32>} : memref<2x18x18x128xbf16, #tpu.memory_space<vmem>>, vector<1x16x1x128xbf16>,
    %cst_15 = arith.constant 0.000000e+00 : bf16
    %14 = vector.broadcast %cst_15 : bf16 to vector<16x1x128xbf16>
    %c0_16 = arith.constant 0 : index
    %c1_17 = arith.constant 1 : index
    %c17_18 = arith.constant 17 : index
    %c0_19 = arith.constant 0 : index
    %15 = vector.load %arg9[%c0_16, %c1_17, %c17_18, %c0_19] : memref<2x18x18x128xbf16, #tpu.memory_space<vmem>>, vector<1x16x1x128xbf16>
    %16 = vector.shape_cast %15 : vector<1x16x1x128xbf16> to vector<16x1x128xbf16>
    %17 = vector.shape_cast %14 : vector<16x1x128xbf16> to vector<1x16x1x128xbf16>
    tpu.vector_store %arg9[%c0_16, %c1_17, %c17_18, %c0_19], %17 {strides = array<i32>} : memref<2x18x18x128xbf16, #tpu.memory_space<vmem>>, vector<1x16x1x128xbf16>,
    %c0_20 = arith.constant 0 : index
    %c1_21 = arith.constant 1 : index
    %c1_22 = arith.constant 1 : index
    %c0_23 = arith.constant 0 : index
    %18 = vector.load %arg9[%c0_20, %c1_21, %c1_22, %c0_23] : memref<2x18x18x128xbf16, #tpu.memory_space<vmem>>, vector<1x16x16x128xbf16>
    %19 = vector.shape_cast %18 : vector<1x16x16x128xbf16> to vector<16x16x128xbf16>
    %20 = vector.shape_cast %1 : vector<16x16x128xbf16> to vector<1x16x16x128xbf16>
    tpu.vector_store %arg9[%c0_20, %c1_21, %c1_22, %c0_23], %20 {strides = array<i32>} : memref<2x18x18x128xbf16, #tpu.memory_space<vmem>>, vector<1x16x16x128xbf16>,
    %c1_24 = arith.constant 1 : index
    %c0_25 = arith.constant 0 : index
    %c0_26 = arith.constant 0 : index
    %c0_27 = arith.constant 0 : index
    %21 = vector.load %arg1[%c1_24, %c0_25, %c0_26, %c0_27] : memref<2x16x16x128xbf16, #tpu.memory_space<vmem>>, vector<1x16x16x128xbf16>
    %22 = vector.shape_cast %21 : vector<1x16x16x128xbf16> to vector<16x16x128xbf16>
    %cst_28 = arith.constant 0.000000e+00 : bf16
    %23 = vector.broadcast %cst_28 : bf16 to vector<1x18x128xbf16>
    %c1_29 = arith.constant 1 : index
    %c0_30 = arith.constant 0 : index
    %c0_31 = arith.constant 0 : index
    %c0_32 = arith.constant 0 : index
    %24 = vector.load %arg9[%c1_29, %c0_30, %c0_31, %c0_32] : memref<2x18x18x128xbf16, #tpu.memory_space<vmem>>, vector<1x1x18x128xbf16>
    %25 = vector.shape_cast %24 : vector<1x1x18x128xbf16> to vector<1x18x128xbf16>
    %26 = vector.shape_cast %23 : vector<1x18x128xbf16> to vector<1x1x18x128xbf16>
    tpu.vector_store %arg9[%c1_29, %c0_30, %c0_31, %c0_32], %26 {strides = array<i32>} : memref<2x18x18x128xbf16, #tpu.memory_space<vmem>>, vector<1x1x18x128xbf16>,
    %cst_33 = arith.constant 0.000000e+00 : bf16
    %27 = vector.broadcast %cst_33 : bf16 to vector<1x18x128xbf16>
    %c1_34 = arith.constant 1 : index
    %c17_35 = arith.constant 17 : index
    %c0_36 = arith.constant 0 : index
    %c0_37 = arith.constant 0 : index
    %28 = vector.load %arg9[%c1_34, %c17_35, %c0_36, %c0_37] : memref<2x18x18x128xbf16, #tpu.memory_space<vmem>>, vector<1x1x18x128xbf16>
    %29 = vector.shape_cast %28 : vector<1x1x18x128xbf16> to vector<1x18x128xbf16>
    %30 = vector.shape_cast %27 : vector<1x18x128xbf16> to vector<1x1x18x128xbf16>
    tpu.vector_store %arg9[%c1_34, %c17_35, %c0_36, %c0_37], %30 {strides = array<i32>} : memref<2x18x18x128xbf16, #tpu.memory_space<vmem>>, vector<1x1x18x128xbf16>,
    %cst_38 = arith.constant 0.000000e+00 : bf16
    %31 = vector.broadcast %cst_38 : bf16 to vector<16x1x128xbf16>
    %c1_39 = arith.constant 1 : index
    %c1_40 = arith.constant 1 : index
    %c0_41 = arith.constant 0 : index
    %c0_42 = arith.constant 0 : index
    %32 = vector.load %arg9[%c1_39, %c1_40, %c0_41, %c0_42] : memref<2x18x18x128xbf16, #tpu.memory_space<vmem>>, vector<1x16x1x128xbf16>
    %33 = vector.shape_cast %32 : vector<1x16x1x128xbf16> to vector<16x1x128xbf16>
    %34 = vector.shape_cast %31 : vector<16x1x128xbf16> to vector<1x16x1x128xbf16>
    tpu.vector_store %arg9[%c1_39, %c1_40, %c0_41, %c0_42], %34 {strides = array<i32>} : memref<2x18x18x128xbf16, #tpu.memory_space<vmem>>, vector<1x16x1x128xbf16>,
    %cst_43 = arith.constant 0.000000e+00 : bf16
    %35 = vector.broadcast %cst_43 : bf16 to vector<16x1x128xbf16>
    %c1_44 = arith.constant 1 : index
    %c1_45 = arith.constant 1 : index
    %c17_46 = arith.constant 17 : index
    %c0_47 = arith.constant 0 : index
    %36 = vector.load %arg9[%c1_44, %c1_45, %c17_46, %c0_47] : memref<2x18x18x128xbf16, #tpu.memory_space<vmem>>, vector<1x16x1x128xbf16>
    %37 = vector.shape_cast %36 : vector<1x16x1x128xbf16> to vector<16x1x128xbf16>
    %38 = vector.shape_cast %35 : vector<16x1x128xbf16> to vector<1x16x1x128xbf16>
    tpu.vector_store %arg9[%c1_44, %c1_45, %c17_46, %c0_47], %38 {strides = array<i32>} : memref<2x18x18x128xbf16, #tpu.memory_space<vmem>>, vector<1x16x1x128xbf16>,
    %c1_48 = arith.constant 1 : index
    %c1_49 = arith.constant 1 : index
    %c1_50 = arith.constant 1 : index
    %c0_51 = arith.constant 0 : index
    %39 = vector.load %arg9[%c1_48, %c1_49, %c1_50, %c0_51] : memref<2x18x18x128xbf16, #tpu.memory_space<vmem>>, vector<1x16x16x128xbf16>
    %40 = vector.shape_cast %39 : vector<1x16x16x128xbf16> to vector<16x16x128xbf16>
    %41 = vector.shape_cast %22 : vector<16x16x128xbf16> to vector<1x16x16x128xbf16>
    tpu.vector_store %arg9[%c1_48, %c1_49, %c1_50, %c0_51], %41 {strides = array<i32>} : memref<2x18x18x128xbf16, #tpu.memory_space<vmem>>, vector<1x16x16x128xbf16>,
    %c0_52 = arith.constant 0 : index
    %c0_53 = arith.constant 0 : index
    %c0_54 = arith.constant 0 : index
    %c0_55 = arith.constant 0 : index
    %42 = vector.load %arg9[%c0_52, %c0_53, %c0_54, %c0_55] : memref<2x18x18x128xbf16, #tpu.memory_space<vmem>>, vector<2x18x16x128xbf16>
    %43 = vector.extract_strided_slice %42 {offsets = [0, 0, 0, 0], sizes = [2, 16, 16, 128], strides = [1, 1, 1, 1]} : vector<2x18x16x128xbf16> to vector<2x16x16x128xbf16>
    %44 = vector.shape_cast %43 : vector<2x16x16x128xbf16> to vector<512x128xbf16>
    %c0_56 = arith.constant 0 : index
    %c0_57 = arith.constant 0 : index
    %45 = vector.load %arg10[%c0_56, %c0_57] : memref<512x1152xbf16, #tpu.memory_space<vmem>>, vector<512x128xbf16>
    tpu.vector_store %arg10[%c0_56, %c0_57], %44 {strides = array<i32>} : memref<512x1152xbf16, #tpu.memory_space<vmem>>, vector<512x128xbf16>,
    %46 = vector.extract_strided_slice %42 {offsets = [0, 1, 0, 0], sizes = [2, 16, 16, 128], strides = [1, 1, 1, 1]} : vector<2x18x16x128xbf16> to vector<2x16x16x128xbf16>
    %47 = vector.shape_cast %46 : vector<2x16x16x128xbf16> to vector<512x128xbf16>
    %c0_58 = arith.constant 0 : index
    %c384 = arith.constant 384 : index
    %48 = vector.load %arg10[%c0_58, %c384] : memref<512x1152xbf16, #tpu.memory_space<vmem>>, vector<512x128xbf16>
    tpu.vector_store %arg10[%c0_58, %c384], %47 {strides = array<i32>} : memref<512x1152xbf16, #tpu.memory_space<vmem>>, vector<512x128xbf16>,
    %49 = vector.extract_strided_slice %42 {offsets = [0, 2, 0, 0], sizes = [2, 16, 16, 128], strides = [1, 1, 1, 1]} : vector<2x18x16x128xbf16> to vector<2x16x16x128xbf16>
    %50 = vector.shape_cast %49 : vector<2x16x16x128xbf16> to vector<512x128xbf16>
    %c0_59 = arith.constant 0 : index
    %c768 = arith.constant 768 : index
    %51 = vector.load %arg10[%c0_59, %c768] : memref<512x1152xbf16, #tpu.memory_space<vmem>>, vector<512x128xbf16>
    tpu.vector_store %arg10[%c0_59, %c768], %50 {strides = array<i32>} : memref<512x1152xbf16, #tpu.memory_space<vmem>>, vector<512x128xbf16>,
    %c0_60 = arith.constant 0 : index
    %c0_61 = arith.constant 0 : index
    %c1_62 = arith.constant 1 : index
    %c0_63 = arith.constant 0 : index
    %52 = vector.load %arg9[%c0_60, %c0_61, %c1_62, %c0_63] : memref<2x18x18x128xbf16, #tpu.memory_space<vmem>>, vector<2x18x16x128xbf16>
    %53 = vector.extract_strided_slice %52 {offsets = [0, 0, 0, 0], sizes = [2, 16, 16, 128], strides = [1, 1, 1, 1]} : vector<2x18x16x128xbf16> to vector<2x16x16x128xbf16>
    %54 = vector.shape_cast %53 : vector<2x16x16x128xbf16> to vector<512x128xbf16>
    %c0_64 = arith.constant 0 : index
    %c128 = arith.constant 128 : index
    %55 = vector.load %arg10[%c0_64, %c128] : memref<512x1152xbf16, #tpu.memory_space<vmem>>, vector<512x128xbf16>
    tpu.vector_store %arg10[%c0_64, %c128], %54 {strides = array<i32>} : memref<512x1152xbf16, #tpu.memory_space<vmem>>, vector<512x128xbf16>,
    %56 = vector.extract_strided_slice %52 {offsets = [0, 1, 0, 0], sizes = [2, 16, 16, 128], strides = [1, 1, 1, 1]} : vector<2x18x16x128xbf16> to vector<2x16x16x128xbf16>
    %57 = vector.shape_cast %56 : vector<2x16x16x128xbf16> to vector<512x128xbf16>
    %c0_65 = arith.constant 0 : index
    %c512 = arith.constant 512 : index
    %58 = vector.load %arg10[%c0_65, %c512] : memref<512x1152xbf16, #tpu.memory_space<vmem>>, vector<512x128xbf16>
    tpu.vector_store %arg10[%c0_65, %c512], %57 {strides = array<i32>} : memref<512x1152xbf16, #tpu.memory_space<vmem>>, vector<512x128xbf16>,
    %59 = vector.extract_strided_slice %52 {offsets = [0, 2, 0, 0], sizes = [2, 16, 16, 128], strides = [1, 1, 1, 1]} : vector<2x18x16x128xbf16> to vector<2x16x16x128xbf16>
    %60 = vector.shape_cast %59 : vector<2x16x16x128xbf16> to vector<512x128xbf16>
    %c0_66 = arith.constant 0 : index
    %c896 = arith.constant 896 : index
    %61 = vector.load %arg10[%c0_66, %c896] : memref<512x1152xbf16, #tpu.memory_space<vmem>>, vector<512x128xbf16>
    tpu.vector_store %arg10[%c0_66, %c896], %60 {strides = array<i32>} : memref<512x1152xbf16, #tpu.memory_space<vmem>>, vector<512x128xbf16>,
    %c0_67 = arith.constant 0 : index
    %c0_68 = arith.constant 0 : index
    %c2 = arith.constant 2 : index
    %c0_69 = arith.constant 0 : index
    %62 = vector.load %arg9[%c0_67, %c0_68, %c2, %c0_69] : memref<2x18x18x128xbf16, #tpu.memory_space<vmem>>, vector<2x18x16x128xbf16>
    %63 = vector.extract_strided_slice %62 {offsets = [0, 0, 0, 0], sizes = [2, 16, 16, 128], strides = [1, 1, 1, 1]} : vector<2x18x16x128xbf16> to vector<2x16x16x128xbf16>
    %64 = vector.shape_cast %63 : vector<2x16x16x128xbf16> to vector<512x128xbf16>
    %c0_70 = arith.constant 0 : index
    %c256 = arith.constant 256 : index
    %65 = vector.load %arg10[%c0_70, %c256] : memref<512x1152xbf16, #tpu.memory_space<vmem>>, vector<512x128xbf16>
    tpu.vector_store %arg10[%c0_70, %c256], %64 {strides = array<i32>} : memref<512x1152xbf16, #tpu.memory_space<vmem>>, vector<512x128xbf16>,
    %66 = vector.extract_strided_slice %62 {offsets = [0, 1, 0, 0], sizes = [2, 16, 16, 128], strides = [1, 1, 1, 1]} : vector<2x18x16x128xbf16> to vector<2x16x16x128xbf16>
    %67 = vector.shape_cast %66 : vector<2x16x16x128xbf16> to vector<512x128xbf16>
    %c0_71 = arith.constant 0 : index
    %c640 = arith.constant 640 : index
    %68 = vector.load %arg10[%c0_71, %c640] : memref<512x1152xbf16, #tpu.memory_space<vmem>>, vector<512x128xbf16>
    tpu.vector_store %arg10[%c0_71, %c640], %67 {strides = array<i32>} : memref<512x1152xbf16, #tpu.memory_space<vmem>>, vector<512x128xbf16>,
    %69 = vector.extract_strided_slice %62 {offsets = [0, 2, 0, 0], sizes = [2, 16, 16, 128], strides = [1, 1, 1, 1]} : vector<2x18x16x128xbf16> to vector<2x16x16x128xbf16>
    %70 = vector.shape_cast %69 : vector<2x16x16x128xbf16> to vector<512x128xbf16>
    %c0_72 = arith.constant 0 : index
    %c1024 = arith.constant 1024 : index
    %71 = vector.load %arg10[%c0_72, %c1024] : memref<512x1152xbf16, #tpu.memory_space<vmem>>, vector<512x128xbf16>
    tpu.vector_store %arg10[%c0_72, %c1024], %70 {strides = array<i32>} : memref<512x1152xbf16, #tpu.memory_space<vmem>>, vector<512x128xbf16>,
    %c0_73 = arith.constant 0 : index
    %c0_74 = arith.constant 0 : index
    %72 = vector.load %arg10[%c0_73, %c0_74] : memref<512x1152xbf16, #tpu.memory_space<vmem>>, vector<512x1152xbf16>
    %c0_75 = arith.constant 0 : index
    %c0_76 = arith.constant 0 : index
    %73 = vector.load %arg2[%c0_75, %c0_76] : memref<1152x128xbf16, #tpu.memory_space<vmem>>, vector<1152x128xbf16>
    %cst_77 = arith.constant dense<0.000000e+00> : vector<512x128xf32>
    %74 = tpu.matmul %72, %73, %cst_77 {dimension_numbers = #tpu.dot_dimension_numbers<[1], [0], [0], [1], [0, 0, 1, 1], [], []>} : vector<512x1152xbf16>, vector<1152x128xbf16>, vector<512x128xf32> -> vector<512x128xf32>
    %c0_78 = arith.constant 0 : index
    %c0_79 = arith.constant 0 : index
    %75 = vector.load %arg3[%c0_78, %c0_79] : memref<1x128xf32, #tpu.memory_space<vmem>>, vector<1x128xf32>
    %76 = vector.broadcast %75 : vector<1x128xf32> to vector<512x128xf32>
    %77 = arith.addf %74, %76 : vector<512x128xf32>
    %cst_80 = arith.constant 0.000000e+00 : f32
    %78 = vector.broadcast %cst_80 : f32 to vector<512x128xf32>
    %79 = arith.maximumf %77, %78 : vector<512x128xf32>
    %c0_81 = arith.constant 0 : index
    %c0_82 = arith.constant 0 : index
    %80 = vector.load %arg11[%c0_81, %c0_82] : memref<512x128xf32, #tpu.memory_space<vmem>>, vector<512x128xf32>
    tpu.vector_store %arg11[%c0_81, %c0_82], %79 {strides = array<i32>} : memref<512x128xf32, #tpu.memory_space<vmem>>, vector<512x128xf32>,
    %c0_83 = arith.constant 0 : index
    %c0_84 = arith.constant 0 : index
    %81 = tpu.strided_load %arg11[%c0_83, %c0_84] {strides = array<i32: 2, 1>} : memref<512x128xf32, #tpu.memory_space<vmem>>, vector<256x128xf32>
    %c1_85 = arith.constant 1 : index
    %c0_86 = arith.constant 0 : index
    %82 = tpu.strided_load %arg11[%c1_85, %c0_86] {strides = array<i32: 2, 1>} : memref<512x128xf32, #tpu.memory_space<vmem>>, vector<256x128xf32>
    %83 = arith.addf %81, %82 : vector<256x128xf32>
    %84 = vector.shape_cast %83 : vector<256x128xf32> to vector<16x16x128xf32>
    %85 = vector.extract_strided_slice %84 {offsets = [0, 0, 0], sizes = [16, 8, 128], strides = [1, 1, 1]} : vector<16x16x128xf32> to vector<16x8x128xf32>
    %86 = vector.extract_strided_slice %84 {offsets = [0, 8, 0], sizes = [16, 8, 128], strides = [1, 1, 1]} : vector<16x16x128xf32> to vector<16x8x128xf32>
    %87 = arith.addf %85, %86 : vector<16x8x128xf32>
    %cst_87 = arith.constant 2.500000e-01 : f32
    %88 = vector.broadcast %cst_87 : f32 to vector<16x8x128xf32>
    %89 = arith.mulf %87, %88 : vector<16x8x128xf32>
    %90 = vector.extract_strided_slice %89 {offsets = [0, 0, 0], sizes = [8, 8, 128], strides = [1, 1, 1]} : vector<16x8x128xf32> to vector<8x8x128xf32>
    %cst_88 = arith.constant 0.000000e+00 : bf16
    %91 = vector.broadcast %cst_88 : bf16 to vector<1x10x128xbf16>
    %c0_89 = arith.constant 0 : index
    %c0_90 = arith.constant 0 : index
    %c0_91 = arith.constant 0 : index
    %c0_92 = arith.constant 0 : index
    %92 = vector.load %arg12[%c0_89, %c0_90, %c0_91, %c0_92] : memref<2x10x10x128xbf16, #tpu.memory_space<vmem>>, vector<1x1x10x128xbf16>
    %93 = vector.shape_cast %92 : vector<1x1x10x128xbf16> to vector<1x10x128xbf16>
    %94 = vector.shape_cast %91 : vector<1x10x128xbf16> to vector<1x1x10x128xbf16>
    tpu.vector_store %arg12[%c0_89, %c0_90, %c0_91, %c0_92], %94 {strides = array<i32>} : memref<2x10x10x128xbf16, #tpu.memory_space<vmem>>, vector<1x1x10x128xbf16>,
    %cst_93 = arith.constant 0.000000e+00 : bf16
    %95 = vector.broadcast %cst_93 : bf16 to vector<1x10x128xbf16>
    %c0_94 = arith.constant 0 : index
    %c9 = arith.constant 9 : index
    %c0_95 = arith.constant 0 : index
    %c0_96 = arith.constant 0 : index
    %96 = vector.load %arg12[%c0_94, %c9, %c0_95, %c0_96] : memref<2x10x10x128xbf16, #tpu.memory_space<vmem>>, vector<1x1x10x128xbf16>
    %97 = vector.shape_cast %96 : vector<1x1x10x128xbf16> to vector<1x10x128xbf16>
    %98 = vector.shape_cast %95 : vector<1x10x128xbf16> to vector<1x1x10x128xbf16>
    tpu.vector_store %arg12[%c0_94, %c9, %c0_95, %c0_96], %98 {strides = array<i32>} : memref<2x10x10x128xbf16, #tpu.memory_space<vmem>>, vector<1x1x10x128xbf16>,
    %cst_97 = arith.constant 0.000000e+00 : bf16
    %99 = vector.broadcast %cst_97 : bf16 to vector<8x1x128xbf16>
    %c0_98 = arith.constant 0 : index
    %c1_99 = arith.constant 1 : index
    %c0_100 = arith.constant 0 : index
    %c0_101 = arith.constant 0 : index
    %100 = vector.load %arg12[%c0_98, %c1_99, %c0_100, %c0_101] : memref<2x10x10x128xbf16, #tpu.memory_space<vmem>>, vector<1x8x1x128xbf16>
    %101 = vector.shape_cast %100 : vector<1x8x1x128xbf16> to vector<8x1x128xbf16>
    %102 = vector.shape_cast %99 : vector<8x1x128xbf16> to vector<1x8x1x128xbf16>
    tpu.vector_store %arg12[%c0_98, %c1_99, %c0_100, %c0_101], %102 {strides = array<i32>} : memref<2x10x10x128xbf16, #tpu.memory_space<vmem>>, vector<1x8x1x128xbf16>,
    %cst_102 = arith.constant 0.000000e+00 : bf16
    %103 = vector.broadcast %cst_102 : bf16 to vector<8x1x128xbf16>
    %c0_103 = arith.constant 0 : index
    %c1_104 = arith.constant 1 : index
    %c9_105 = arith.constant 9 : index
    %c0_106 = arith.constant 0 : index
    %104 = vector.load %arg12[%c0_103, %c1_104, %c9_105, %c0_106] : memref<2x10x10x128xbf16, #tpu.memory_space<vmem>>, vector<1x8x1x128xbf16>
    %105 = vector.shape_cast %104 : vector<1x8x1x128xbf16> to vector<8x1x128xbf16>
    %106 = vector.shape_cast %103 : vector<8x1x128xbf16> to vector<1x8x1x128xbf16>
    tpu.vector_store %arg12[%c0_103, %c1_104, %c9_105, %c0_106], %106 {strides = array<i32>} : memref<2x10x10x128xbf16, #tpu.memory_space<vmem>>, vector<1x8x1x128xbf16>,
    %107 = arith.truncf %90 : vector<8x8x128xf32> to vector<8x8x128xbf16>
    %c0_107 = arith.constant 0 : index
    %c1_108 = arith.constant 1 : index
    %c1_109 = arith.constant 1 : index
    %c0_110 = arith.constant 0 : index
    %108 = vector.load %arg12[%c0_107, %c1_108, %c1_109, %c0_110] : memref<2x10x10x128xbf16, #tpu.memory_space<vmem>>, vector<1x8x8x128xbf16>
    %109 = vector.shape_cast %108 : vector<1x8x8x128xbf16> to vector<8x8x128xbf16>
    %110 = vector.shape_cast %107 : vector<8x8x128xbf16> to vector<1x8x8x128xbf16>
    tpu.vector_store %arg12[%c0_107, %c1_108, %c1_109, %c0_110], %110 {strides = array<i32>} : memref<2x10x10x128xbf16, #tpu.memory_space<vmem>>, vector<1x8x8x128xbf16>,
    %111 = vector.extract_strided_slice %89 {offsets = [8, 0, 0], sizes = [8, 8, 128], strides = [1, 1, 1]} : vector<16x8x128xf32> to vector<8x8x128xf32>
    %cst_111 = arith.constant 0.000000e+00 : bf16
    %112 = vector.broadcast %cst_111 : bf16 to vector<1x10x128xbf16>
    %c1_112 = arith.constant 1 : index
    %c0_113 = arith.constant 0 : index
    %c0_114 = arith.constant 0 : index
    %c0_115 = arith.constant 0 : index
    %113 = vector.load %arg12[%c1_112, %c0_113, %c0_114, %c0_115] : memref<2x10x10x128xbf16, #tpu.memory_space<vmem>>, vector<1x1x10x128xbf16>
    %114 = vector.shape_cast %113 : vector<1x1x10x128xbf16> to vector<1x10x128xbf16>
    %115 = vector.shape_cast %112 : vector<1x10x128xbf16> to vector<1x1x10x128xbf16>
    tpu.vector_store %arg12[%c1_112, %c0_113, %c0_114, %c0_115], %115 {strides = array<i32>} : memref<2x10x10x128xbf16, #tpu.memory_space<vmem>>, vector<1x1x10x128xbf16>,
    %cst_116 = arith.constant 0.000000e+00 : bf16
    %116 = vector.broadcast %cst_116 : bf16 to vector<1x10x128xbf16>
    %c1_117 = arith.constant 1 : index
    %c9_118 = arith.constant 9 : index
    %c0_119 = arith.constant 0 : index
    %c0_120 = arith.constant 0 : index
    %117 = vector.load %arg12[%c1_117, %c9_118, %c0_119, %c0_120] : memref<2x10x10x128xbf16, #tpu.memory_space<vmem>>, vector<1x1x10x128xbf16>
    %118 = vector.shape_cast %117 : vector<1x1x10x128xbf16> to vector<1x10x128xbf16>
    %119 = vector.shape_cast %116 : vector<1x10x128xbf16> to vector<1x1x10x128xbf16>
    tpu.vector_store %arg12[%c1_117, %c9_118, %c0_119, %c0_120], %119 {strides = array<i32>} : memref<2x10x10x128xbf16, #tpu.memory_space<vmem>>, vector<1x1x10x128xbf16>,
    %cst_121 = arith.constant 0.000000e+00 : bf16
    %120 = vector.broadcast %cst_121 : bf16 to vector<8x1x128xbf16>
    %c1_122 = arith.constant 1 : index
    %c1_123 = arith.constant 1 : index
    %c0_124 = arith.constant 0 : index
    %c0_125 = arith.constant 0 : index
    %121 = vector.load %arg12[%c1_122, %c1_123, %c0_124, %c0_125] : memref<2x10x10x128xbf16, #tpu.memory_space<vmem>>, vector<1x8x1x128xbf16>
    %122 = vector.shape_cast %121 : vector<1x8x1x128xbf16> to vector<8x1x128xbf16>
    %123 = vector.shape_cast %120 : vector<8x1x128xbf16> to vector<1x8x1x128xbf16>
    tpu.vector_store %arg12[%c1_122, %c1_123, %c0_124, %c0_125], %123 {strides = array<i32>} : memref<2x10x10x128xbf16, #tpu.memory_space<vmem>>, vector<1x8x1x128xbf16>,
    %cst_126 = arith.constant 0.000000e+00 : bf16
    %124 = vector.broadcast %cst_126 : bf16 to vector<8x1x128xbf16>
    %c1_127 = arith.constant 1 : index
    %c1_128 = arith.constant 1 : index
    %c9_129 = arith.constant 9 : index
    %c0_130 = arith.constant 0 : index
    %125 = vector.load %arg12[%c1_127, %c1_128, %c9_129, %c0_130] : memref<2x10x10x128xbf16, #tpu.memory_space<vmem>>, vector<1x8x1x128xbf16>
    %126 = vector.shape_cast %125 : vector<1x8x1x128xbf16> to vector<8x1x128xbf16>
    %127 = vector.shape_cast %124 : vector<8x1x128xbf16> to vector<1x8x1x128xbf16>
    tpu.vector_store %arg12[%c1_127, %c1_128, %c9_129, %c0_130], %127 {strides = array<i32>} : memref<2x10x10x128xbf16, #tpu.memory_space<vmem>>, vector<1x8x1x128xbf16>,
    %128 = arith.truncf %111 : vector<8x8x128xf32> to vector<8x8x128xbf16>
    %c1_131 = arith.constant 1 : index
    %c1_132 = arith.constant 1 : index
    %c1_133 = arith.constant 1 : index
    %c0_134 = arith.constant 0 : index
    %129 = vector.load %arg12[%c1_131, %c1_132, %c1_133, %c0_134] : memref<2x10x10x128xbf16, #tpu.memory_space<vmem>>, vector<1x8x8x128xbf16>
    %130 = vector.shape_cast %129 : vector<1x8x8x128xbf16> to vector<8x8x128xbf16>
    %131 = vector.shape_cast %128 : vector<8x8x128xbf16> to vector<1x8x8x128xbf16>
    tpu.vector_store %arg12[%c1_131, %c1_132, %c1_133, %c0_134], %131 {strides = array<i32>} : memref<2x10x10x128xbf16, #tpu.memory_space<vmem>>, vector<1x8x8x128xbf16>,
    %c0_135 = arith.constant 0 : index
    %c0_136 = arith.constant 0 : index
    %c0_137 = arith.constant 0 : index
    %c0_138 = arith.constant 0 : index
    %132 = vector.load %arg12[%c0_135, %c0_136, %c0_137, %c0_138] : memref<2x10x10x128xbf16, #tpu.memory_space<vmem>>, vector<2x10x8x128xbf16>
    %133 = vector.extract_strided_slice %132 {offsets = [0, 0, 0, 0], sizes = [2, 8, 8, 128], strides = [1, 1, 1, 1]} : vector<2x10x8x128xbf16> to vector<2x8x8x128xbf16>
    %134 = vector.shape_cast %133 : vector<2x8x8x128xbf16> to vector<128x128xbf16>
    %c0_139 = arith.constant 0 : index
    %c0_140 = arith.constant 0 : index
    %135 = vector.load %arg13[%c0_139, %c0_140] : memref<128x1152xbf16, #tpu.memory_space<vmem>>, vector<128x128xbf16>
    tpu.vector_store %arg13[%c0_139, %c0_140], %134 {strides = array<i32>} : memref<128x1152xbf16, #tpu.memory_space<vmem>>, vector<128x128xbf16>,
    %136 = vector.extract_strided_slice %132 {offsets = [0, 1, 0, 0], sizes = [2, 8, 8, 128], strides = [1, 1, 1, 1]} : vector<2x10x8x128xbf16> to vector<2x8x8x128xbf16>
    %137 = vector.shape_cast %136 : vector<2x8x8x128xbf16> to vector<128x128xbf16>
    %c0_141 = arith.constant 0 : index
    %c384_142 = arith.constant 384 : index
    %138 = vector.load %arg13[%c0_141, %c384_142] : memref<128x1152xbf16, #tpu.memory_space<vmem>>, vector<128x128xbf16>
    tpu.vector_store %arg13[%c0_141, %c384_142], %137 {strides = array<i32>} : memref<128x1152xbf16, #tpu.memory_space<vmem>>, vector<128x128xbf16>,
    %139 = vector.extract_strided_slice %132 {offsets = [0, 2, 0, 0], sizes = [2, 8, 8, 128], strides = [1, 1, 1, 1]} : vector<2x10x8x128xbf16> to vector<2x8x8x128xbf16>
    %140 = vector.shape_cast %139 : vector<2x8x8x128xbf16> to vector<128x128xbf16>
    %c0_143 = arith.constant 0 : index
    %c768_144 = arith.constant 768 : index
    %141 = vector.load %arg13[%c0_143, %c768_144] : memref<128x1152xbf16, #tpu.memory_space<vmem>>, vector<128x128xbf16>
    tpu.vector_store %arg13[%c0_143, %c768_144], %140 {strides = array<i32>} : memref<128x1152xbf16, #tpu.memory_space<vmem>>, vector<128x128xbf16>,
    %c0_145 = arith.constant 0 : index
    %c0_146 = arith.constant 0 : index
    %c1_147 = arith.constant 1 : index
    %c0_148 = arith.constant 0 : index
    %142 = vector.load %arg12[%c0_145, %c0_146, %c1_147, %c0_148] : memref<2x10x10x128xbf16, #tpu.memory_space<vmem>>, vector<2x10x8x128xbf16>
    %143 = vector.extract_strided_slice %142 {offsets = [0, 0, 0, 0], sizes = [2, 8, 8, 128], strides = [1, 1, 1, 1]} : vector<2x10x8x128xbf16> to vector<2x8x8x128xbf16>
    %144 = vector.shape_cast %143 : vector<2x8x8x128xbf16> to vector<128x128xbf16>
    %c0_149 = arith.constant 0 : index
    %c128_150 = arith.constant 128 : index
    %145 = vector.load %arg13[%c0_149, %c128_150] : memref<128x1152xbf16, #tpu.memory_space<vmem>>, vector<128x128xbf16>
    tpu.vector_store %arg13[%c0_149, %c128_150], %144 {strides = array<i32>} : memref<128x1152xbf16, #tpu.memory_space<vmem>>, vector<128x128xbf16>,
    %146 = vector.extract_strided_slice %142 {offsets = [0, 1, 0, 0], sizes = [2, 8, 8, 128], strides = [1, 1, 1, 1]} : vector<2x10x8x128xbf16> to vector<2x8x8x128xbf16>
    %147 = vector.shape_cast %146 : vector<2x8x8x128xbf16> to vector<128x128xbf16>
    %c0_151 = arith.constant 0 : index
    %c512_152 = arith.constant 512 : index
    %148 = vector.load %arg13[%c0_151, %c512_152] : memref<128x1152xbf16, #tpu.memory_space<vmem>>, vector<128x128xbf16>
    tpu.vector_store %arg13[%c0_151, %c512_152], %147 {strides = array<i32>} : memref<128x1152xbf16, #tpu.memory_space<vmem>>, vector<128x128xbf16>,
    %149 = vector.extract_strided_slice %142 {offsets = [0, 2, 0, 0], sizes = [2, 8, 8, 128], strides = [1, 1, 1, 1]} : vector<2x10x8x128xbf16> to vector<2x8x8x128xbf16>
    %150 = vector.shape_cast %149 : vector<2x8x8x128xbf16> to vector<128x128xbf16>
    %c0_153 = arith.constant 0 : index
    %c896_154 = arith.constant 896 : index
    %151 = vector.load %arg13[%c0_153, %c896_154] : memref<128x1152xbf16, #tpu.memory_space<vmem>>, vector<128x128xbf16>
    tpu.vector_store %arg13[%c0_153, %c896_154], %150 {strides = array<i32>} : memref<128x1152xbf16, #tpu.memory_space<vmem>>, vector<128x128xbf16>,
    %c0_155 = arith.constant 0 : index
    %c0_156 = arith.constant 0 : index
    %c2_157 = arith.constant 2 : index
    %c0_158 = arith.constant 0 : index
    %152 = vector.load %arg12[%c0_155, %c0_156, %c2_157, %c0_158] : memref<2x10x10x128xbf16, #tpu.memory_space<vmem>>, vector<2x10x8x128xbf16>
    %153 = vector.extract_strided_slice %152 {offsets = [0, 0, 0, 0], sizes = [2, 8, 8, 128], strides = [1, 1, 1, 1]} : vector<2x10x8x128xbf16> to vector<2x8x8x128xbf16>
    %154 = vector.shape_cast %153 : vector<2x8x8x128xbf16> to vector<128x128xbf16>
    %c0_159 = arith.constant 0 : index
    %c256_160 = arith.constant 256 : index
    %155 = vector.load %arg13[%c0_159, %c256_160] : memref<128x1152xbf16, #tpu.memory_space<vmem>>, vector<128x128xbf16>
    tpu.vector_store %arg13[%c0_159, %c256_160], %154 {strides = array<i32>} : memref<128x1152xbf16, #tpu.memory_space<vmem>>, vector<128x128xbf16>,
    %156 = vector.extract_strided_slice %152 {offsets = [0, 1, 0, 0], sizes = [2, 8, 8, 128], strides = [1, 1, 1, 1]} : vector<2x10x8x128xbf16> to vector<2x8x8x128xbf16>
    %157 = vector.shape_cast %156 : vector<2x8x8x128xbf16> to vector<128x128xbf16>
    %c0_161 = arith.constant 0 : index
    %c640_162 = arith.constant 640 : index
    %158 = vector.load %arg13[%c0_161, %c640_162] : memref<128x1152xbf16, #tpu.memory_space<vmem>>, vector<128x128xbf16>
    tpu.vector_store %arg13[%c0_161, %c640_162], %157 {strides = array<i32>} : memref<128x1152xbf16, #tpu.memory_space<vmem>>, vector<128x128xbf16>,
    %159 = vector.extract_strided_slice %152 {offsets = [0, 2, 0, 0], sizes = [2, 8, 8, 128], strides = [1, 1, 1, 1]} : vector<2x10x8x128xbf16> to vector<2x8x8x128xbf16>
    %160 = vector.shape_cast %159 : vector<2x8x8x128xbf16> to vector<128x128xbf16>
    %c0_163 = arith.constant 0 : index
    %c1024_164 = arith.constant 1024 : index
    %161 = vector.load %arg13[%c0_163, %c1024_164] : memref<128x1152xbf16, #tpu.memory_space<vmem>>, vector<128x128xbf16>
    tpu.vector_store %arg13[%c0_163, %c1024_164], %160 {strides = array<i32>} : memref<128x1152xbf16, #tpu.memory_space<vmem>>, vector<128x128xbf16>,
    %c0_165 = arith.constant 0 : index
    %c0_166 = arith.constant 0 : index
    %162 = vector.load %arg13[%c0_165, %c0_166] : memref<128x1152xbf16, #tpu.memory_space<vmem>>, vector<128x1152xbf16>
    %c0_167 = arith.constant 0 : index
    %c0_168 = arith.constant 0 : index
    %163 = vector.load %arg4[%c0_167, %c0_168] : memref<1152x128xbf16, #tpu.memory_space<vmem>>, vector<1152x128xbf16>
    %cst_169 = arith.constant dense<0.000000e+00> : vector<128x128xf32>
    %164 = tpu.matmul %162, %163, %cst_169 {dimension_numbers = #tpu.dot_dimension_numbers<[1], [0], [0], [1], [0, 0, 1, 1], [], []>} : vector<128x1152xbf16>, vector<1152x128xbf16>, vector<128x128xf32> -> vector<128x128xf32>
    %c0_170 = arith.constant 0 : index
    %c0_171 = arith.constant 0 : index
    %165 = vector.load %arg5[%c0_170, %c0_171] : memref<1x128xf32, #tpu.memory_space<vmem>>, vector<1x128xf32>
    %166 = vector.broadcast %165 : vector<1x128xf32> to vector<128x128xf32>
    %167 = arith.addf %164, %166 : vector<128x128xf32>
    %cst_172 = arith.constant 0.000000e+00 : f32
    %168 = vector.broadcast %cst_172 : f32 to vector<128x128xf32>
    %169 = arith.maximumf %167, %168 : vector<128x128xf32>
    %c0_173 = arith.constant 0 : index
    %c0_174 = arith.constant 0 : index
    %170 = vector.load %arg14[%c0_173, %c0_174] : memref<128x128xf32, #tpu.memory_space<vmem>>, vector<128x128xf32>
    tpu.vector_store %arg14[%c0_173, %c0_174], %169 {strides = array<i32>} : memref<128x128xf32, #tpu.memory_space<vmem>>, vector<128x128xf32>,
    %c0_175 = arith.constant 0 : index
    %c0_176 = arith.constant 0 : index
    %171 = tpu.strided_load %arg14[%c0_175, %c0_176] {strides = array<i32: 2, 1>} : memref<128x128xf32, #tpu.memory_space<vmem>>, vector<64x128xf32>
    %c1_177 = arith.constant 1 : index
    %c0_178 = arith.constant 0 : index
    %172 = tpu.strided_load %arg14[%c1_177, %c0_178] {strides = array<i32: 2, 1>} : memref<128x128xf32, #tpu.memory_space<vmem>>, vector<64x128xf32>
    %173 = arith.addf %171, %172 : vector<64x128xf32>
    %174 = vector.shape_cast %173 : vector<64x128xf32> to vector<8x8x128xf32>
    %175 = vector.extract_strided_slice %174 {offsets = [0, 0, 0], sizes = [8, 4, 128], strides = [1, 1, 1]} : vector<8x8x128xf32> to vector<8x4x128xf32>
    %176 = vector.extract_strided_slice %174 {offsets = [0, 4, 0], sizes = [8, 4, 128], strides = [1, 1, 1]} : vector<8x8x128xf32> to vector<8x4x128xf32>
    %177 = arith.addf %175, %176 : vector<8x4x128xf32>
    %cst_179 = arith.constant 2.500000e-01 : f32
    %178 = vector.broadcast %cst_179 : f32 to vector<8x4x128xf32>
    %179 = arith.mulf %177, %178 : vector<8x4x128xf32>
    %180 = vector.shape_cast %179 : vector<8x4x128xf32> to vector<32x128xf32>
    %181 = arith.truncf %180 : vector<32x128xf32> to vector<32x128xbf16>
    %c0_180 = arith.constant 0 : index
    %c0_181 = arith.constant 0 : index
    %182 = vector.load %arg15[%c0_180, %c0_181] : memref<32x128xbf16, #tpu.memory_space<vmem>>, vector<32x128xbf16>
    tpu.vector_store %arg15[%c0_180, %c0_181], %181 {strides = array<i32>} : memref<32x128xbf16, #tpu.memory_space<vmem>>, vector<32x128xbf16>,
    %c0_182 = arith.constant 0 : index
    %c0_183 = arith.constant 0 : index
    %183 = vector.load %arg15[%c0_182, %c0_183] : memref<32x128xbf16, #tpu.memory_space<vmem>>, vector<32x128xbf16>
    %c0_184 = arith.constant 0 : index
    %c0_185 = arith.constant 0 : index
    %184 = vector.load %arg6[%c0_184, %c0_185] : memref<128x128xbf16, #tpu.memory_space<vmem>>, vector<128x128xbf16>
    %cst_186 = arith.constant dense<0.000000e+00> : vector<32x128xf32>
    %185 = tpu.matmul %183, %184, %cst_186 {dimension_numbers = #tpu.dot_dimension_numbers<[1], [0], [0], [1], [0, 0, 1, 1], [], []>} : vector<32x128xbf16>, vector<128x128xbf16>, vector<32x128xf32> -> vector<32x128xf32>
    %c0_187 = arith.constant 0 : index
    %c0_188 = arith.constant 0 : index
    %186 = vector.load %arg7[%c0_187, %c0_188] : memref<1x128xf32, #tpu.memory_space<vmem>>, vector<1x128xf32>
    %187 = vector.broadcast %186 : vector<1x128xf32> to vector<32x128xf32>
    %188 = arith.addf %185, %187 : vector<32x128xf32>
    %cst_189 = arith.constant 0.000000e+00 : f32
    %189 = vector.broadcast %cst_189 : f32 to vector<32x128xf32>
    %190 = arith.maximumf %188, %189 : vector<32x128xf32>
    %191 = vector.extract_strided_slice %190 {offsets = [0, 0], sizes = [16, 128], strides = [1, 1]} : vector<32x128xf32> to vector<16x128xf32>
    %cst_190 = arith.constant dense<0.000000e+00> : vector<128xf32>
    %192 = vector.multi_reduction <add>, %191, %cst_190 [0] : vector<16x128xf32> to vector<128xf32>
    %193 = vector.shape_cast %192 : vector<128xf32> to vector<1x128xf32>
    %cst_191 = arith.constant 6.250000e-02 : f32
    %194 = vector.broadcast %cst_191 : f32 to vector<1x128xf32>
    %195 = arith.mulf %193, %194 : vector<1x128xf32>
    %196 = vector.shape_cast %195 : vector<1x128xf32> to vector<1x1x128xf32>
    %c0_192 = arith.constant 0 : index
    %c0_193 = arith.constant 0 : index
    %c0_194 = arith.constant 0 : index
    %197 = vector.load %arg8[%c0_192, %c0_193, %c0_194] : memref<2x1x128xf32, #tpu.memory_space<vmem>>, vector<1x1x128xf32>
    tpu.vector_store %arg8[%c0_192, %c0_193, %c0_194], %196 {strides = array<i32>} : memref<2x1x128xf32, #tpu.memory_space<vmem>>, vector<1x1x128xf32>,
    %198 = vector.extract_strided_slice %190 {offsets = [16, 0], sizes = [16, 128], strides = [1, 1]} : vector<32x128xf32> to vector<16x128xf32>
    %cst_195 = arith.constant dense<0.000000e+00> : vector<128xf32>
    %199 = vector.multi_reduction <add>, %198, %cst_195 [0] : vector<16x128xf32> to vector<128xf32>
    %200 = vector.shape_cast %199 : vector<128xf32> to vector<1x128xf32>
    %cst_196 = arith.constant 6.250000e-02 : f32
    %201 = vector.broadcast %cst_196 : f32 to vector<1x128xf32>
    %202 = arith.mulf %200, %201 : vector<1x128xf32>
    %203 = vector.shape_cast %202 : vector<1x128xf32> to vector<1x1x128xf32>
    %c1_197 = arith.constant 1 : index
    %c0_198 = arith.constant 0 : index
    %c0_199 = arith.constant 0 : index
    %204 = vector.load %arg8[%c1_197, %c0_198, %c0_199] : memref<2x1x128xf32, #tpu.memory_space<vmem>>, vector<1x1x128xf32>
    tpu.vector_store %arg8[%c1_197, %c0_198, %c0_199], %203 {strides = array<i32>} : memref<2x1x128xf32, #tpu.memory_space<vmem>>, vector<1x1x128xf32>,
    return
  }
  func.func @transform_0(%arg0: i32) -> (i32, i32, i32, i32) {
    %c0_i32 = arith.constant 0 : i32
    %c0_i32_0 = arith.constant 0 : i32
    %c0_i32_1 = arith.constant 0 : i32
    %c0_i32_2 = arith.constant 0 : i32
    return %arg0, %c0_i32, %c0_i32_0, %c0_i32_1 : i32, i32, i32, i32
  }
  func.func @transform_1(%arg0: i32) -> (i32, i32) {
    %c0_i32 = arith.constant 0 : i32
    %c0_i32_0 = arith.constant 0 : i32
    %c0_i32_1 = arith.constant 0 : i32
    return %c0_i32, %c0_i32_0 : i32, i32
  }
  func.func @transform_2(%arg0: i32) -> (i32, i32) {
    %c0_i32 = arith.constant 0 : i32
    %c0_i32_0 = arith.constant 0 : i32
    %c0_i32_1 = arith.constant 0 : i32
    return %c0_i32, %c0_i32_0 : i32, i32
  }
  func.func @transform_3(%arg0: i32) -> (i32, i32) {
    %c0_i32 = arith.constant 0 : i32
    %c0_i32_0 = arith.constant 0 : i32
    %c0_i32_1 = arith.constant 0 : i32
    return %c0_i32, %c0_i32_0 : i32, i32
  }
  func.func @transform_4(%arg0: i32) -> (i32, i32) {
    %c0_i32 = arith.constant 0 : i32
    %c0_i32_0 = arith.constant 0 : i32
    %c0_i32_1 = arith.constant 0 : i32
    return %c0_i32, %c0_i32_0 : i32, i32
  }
  func.func @transform_5(%arg0: i32) -> (i32, i32) {
    %c0_i32 = arith.constant 0 : i32
    %c0_i32_0 = arith.constant 0 : i32
    %c0_i32_1 = arith.constant 0 : i32
    return %c0_i32, %c0_i32_0 : i32, i32
  }
  func.func @transform_6(%arg0: i32) -> (i32, i32) {
    %c0_i32 = arith.constant 0 : i32
    %c0_i32_0 = arith.constant 0 : i32
    %c0_i32_1 = arith.constant 0 : i32
    return %c0_i32, %c0_i32_0 : i32, i32
  }
  func.func @transform_7(%arg0: i32) -> (i32, i32, i32) {
    %c0_i32 = arith.constant 0 : i32
    %c0_i32_0 = arith.constant 0 : i32
    %c0_i32_1 = arith.constant 0 : i32
    return %arg0, %c0_i32, %c0_i32_0 : i32, i32, i32
  }
}

</mosaic_0001>

<bundles_post_ra>
// kernel: tpu_custom_call.1
= control target key start
LH: loop header
LB: loop body
LE: loop exit
PB: predicated region body
PF: predicated region fallthrough
CT: control target
= control target key end

     0   :  { %12 = vsyncpa [#allocation10], 0  ;;  %s13542_s0 = inlined_call_operand.hbm [shape: bf16[2,16,16,128], index: 0, kind: input, shape index: {}]   ;;  %s13543_s1 = inlined_call_operand.hbm [shape: bf16[1152,128], index: 1, kind: input, shape index: {}]   ;;  %s13544_s2 = inlined_call_operand.vmem [shape: f32[1,128], index: 2, kind: input, shape index: {}]   ;;  %s13545_s3 = inlined_call_operand.hbm [shape: bf16[1152,128], index: 3, kind: input, shape index: {}]   ;;  %s13546_s4 = inlined_call_operand.vmem [shape: f32[1,128], index: 4, kind: input, shape index: {}]   ;;  %s13547_s5 = inlined_call_operand.hbm [shape: bf16[128,128], index: 5, kind: input, shape index: {}]   ;;  %s13548_s6 = inlined_call_operand.vmem [shape: f32[1,128], index: 6, kind: input, shape index: {}]   ;;  %s13549_s7 = inlined_call_operand.hbm [shape: f32[2,1,128], index: 7, kind: output, shape index: {}]  }
   0x1   :  { %13 = vsyncpa [#allocation13], 0 }
   0x2   :  { %14 = vsyncpa [#allocation16], 0 }
   0x3   :  { %15 = vsyncpa [#allocation11], 0  ;;  %s10476_s24 = smov [#allocation12]   ;;  %s10477_s26 = smov [#allocation9]  }
   0x4   :  { %s33_s25 = sshll.u32 %s10476_s24, 4  ;;  %s21_s27 = sshll.u32 %s10477_s26, 4  ;;  %s34_s25 = int_to_ptr.vmem [resolvable:$true] %s33_s25  ;;  %s10526_s27 = int_to_ptr.vmem [resolvable:$true] %s21_s27 }
   0x5   :  { %s10358_s30 = scalar_lea.hbm %s13543_s1, 9216 }
   0x6   :  { %p10359_p0 = scmp.ne.s32.totalorder %s13543_s1, %s10358_s30  ;;  %p10362_p1 = scmp.lt.u32.totalorder %s10358_s30, %s13543_s1 }
   0x8   :  { %p10364_p2 = pnand %p10362_p1, %p10359_p0 }
   0xa   :  { %10367 = shalt.err (!%p10364_p2)
}
   0xb   :  { %s10368_s12 = scalar_lea.vmem %s34_s25, 9216  ;;  %p10373_p4 = scmp.lt.s32.totalorder %s34_s25, %s34_s25 }
   0xc   :  { %p10369_p3 = scmp.ne.s32.totalorder %s34_s25, %s10368_s12  ;;  %p10374_p5 = scmp.lt.s32.totalorder %s10368_s12, %s10368_s12 }
   0xe   :  { %p10375_p6 = por %p10374_p5, %p10373_p4 }
  0x10   :  { %p10376_p7 = pnand %p10375_p6, %p10369_p3 }
  0x12   :  { %10379 = shalt.err (!%p10376_p7)
}
  0x13   :  { %s10478_s13 = smov 64   ;;  %s10479_s14 = smov 4  }
  0x14   :  { %39 = dma.hbm_to_vmem [thread:$0]  %s13543_s1, 9216, %s34_s25, [#allocation13], %s10478_s13, %s10478_s13, %s10479_s14  }
  0x15   :  { %s10380_s19 = scalar_lea.hbm %s13542_s0, 4096 }
  0x16   :  { %p10381_p8 = scmp.ne.s32.totalorder %s13542_s0, %s10380_s19  ;;  %p10384_p9 = scmp.lt.u32.totalorder %s10380_s19, %s13542_s0 }
  0x18   :  { %p10386_p10 = pnand %p10384_p9, %p10381_p8 }
  0x1a   :  { %10389 = shalt.err (!%p10386_p10)
}
  0x1b   :  { %s10390_s24 = scalar_lea.vmem %s10526_s27, 4096  ;;  %p10395_p12 = scmp.lt.s32.totalorder %s10526_s27, %s10526_s27 }
  0x1c   :  { %p10391_p11 = scmp.ne.s32.totalorder %s10526_s27, %s10390_s24  ;;  %p10396_p13 = scmp.lt.s32.totalorder %s10390_s24, %s10390_s24 }
  0x1e   :  { %p10397_p0 = por %p10396_p13, %p10395_p12 }
  0x20   :  { %p10398_p1 = pnand %p10397_p0, %p10391_p11 }
  0x22   :  { %10401 = shalt.err (!%p10398_p1)
}
  0x23   :  { %27 = dma.hbm_to_vmem [thread:$0]  %s13542_s0, 4096, %s10526_s27, [#allocation10], %s10478_s13, %s10478_s13, %s10479_s14  }
  0x24   :  { %s10480_s26 = smov [#allocation14]   ;;  %s10481_s29 = smov [#allocation15]  }
  0x25   :  { %s47_s28 = sshll.u32 %s10480_s26, 4  ;;  %s61_s30 = sshll.u32 %s10481_s29, 4  ;;  %s48_s28 = int_to_ptr.vmem [resolvable:$true] %s47_s28  ;;  %s10563_s30 = int_to_ptr.vmem [resolvable:$true] %s61_s30 }
  0x26   :  { %s10402_s10 = scalar_lea.hbm %s13545_s3, 9216 }
  0x27   :  { %p10403_p2 = scmp.ne.s32.totalorder %s13545_s3, %s10402_s10  ;;  %p10406_p3 = scmp.lt.u32.totalorder %s10402_s10, %s13545_s3 }
  0x29   :  { %p10408_p4 = pnand %p10406_p3, %p10403_p2 }
  0x2b   :  { %10411 = shalt.err (!%p10408_p4)
}
  0x2c   :  { %s10412_s0 = scalar_lea.vmem %s48_s28, 9216  ;;  %p10417_p6 = scmp.lt.s32.totalorder %s48_s28, %s48_s28 }
  0x2d   :  { %p10413_p5 = scmp.ne.s32.totalorder %s48_s28, %s10412_s0  ;;  %p10418_p7 = scmp.lt.s32.totalorder %s10412_s0, %s10412_s0 }
  0x2f   :  { %p10419_p8 = por %p10418_p7, %p10417_p6 }
  0x31   :  { %p10420_p9 = pnand %p10419_p8, %p10413_p5 }
  0x33   :  { %10423 = shalt.err (!%p10420_p9)
}
  0x34   :  { %53 = dma.hbm_to_vmem [thread:$0]  %s13545_s3, 9216, %s48_s28, [#allocation13], %s10478_s13, %s10478_s13, %s10479_s14  }
  0x35   :  { %s10424_s20 = scalar_lea.hbm %s13547_s5, 1024 }
  0x36   :  { %p10425_p10 = scmp.ne.s32.totalorder %s13547_s5, %s10424_s20  ;;  %p10428_p11 = scmp.lt.u32.totalorder %s10424_s20, %s13547_s5 }
  0x38   :  { %p10430_p12 = pnand %p10428_p11, %p10425_p10 }
  0x3a   :  { %10433 = shalt.err (!%p10430_p12)
}
  0x3b   :  { %s10434_s1 = scalar_lea.vmem %s10563_s30, 1024  ;;  %p10439_p0 = scmp.lt.s32.totalorder %s10563_s30, %s10563_s30 }
  0x3c   :  { %p10435_p13 = scmp.ne.s32.totalorder %s10563_s30, %s10434_s1  ;;  %p10440_p1 = scmp.lt.s32.totalorder %s10434_s1, %s10434_s1 }
  0x3e   :  { %p10441_p2 = por %p10440_p1, %p10439_p0 }
  0x40   :  { %p10442_p3 = pnand %p10441_p2, %p10435_p13 }
  0x42   :  { %10445 = shalt.err (!%p10442_p3)
}
  0x43   :  { %67 = dma.hbm_to_vmem [thread:$0]  %s13547_s5, 1024, %s10563_s30, [#allocation16], %s10478_s13, %s10478_s13, %s10479_s14  }
  0x44   :  { %10468 = dma.done.wait [#allocation10], 4096  }
  0x45   :  { %10469 = vsyncadd [#allocation10], 4294963200 }
  0x46   :  { %10470 = dma.done.wait [#allocation13], 18432  }
  0x47   :  { %10471 = vsyncadd [#allocation13], 4294948864 }
  0x48   :  { %10472 = dma.done.wait [#allocation16], 1024  }
  0x49   :  { %10473 = vsyncadd [#allocation16], 4294966272  ;;  %v13553_v0 = vmov 0   ;;  %v10084_v1 = vld [vmem:[#allocation12 + $0x80] sm:$0xff]   ;;  %v10085_v2 = vld [vmem:[#allocation12 + $0x88] sm:$0xff]   ;;  %vm123_vm1 = vcmask 1040384  }
  0x4a   :  { %4700 = vmatprep.subr.bf16.mxu0 %v13553_v0  ;;  %115 = vst [vmem:[#allocation2] sm:$0xf] %v13553_v0  ;;  %116 = vst [vmem:[#allocation2 + $0x4] sm:$0xf] %v13553_v0  ;;  %4411 = vmatprep.subr.bf16.mxu1 %v13553_v0  ;;  %v10086_v3 = vld [vmem:[#allocation12 + $0x90] sm:$0xff]   ;;  %v10087_v4 = vld [vmem:[#allocation12 + $0x98] sm:$0xff]  }
  0x4b   :  { %117 = vst [vmem:[#allocation2 + $0x8] sm:$0x1] %v13553_v0  ;;  %119 = vst [vmem:[#allocation2 + $0xcc] sm:$0xf] %v13553_v0  ;;  %4701 = vmatpush1.bf16.msra.mxu0 %v10084_v1  ;;  %vm124_vm0 = vsmask.f32 256 }
  0x4c   :  { %120 = vst [vmem:[#allocation2 + $0xd0] sm:$0xf] %v13553_v0  ;;  %121 = vst [vmem:[#allocation2 + $0xd4] sm:$0x1] %v13553_v0  ;;  %4702 = vmatprep.subr.bf16.mxu0 %v13553_v0  ;;  %v10088_v6 = vld [vmem:[#allocation12 + $0xa0] sm:$0xff]   ;;  %v10089_v13 = vld [vmem:[#allocation12 + $0xa8] sm:$0xff]  }
  0x4d   :  { %694 = vst [vmem:[#allocation2 + $0xd8] sm:$0xf] %v13553_v0  ;;  %695 = vst [vmem:[#allocation2 + $0xdc] sm:$0xf] %v13553_v0  ;;  %v83_v7 = vld [vmem:[#allocation9] sm:$0xf] }
  0x4e   :  { %696 = vst [vmem:[#allocation2 + $0xe0] sm:$0x1] %v13553_v0  ;;  %698 = vst [vmem:[#allocation2 + $0x1a4] sm:$0xf] %v13553_v0  ;;  %v84_v8 = vld [vmem:[#allocation9 + $0x4] sm:$0xf] }
  0x4f   :  { %699 = vst [vmem:[#allocation2 + $0x1a8] sm:$0xf] %v13553_v0  ;;  %700 = vst [vmem:[#allocation2 + $0x1ac] sm:$0x1] %v13553_v0  ;;  %4703 = vmatpush1.bf16.msra.mxu0 %v10085_v2  ;;  %v126_v9 = vld [vmem:[#allocation2 + $0xc] sm:$0x1] }
  0x50   :  { %6175 = vst [vmem:[#allocation5] sm:$0xf] %v13553_v0  ;;  %6176 = vst [vmem:[#allocation5 + $0x4] sm:$0x1] %v13553_v0  ;;  %4704 = vmatprep.subr.bf16.mxu0 %v13553_v0  ;;  %vm224_vm3 = vsmask.f32 4368 }
  0x51   :  { %6178 = vst [vmem:[#allocation5 + $0x48] sm:$0xf] %v13553_v0  ;;  %6179 = vst [vmem:[#allocation5 + $0x4c] sm:$0x1] %v13553_v0  ;;  %v227_v11 = vshrl.u32 %v83_v7, 16  ;;  %v235_v12 = vshrl.u32 %v84_v8, 16 }
  0x52   :  { %6390 = vst [vmem:[#allocation5 + $0x50] sm:$0xf] %v13553_v0  ;;  %6391 = vst [vmem:[#allocation5 + $0x54] sm:$0x1] %v13553_v0  ;;  %vm174_vm4 = vsmask.f32 7938 }
  0x53   :  { %6393 = vst [vmem:[#allocation5 + $0x98] sm:$0xf] %v13553_v0  ;;  %6394 = vst [vmem:[#allocation5 + $0x9c] sm:$0x1] %v13553_v0  ;;  %4705 = vmatpush1.bf16.msra.mxu0 %v10086_v3  ;;  %v230_v14 = vshll.u32 %v83_v7, 16  ;;  %v238_v15 = vshll.u32 %v84_v8, 16 }
  0x54   :  { %4706 = vmatprep.subr.bf16.mxu0 %v13553_v0  ;;  %vm10627_vm2 = vmand %vm123_vm1, %vm124_vm0  ;;  %v229_v16 = vrot.slane %v227_v11, 7  ;;  %v10635_v17 = vrot.slane %v235_v12, 7  ;;  %vm546_vm6 = vcmask 1043456   ;;  %v85_v19 = vld [vmem:[#allocation9 + $0x8] sm:$0xf]  ;;  %v13629_v20 = vmov 0 }
  0x55   :  { %v127_v10 = vsel %vm10627_vm2, 0, %v126_v9  ;;  %vm10638_vm5 = vmor %vm124_vm0, %vm224_vm3  ;;  %v86_v23 = vld [vmem:[#allocation9 + $0xc] sm:$0xf]  ;;  %v129_v24 = vld [vmem:[#allocation2 + $0x18] sm:$0x1]  ;;  %v244_v28 = vshrl.u32 %v85_v19, 16 }
  0x56   :  { %128 = vst [vmem:[#allocation2 + $0xc] sm:$0x1] %v127_v10  ;;  %vm10644_vm7 = vmand %vm123_vm1, %vm174_vm4  ;;  %v233_v21 = vrot.slane %v229_v16, 4  ;;  %v240_v22 = vor.u32 %v238_v15, %v10635_v17  ;;  %v10090_v25 = vld [vmem:[#allocation12 + $0xb0] sm:$0xff]   ;;  %v232_v26 = vor.u32 %v230_v14, %v229_v16  ;;  %v130_v27 = vsel %vm10627_vm2, 0, %v129_v24  ;;  %v10091_v36 = vld [vmem:[#allocation12 + $0xb8] sm:$0xff]  }
  0x57   :  { %4707 = vmatpush1.bf16.msra.mxu0 %v10087_v4  ;;  %v13630_v20 = vsel %vm10644_vm7, 4294967295, %v13629_v20  ;;  %v176_v29 = vld [vmem:[#allocation2 + $0x14] sm:$0x1]  ;;  %vm10656_vm8 = vmand %vm546_vm6, %vm174_vm4  ;;  %v13632_v31 = vmov 0  ;;  %131 = vst [vmem:[#allocation2 + $0x18] sm:$0x1] %v130_v27 }
  0x58   :  { %4708 = vmatprep.subr.bf16.mxu0 %v13553_v0  ;;  %13631 = vst [vmem:[#allocation22_spill] sm:$0xff] %v13630_v20  ;;  %v241_v30 = vsel %vm10638_vm5, %v233_v21, %v240_v22  ;;  %v13633_v31 = vsel %vm10656_vm8, 4294967295, %v13632_v31  ;;  %v247_v32 = vshll.u32 %v85_v19, 16  ;;  %v252_v33 = vshrl.u32 %v86_v23, 16  ;;  %v87_v35 = vld [vmem:[#allocation9 + $0x10] sm:$0xf] }
  0x59   :  { %13634 = vst [vmem:[#allocation23_spill] sm:$0xff] %v13633_v31  ;;  %v255_v34 = vshll.u32 %v86_v23, 16  ;;  %551 = vst [vmem:[#allocation2 + $0x10] sm:$0xf] %v241_v30  ;;  %v246_v37 = vrot.slane %v244_v28, 7  ;;  %v177_v38 = vsel %vm10644_vm7, 0, %v176_v29 }
  0x5a   :  { %v88_v39 = vld [vmem:[#allocation9 + $0x14] sm:$0xf]  ;;  %v242_v41 = vrot.slane %v10635_v17, 4  ;;  %v10663_v43 = vrot.slane %v252_v33, 7  ;;  %178 = vst [vmem:[#allocation2 + $0x14] sm:$0x1] %v177_v38 }
  0x5b   :  { %4709 = vmatpush1.bf16.msra.mxu0 %v10088_v6  ;;  %v132_v40 = vld [vmem:[#allocation2 + $0x24] sm:$0x1]  ;;  %v261_v45 = vshrl.u32 %v87_v35, 16  ;;  %v250_v47 = vrot.slane %v246_v37, 4  ;;  %v264_v48 = vshll.u32 %v87_v35, 16  ;;  %v249_v49 = vor.u32 %v247_v32, %v246_v37  ;;  %v10092_v63 = vld [vmem:[#allocation12 + $0xc0] sm:$0xff]  }
  0x5c   :  { %4710 = vmatprep.subr.bf16.mxu0 %v13553_v0  ;;  %v133_v44 = vsel %vm10627_vm2, 0, %v132_v40  ;;  %v257_v50 = vor.u32 %v255_v34, %v10663_v43  ;;  %v269_v52 = vshrl.u32 %v88_v39, 16  ;;  %v179_v53 = vld [vmem:[#allocation2 + $0x20] sm:$0x1]  ;;  %v272_v54 = vshll.u32 %v88_v39, 16  ;;  %v10093_v21 = vld [vmem:[#allocation12 + $0xc8] sm:$0xff]  }
  0x5d   :  { %v548_v42 = vld [vmem:[#allocation2 + $0xc] sm:$0xf]  ;;  %134 = vst [vmem:[#allocation2 + $0x24] sm:$0x1] %v133_v44  ;;  %v263_v51 = vrot.slane %v261_v45, 7  ;;  %v180_v55 = vsel %vm10644_vm7, 0, %v179_v53 }
  0x5e   :  { %v549_v46 = vsel %vm10656_vm8, %v232_v26, %v548_v42  ;;  %v89_v56 = vld [vmem:[#allocation9 + $0x18] sm:$0xf]  ;;  %v90_v57 = vld [vmem:[#allocation9 + $0x1c] sm:$0xf]  ;;  %v258_v58 = vsel %vm10638_vm5, %v250_v47, %v257_v50  ;;  %v10675_v60 = vrot.slane %v269_v52, 7  ;;  %v259_v11 = vrot.slane %v10663_v43, 4 }
  0x5f   :  { %4711 = vmatpush1.bf16.msra.mxu0 %v10089_v13  ;;  %550 = vst [vmem:[#allocation2 + $0xc] sm:$0xf] %v549_v46  ;;  %v267_v59 = vrot.slane %v263_v51, 4  ;;  %181 = vst [vmem:[#allocation2 + $0x20] sm:$0x1] %v180_v55  ;;  %v266_v2 = vor.u32 %v264_v48, %v263_v51  ;;  %v278_v4 = vshrl.u32 %v89_v56, 16 }
  0x60   :  { %4712 = vmatprep.subr.bf16.mxu0 %v13553_v0  ;;  %v135_v61 = vld [vmem:[#allocation2 + $0x30] sm:$0x1]  ;;  %v182_v62 = vld [vmem:[#allocation2 + $0x2c] sm:$0x1]  ;;  %v555_v1 = vld [vmem:[#allocation2 + $0x18] sm:$0xf]  ;;  %v274_v8 = vor.u32 %v272_v54, %v10675_v60 }
  0x61   :  { %558 = vst [vmem:[#allocation2 + $0x1c] sm:$0xf] %v258_v58  ;;  %v136_v3 = vsel %vm10627_vm2, 0, %v135_v61  ;;  %v286_v6 = vshrl.u32 %v90_v57, 16  ;;  %v556_v7 = vsel %vm10656_vm8, %v249_v49, %v555_v1  ;;  %v281_v9 = vshll.u32 %v89_v56, 16  ;;  %v10095_v47 = vld [vmem:[#allocation12 + $0xd8] sm:$0xff]  }
  0x62   :  { %137 = vst [vmem:[#allocation2 + $0x30] sm:$0x1] %v136_v3  ;;  %v289_v10 = vshll.u32 %v90_v57, 16  ;;  %557 = vst [vmem:[#allocation2 + $0x18] sm:$0xf] %v556_v7  ;;  %v280_v13 = vrot.slane %v278_v4, 7  ;;  %v275_v17 = vsel %vm10638_vm5, %v267_v59, %v274_v8 }
  0x63   :  { %4713 = vmatpush1.bf16.msra.mxu0 %v10090_v25  ;;  %v552_v12 = vld [vmem:[#allocation2 + $0x14] sm:$0x1]  ;;  %v10684_v14 = vrot.slane %v286_v6, 7  ;;  %v183_v15 = vsel %vm10644_vm7, 0, %v182_v62  ;;  %565 = vst [vmem:[#allocation2 + $0x28] sm:$0xf] %v275_v17 }
  0x64   :  { %4714 = vmatprep.subr.bf16.mxu0 %v13553_v0  ;;  %v553_v16 = vsel %vm10627_vm2, %v242_v41, %v552_v12  ;;  %v562_v19 = vld [vmem:[#allocation2 + $0x24] sm:$0xf]  ;;  %184 = vst [vmem:[#allocation2 + $0x2c] sm:$0x1] %v183_v15  ;;  %v283_v25 = vor.u32 %v281_v9, %v280_v13  ;;  %v284_v26 = vrot.slane %v280_v13, 4  ;;  %v276_v32 = vrot.slane %v10675_v60, 4 }
  0x65   :  { %554 = vst [vmem:[#allocation2 + $0x14] sm:$0x1] %v553_v16  ;;  %v563_v23 = vsel %vm10656_vm8, %v266_v2, %v562_v19  ;;  %v291_v24 = vor.u32 %v289_v10, %v10684_v14  ;;  %v91_v27 = vld [vmem:[#allocation9 + $0x20] sm:$0xf]  ;;  %v92_v29 = vld [vmem:[#allocation9 + $0x24] sm:$0xf] }
  0x66   :  { %v10100_v22 = vld [vmem:[#allocation2 + $0xc] sm:$0xff]   ;;  %564 = vst [vmem:[#allocation2 + $0x24] sm:$0xf] %v563_v23  ;;  %v559_v28 = vld [vmem:[#allocation2 + $0x20] sm:$0x1]  ;;  %v295_v38 = vshrl.u32 %v91_v27, 16 }
  0x67   :  { %4715 = vmatpush1.bf16.msra.mxu0 %v10091_v36  ;;  %4732 = vmatprep.mubr.bf16.mxu0 %v10100_v22  ;;  %v138_v30 = vld [vmem:[#allocation2 + $0x3c] sm:$0x1]  ;;  %v560_v33 = vsel %vm10627_vm2, %v259_v11, %v559_v28  ;;  %v292_v34 = vsel %vm10638_vm5, %v284_v26, %v291_v24  ;;  %v10094_v36 = vld [vmem:[#allocation12 + $0xd0] sm:$0xff]   ;;  %v303_v39 = vshrl.u32 %v92_v29, 16  ;;  %v298_v41 = vshll.u32 %v91_v27, 16  ;;  %v10096_v57 = vld [vmem:[#allocation12 + $0xe0] sm:$0xff]  }
  0x68   :  { %4716 = vmatprep.subr.bf16.mxu0 %v13553_v0  ;;  %v139_v35 = vsel %vm10627_vm2, 0, %v138_v30  ;;  %561 = vst [vmem:[#allocation2 + $0x20] sm:$0x1] %v560_v33  ;;  %572 = vst [vmem:[#allocation2 + $0x34] sm:$0xf] %v292_v34  ;;  %v306_v42 = vshll.u32 %v92_v29, 16 }
  0x69   :  { %v569_v37 = vld [vmem:[#allocation2 + $0x30] sm:$0xf]  ;;  %140 = vst [vmem:[#allocation2 + $0x3c] sm:$0x1] %v139_v35  ;;  %v297_v44 = vrot.slane %v295_v38, 7  ;;  %v10706_v45 = vrot.slane %v303_v39, 7 }
  0x6a   :  { %v570_v40 = vsel %vm10656_vm8, %v283_v25, %v569_v37  ;;  %v185_v51 = vld [vmem:[#allocation2 + $0x38] sm:$0x1]  ;;  %v10714_v54 = vld [vmem:[#allocation2 + $0x4] sm:$0xf]  ;;  %v10716_v55 = vld [vmem:[#allocation2 + $0x10] sm:$0xf] }
  0x6b   :  { %4717 = vmatpush1.bf16.msra.mxu0 %v10092_v63  ;;  %571 = vst [vmem:[#allocation2 + $0x30] sm:$0xf] %v570_v40  ;;  %v566_v43 = vld [vmem:[#allocation2 + $0x2c] sm:$0x1]  ;;  %v308_v48 = vor.u32 %v306_v42, %v10706_v45  ;;  %v300_v49 = vor.u32 %v298_v41, %v297_v44  ;;  %v301_v50 = vrot.slane %v297_v44, 4  ;;  %v186_v52 = vsel %vm10644_vm7, 0, %v185_v51 }
  0x6c   :  { %4718 = vmatprep.subr.bf16.mxu0 %v13553_v0  ;;  %v567_v46 = vsel %vm10627_vm2, %v276_v32, %v566_v43  ;;  %v93_v53 = vld [vmem:[#allocation9 + $0x28] sm:$0xf]  ;;  %187 = vst [vmem:[#allocation2 + $0x38] sm:$0x1] %v186_v52  ;;  %v94_v59 = vld [vmem:[#allocation9 + $0x2c] sm:$0xf] }
  0x6d   :  { %568 = vst [vmem:[#allocation2 + $0x2c] sm:$0x1] %v567_v46  ;;  %v309_v56 = vsel %vm10638_vm5, %v301_v50, %v308_v48  ;;  %v312_v60 = vshrl.u32 %v93_v53, 16  ;;  %vm3033_vm9 = vcmask 1042432   ;;  %vm3034_vm10 = vcmask 1046532   ;;  %v10097_v4 = vld [vmem:[#allocation12 + $0xe8] sm:$0xff]  }
  0x6e   :  { %579 = vst [vmem:[#allocation2 + $0x40] sm:$0xf] %v309_v56  ;;  %v10723_v62 = vld [vmem:[#allocation2] sm:$0xe]  ;;  %v10725_v63 = vld [vmem:[#allocation2 + $0x8] sm:$0x1]  ;;  %vm10748_vm11 = vmor %vm3033_vm9, %vm3034_vm10 }
  0x6f   :  { %4719 = vmatpush1.bf16.msra.mxu0 %v10093_v21  ;;  %v3038_v1 = vrot.slane %v10714_v54, 5  ;;  %v141_v2 = vld [vmem:[#allocation2 + $0x48] sm:$0x1]  ;;  %v314_v3 = vrot.slane %v312_v60, 7  ;;  %v3045_v6 = vrot.slane %v10716_v55, 5  ;;  %v293_v7 = vrot.slane %v10684_v14, 4 }
  0x70   :  { %4720 = vmatprep.subr.bf16.mxu0 %v13553_v0  ;;  %v576_v58 = vld [vmem:[#allocation2 + $0x3c] sm:$0xf]  ;;  %v142_v8 = vsel %vm10627_vm2, 0, %v141_v2  ;;  %v320_v9 = vshrl.u32 %v94_v59, 16  ;;  %v10124_v10 = vld [vmem:[#allocation12] sm:$0xff]   ;;  %v315_v12 = vshll.u32 %v93_v53, 16 }
  0x71   :  { %v577_v61 = vsel %vm10656_vm8, %v300_v49, %v576_v58  ;;  %v10732_v11 = vld [vmem:[#allocation2 + $0xc] sm:$0xe]  ;;  %143 = vst [vmem:[#allocation2 + $0x48] sm:$0x1] %v142_v8  ;;  %v318_v13 = vrot.slane %v314_v3, 4  ;;  %v323_v17 = vshll.u32 %v94_v59, 16  ;;  %4412 = vmatpush1.bf16.msra.mxu1 %v10124_v10 }
  0x72   :  { %578 = vst [vmem:[#allocation2 + $0x3c] sm:$0xf] %v577_v61  ;;  %v188_v15 = vld [vmem:[#allocation2 + $0x44] sm:$0x1]  ;;  %v10735_v16 = vrot.slane %v320_v9, 7  ;;  %v10125_v19 = vld [vmem:[#allocation12 + $0x8] sm:$0xff]   ;;  %4413 = vmatprep.subr.bf16.mxu1 %v13553_v0  ;;  %v317_v30 = vor.u32 %v315_v12, %v314_v3 }
  0x73   :  { %4721 = vmatpush1.bf16.msra.mxu0 %v10094_v36  ;;  %v189_v14 = vsel %vm10644_vm7, 0, %v188_v15  ;;  %v573_v21 = vld [vmem:[#allocation2 + $0x38] sm:$0x1]  ;;  %v95_v22 = vld [vmem:[#allocation9 + $0x30] sm:$0xf]  ;;  %v8871_v24 = vrot.slane %v10723_v62, 9 }
  0x74   :  { %4722 = vmatprep.subr.bf16.mxu0 %v13553_v0  ;;  %190 = vst [vmem:[#allocation2 + $0x44] sm:$0x1] %v189_v14  ;;  %v96_v23 = vld [vmem:[#allocation9 + $0x34] sm:$0xf]  ;;  %v3041_v25 = vrot.slane %v10725_v63, 5  ;;  %v574_v26 = vsel %vm10627_vm2, %v293_v7, %v573_v21  ;;  %v325_v27 = vor.u32 %v323_v17, %v10735_v16  ;;  %v3040_v29 = vrot.slane %v3038_v1, 4 }
  0x75   :  { %v10098_v28 = vld [vmem:[#allocation12 + $0xf0] sm:$0xff]   ;;  %575 = vst [vmem:[#allocation2 + $0x38] sm:$0x1] %v574_v26  ;;  %v144_v32 = vld [vmem:[#allocation2 + $0x54] sm:$0x1]  ;;  %v329_v33 = vshrl.u32 %v95_v22, 16  ;;  %4414 = vmatpush1.bf16.msra.mxu1 %v10125_v19  ;;  %v3039_v51 = vsel %vm10748_vm11, %v8871_v24, %v3038_v1 }
  0x76   :  { %v337_v34 = vshrl.u32 %v96_v23, 16  ;;  %v13635_v35 = vmov 0  ;;  %v8872_v36 = vrot.slane %v10732_v11, 9  ;;  %v10755_v37 = vrot.slane %v3045_v6, 4  ;;  %v10099_v40 = vld [vmem:[#allocation12 + $0xf8] sm:$0xff]   ;;  %4415 = vmatprep.subr.bf16.mxu1 %v13553_v0  ;;  %v10127_v58 = vld [vmem:[#allocation12 + $0x10] sm:$0xff]  }
  0x77   :  { %4723 = vmatpush1.bf16.msra.mxu0 %v10095_v47  ;;  %v13636_v35 = vsel %vm10748_vm11, 4294967295, %v13635_v35  ;;  %v326_v38 = vsel %vm10638_vm5, %v318_v13, %v325_v27  ;;  %v145_v39 = vsel %vm10627_vm2, 0, %v144_v32  ;;  %v310_v41 = vrot.slane %v10706_v45, 4  ;;  %v191_v46 = vld [vmem:[#allocation2 + $0x50] sm:$0x1]  ;;  %v10129_v8 = vld [vmem:[#allocation12 + $0x18] sm:$0xff]  }
  0x78   :  { %4724 = vmatprep.subr.bf16.mxu0 %v13553_v0  ;;  %13637 = vst [vmem:[#allocation24_spill] sm:$0xff] %v13636_v35  ;;  %586 = vst [vmem:[#allocation2 + $0x4c] sm:$0xf] %v326_v38  ;;  %v331_v42 = vrot.slane %v329_v33, 7  ;;  %v332_v43 = vshll.u32 %v95_v22, 16  ;;  %v10762_v44 = vrot.slane %v337_v34, 7  ;;  %v3042_v45 = vsel %vm10748_vm11, %v3040_v29, %v3041_v25 }
  0x79   :  { %146 = vst [vmem:[#allocation2 + $0x54] sm:$0x1] %v145_v39  ;;  %v583_v47 = vld [vmem:[#allocation2 + $0x48] sm:$0xf]  ;;  %v340_v48 = vshll.u32 %v96_v23, 16  ;;  %v192_v49 = vsel %vm10644_vm7, 0, %v191_v46  ;;  %4416 = vmatpush1.bf16.msra.mxu1 %v10127_v58  ;;  %v8903_v9 = vcombine.low %v3039_v51, %v3042_v45  ;;  %v3046_v39 = vsel %vm10748_vm11, %v8872_v36, %v3045_v6 }
  0x7a   :  { %v97_v50 = vld [vmem:[#allocation9 + $0x38] sm:$0xf]  ;;  %v10771_v52 = vld [vmem:[#allocation2 + $0x1c] sm:$0xf]  ;;  %v584_v53 = vsel %vm10656_vm8, %v317_v30, %v583_v47  ;;  %v335_v54 = vrot.slane %v331_v42, 4  ;;  %v10101_v1 = vld [vmem:[#allocation12 + $0x100] sm:$0xff]   ;;  %v334_v3 = vor.u32 %v332_v43, %v331_v42  ;;  %4417 = vmatprep.subr.bf16.mxu1 %v13553_v0 }
  0x7b   :  { %4725 = vmatpush1.bf16.msra.mxu0 %v10096_v57  ;;  %193 = vst [vmem:[#allocation2 + $0x50] sm:$0x1] %v192_v49  ;;  %v98_v56 = vld [vmem:[#allocation9 + $0x3c] sm:$0xf]  ;;  %v147_v57 = vld [vmem:[#allocation2 + $0x60] sm:$0x1]  ;;  %v342_v61 = vor.u32 %v340_v48, %v10762_v44 }
  0x7c   :  { %4726 = vmatprep.subr.bf16.mxu0 %v13553_v0  ;;  %v2834_v59 = vld [vmem:[#allocation2 + $0x14] sm:$0x1]  ;;  %585 = vst [vmem:[#allocation2 + $0x48] sm:$0xf] %v584_v53  ;;  %v580_v60 = vld [vmem:[#allocation2 + $0x44] sm:$0x1] }
  0x7d   :  { %v148_v62 = vsel %vm10627_vm2, 0, %v147_v57  ;;  %v346_v63 = vshrl.u32 %v97_v50, 16  ;;  %v581_v2 = vsel %vm10627_vm2, %v310_v41, %v580_v60  ;;  %v354_v7 = vshrl.u32 %v98_v56, 16  ;;  %v10781_v10 = vld [vmem:[#allocation2 + $0x18] sm:$0xe]  ;;  %4418 = vmatpush1.bf16.msra.mxu1 %v10129_v8  ;;  %v10131_v46 = vld [vmem:[#allocation12 + $0x20] sm:$0xff]  }
  0x7e   :  { %149 = vst [vmem:[#allocation2 + $0x60] sm:$0x1] %v148_v62  ;;  %582 = vst [vmem:[#allocation2 + $0x44] sm:$0x1] %v581_v2  ;;  %v343_v12 = vsel %vm10638_vm5, %v335_v54, %v342_v61  ;;  %v357_v15 = vshll.u32 %v98_v56, 16  ;;  %v10102_v17 = vld [vmem:[#allocation2 + $0x18] sm:$0xff]   ;;  %4419 = vmatprep.subr.bf16.mxu1 %v13553_v0 }
  0x7f   :  { %4727 = vmatpush1.bf16.msra.mxu0 %v10097_v4  ;;  %v349_v4 = vshll.u32 %v97_v50, 16  ;;  %v348_v13 = vrot.slane %v346_v63, 7  ;;  %v3048_v14 = vrot.slane %v2834_v59, 5  ;;  %v327_v19 = vrot.slane %v10735_v16, 4  ;;  %593 = vst [vmem:[#allocation2 + $0x58] sm:$0xf] %v343_v12 }
  0x80   :  { %4728 = vmatprep.subr.bf16.mxu0 %v13553_v0  ;;  %v10787_v21 = vrot.slane %v354_v7, 7  ;;  %v194_v22 = vld [vmem:[#allocation2 + $0x5c] sm:$0x1]  ;;  %v3052_v23 = vrot.slane %v10771_v52, 5  ;;  %v590_v24 = vld [vmem:[#allocation2 + $0x54] sm:$0xf] }
  0x81   :  { %v10104_v25 = vld [vmem:[#allocation12 + $0x108] sm:$0xff]   ;;  %v591_v26 = vsel %vm10656_vm8, %v334_v3, %v590_v24  ;;  %v351_v27 = vor.u32 %v349_v4, %v348_v13  ;;  %v99_v29 = vld [vmem:[#allocation9 + $0x40] sm:$0xf]  ;;  %v150_v30 = vld [vmem:[#allocation2 + $0x6c] sm:$0x1]  ;;  %v8873_v16 = vrot.slane %v10781_v10, 9  ;;  %4420 = vmatpush1.bf16.msra.mxu1 %v10131_v46 }
  0x82   :  { %592 = vst [vmem:[#allocation2 + $0x54] sm:$0xf] %v591_v26  ;;  %v587_v32 = vld [vmem:[#allocation2 + $0x50] sm:$0x1]  ;;  %v359_v33 = vor.u32 %v357_v15, %v10787_v21  ;;  %v195_v34 = vsel %vm10644_vm7, 0, %v194_v22  ;;  %v3054_v55 = vrot.slane %v3052_v23, 4  ;;  %4421 = vmatprep.subr.bf16.mxu1 %v13553_v0 }
  0x83   :  { %4729 = vmatpush1.bf16.msra.mxu0 %v10098_v28  ;;  %v352_v28 = vrot.slane %v348_v13, 4  ;;  %v100_v38 = vld [vmem:[#allocation9 + $0x44] sm:$0xf]  ;;  %v2837_v41 = vld [vmem:[#allocation2 + $0x20] sm:$0x1]  ;;  %v588_v42 = vsel %vm10627_vm2, %v327_v19, %v587_v32  ;;  %v151_v36 = vsel %vm10627_vm2, 0, %v150_v30 }
  0x84   :  { %4730 = vmatprep.subr.bf16.mxu0 %v13553_v0  ;;  %196 = vst [vmem:[#allocation2 + $0x5c] sm:$0x1] %v195_v34  ;;  %v197_v43 = vld [vmem:[#allocation2 + $0x68] sm:$0x1]  ;;  %589 = vst [vmem:[#allocation2 + $0x50] sm:$0x1] %v588_v42 }
  0x85   :  { %v360_v11 = vsel %vm10638_vm5, %v352_v28, %v359_v33  ;;  %v597_v6 = vld [vmem:[#allocation2 + $0x60] sm:$0xf]  ;;  %v10103_v47 = vld [vmem:[#allocation2 + $0x24] sm:$0xff]   ;;  %152 = vst [vmem:[#allocation2 + $0x6c] sm:$0x1] %v151_v36  ;;  %v366_v51 = vshll.u32 %v99_v29, 16 }
  0x86   :  { %v10816_v48 = vld [vmem:[#allocation2 + $0x28] sm:$0xf]  ;;  %v10106_v49 = vld [vmem:[#allocation12 + $0x110] sm:$0xff]   ;;  %v598_v50 = vsel %vm10656_vm8, %v351_v27, %v597_v6  ;;  %600 = vst [vmem:[#allocation2 + $0x64] sm:$0xf] %v360_v11  ;;  %v371_v45 = vshrl.u32 %v100_v38, 16 }
  0x87   :  { %4731 = vmatpush1.bf16.msra.mxu0 %v10099_v40  ;;  %v3049_v40 = vsel %vm10748_vm11, %v10755_v37, %v3048_v14  ;;  %v363_v37 = vshrl.u32 %v99_v29, 16  ;;  %v374_v53 = vshll.u32 %v100_v38, 16  ;;  %v10822_v56 = vld [vmem:[#allocation2 + $0x24] sm:$0xe]  ;;  %599 = vst [vmem:[#allocation2 + $0x60] sm:$0xf] %v598_v50 }
  0x88   :  { %4989 = vmatprep.subr.bf16.mxu0 %v13553_v0  ;;  %v10820_v54 = vcombine.low %v3046_v39, %v3049_v40  ;;  %v10132_v58 = vld [vmem:[#allocation12 + $0x28] sm:$0xff]   ;;  %v3055_v59 = vrot.slane %v2837_v41, 5  ;;  %v344_v60 = vrot.slane %v10762_v44, 4  ;;  %v10825_v61 = vrot.slane %v371_v45, 7  ;;  %v2840_v7 = vld [vmem:[#allocation2 + $0x2c] sm:$0x1] }
  0x89   :  { %v365_v57 = vrot.slane %v363_v37, 7  ;;  %v198_v62 = vsel %vm10644_vm7, 0, %v197_v43  ;;  %v3059_v2 = vrot.slane %v10816_v48, 5  ;;  %v3053_v44 = vsel %vm10748_vm11, %v8873_v16, %v3052_v23  ;;  %4422 = vmatpush1.bf16.msra.mxu1 %v10132_v58  ;;  %v10109_v12 = vld [vmem:[#allocation12 + $0x118] sm:$0xff]   ;;  %v102_v15 = vld [vmem:[#allocation9 + $0x4c] sm:$0xf] }
  0x8a   :  { %4733 = vmatmul.mubr.bf16.vlgmr.msra.gmra.mrb[0].mxu0 %v8903_v9  ;;  %199 = vst [vmem:[#allocation2 + $0x68] sm:$0x1] %v198_v62  ;;  %v376_v4 = vor.u32 %v374_v53, %v10825_v61  ;;  %v8874_v8 = vrot.slane %v10822_v56, 9  ;;  %v3056_v10 = vsel %vm10748_vm11, %v3054_v55, %v3055_v59  ;;  %v10845_v19 = vld [vmem:[#allocation2 + $0x34] sm:$0xf]  ;;  %v361_v22 = vrot.slane %v10787_v21, 4  ;;  %4423 = vmatprep.subr.bf16.mxu1 %v13553_v0 }
  0x8b   :  { %4990 = vmatpush1.bf16.msra.mxu0 %v10101_v1  ;;  %4740 = vmatprep.mubr.bf16.mxu0 %v10102_v17  ;;  %v369_v63 = vrot.slane %v365_v57, 4  ;;  %v101_v1 = vld [vmem:[#allocation9 + $0x48] sm:$0xf]  ;;  %v368_v3 = vor.u32 %v366_v51, %v365_v57  ;;  %v594_v9 = vld [vmem:[#allocation2 + $0x5c] sm:$0x1]  ;;  %v3061_v26 = vrot.slane %v3059_v2, 4  ;;  %v10856_v21 = vcombine.low %v3053_v44, %v3056_v10 }
  0x8c   :  { %4991 = vmatprep.subr.bf16.mxu0 %v13553_v0  ;;  %v595_v13 = vsel %vm10627_vm2, %v344_v60, %v594_v9  ;;  %v153_v17 = vld [vmem:[#allocation2 + $0x78] sm:$0x1]  ;;  %v380_v14 = vshrl.u32 %v101_v1, 16  ;;  %v604_v23 = vld [vmem:[#allocation2 + $0x6c] sm:$0xf]  ;;  %v10112_v27 = vld [vmem:[#allocation12 + $0x120] sm:$0xff]   ;;  %v3060_v57 = vsel %vm10748_vm11, %v8874_v8, %v3059_v2 }
  0x8d   :  { %v377_v52 = vsel %vm10638_vm5, %v369_v63, %v376_v4  ;;  %596 = vst [vmem:[#allocation2 + $0x5c] sm:$0x1] %v595_v13  ;;  %v154_v24 = vsel %vm10627_vm2, 0, %v153_v17  ;;  %v605_v28 = vsel %vm10656_vm8, %v368_v3, %v604_v23  ;;  %v383_v30 = vshll.u32 %v101_v1, 16  ;;  %13638 = vst [vmem:[#allocation25_spill] sm:$0xff] %v10856_v21  ;;  %v10114_v51 = vld [vmem:[#allocation12 + $0x128] sm:$0xff]  }
  0x8e   :  { %607 = vst [vmem:[#allocation2 + $0x70] sm:$0xf] %v377_v52  ;;  %155 = vst [vmem:[#allocation2 + $0x78] sm:$0x1] %v154_v24  ;;  %v382_v29 = vrot.slane %v380_v14, 7  ;;  %v388_v33 = vshrl.u32 %v102_v15, 16 }
  0x8f   :  { %4992 = vmatpush1.bf16.msra.mxu0 %v10104_v25  ;;  %v10105_v25 = vld [vmem:[#allocation2 + $0x30] sm:$0xff]   ;;  %v10860_v32 = vld [vmem:[#allocation2 + $0x40] sm:$0xf]  ;;  %606 = vst [vmem:[#allocation2 + $0x6c] sm:$0xf] %v605_v28  ;;  %v391_v34 = vshll.u32 %v102_v15, 16 }
  0x90   :  { %4993 = vmatprep.subr.bf16.mxu0 %v13553_v0  ;;  %v10858_v16 = vld [vmem:[#allocation2 + $0x30] sm:$0xe]  ;;  %v3062_v38 = vrot.slane %v2840_v7, 5  ;;  %v386_v40 = vrot.slane %v382_v29, 4  ;;  %v200_v41 = vld [vmem:[#allocation2 + $0x74] sm:$0x1]  ;;  %v385_v37 = vor.u32 %v383_v30, %v382_v29 }
  0x91   :  { %v601_v39 = vld [vmem:[#allocation2 + $0x68] sm:$0x1]  ;;  %v10865_v43 = vrot.slane %v388_v33, 7  ;;  %v201_v55 = vsel %vm10644_vm7, 0, %v200_v41  ;;  %v103_v11 = vld [vmem:[#allocation9 + $0x50] sm:$0xf] }
  0x92   :  { %4741 = vmatmul.mubr.bf16.gmra.mrb[4].mxu0 %v10820_v54  ;;  %v602_v42 = vsel %vm10627_vm2, %v361_v22, %v601_v39  ;;  %v104_v6 = vld [vmem:[#allocation9 + $0x54] sm:$0xf]  ;;  %v3066_v36 = vrot.slane %v10845_v19, 5  ;;  %202 = vst [vmem:[#allocation2 + $0x74] sm:$0x1] %v201_v55  ;;  %v8875_v50 = vrot.slane %v10858_v16, 9  ;;  %v3063_v58 = vsel %vm10748_vm11, %v3061_v26, %v3062_v38 }
  0x93   :  { %4748 = vmatprep.mubr.bf16.mxu0 %v10103_v47  ;;  %4994 = vmatpush1.bf16.msra.mxu0 %v10106_v49  ;;  %603 = vst [vmem:[#allocation2 + $0x68] sm:$0x1] %v602_v42  ;;  %v156_v46 = vld [vmem:[#allocation2 + $0x84] sm:$0x1]  ;;  %v397_v47 = vshrl.u32 %v103_v11, 16  ;;  %v393_v45 = vor.u32 %v391_v34, %v10865_v43  ;;  %v405_v56 = vshrl.u32 %v104_v6, 16  ;;  %v10893_v10 = vcombine.low %v3060_v57, %v3063_v58 }
  0x94   :  { %4995 = vmatprep.subr.bf16.mxu0 %v13553_v0  ;;  %v10135_v49 = vld [vmem:[#allocation12 + $0x30] sm:$0xff]   ;;  %v157_v53 = vsel %vm10627_vm2, 0, %v156_v46  ;;  %v10881_v59 = vld [vmem:[#allocation2 + $0x3c] sm:$0xe]  ;;  %v3073_v60 = vrot.slane %v10860_v32, 5  ;;  %v400_v62 = vshll.u32 %v103_v11, 16 }
  0x95   :  { %158 = vst [vmem:[#allocation2 + $0x84] sm:$0x1] %v157_v53  ;;  %v2843_v63 = vld [vmem:[#allocation2 + $0x38] sm:$0x1]  ;;  %v394_v1 = vsel %vm10638_vm5, %v386_v40, %v393_v45  ;;  %v399_v3 = vrot.slane %v397_v47, 7  ;;  %4424 = vmatpush1.bf16.msra.mxu1 %v10135_v49  ;;  %v10136_v2 = vld [vmem:[#allocation12 + $0x38] sm:$0xff]  }
  0x96   :  { %v611_v48 = vld [vmem:[#allocation2 + $0x78] sm:$0xf]  ;;  %v378_v4 = vrot.slane %v10825_v61, 4  ;;  %614 = vst [vmem:[#allocation2 + $0x7c] sm:$0xf] %v394_v1  ;;  %v10890_v7 = vrot.slane %v405_v56, 7  ;;  %4425 = vmatprep.subr.bf16.mxu1 %v13553_v0 }
  0x97   :  { %4996 = vmatpush1.bf16.msra.mxu0 %v10109_v12  ;;  %v612_v44 = vsel %vm10656_vm8, %v385_v37, %v611_v48  ;;  %v203_v8 = vld [vmem:[#allocation2 + $0x80] sm:$0x1]  ;;  %13639 = vst [vmem:[#allocation26_spill] sm:$0xff] %v10893_v10  ;;  %v3068_v12 = vrot.slane %v3066_v36, 4  ;;  %v8876_v13 = vrot.slane %v10881_v59, 9  ;;  %v3069_v15 = vrot.slane %v2843_v63, 5 }
  0x98   :  { %4997 = vmatprep.subr.bf16.mxu0 %v13553_v0  ;;  %v10117_v9 = vld [vmem:[#allocation12 + $0x130] sm:$0xff]   ;;  %613 = vst [vmem:[#allocation2 + $0x78] sm:$0xf] %v612_v44  ;;  %v402_v61 = vor.u32 %v400_v62, %v399_v3  ;;  %v403_v17 = vrot.slane %v399_v3, 4  ;;  %v408_v14 = vshll.u32 %v104_v6, 16  ;;  %v10898_v22 = vrot.slane %v3073_v60, 4 }
  0x99   :  { %v10107_v52 = vld [vmem:[#allocation2 + $0x3c] sm:$0xff]   ;;  %v105_v19 = vld [vmem:[#allocation9 + $0x58] sm:$0xf]  ;;  %v608_v23 = vld [vmem:[#allocation2 + $0x74] sm:$0x1]  ;;  %v204_v24 = vsel %vm10644_vm7, 0, %v203_v8  ;;  %4426 = vmatpush1.bf16.msra.mxu1 %v10136_v2  ;;  %v3070_v55 = vsel %vm10748_vm11, %v3068_v12, %v3069_v15 }
  0x9a   :  { %4749 = vmatmul.mubr.bf16.gmra.mrb[8].mxu0 %v10856_v21  ;;  %v10138_v26 = vld [vmem:[#allocation12 + $0x40] sm:$0xff]   ;;  %v10905_v28 = vld [vmem:[#allocation2 + $0x4c] sm:$0xf]  ;;  %v609_v29 = vsel %vm10627_vm2, %v378_v4, %v608_v23  ;;  %v410_v30 = vor.u32 %v408_v14, %v10890_v7  ;;  %205 = vst [vmem:[#allocation2 + $0x80] sm:$0x1] %v204_v24  ;;  %4427 = vmatprep.subr.bf16.mxu1 %v13553_v0  ;;  %v417_v37 = vshll.u32 %v105_v19, 16 }
  0x9b   :  { %4756 = vmatprep.mubr.bf16.mxu0 %v10105_v25  ;;  %4998 = vmatpush1.bf16.msra.mxu0 %v10112_v27  ;;  %v414_v25 = vshrl.u32 %v105_v19, 16  ;;  %v3067_v27 = vsel %vm10748_vm11, %v8875_v50, %v3066_v36  ;;  %v106_v16 = vld [vmem:[#allocation9 + $0x5c] sm:$0xf]  ;;  %v159_v33 = vld [vmem:[#allocation2 + $0x90] sm:$0x1]  ;;  %v10139_v47 = vld [vmem:[#allocation12 + $0x48] sm:$0xff]  }
  0x9c   :  { %4999 = vmatprep.subr.bf16.mxu0 %v13553_v0  ;;  %v10120_v34 = vld [vmem:[#allocation12 + $0x138] sm:$0xff]   ;;  %610 = vst [vmem:[#allocation2 + $0x74] sm:$0x1] %v609_v29  ;;  %v618_v38 = vld [vmem:[#allocation2 + $0x84] sm:$0xf]  ;;  %v160_v39 = vsel %vm10627_vm2, 0, %v159_v33  ;;  %v411_v6 = vsel %vm10638_vm5, %v403_v17, %v410_v30  ;;  %v10926_v57 = vcombine.low %v3067_v27, %v3070_v55 }
  0x9d   :  { %v416_v40 = vrot.slane %v414_v25, 7  ;;  %v422_v41 = vshrl.u32 %v106_v16, 16  ;;  %v425_v42 = vshll.u32 %v106_v16, 16  ;;  %v2846_v11 = vld [vmem:[#allocation2 + $0x44] sm:$0x1]  ;;  %v619_v36 = vsel %vm10656_vm8, %v402_v61, %v618_v38  ;;  %4428 = vmatpush1.bf16.msra.mxu1 %v10138_v26  ;;  %v10122_v48 = vld [vmem:[#allocation12 + $0x140] sm:$0xff]  }
  0x9e   :  { %161 = vst [vmem:[#allocation2 + $0x90] sm:$0x1] %v160_v39  ;;  %v206_v46 = vld [vmem:[#allocation2 + $0x8c] sm:$0x1]  ;;  %620 = vst [vmem:[#allocation2 + $0x84] sm:$0xf] %v619_v36  ;;  %4429 = vmatprep.subr.bf16.mxu1 %v13553_v0  ;;  %v3074_v25 = vsel %vm10748_vm11, %v8876_v13, %v3073_v60 }
  0x9f   :  { %5000 = vmatpush1.bf16.msra.mxu0 %v10114_v51  ;;  %621 = vst [vmem:[#allocation2 + $0x88] sm:$0xf] %v411_v6  ;;  %v420_v49 = vrot.slane %v416_v40, 4  ;;  %v10920_v50 = vrot.slane %v422_v41, 7  ;;  %v107_v51 = vld [vmem:[#allocation9 + $0x60] sm:$0xf]  ;;  %v419_v4 = vor.u32 %v417_v37, %v416_v40 }
  0xa0   :  { %5001 = vmatprep.subr.bf16.mxu0 %v13553_v0  ;;  %v3080_v45 = vrot.slane %v10905_v28, 5  ;;  %v395_v53 = vrot.slane %v10865_v43, 4  ;;  %v108_v56 = vld [vmem:[#allocation9 + $0x64] sm:$0xf]  ;;  %13640 = vst [vmem:[#allocation27_spill] sm:$0xff] %v10926_v57  ;;  %v3076_v58 = vrot.slane %v2846_v11, 5 }
  0xa1   :  { %v427_v62 = vor.u32 %v425_v42, %v10920_v50  ;;  %v207_v63 = vsel %vm10644_vm7, 0, %v206_v46  ;;  %v162_v1 = vld [vmem:[#allocation2 + $0x9c] sm:$0x1]  ;;  %v10108_v3 = vld [vmem:[#allocation2 + $0x48] sm:$0xff]   ;;  %v431_v44 = vshrl.u32 %v107_v51, 16  ;;  %v434_v8 = vshll.u32 %v107_v51, 16  ;;  %4430 = vmatpush1.bf16.msra.mxu1 %v10139_v47 }
  0xa2   :  { %4757 = vmatmul.mubr.bf16.gmra.mrb[12].mxu0 %v10893_v10  ;;  %v10931_v2 = vld [vmem:[#allocation2 + $0x48] sm:$0xe]  ;;  %208 = vst [vmem:[#allocation2 + $0x8c] sm:$0x1] %v207_v63  ;;  %v163_v43 = vsel %vm10627_vm2, 0, %v162_v1  ;;  %v439_v15 = vshrl.u32 %v108_v56, 16  ;;  %4431 = vmatprep.subr.bf16.mxu1 %v13553_v0  ;;  %v3077_v26 = vsel %vm10748_vm11, %v10898_v22, %v3076_v58 }
  0xa3   :  { %4764 = vmatprep.mubr.bf16.mxu0 %v10107_v52  ;;  %5002 = vmatpush1.bf16.msra.mxu0 %v10117_v9  ;;  %v209_v9 = vld [vmem:[#allocation2 + $0x98] sm:$0x1]  ;;  %v615_v12 = vld [vmem:[#allocation2 + $0x80] sm:$0x1]  ;;  %v428_v52 = vsel %vm10638_vm5, %v420_v49, %v427_v62  ;;  %164 = vst [vmem:[#allocation2 + $0x9c] sm:$0x1] %v163_v43  ;;  %v10967_v39 = vcombine.low %v3074_v25, %v3077_v26 }
  0xa4   :  { %5003 = vmatprep.subr.bf16.mxu0 %v13553_v0  ;;  %v442_v61 = vshll.u32 %v108_v56, 16  ;;  %v10938_v17 = vld [vmem:[#allocation2 + $0x50] sm:$0x1]  ;;  %v616_v14 = vsel %vm10627_vm2, %v395_v53, %v615_v12  ;;  %628 = vst [vmem:[#allocation2 + $0x94] sm:$0xf] %v428_v52  ;;  %v433_v19 = vrot.slane %v431_v44, 7 }
  0xa5   :  { %v210_v23 = vsel %vm10644_vm7, 0, %v209_v9  ;;  %v10128_v24 = vld [vmem:[#allocation12 + $0x148] sm:$0xff]   ;;  %v3082_v27 = vrot.slane %v3080_v45, 4  ;;  %617 = vst [vmem:[#allocation2 + $0x80] sm:$0x1] %v616_v14  ;;  %v10957_v30 = vrot.slane %v439_v15, 7 }
  0xa6   :  { %v625_v29 = vld [vmem:[#allocation2 + $0x90] sm:$0xf]  ;;  %211 = vst [vmem:[#allocation2 + $0x98] sm:$0x1] %v210_v23  ;;  %v109_v16 = vld [vmem:[#allocation9 + $0x68] sm:$0xf]  ;;  %v436_v33 = vor.u32 %v434_v8, %v433_v19 }
  0xa7   :  { %5004 = vmatpush1.bf16.msra.mxu0 %v10120_v34  ;;  %v412_v32 = vrot.slane %v10890_v7, 4  ;;  %v626_v59 = vsel %vm10656_vm8, %v419_v4, %v625_v29  ;;  %v437_v60 = vrot.slane %v433_v19, 4  ;;  %v8877_v13 = vrot.slane %v10931_v2, 9  ;;  %v10963_v22 = vld [vmem:[#allocation2 + $0x58] sm:$0xf]  ;;  %13641 = vst [vmem:[#allocation28_spill] sm:$0xff] %v10967_v39 }
  0xa8   :  { %5005 = vmatprep.subr.bf16.mxu0 %v13553_v0  ;;  %627 = vst [vmem:[#allocation2 + $0x90] sm:$0xf] %v626_v59  ;;  %v444_v34 = vor.u32 %v442_v61, %v10957_v30  ;;  %v448_v38 = vshrl.u32 %v109_v16, 16  ;;  %v10110_v40 = vld [vmem:[#allocation2 + $0x54] sm:$0xff]   ;;  %v3083_v7 = vrot.slane %v10938_v17, 5  ;;  %v10134_v55 = vld [vmem:[#allocation12 + $0x150] sm:$0xff]  }
  0xa9   :  { %v110_v41 = vld [vmem:[#allocation9 + $0x6c] sm:$0xf]  ;;  %v165_v42 = vld [vmem:[#allocation2 + $0xa8] sm:$0x1]  ;;  %v429_v11 = vrot.slane %v10920_v50, 4  ;;  %v10142_v47 = vld [vmem:[#allocation12 + $0x50] sm:$0xff]   ;;  %v3081_v4 = vsel %vm10748_vm11, %v8877_v13, %v3080_v45 }
  0xaa   :  { %4765 = vmatmul.mubr.bf16.gmra.mrb[16].mxu0 %v10926_v57  ;;  %v622_v6 = vld [vmem:[#allocation2 + $0x8c] sm:$0x1]  ;;  %v445_v36 = vsel %vm10638_vm5, %v437_v60, %v444_v34  ;;  %v166_v37 = vsel %vm10627_vm2, 0, %v165_v42  ;;  %v450_v46 = vrot.slane %v448_v38, 7  ;;  %v632_v51 = vld [vmem:[#allocation2 + $0x9c] sm:$0xf]  ;;  %4432 = vmatpush1.bf16.msra.mxu1 %v10142_v47  ;;  %v3084_v8 = vsel %vm10748_vm11, %v3082_v27, %v3083_v7 }
  0xab   :  { %4772 = vmatprep.mubr.bf16.mxu0 %v10108_v3  ;;  %5006 = vmatpush1.bf16.msra.mxu0 %v10122_v48  ;;  %v623_v49 = vsel %vm10627_vm2, %v412_v32, %v622_v6  ;;  %635 = vst [vmem:[#allocation2 + $0xa0] sm:$0xf] %v445_v36  ;;  %167 = vst [vmem:[#allocation2 + $0xa8] sm:$0x1] %v166_v37  ;;  %v451_v53 = vshll.u32 %v109_v16, 16  ;;  %v456_v56 = vshrl.u32 %v110_v41, 16 }
  0xac   :  { %5007 = vmatprep.subr.bf16.mxu0 %v13553_v0  ;;  %v212_v58 = vld [vmem:[#allocation2 + $0xa4] sm:$0x1]  ;;  %v3087_v50 = vrot.slane %v10963_v22, 5  ;;  %624 = vst [vmem:[#allocation2 + $0x8c] sm:$0x1] %v623_v49  ;;  %v633_v62 = vsel %vm10656_vm8, %v436_v33, %v632_v51  ;;  %v459_v63 = vshll.u32 %v110_v41, 16  ;;  %4433 = vmatprep.subr.bf16.mxu1 %v13553_v0 }
  0xad   :  { %v2850_v1 = vld [vmem:[#allocation2 + $0x54] sm:$0xe]  ;;  %634 = vst [vmem:[#allocation2 + $0x9c] sm:$0xf] %v633_v62  ;;  %v629_v48 = vld [vmem:[#allocation2 + $0x98] sm:$0x1]  ;;  %v453_v9 = vor.u32 %v451_v53, %v450_v46 }
  0xae   :  { %v454_v3 = vrot.slane %v450_v46, 4  ;;  %v10981_v2 = vrot.slane %v456_v56, 7  ;;  %v630_v43 = vsel %vm10627_vm2, %v429_v11, %v629_v48  ;;  %v213_v44 = vsel %vm10644_vm7, 0, %v212_v58  ;;  %v10140_v28 = vld [vmem:[#allocation12 + $0x158] sm:$0xff]   ;;  %v2852_v52 = vld [vmem:[#allocation2 + $0x5c] sm:$0x1] }
  0xaf   :  { %5008 = vmatpush1.bf16.msra.mxu0 %v10128_v24  ;;  %631 = vst [vmem:[#allocation2 + $0x98] sm:$0x1] %v630_v43  ;;  %214 = vst [vmem:[#allocation2 + $0xa4] sm:$0x1] %v213_v44  ;;  %v111_v15 = vld [vmem:[#allocation9 + $0x70] sm:$0xf]  ;;  %v10999_v24 = vcombine.low %v3081_v4, %v3084_v8 }
  0xb0   :  { %5009 = vmatprep.subr.bf16.mxu0 %v13553_v0  ;;  %v461_v12 = vor.u32 %v459_v63, %v10981_v2  ;;  %v10111_v45 = vld [vmem:[#allocation2 + $0x60] sm:$0xff]   ;;  %v8878_v61 = vrot.slane %v2850_v1, 9  ;;  %v3089_v17 = vrot.slane %v3087_v50, 4  ;;  %v168_v19 = vld [vmem:[#allocation2 + $0xb4] sm:$0x1]  ;;  %v465_v23 = vshrl.u32 %v111_v15, 16 }
  0xb1   :  { %13642 = vst [vmem:[#allocation29_spill] sm:$0xff] %v10999_v24  ;;  %v11001_v25 = vld [vmem:[#allocation2 + $0x64] sm:$0xf]  ;;  %v3090_v27 = vrot.slane %v2852_v52, 5  ;;  %v446_v29 = vrot.slane %v10957_v30, 4  ;;  %v169_v59 = vsel %vm10627_vm2, 0, %v168_v19 }
  0xb2   :  { %4773 = vmatmul.mubr.bf16.gmra.mrb[20].mxu0 %v10967_v39  ;;  %v462_v14 = vsel %vm10638_vm5, %v454_v3, %v461_v12  ;;  %v639_v26 = vld [vmem:[#allocation2 + $0xa8] sm:$0xf]  ;;  %v112_v32 = vld [vmem:[#allocation9 + $0x74] sm:$0xf]  ;;  %v2853_v13 = vld [vmem:[#allocation2 + $0x60] sm:$0xe] }
  0xb3   :  { %4780 = vmatprep.mubr.bf16.mxu0 %v10110_v40  ;;  %5010 = vmatpush1.bf16.msra.mxu0 %v10134_v55  ;;  %642 = vst [vmem:[#allocation2 + $0xac] sm:$0xf] %v462_v14  ;;  %v640_v16 = vsel %vm10656_vm8, %v453_v9, %v639_v26  ;;  %v10143_v60 = vld [vmem:[#allocation12 + $0x58] sm:$0xff]   ;;  %170 = vst [vmem:[#allocation2 + $0xb4] sm:$0x1] %v169_v59  ;;  %v467_v22 = vrot.slane %v465_v23, 7  ;;  %v3088_v55 = vsel %vm10748_vm11, %v8878_v61, %v3087_v50 }
  0xb4   :  { %5011 = vmatprep.subr.bf16.mxu0 %v13553_v0  ;;  %641 = vst [vmem:[#allocation2 + $0xa8] sm:$0xf] %v640_v16  ;;  %v468_v33 = vshll.u32 %v111_v15, 16  ;;  %v3094_v34 = vrot.slane %v11001_v25, 5  ;;  %v215_v38 = vld [vmem:[#allocation2 + $0xb0] sm:$0x1]  ;;  %4434 = vmatpush1.bf16.msra.mxu1 %v10143_v60  ;;  %v3091_v11 = vsel %vm10748_vm11, %v3089_v17, %v3090_v27 }
  0xb5   :  { %v10145_v30 = vld [vmem:[#allocation12 + $0x60] sm:$0xff]   ;;  %v2855_v40 = vld [vmem:[#allocation2 + $0x68] sm:$0x1]  ;;  %v473_v41 = vshrl.u32 %v112_v32, 16  ;;  %v476_v42 = vshll.u32 %v112_v32, 16  ;;  %4435 = vmatprep.subr.bf16.mxu1 %v13553_v0  ;;  %v8879_v6 = vrot.slane %v2853_v13, 9  ;;  %v11024_v62 = vcombine.low %v3088_v55, %v3091_v11 }
  0xb6   :  { %v636_v7 = vld [vmem:[#allocation2 + $0xa4] sm:$0x1]  ;;  %v11016_v36 = vld [vmem:[#allocation2 + $0x70] sm:$0xf]  ;;  %v470_v47 = vor.u32 %v468_v33, %v467_v22  ;;  %v471_v49 = vrot.slane %v467_v22, 4  ;;  %v216_v53 = vsel %vm10644_vm7, 0, %v215_v38 }
  0xb7   :  { %5012 = vmatpush1.bf16.msra.mxu0 %v10140_v28  ;;  %v637_v37 = vsel %vm10627_vm2, %v446_v29, %v636_v7  ;;  %v10146_v46 = vld [vmem:[#allocation12 + $0x160] sm:$0xff]   ;;  %v11020_v51 = vrot.slane %v473_v41, 7  ;;  %v3096_v58 = vrot.slane %v3094_v34, 4  ;;  %217 = vst [vmem:[#allocation2 + $0xb0] sm:$0x1] %v216_v53  ;;  %13643 = vst [vmem:[#allocation30_spill] sm:$0xff] %v11024_v62  ;;  %v3095_v23 = vsel %vm10748_vm11, %v8879_v6, %v3094_v34 }
  0xb8   :  { %5013 = vmatprep.subr.bf16.mxu0 %v13553_v0  ;;  %638 = vst [vmem:[#allocation2 + $0xa4] sm:$0x1] %v637_v37  ;;  %v10113_v56 = vld [vmem:[#allocation2 + $0x6c] sm:$0xff]   ;;  %v113_v50 = vld [vmem:[#allocation9 + $0x78] sm:$0xf]  ;;  %4436 = vmatpush1.bf16.msra.mxu1 %v10145_v30  ;;  %v3097_v4 = vrot.slane %v2855_v40, 5 }
  0xb9   :  { %v478_v63 = vor.u32 %v476_v42, %v11020_v51  ;;  %v114_v1 = vld [vmem:[#allocation9 + $0x7c] sm:$0xf]  ;;  %v171_v48 = vld [vmem:[#allocation2 + $0xc0] sm:$0x1]  ;;  %v218_v3 = vld [vmem:[#allocation2 + $0xbc] sm:$0x1]  ;;  %4437 = vmatprep.subr.bf16.mxu1 %v13553_v0 }
  0xba   :  { %4781 = vmatmul.mubr.bf16.gmra.mrb[24].mxu0 %v10999_v24  ;;  %v646_v43 = vld [vmem:[#allocation2 + $0xb4] sm:$0xf]  ;;  %v172_v44 = vsel %vm10627_vm2, 0, %v171_v48  ;;  %v11031_v8 = vld [vmem:[#allocation2 + $0x6c] sm:$0xe]  ;;  %v3101_v9 = vrot.slane %v11016_v36, 5  ;;  %v3098_v25 = vsel %vm10748_vm11, %v3096_v58, %v3097_v4 }
  0xbb   :  { %4788 = vmatprep.mubr.bf16.mxu0 %v10111_v45  ;;  %5014 = vmatpush1.bf16.msra.mxu0 %v10146_v46  ;;  %v479_v12 = vsel %vm10638_vm5, %v471_v49, %v478_v63  ;;  %v647_v28 = vsel %vm10656_vm8, %v470_v47, %v646_v43  ;;  %173 = vst [vmem:[#allocation2 + $0xc0] sm:$0x1] %v172_v44  ;;  %v482_v52 = vshrl.u32 %v113_v50, 16  ;;  %v463_v15 = vrot.slane %v10981_v2, 4  ;;  %v2858_v26 = vld [vmem:[#allocation2 + $0x74] sm:$0x1] }
  0xbc   :  { %5015 = vmatprep.subr.bf16.mxu0 %v13553_v0  ;;  %648 = vst [vmem:[#allocation2 + $0xb4] sm:$0xf] %v647_v28  ;;  %649 = vst [vmem:[#allocation2 + $0xb8] sm:$0xf] %v479_v12  ;;  %v485_v45 = vshll.u32 %v113_v50, 16  ;;  %v490_v61 = vshrl.u32 %v114_v1, 16  ;;  %v11056_v40 = vcombine.low %v3095_v23, %v3098_v25 }
  0xbd   :  { %v493_v17 = vshll.u32 %v114_v1, 16  ;;  %v484_v14 = vrot.slane %v482_v52, 7  ;;  %v219_v19 = vsel %vm10644_vm7, 0, %v218_v3  ;;  %v10147_v27 = vld [vmem:[#allocation12 + $0x68] sm:$0xff]   ;;  %v8880_v29 = vrot.slane %v11031_v8, 9  ;;  %v10149_v30 = vld [vmem:[#allocation12 + $0x70] sm:$0xff]  }
  0xbe   :  { %v11046_v2 = vrot.slane %v490_v61, 7  ;;  %220 = vst [vmem:[#allocation2 + $0xbc] sm:$0x1] %v219_v19  ;;  %v11049_v16 = vld [vmem:[#allocation2 + $0x7c] sm:$0xf]  ;;  %v3103_v13 = vrot.slane %v3101_v9, 4  ;;  %4438 = vmatpush1.bf16.msra.mxu1 %v10147_v27 }
  0xbf   :  { %v643_v32 = vld [vmem:[#allocation2 + $0xb0] sm:$0x1]  ;;  %v487_v59 = vor.u32 %v485_v45, %v484_v14  ;;  %v488_v60 = vrot.slane %v484_v14, 4  ;;  %v662_v38 = vld [vmem:[#allocation9 + $0x84] sm:$0xf]  ;;  %13644 = vst [vmem:[#allocation31_spill] sm:$0xff] %v11056_v40  ;;  %4439 = vmatprep.subr.bf16.mxu1 %v13553_v0  ;;  %v3102_v4 = vsel %vm10748_vm11, %v8880_v29, %v3101_v9 }
  0xc0   :  { %v644_v22 = vsel %vm10627_vm2, %v463_v15, %v643_v32  ;;  %v495_v33 = vor.u32 %v493_v17, %v11046_v2  ;;  %v661_v34 = vld [vmem:[#allocation9 + $0x80] sm:$0xf]  ;;  %v3104_v7 = vrot.slane %v2858_v26, 5  ;;  %v702_v41 = vld [vmem:[#allocation2 + $0xe4] sm:$0x1]  ;;  %v807_v55 = vshrl.u32 %v662_v38, 16 }
  0xc1   :  { %645 = vst [vmem:[#allocation2 + $0xb0] sm:$0x1] %v644_v22  ;;  %v799_v42 = vshrl.u32 %v661_v34, 16  ;;  %v10115_v11 = vld [vmem:[#allocation2 + $0x78] sm:$0xff]   ;;  %v480_v6 = vrot.slane %v11020_v51, 4  ;;  %v703_v47 = vsel %vm10627_vm2, 0, %v702_v41 }
  0xc2   :  { %4789 = vmatmul.mubr.bf16.gmra.mrb[28].mxu0 %v11024_v62  ;;  %v496_v37 = vsel %vm10638_vm5, %v488_v60, %v495_v33  ;;  %v653_v46 = vld [vmem:[#allocation2 + $0xc0] sm:$0xf]  ;;  %v810_v49 = vshll.u32 %v662_v38, 16  ;;  %704 = vst [vmem:[#allocation2 + $0xe4] sm:$0x1] %v703_v47  ;;  %v802_v58 = vshll.u32 %v661_v34, 16  ;;  %4440 = vmatpush1.bf16.msra.mxu1 %v10149_v30  ;;  %v3105_v43 = vsel %vm10748_vm11, %v3103_v13, %v3104_v7 }
  0xc3   :  { %4796 = vmatprep.mubr.bf16.mxu0 %v10113_v56  ;;  %v654_v53 = vsel %vm10656_vm8, %v487_v59, %v653_v46  ;;  %656 = vst [vmem:[#allocation2 + $0xc4] sm:$0xf] %v496_v37  ;;  %v801_v56 = vrot.slane %v799_v42, 7  ;;  %v2859_v50 = vld [vmem:[#allocation2 + $0x78] sm:$0xe]  ;;  %v3108_v63 = vrot.slane %v11049_v16, 5  ;;  %4441 = vmatprep.subr.bf16.mxu1 %v13553_v0  ;;  %v11084_v17 = vcombine.low %v3102_v4, %v3105_v43 }
  0xc4   :  { %655 = vst [vmem:[#allocation2 + $0xc0] sm:$0xf] %v654_v53  ;;  %v11067_v51 = vrot.slane %v807_v55, 7  ;;  %v10150_v1 = vld [vmem:[#allocation12 + $0x78] sm:$0xff]   ;;  %v2861_v44 = vld [vmem:[#allocation2 + $0x80] sm:$0x1] }
  0xc5   :  { %v650_v48 = vld [vmem:[#allocation2 + $0xbc] sm:$0x1]  ;;  %v805_v3 = vrot.slane %v801_v56, 4  ;;  %v8881_v52 = vrot.slane %v2859_v50, 9  ;;  %v11080_v15 = vld [vmem:[#allocation2 + $0x88] sm:$0xf]  ;;  %v804_v45 = vor.u32 %v802_v58, %v801_v56 }
  0xc6   :  { %v651_v8 = vsel %vm10627_vm2, %v480_v6, %v650_v48  ;;  %v812_v12 = vor.u32 %v810_v49, %v11067_v51  ;;  %v10153_v28 = vld [vmem:[#allocation12 + $0x168] sm:$0xff]   ;;  %v3110_v61 = vrot.slane %v3108_v63, 4  ;;  %4442 = vmatpush1.bf16.msra.mxu1 %v10150_v1  ;;  %v10155_v9 = vld [vmem:[#allocation12 + $0x170] sm:$0xff]   ;;  %13645 = vst [vmem:[#allocation32_spill] sm:$0xff] %v11084_v17  ;;  %v3111_v19 = vrot.slane %v2861_v44, 5  ;;  %v10158_v37 = vld [vmem:[#allocation12 + $0x178] sm:$0xff]  }
  0xc7   :  { %652 = vst [vmem:[#allocation2 + $0xbc] sm:$0x1] %v651_v8  ;;  %5016 = vmatpush1.bf16.msra.mxu0 %v10153_v28  ;;  %v10116_v14 = vld [vmem:[#allocation2 + $0x84] sm:$0xff]   ;;  %v663_v23 = vld [vmem:[#allocation9 + $0x88] sm:$0xf]  ;;  %9658 = vmatprep.subr.bf16.mxu1 %v13553_v0  ;;  %v3115_v29 = vrot.slane %v11080_v15, 5  ;;  %v3109_v41 = vsel %vm10748_vm11, %v8881_v52, %v3108_v63 }
  0xc8   :  { %v813_v36 = vsel %vm10638_vm5, %v805_v3, %v812_v12  ;;  %5017 = vmatprep.subr.bf16.mxu0 %v13553_v0  ;;  %v664_v26 = vld [vmem:[#allocation9 + $0x8c] sm:$0xf]  ;;  %v2862_v27 = vld [vmem:[#allocation2 + $0x84] sm:$0xe]  ;;  %v705_v32 = vld [vmem:[#allocation2 + $0xf0] sm:$0x1]  ;;  %v3112_v42 = vsel %vm10748_vm11, %v3110_v61, %v3111_v19 }
  0xc9   :  { %1121 = vst [vmem:[#allocation2 + $0xe8] sm:$0xf] %v813_v36  ;;  %v1118_v25 = vld [vmem:[#allocation2 + $0xe4] sm:$0xf]  ;;  %v816_v59 = vshrl.u32 %v663_v23, 16  ;;  %v706_v13 = vsel %vm10627_vm2, 0, %v705_v32  ;;  %v11105_v49 = vcombine.low %v3109_v41, %v3112_v42 }
  0xca   :  { %4797 = vmatmul.mubr.bf16.gmra.mrb[32].mxu0 %v11056_v40  ;;  %v1119_v16 = vsel %vm10656_vm8, %v804_v45, %v1118_v25  ;;  %v11091_v60 = vld [vmem:[#allocation2 + $0x94] sm:$0xf]  ;;  %v819_v22 = vshll.u32 %v663_v23, 16  ;;  %v750_v33 = vld [vmem:[#allocation2 + $0xec] sm:$0x1]  ;;  %v824_v38 = vshrl.u32 %v664_v26, 16 }
  0xcb   :  { %4804 = vmatprep.mubr.bf16.mxu0 %v10115_v11  ;;  %1120 = vst [vmem:[#allocation2 + $0xe4] sm:$0xf] %v1119_v16  ;;  %5018 = vmatpush1.bf16.msra.mxu0 %v10155_v9  ;;  %707 = vst [vmem:[#allocation2 + $0xf0] sm:$0x1] %v706_v13  ;;  %v818_v34 = vrot.slane %v816_v59, 7  ;;  %v827_v30 = vshll.u32 %v664_v26, 16 }
  0xcc   :  { %v751_v7 = vsel %vm10644_vm7, 0, %v750_v33  ;;  %5019 = vmatprep.subr.bf16.mxu0 %v13553_v0  ;;  %v2864_v55 = vld [vmem:[#allocation2 + $0x8c] sm:$0x1]  ;;  %v11103_v6 = vrot.slane %v824_v38, 7  ;;  %v8882_v46 = vrot.slane %v2862_v27, 9  ;;  %v3117_v47 = vrot.slane %v3115_v29, 4 }
  0xcd   :  { %752 = vst [vmem:[#allocation2 + $0xec] sm:$0x1] %v751_v7  ;;  %v822_v11 = vrot.slane %v818_v34, 4  ;;  %13646 = vst [vmem:[#allocation33_spill] sm:$0xff] %v11105_v49  ;;  %v10118_v53 = vld [vmem:[#allocation2 + $0x90] sm:$0xff]   ;;  %v3122_v56 = vrot.slane %v11091_v60, 5  ;;  %v821_v58 = vor.u32 %v819_v22, %v818_v34 }
  0xce   :  { %v829_v50 = vor.u32 %v827_v30, %v11103_v6  ;;  %v665_v63 = vld [vmem:[#allocation9 + $0x90] sm:$0xf]  ;;  %v666_v1 = vld [vmem:[#allocation9 + $0x94] sm:$0xf]  ;;  %v3118_v48 = vrot.slane %v2864_v55, 5  ;;  %v814_v3 = vrot.slane %v11067_v51, 4  ;;  %v3116_v51 = vsel %vm10748_vm11, %v8882_v46, %v3115_v29 }
  0xcf   :  { %5020 = vmatpush1.bf16.msra.mxu0 %v10158_v37  ;;  %v708_v4 = vld [vmem:[#allocation2 + $0xfc] sm:$0x1]  ;;  %v833_v43 = vshrl.u32 %v665_v63, 16  ;;  %v841_v44 = vshrl.u32 %v666_v1, 16  ;;  %v2865_v8 = vld [vmem:[#allocation2 + $0x90] sm:$0xe] }
  0xd0   :  { %5278 = vmatprep.subr.bf16.mxu0 %v13553_v0  ;;  %v830_v12 = vsel %vm10638_vm5, %v822_v11, %v829_v50  ;;  %v709_v52 = vsel %vm10627_vm2, 0, %v708_v4  ;;  %v2867_v61 = vld [vmem:[#allocation2 + $0x98] sm:$0x1]  ;;  %v844_v19 = vshll.u32 %v666_v1, 16  ;;  %v3119_v25 = vsel %vm10748_vm11, %v3117_v47, %v3118_v48  ;;  %v11126_v27 = vld [vmem:[#allocation2 + $0xa0] sm:$0xf] }
  0xd1   :  { %1128 = vst [vmem:[#allocation2 + $0xf4] sm:$0xf] %v830_v12  ;;  %v835_v15 = vrot.slane %v833_v43, 7  ;;  %v11115_v45 = vrot.slane %v841_v44, 7  ;;  %710 = vst [vmem:[#allocation2 + $0xfc] sm:$0x1] %v709_v52  ;;  %v11133_v33 = vcombine.low %v3116_v51, %v3119_v25 }
  0xd2   :  { %4805 = vmatmul.mubr.bf16.gmra.mrb[36].mxu0 %v11084_v17  ;;  %v1125_v28 = vld [vmem:[#allocation2 + $0xf0] sm:$0xf]  ;;  %v753_v23 = vld [vmem:[#allocation2 + $0xf8] sm:$0x1]  ;;  %v3124_v26 = vrot.slane %v3122_v56, 4  ;;  %v8883_v32 = vrot.slane %v2865_v8, 9 }
  0xd3   :  { %4812 = vmatprep.mubr.bf16.mxu0 %v10116_v14  ;;  %v1126_v36 = vsel %vm10656_vm8, %v821_v58, %v1125_v28  ;;  %v836_v14 = vshll.u32 %v665_v63, 16  ;;  %v839_v16 = vrot.slane %v835_v15, 4  ;;  %v846_v59 = vor.u32 %v844_v19, %v11115_v45  ;;  %v667_v22 = vld [vmem:[#allocation9 + $0x98] sm:$0xf]  ;;  %13647 = vst [vmem:[#allocation34_spill] sm:$0xff] %v11133_v33  ;;  %v10119_v34 = vld [vmem:[#allocation2 + $0x9c] sm:$0xff]  }
  0xd4   :  { %v1122_v9 = vld [vmem:[#allocation2 + $0xec] sm:$0x1]  ;;  %1127 = vst [vmem:[#allocation2 + $0xf0] sm:$0xf] %v1126_v36  ;;  %v754_v13 = vsel %vm10644_vm7, 0, %v753_v23  ;;  %v850_v55 = vshrl.u32 %v667_v22, 16  ;;  %v3123_v8 = vsel %vm10748_vm11, %v8883_v32, %v3122_v56 }
  0xd5   :  { %v1123_v29 = vsel %vm10627_vm2, %v814_v3, %v1122_v9  ;;  %755 = vst [vmem:[#allocation2 + $0xf8] sm:$0x1] %v754_v13  ;;  %v11135_v38 = vld [vmem:[#allocation2 + $0x9c] sm:$0xe]  ;;  %v838_v30 = vor.u32 %v836_v14, %v835_v15  ;;  %v847_v7 = vsel %vm10638_vm5, %v839_v16, %v846_v59  ;;  %v668_v41 = vld [vmem:[#allocation9 + $0x9c] sm:$0xf] }
  0xd6   :  { %1124 = vst [vmem:[#allocation2 + $0xec] sm:$0x1] %v1123_v29  ;;  %v711_v42 = vld [vmem:[#allocation2 + $0x108] sm:$0x1]  ;;  %v3125_v11 = vrot.slane %v2867_v61, 5  ;;  %v858_v46 = vshrl.u32 %v668_v41, 16 }
  0xd7   :  { %1135 = vst [vmem:[#allocation2 + $0x100] sm:$0xf] %v847_v7  ;;  %v712_v37 = vsel %vm10627_vm2, 0, %v711_v42  ;;  %v861_v47 = vshll.u32 %v668_v41, 16  ;;  %v3129_v58 = vrot.slane %v11126_v27, 5  ;;  %v852_v50 = vrot.slane %v850_v55, 7 }
  0xd8   :  { %713 = vst [vmem:[#allocation2 + $0x108] sm:$0x1] %v712_v37  ;;  %v853_v63 = vshll.u32 %v667_v22, 16  ;;  %v831_v48 = vrot.slane %v11103_v6, 4  ;;  %v1132_v3 = vld [vmem:[#allocation2 + $0xfc] sm:$0xf]  ;;  %v3126_v12 = vsel %vm10748_vm11, %v3124_v26, %v3125_v11 }
  0xd9   :  { %v11145_v4 = vrot.slane %v858_v46, 7  ;;  %v1133_v43 = vsel %vm10656_vm8, %v838_v30, %v1132_v3  ;;  %v856_v44 = vrot.slane %v852_v50, 4  ;;  %v2870_v6 = vld [vmem:[#allocation2 + $0xa4] sm:$0x1]  ;;  %v8884_v28 = vrot.slane %v11135_v38, 9  ;;  %v10121_v23 = vld [vmem:[#allocation2 + $0xa8] sm:$0xff]  }
  0xda   :  { %4813 = vmatmul.mubr.bf16.gmra.mrb[40].mxu0 %v11105_v49  ;;  %v11157_v52 = vld [vmem:[#allocation2 + $0xac] sm:$0xf]  ;;  %1134 = vst [vmem:[#allocation2 + $0xfc] sm:$0xf] %v1133_v43  ;;  %v3131_v51 = vrot.slane %v3129_v58, 4  ;;  %v848_v61 = vrot.slane %v11115_v45, 4  ;;  %v855_v9 = vor.u32 %v853_v63, %v852_v50  ;;  %v11165_v19 = vcombine.low %v3123_v8, %v3126_v12 }
  0xdb   :  { %4820 = vmatprep.mubr.bf16.mxu0 %v10118_v53  ;;  %v756_v53 = vld [vmem:[#allocation2 + $0x104] sm:$0x1]  ;;  %v863_v15 = vor.u32 %v861_v47, %v11145_v4  ;;  %v669_v14 = vld [vmem:[#allocation9 + $0xa0] sm:$0xf]  ;;  %v3136_v25 = vrot.slane %v11157_v52, 5  ;;  %v3132_v27 = vrot.slane %v2870_v6, 5 }
  0xdc   :  { %v757_v1 = vsel %vm10644_vm7, 0, %v756_v53  ;;  %v1129_v36 = vld [vmem:[#allocation2 + $0xf8] sm:$0x1]  ;;  %13648 = vst [vmem:[#allocation35_spill] sm:$0xff] %v11165_v19  ;;  %v670_v26 = vld [vmem:[#allocation9 + $0xa4] sm:$0xf]  ;;  %v3130_v53 = vsel %vm10748_vm11, %v8884_v28, %v3129_v58 }
  0xdd   :  { %758 = vst [vmem:[#allocation2 + $0x104] sm:$0x1] %v757_v1  ;;  %v1130_v60 = vsel %vm10627_vm2, %v831_v48, %v1129_v36  ;;  %v864_v56 = vsel %vm10638_vm5, %v856_v44, %v863_v15  ;;  %v2871_v29 = vld [vmem:[#allocation2 + $0xa8] sm:$0xe]  ;;  %v11168_v45 = vld [vmem:[#allocation2 + $0xd8] sm:$0xe]  ;;  %v3133_v50 = vsel %vm10748_vm11, %v3131_v51, %v3132_v27 }
  0xde   :  { %1131 = vst [vmem:[#allocation2 + $0xf8] sm:$0x1] %v1130_v60  ;;  %1142 = vst [vmem:[#allocation2 + $0x10c] sm:$0xf] %v864_v56  ;;  %v714_v32 = vld [vmem:[#allocation2 + $0x114] sm:$0x1]  ;;  %v11192_v28 = vcombine.low %v3130_v53, %v3133_v50 }
  0xdf   :  { %v1139_v16 = vld [vmem:[#allocation2 + $0x108] sm:$0xf]  ;;  %v867_v59 = vshrl.u32 %v669_v14, 16  ;;  %v11170_v13 = vld [vmem:[#allocation2 + $0xb8] sm:$0xf]  ;;  %v715_v38 = vsel %vm10627_vm2, 0, %v714_v32 }
  0xe0   :  { %v1140_v22 = vsel %vm10656_vm8, %v855_v9, %v1139_v16  ;;  %v875_v30 = vshrl.u32 %v670_v26, 16  ;;  %716 = vst [vmem:[#allocation2 + $0x114] sm:$0x1] %v715_v38  ;;  %v870_v42 = vshll.u32 %v669_v14, 16  ;;  %v878_v55 = vshll.u32 %v670_v26, 16  ;;  %v10123_v8 = vld [vmem:[#allocation2 + $0xb4] sm:$0xff]  }
  0xe1   :  { %1141 = vst [vmem:[#allocation2 + $0x108] sm:$0xf] %v1140_v22  ;;  %v869_v41 = vrot.slane %v867_v59, 7  ;;  %v759_v11 = vld [vmem:[#allocation2 + $0x110] sm:$0x1]  ;;  %v3138_v46 = vrot.slane %v3136_v25, 4 }
  0xe2   :  { %4821 = vmatmul.mubr.bf16.gmra.mrb[44].mxu0 %v11133_v33  ;;  %v2873_v37 = vld [vmem:[#allocation2 + $0xb0] sm:$0x1]  ;;  %v11179_v47 = vrot.slane %v875_v30, 7  ;;  %v2874_v63 = vld [vmem:[#allocation2 + $0xb4] sm:$0xe]  ;;  %v760_v48 = vsel %vm10644_vm7, 0, %v759_v11 }
  0xe3   :  { %4828 = vmatprep.mubr.bf16.mxu0 %v10119_v34  ;;  %v873_v1 = vrot.slane %v869_v41, 4  ;;  %v8885_v3 = vrot.slane %v2871_v29, 9  ;;  %v8887_v43 = vrot.slane %v11168_v45, 9  ;;  %761 = vst [vmem:[#allocation2 + $0x110] sm:$0x1] %v760_v48  ;;  %v3139_v12 = vrot.slane %v2873_v37, 5 }
  0xe4   :  { %v1136_v34 = vld [vmem:[#allocation2 + $0x104] sm:$0x1]  ;;  %v880_v44 = vor.u32 %v878_v55, %v11179_v47  ;;  %v3143_v6 = vrot.slane %v11170_v13, 5  ;;  %v11190_v52 = vld [vmem:[#allocation2 + $0xdc] sm:$0xf]  ;;  %v872_v58 = vor.u32 %v870_v42, %v869_v41  ;;  %13649 = vst [vmem:[#allocation36_spill] sm:$0xff] %v11192_v28 }
  0xe5   :  { %v1137_v7 = vsel %vm10627_vm2, %v848_v61, %v1136_v34  ;;  %v11194_v15 = vld [vmem:[#allocation2 + $0xe8] sm:$0xf]  ;;  %v8886_v61 = vrot.slane %v2874_v63, 9  ;;  %v11198_v36 = vld [vmem:[#allocation2 + $0xe0] sm:$0x1]  ;;  %v865_v9 = vrot.slane %v11145_v4, 4  ;;  %v3140_v4 = vsel %vm10748_vm11, %v3138_v46, %v3139_v12 }
  0xe6   :  { %1138 = vst [vmem:[#allocation2 + $0x104] sm:$0x1] %v1137_v7  ;;  %v881_v51 = vsel %vm10638_vm5, %v873_v1, %v880_v44  ;;  %v671_v60 = vld [vmem:[#allocation9 + $0xa8] sm:$0xf]  ;;  %v672_v14 = vld [vmem:[#allocation9 + $0xac] sm:$0xf] }
  0xe7   :  { %1149 = vst [vmem:[#allocation2 + $0x118] sm:$0xf] %v881_v51  ;;  %v1146_v56 = vld [vmem:[#allocation2 + $0x114] sm:$0xf]  ;;  %v2876_v26 = vld [vmem:[#allocation2 + $0xbc] sm:$0x1]  ;;  %v3144_v44 = vsel %vm10748_vm11, %v8886_v61, %v3143_v6 }
  0xe8   :  { %v3145_v27 = vrot.slane %v3143_v6, 4  ;;  %v3150_v29 = vrot.slane %v11190_v52, 5  ;;  %v1147_v16 = vsel %vm10656_vm8, %v872_v58, %v1146_v56  ;;  %v717_v32 = vld [vmem:[#allocation2 + $0x120] sm:$0x1]  ;;  %v3157_v59 = vrot.slane %v11194_v15, 5 }
  0xe9   :  { %1148 = vst [vmem:[#allocation2 + $0x114] sm:$0xf] %v1147_v16  ;;  %v718_v13 = vsel %vm10627_vm2, 0, %v717_v32  ;;  %v762_v22 = vld [vmem:[#allocation2 + $0x11c] sm:$0x1]  ;;  %v887_v30 = vshll.u32 %v671_v60, 16 }
  0xea   :  { %4829 = vmatmul.mubr.bf16.gmra.mrb[48].mxu0 %v11165_v19  ;;  %v11212_v34 = vld [vmem:[#allocation2 + $0xe4] sm:$0xe]  ;;  %v1143_v38 = vld [vmem:[#allocation2 + $0x110] sm:$0x1]  ;;  %719 = vst [vmem:[#allocation2 + $0x120] sm:$0x1] %v718_v13 }
  0xeb   :  { %4836 = vmatprep.mubr.bf16.mxu0 %v10121_v23  ;;  %v3137_v23 = vsel %vm10748_vm11, %v8885_v3, %v3136_v25  ;;  %v884_v25 = vshrl.u32 %v671_v60, 16  ;;  %v892_v7 = vshrl.u32 %v672_v14, 16  ;;  %v895_v41 = vshll.u32 %v672_v14, 16  ;;  %v11227_v1 = vld [vmem:[#allocation2 + $0xf4] sm:$0xf]  ;;  %v10126_v3 = vld [vmem:[#allocation2 + $0xc0] sm:$0xff]  }
  0xec   :  { %v763_v42 = vsel %vm10644_vm7, 0, %v762_v22  ;;  %v3153_v55 = vrot.slane %v11198_v36, 5  ;;  %v1144_v11 = vsel %vm10627_vm2, %v865_v9, %v1143_v38  ;;  %v3146_v46 = vrot.slane %v2876_v26, 5  ;;  %v673_v51 = vld [vmem:[#allocation9 + $0xb0] sm:$0xf] }
  0xed   :  { %v886_v37 = vrot.slane %v884_v25, 7  ;;  %764 = vst [vmem:[#allocation2 + $0x11c] sm:$0x1] %v763_v42  ;;  %1145 = vst [vmem:[#allocation2 + $0x110] sm:$0x1] %v1144_v11  ;;  %v11219_v53 = vrot.slane %v892_v7, 7  ;;  %v11221_v50 = vcombine.low %v3137_v23, %v3140_v4 }
  0xee   :  { %v11225_v63 = vrot.slane %v3150_v29, 4  ;;  %v674_v9 = vld [vmem:[#allocation9 + $0xb4] sm:$0xf]  ;;  %v8888_v60 = vrot.slane %v11212_v34, 9  ;;  %v882_v56 = vrot.slane %v11179_v47, 4  ;;  %v901_v23 = vshrl.u32 %v673_v51, 16 }
  0xef   :  { %13650 = vst [vmem:[#allocation37_spill] sm:$0xff] %v11221_v50  ;;  %v890_v48 = vrot.slane %v886_v37, 4  ;;  %v889_v12 = vor.u32 %v887_v30, %v886_v37  ;;  %v897_v58 = vor.u32 %v895_v41, %v11219_v53  ;;  %v720_v14 = vld [vmem:[#allocation2 + $0x12c] sm:$0x1]  ;;  %v909_v26 = vshrl.u32 %v674_v9, 16 }
  0xf0   :  { %v3147_v16 = vsel %vm10748_vm11, %v3145_v27, %v3146_v46  ;;  %v13552_v6 = vrot.slane %v11227_v1, 5  ;;  %v11241_v61 = vld [vmem:[#allocation2 + $0x100] sm:$0xf]  ;;  %v912_v4 = vshll.u32 %v674_v9, 16  ;;  %v721_v47 = vsel %vm10627_vm2, 0, %v720_v14  ;;  %v10130_v14 = vld [vmem:[#allocation2 + $0xe4] sm:$0xff]  }
  0xf1   :  { %v898_v32 = vsel %vm10638_vm5, %v890_v48, %v897_v58  ;;  %v1153_v13 = vld [vmem:[#allocation2 + $0x120] sm:$0xf]  ;;  %v903_v25 = vrot.slane %v901_v23, 7  ;;  %v904_v22 = vshll.u32 %v673_v51, 16  ;;  %v11248_v38 = vrot.slane %v909_v26, 7 }
  0xf2   :  { %4837 = vmatmul.mubr.bf16.gmra.mrb[52].mxu0 %v11192_v28  ;;  %1156 = vst [vmem:[#allocation2 + $0x124] sm:$0xf] %v898_v32  ;;  %v1154_v27 = vsel %vm10656_vm8, %v889_v12, %v1153_v13  ;;  %722 = vst [vmem:[#allocation2 + $0x12c] sm:$0x1] %v721_v47  ;;  %v1614_v7 = vld [vmem:[#allocation2] sm:$0xf]  ;;  %v11257_v58 = vcombine.low %v3144_v44, %v3147_v16 }
  0xf3   :  { %4844 = vmatprep.mubr.bf16.mxu0 %v10123_v8  ;;  %v11233_v8 = vrot.slane %v3157_v59, 4  ;;  %v1615_v41 = vld [vmem:[#allocation2 + $0x4] sm:$0xf]  ;;  %v11252_v42 = vld [vmem:[#allocation2 + $0xf0] sm:$0xe]  ;;  %v13550_v11 = vrot.slane %v11241_v61, 5  ;;  %v914_v9 = vor.u32 %v912_v4, %v11248_v38 }
  0xf4   :  { %v1150_v30 = vld [vmem:[#allocation2 + $0x11c] sm:$0x1]  ;;  %1155 = vst [vmem:[#allocation2 + $0x120] sm:$0xf] %v1154_v27  ;;  %v907_v46 = vrot.slane %v903_v25, 4  ;;  %13651 = vst [vmem:[#allocation38_spill] sm:$0xff] %v11257_v58 }
  0xf5   :  { %v1151_v37 = vsel %vm10627_vm2, %v882_v56, %v1150_v30  ;;  %v1616_v48 = vld [vmem:[#allocation2 + $0x8] sm:$0x1]  ;;  %v11267_v12 = vld [vmem:[#allocation2 + $0xec] sm:$0x1]  ;;  %vm1722_vm12 = vsmask.f32 3328 }
  0xf6   :  { %v11269_v51 = vld [vmem:[#allocation2 + $0x10c] sm:$0xf]  ;;  %1152 = vst [vmem:[#allocation2 + $0x11c] sm:$0x1] %v1151_v37  ;;  %v765_v56 = vld [vmem:[#allocation2 + $0x128] sm:$0x1] }
  0xf7   :  { %v11272_v44 = vld [vmem:[#allocation2 + $0xfc] sm:$0xe]  ;;  %vm1723_vm13 = vsmask.f32 7440  ;;  %v1726_v52 = vshrl.u32 %v1614_v7, 16  ;;  %v1729_v23 = vshll.u32 %v1614_v7, 16 }
  0xf8   :  { %v1735_v45 = vshll.u32 %v1615_v41, 16  ;;  %v11274_v26 = vld [vmem:[#allocation2 + $0xf8] sm:$0x1]  ;;  %v1739_v16 = vshrl.u32 %v1615_v41, 16  ;;  %v1745_v32 = vshll.u32 %v1616_v48, 16  ;;  %v11281_v30 = vrot.slane %v13552_v6, 4  ;;  %vm11302_vm14 = vmor %vm1722_vm12, %vm1723_vm13 }
  0xf9   :  { %v1728_v4 = vrot.slane %v1726_v52, 4  ;;  %v1731_v47 = vrot.slane %v1729_v23, 5  ;;  %v13551_v7 = vrot.slane %v11269_v51, 5  ;;  %v3160_v41 = vrot.slane %v11267_v12, 5  ;;  %v1160_v48 = vld [vmem:[#allocation2 + $0x12c] sm:$0xf] }
  0xfa   :  { %4845 = vmatmul.mubr.bf16.gmra.mrb[56].mxu0 %v11221_v50  ;;  %v1737_v27 = vrot.slane %v1735_v45, 5  ;;  %v1741_v37 = vrot.slane %v1739_v16, 4  ;;  %v11307_v23 = vld [vmem:[#allocation2 + $0x118] sm:$0xf]  ;;  %v11309_v16 = vld [vmem:[#allocation2 + $0x104] sm:$0x1] }
  0xfb   :  { %4852 = vmatprep.mubr.bf16.mxu0 %v10126_v3  ;;  %v11265_v3 = vsel %vm10748_vm11, %v8887_v43, %v3150_v29  ;;  %v906_v43 = vor.u32 %v904_v22, %v903_v25  ;;  %v915_v29 = vsel %vm10638_vm5, %v907_v46, %v914_v9  ;;  %v766_v25 = vsel %vm10644_vm7, 0, %v765_v56  ;;  %v1617_v12 = vld [vmem:[#allocation2 + $0xc] sm:$0xf]  ;;  %v11338_v0 = vld [vmem:[#allocation2 + $0x114] sm:$0xe] }
  0xfc   :  { %1163 = vst [vmem:[#allocation2 + $0x130] sm:$0xf] %v915_v29  ;;  %v3154_v22 = vsel %vm10748_vm11, %v11225_v63, %v3153_v55  ;;  %v11295_v46 = vrot.slane %v13550_v11, 4  ;;  %v1732_v9 = vor.u32 %v1731_v47, %v1728_v4  ;;  %767 = vst [vmem:[#allocation2 + $0x128] sm:$0x1] %v766_v25  ;;  %v1742_v55 = vor.u32 %v1741_v37, %v1737_v27  ;;  %v10133_v29 = vld [vmem:[#allocation2 + $0xf0] sm:$0xff]  }
  0xfd   :  { %v1161_v52 = vsel %vm10656_vm8, %v906_v43, %v1160_v48  ;;  %v1747_v63 = vrot.slane %v1745_v32, 5  ;;  %v11313_v43 = vrot.slane %v13551_v7, 4  ;;  %v899_v4 = vrot.slane %v11219_v53, 4  ;;  %v10152_v25 = vld [vmem:[#allocation2] sm:$0xff]   ;;  %v676_v37 = vld [vmem:[#allocation9 + $0xbc] sm:$0xf] }
  0xfe   :  { %1162 = vst [vmem:[#allocation2 + $0x12c] sm:$0xf] %v1161_v52  ;;  %v1733_v45 = vrot.slane %v1732_v9, 4  ;;  %v1743_v47 = vrot.slane %v1742_v55, 4  ;;  %v8919_v48 = vcombine.low %v11265_v3, %v3154_v22  ;;  %v723_v9 = vld [vmem:[#allocation2 + $0x138] sm:$0x1]  ;;  %v3158_v53 = vsel %vm10748_vm11, %v8888_v60, %v3157_v59 }
  0xff   :  { %v926_v11 = vshrl.u32 %v676_v37, 16  ;;  %v724_v3 = vsel %vm10627_vm2, 0, %v723_v9  ;;  %v1618_v7 = vld [vmem:[#allocation2 + $0x10] sm:$0xf]  ;;  %v1619_v59 = vld [vmem:[#allocation2 + $0x14] sm:$0x1] }
 0x100   :  { %v1738_v52 = vsel %vm11302_vm14, %v1733_v45, %v1737_v27  ;;  %v1748_v55 = vsel %vm11302_vm14, %v1743_v47, %v1747_v63  ;;  %v3161_v27 = vsel %vm10748_vm11, %v11233_v8, %v3160_v41  ;;  %v11332_v45 = vld [vmem:[#allocation2 + $0x108] sm:$0xe]  ;;  %725 = vst [vmem:[#allocation2 + $0x138] sm:$0x1] %v724_v3  ;;  %v768_v60 = vld [vmem:[#allocation2 + $0x134] sm:$0x1] }
 0x101   :  { %v8835_v15 = vcombine.low %v1738_v52, %v1748_v55  ;;  %v11334_v34 = vrot.slane %v926_v11, 7  ;;  %v1750_v9 = vshrl.u32 %v1617_v12, 16  ;;  %v1759_v41 = vshll.u32 %v1618_v7, 16  ;;  %v10284_v63 = vld [vmem:[#allocation12 + $0x80] sm:$0xff]   ;;  %v7143_v36 = vld [vmem:[#allocation5 + $0x4c] sm:$0x1] }
 0x102   :  { %4853 = vmatmul.mubr.bf16.gmra.mrb[60].mxu0 %v11257_v58  ;;  %v1763_v3 = vshrl.u32 %v1618_v7, 16  ;;  %v1769_v6 = vshll.u32 %v1619_v59, 16  ;;  %v13657_v59 = vrot.slane %v11227_v1, 5 }
 0x103   :  { %4860 = vmatprep.mubr.bf16.mxu0 %v10130_v14  ;;  %v675_v14 = vld [vmem:[#allocation9 + $0xb8] sm:$0xf]  ;;  %4443 = vmatprep.mubr.bf16.mxu1 %v8835_v15  ;;  %v1752_v52 = vrot.slane %v1750_v9, 4  ;;  %v769_v15 = vsel %vm10644_vm7, 0, %v768_v60  ;;  %v13658_v60 = vrot.slane %v11252_v42, 9  ;;  %v916_v9 = vrot.slane %v11248_v38, 4 }
 0x104   :  { %v918_v32 = vshrl.u32 %v675_v14, 16  ;;  %v921_v56 = vshll.u32 %v675_v14, 16  ;;  %v929_v14 = vshll.u32 %v676_v37, 16  ;;  %v1157_v47 = vld [vmem:[#allocation2 + $0x128] sm:$0x1]  ;;  %4444 = vmatmul.mubr.bf16.vlgmr.msra.gmra.mrb[0].mxu1 %v10152_v25  ;;  %v1765_v7 = vrot.slane %v1763_v3, 4 }
 0x105   :  { %v1158_v8 = vsel %vm10627_vm2, %v899_v4, %v1157_v47  ;;  %9674 = vmatpush1.bf16.msra.mxu1 %v10284_v63  ;;  %v10137_v4 = vld [vmem:[#allocation2 + $0xfc] sm:$0xff]   ;;  %770 = vst [vmem:[#allocation2 + $0x134] sm:$0x1] %v769_v15  ;;  %v3165_v63 = vsel %vm10748_vm11, %v13658_v60, %v13657_v59  ;;  %v8892_v47 = vrot.slane %v11338_v0, 9  ;;  %v726_v42 = vld [vmem:[#allocation2 + $0x144] sm:$0x1] }
 0x106   :  { %v920_v22 = vrot.slane %v918_v32, 7  ;;  %v1753_v32 = vshll.u32 %v1617_v12, 16  ;;  %v931_v11 = vor.u32 %v929_v14, %v11334_v34  ;;  %1159 = vst [vmem:[#allocation2 + $0x128] sm:$0x1] %v1158_v8  ;;  %v8891_v14 = vrot.slane %v11332_v45, 9 }
 0x107   :  { %v678_v8 = vld [vmem:[#allocation9 + $0xc4] sm:$0xf]  ;;  %v727_v3 = vsel %vm10627_vm2, 0, %v726_v42  ;;  %v1620_v15 = vld [vmem:[#allocation2 + $0x18] sm:$0xf] }
 0x108   :  { %v924_v13 = vrot.slane %v920_v22, 4  ;;  %v923_v37 = vor.u32 %v921_v56, %v920_v22  ;;  %v1755_v55 = vrot.slane %v1753_v32, 5  ;;  %v13655_v22 = vmov 0   ;;  %v677_v32 = vld [vmem:[#allocation9 + $0xc0] sm:$0xf] }
 0x109   :  { %9659 = vmatprep.subr.bf16.mxu1 %v13655_v22  ;;  %v935_v38 = vshrl.u32 %v677_v32, 16  ;;  %728 = vst [vmem:[#allocation2 + $0x144] sm:$0x1] %v727_v3  ;;  %v1621_v59 = vld [vmem:[#allocation2 + $0x1c] sm:$0xf]  ;;  %v1774_v60 = vshrl.u32 %v1620_v15, 16 }
 0x10a   :  { %4861 = vmatmul.mubr.bf16.gmra.mrb[64].mxu0 %v8919_v48  ;;  %v932_v12 = vsel %vm10638_vm5, %v924_v13, %v931_v11  ;;  %v1761_v48 = vrot.slane %v1759_v41, 5  ;;  %v1756_v56 = vor.u32 %v1755_v55, %v1752_v52  ;;  %v11353_v13 = vcombine.low %v3158_v53, %v3161_v27  ;;  %v1167_v27 = vld [vmem:[#allocation2 + $0x138] sm:$0xf]  ;;  %v771_v42 = vld [vmem:[#allocation2 + $0x140] sm:$0x1] }
 0x10b   :  { %4868 = vmatprep.mubr.bf16.mxu0 %v10133_v29  ;;  %v13654_v29 = vrot.slane %v11307_v23, 5  ;;  %1170 = vst [vmem:[#allocation2 + $0x13c] sm:$0xf] %v932_v12  ;;  %v13659_v11 = vrot.slane %v11274_v26, 5  ;;  %v1771_v52 = vrot.slane %v1769_v6, 5  ;;  %v1168_v55 = vsel %vm10656_vm8, %v923_v37, %v1167_v27 }
 0x10c   :  { %13656 = vst [vmem:[#allocation39_spill] sm:$0xff] %v11353_v13  ;;  %v1757_v41 = vrot.slane %v1756_v56, 4  ;;  %v1766_v1 = vor.u32 %v1765_v7, %v1761_v48  ;;  %v938_v12 = vshll.u32 %v677_v32, 16  ;;  %1169 = vst [vmem:[#allocation2 + $0x138] sm:$0xf] %v1168_v55  ;;  %v943_v56 = vshrl.u32 %v678_v8, 16 }
 0x10d   :  { %v11350_v25 = vrot.slane %v13654_v29, 4  ;;  %v3168_v53 = vsel %vm10748_vm11, %v11281_v30, %v13659_v11  ;;  %v10285_v29 = vld [vmem:[#allocation12 + $0x88] sm:$0xff]   ;;  %v946_v6 = vshll.u32 %v678_v8, 16  ;;  %v11376_v37 = vld [vmem:[#allocation2 + $0x110] sm:$0x1]  ;;  %v937_v7 = vrot.slane %v935_v38, 7 }
 0x10e   :  { %9675 = vmatpush1.bf16.msra.mxu1 %v10285_v29  ;;  %v1762_v26 = vsel %vm11302_vm14, %v1757_v41, %v1761_v48  ;;  %v1767_v30 = vrot.slane %v1766_v1, 4  ;;  %v13660_v32 = vrot.slane %v11241_v61, 5  ;;  %v13661_v11 = vrot.slane %v11272_v44, 9  ;;  %v1622_v41 = vld [vmem:[#allocation2 + $0x20] sm:$0x1]  ;;  %v10141_v44 = vld [vmem:[#allocation2 + $0x108] sm:$0xff]  }
 0x10f   :  { %9660 = vmatprep.subr.bf16.mxu1 %v13655_v22  ;;  %v11386_v27 = vrot.slane %v943_v56, 7  ;;  %v1777_v1 = vshll.u32 %v1620_v15, 16  ;;  %v11388_v55 = vcombine.low %v3165_v63, %v3168_v53  ;;  %v941_v38 = vrot.slane %v937_v7, 4  ;;  %v10286_v29 = vld [vmem:[#allocation12 + $0x90] sm:$0xff]  }
 0x110   :  { %v3172_v48 = vsel %vm10748_vm11, %v13661_v11, %v13660_v32  ;;  %v1772_v8 = vsel %vm11302_vm14, %v1767_v30, %v1771_v52  ;;  %v1776_v61 = vrot.slane %v1774_v60, 4  ;;  %v13663_v32 = vrot.slane %v11309_v16, 5  ;;  %v11397_v30 = vld [vmem:[#allocation2 + $0x11c] sm:$0x1]  ;;  %v11399_v15 = vld [vmem:[#allocation2 + $0x120] sm:$0xe] }
 0x111   :  { %13662 = vst [vmem:[#allocation40_spill] sm:$0xff] %v11388_v55  ;;  %v11390_v3 = vcombine.low %v1762_v26, %v1772_v8  ;;  %v11401_v63 = vld [vmem:[#allocation2 + $0x124] sm:$0xf]  ;;  %v940_v26 = vor.u32 %v938_v12, %v937_v7  ;;  %v948_v56 = vor.u32 %v946_v6, %v11386_v27  ;;  %v3181_v16 = vrot.slane %v11376_v37, 5  ;;  %v679_v8 = vld [vmem:[#allocation9 + $0xc8] sm:$0xf] }
 0x112   :  { %4869 = vmatmul.mubr.bf16.gmra.mrb[68].mxu0 %v11353_v13  ;;  %9676 = vmatpush1.bf16.msra.mxu1 %v10286_v29  ;;  %v3175_v52 = vsel %vm10748_vm11, %v11295_v46, %v13663_v32  ;;  %v1779_v46 = vrot.slane %v1777_v1, 5  ;;  %v1783_v60 = vshll.u32 %v1621_v59, 16  ;;  %v1787_v11 = vshrl.u32 %v1621_v59, 16  ;;  %v10287_v12 = vld [vmem:[#allocation2 + $0xc] sm:$0xff]   ;;  %v680_v1 = vld [vmem:[#allocation9 + $0xcc] sm:$0xf] }
 0x113   :  { %4876 = vmatprep.mubr.bf16.mxu0 %v10137_v4  ;;  %v1164_v4 = vld [vmem:[#allocation2 + $0x134] sm:$0x1]  ;;  %9661 = vmatprep.subr.bf16.mxu1 %v13655_v22  ;;  %v13664_v29 = vrot.slane %v11269_v51, 5  ;;  %v949_v6 = vsel %vm10638_vm5, %v941_v38, %v948_v56  ;;  %v1793_v37 = vshll.u32 %v1622_v41, 16  ;;  %v772_v7 = vsel %vm10644_vm7, 0, %v771_v42 }
 0x114   :  { %v1165_v53 = vsel %vm10627_vm2, %v916_v9, %v1164_v4  ;;  %4451 = vmatprep.mubr.bf16.mxu1 %v11390_v3  ;;  %v729_v59 = vld [vmem:[#allocation2 + $0x150] sm:$0x1]  ;;  %v11421_v4 = vcombine.low %v3172_v48, %v3175_v52  ;;  %v1174_v45 = vld [vmem:[#allocation2 + $0x144] sm:$0xf]  ;;  %1177 = vst [vmem:[#allocation2 + $0x148] sm:$0xf] %v949_v6  ;;  %v1780_v32 = vor.u32 %v1779_v46, %v1776_v61 }
 0x115   :  { %1166 = vst [vmem:[#allocation2 + $0x134] sm:$0x1] %v1165_v53  ;;  %v11415_v9 = vsel %vm10748_vm11, %v8891_v14, %v13664_v29  ;;  %4452 = vmatmul.mubr.bf16.gmra.mrb[4].mxu1 %v10287_v12  ;;  %v1785_v14 = vrot.slane %v1783_v60, 5  ;;  %773 = vst [vmem:[#allocation2 + $0x140] sm:$0x1] %v772_v7  ;;  %v10288_v53 = vld [vmem:[#allocation12 + $0x98] sm:$0xff]   ;;  %v1175_v42 = vsel %vm10656_vm8, %v940_v26, %v1174_v45 }
 0x116   :  { %13665 = vst [vmem:[#allocation41_spill] sm:$0xff] %v11421_v4  ;;  %9677 = vmatpush1.bf16.msra.mxu1 %v10288_v53  ;;  %v1789_v38 = vrot.slane %v1787_v11, 4  ;;  %1176 = vst [vmem:[#allocation2 + $0x144] sm:$0xf] %v1175_v42  ;;  %v1781_v48 = vrot.slane %v1780_v32, 4  ;;  %v1795_v52 = vrot.slane %v1793_v37, 5 }
 0x117   :  { %9662 = vmatprep.subr.bf16.mxu1 %v13655_v22  ;;  %v730_v61 = vsel %vm10627_vm2, 0, %v729_v59  ;;  %v952_v56 = vshrl.u32 %v679_v8, 16  ;;  %v1623_v46 = vld [vmem:[#allocation2 + $0x24] sm:$0xf]  ;;  %v955_v12 = vshll.u32 %v679_v8, 16  ;;  %v960_v6 = vshrl.u32 %v680_v1, 16 }
 0x118   :  { %v1790_v60 = vor.u32 %v1789_v38, %v1785_v14  ;;  %731 = vst [vmem:[#allocation2 + $0x150] sm:$0x1] %v730_v61  ;;  %v963_v7 = vshll.u32 %v680_v1, 16  ;;  %v1624_v26 = vld [vmem:[#allocation2 + $0x28] sm:$0xf]  ;;  %v933_v11 = vrot.slane %v11334_v34, 4  ;;  %v1786_v32 = vsel %vm11302_vm14, %v1781_v48, %v1785_v14 }
 0x119   :  { %v11433_v45 = vld [vmem:[#allocation2 + $0x12c] sm:$0xe]  ;;  %v954_v37 = vrot.slane %v952_v56, 7  ;;  %v1798_v53 = vshrl.u32 %v1623_v46, 16  ;;  %v10289_v42 = vld [vmem:[#allocation12 + $0xa0] sm:$0xff]   ;;  %v11439_v38 = vrot.slane %v960_v6, 7  ;;  %v3182_v34 = vsel %vm10748_vm11, %v11313_v43, %v3181_v16 }
 0x11a   :  { %4877 = vmatmul.mubr.bf16.gmra.mrb[72].mxu0 %v11388_v55  ;;  %9678 = vmatpush1.bf16.msra.mxu1 %v10289_v42  ;;  %v11437_v59 = vld [vmem:[#allocation2 + $0x130] sm:$0xf]  ;;  %v1625_v8 = vld [vmem:[#allocation2 + $0x2c] sm:$0x1]  ;;  %v1801_v61 = vshll.u32 %v1623_v46, 16  ;;  %v1807_v1 = vshll.u32 %v1624_v26, 16 }
 0x11b   :  { %4884 = vmatprep.mubr.bf16.mxu0 %v10141_v44  ;;  %v1791_v44 = vrot.slane %v1790_v60, 4  ;;  %9663 = vmatprep.subr.bf16.mxu1 %v13655_v22  ;;  %v13666_v14 = vrot.slane %v11307_v23, 5  ;;  %v958_v56 = vrot.slane %v954_v37, 4  ;;  %v1800_v60 = vrot.slane %v1798_v53, 4  ;;  %v774_v6 = vld [vmem:[#allocation2 + $0x14c] sm:$0x1] }
 0x11c   :  { %v10144_v42 = vld [vmem:[#allocation2 + $0x114] sm:$0xff]   ;;  %v1171_v41 = vld [vmem:[#allocation2 + $0x140] sm:$0x1]  ;;  %v957_v29 = vor.u32 %v955_v12, %v954_v37  ;;  %v965_v51 = vor.u32 %v963_v7, %v11439_v38  ;;  %v1803_v43 = vrot.slane %v1801_v61, 5  ;;  %v13667_v23 = vrot.slane %v11401_v63, 5 }
 0x11d   :  { %v11451_v48 = vsel %vm10748_vm11, %v8892_v47, %v13666_v14  ;;  %v1796_v46 = vsel %vm11302_vm14, %v1791_v44, %v1795_v52  ;;  %v1172_v53 = vsel %vm10627_vm2, %v933_v11, %v1171_v41  ;;  %v10290_v14 = vld [vmem:[#allocation12 + $0xa8] sm:$0xff]   ;;  %v11467_v7 = vrot.slane %v1807_v1, 5  ;;  %v10293_v44 = vld [vmem:[#allocation12 + $0xb8] sm:$0xff]   ;;  %v1639_v55 = vld [vmem:[#allocation2 + $0x64] sm:$0xf] }
 0x11e   :  { %v11458_v16 = vrot.slane %v13667_v23, 4  ;;  %v11461_v47 = vcombine.low %v1786_v32, %v1796_v46  ;;  %9679 = vmatpush1.bf16.msra.mxu1 %v10290_v14  ;;  %1173 = vst [vmem:[#allocation2 + $0x140] sm:$0x1] %v1172_v53  ;;  %v966_v52 = vsel %vm10638_vm5, %v958_v56, %v965_v51  ;;  %v1804_v12 = vor.u32 %v1803_v43, %v1800_v60  ;;  %v681_v46 = vld [vmem:[#allocation9 + $0xd0] sm:$0xf] }
 0x11f   :  { %v1811_v37 = vshrl.u32 %v1624_v26, 16  ;;  %9664 = vmatprep.subr.bf16.mxu1 %v13655_v22  ;;  %v3199_v32 = vrot.slane %v11437_v59, 5  ;;  %v1181_v41 = vld [vmem:[#allocation2 + $0x150] sm:$0xf]  ;;  %1184 = vst [vmem:[#allocation2 + $0x154] sm:$0xf] %v966_v52  ;;  %v11477_v61 = vcombine.low %v11415_v9, %v3182_v34 }
 0x120   :  { %13668 = vst [vmem:[#allocation42_spill] sm:$0xff] %v11461_v47  ;;  %4459 = vmatprep.mubr.bf16.mxu1 %v11461_v47  ;;  %v1817_v11 = vshll.u32 %v1625_v8, 16  ;;  %v775_v51 = vsel %vm10644_vm7, 0, %v774_v6  ;;  %v10291_v26 = vld [vmem:[#allocation2 + $0x18] sm:$0xff]   ;;  %v1182_v1 = vsel %vm10656_vm8, %v957_v29, %v1181_v41  ;;  %v1805_v56 = vrot.slane %v1804_v12, 4  ;;  %v10292_v52 = vld [vmem:[#allocation12 + $0xb0] sm:$0xff]  }
 0x121   :  { %13669 = vst [vmem:[#allocation43_spill] sm:$0xff] %v11477_v61  ;;  %4460 = vmatmul.mubr.bf16.gmra.mrb[8].mxu1 %v10291_v26  ;;  %v1813_v60 = vrot.slane %v1811_v37, 4  ;;  %776 = vst [vmem:[#allocation2 + $0x14c] sm:$0x1] %v775_v51  ;;  %v682_v43 = vld [vmem:[#allocation9 + $0xd4] sm:$0xf] }
 0x122   :  { %4885 = vmatmul.mubr.bf16.gmra.mrb[76].mxu0 %v11421_v4  ;;  %v13670_v23 = vrot.slane %v11397_v30, 5  ;;  %v13671_v6 = vrot.slane %v11401_v63, 5  ;;  %v13672_v9 = vrot.slane %v11399_v15, 9  ;;  %v11494_v29 = vld [vmem:[#allocation2 + $0x13c] sm:$0xf]  ;;  %v969_v14 = vshrl.u32 %v681_v46, 16  ;;  %9680 = vmatpush1.bf16.msra.mxu1 %v10292_v52 }
 0x123   :  { %4892 = vmatprep.mubr.bf16.mxu0 %v10144_v42  ;;  %1183 = vst [vmem:[#allocation2 + $0x150] sm:$0xf] %v1182_v1  ;;  %v1819_v42 = vrot.slane %v1817_v11, 5  ;;  %v732_v53 = vld [vmem:[#allocation2 + $0x15c] sm:$0x1]  ;;  %v1814_v30 = vor.u32 %v1813_v60, %v11467_v7  ;;  %v972_v63 = vshll.u32 %v681_v46, 16  ;;  %9665 = vmatprep.subr.bf16.mxu1 %v13655_v22 }
 0x124   :  { %v3189_v8 = vsel %vm10748_vm11, %v11350_v25, %v13670_v23  ;;  %v11492_v34 = vsel %vm10748_vm11, %v13672_v9, %v13671_v6  ;;  %v1810_v25 = vsel %vm11302_vm14, %v1805_v56, %v11467_v7  ;;  %v733_v15 = vsel %vm10627_vm2, 0, %v732_v53  ;;  %v1626_v12 = vld [vmem:[#allocation2 + $0x30] sm:$0xf]  ;;  %v1627_v37 = vld [vmem:[#allocation2 + $0x34] sm:$0xf]  ;;  %v10148_v41 = vld [vmem:[#allocation2 + $0x120] sm:$0xff]  }
 0x125   :  { %734 = vst [vmem:[#allocation2 + $0x15c] sm:$0x1] %v733_v15  ;;  %v971_v11 = vrot.slane %v969_v14, 7  ;;  %v977_v51 = vshrl.u32 %v682_v43, 16  ;;  %v980_v26 = vshll.u32 %v682_v43, 16  ;;  %v1822_v1 = vshrl.u32 %v1626_v12, 16 }
 0x126   :  { %v11503_v23 = vld [vmem:[#allocation2 + $0x128] sm:$0x1]  ;;  %v1815_v6 = vrot.slane %v1814_v30, 4  ;;  %v1825_v56 = vshll.u32 %v1626_v12, 16  ;;  %v1831_v9 = vshll.u32 %v1627_v37, 16  ;;  %v1835_v7 = vshrl.u32 %v1627_v37, 16  ;;  %9681 = vmatpush1.bf16.msra.mxu1 %v10293_v44 }
 0x127   :  { %v975_v53 = vrot.slane %v971_v11, 4  ;;  %v11506_v46 = vrot.slane %v977_v51, 7  ;;  %v1628_v52 = vld [vmem:[#allocation2 + $0x38] sm:$0x1]  ;;  %v1824_v0 = vrot.slane %v1822_v1, 4  ;;  %v11509_v14 = vcombine.low %v11451_v48, %v3189_v8  ;;  %9666 = vmatprep.subr.bf16.mxu1 %v13655_v22  ;;  %v10297_v4 = vld [vmem:[#allocation12 + $0xd0] sm:$0xff]  }
 0x128   :  { %v1820_v43 = vsel %vm11302_vm14, %v1815_v6, %v1819_v42  ;;  %v1827_v15 = vrot.slane %v1825_v56, 5  ;;  %v1833_v30 = vrot.slane %v1831_v9, 5  ;;  %v777_v12 = vld [vmem:[#allocation2 + $0x158] sm:$0x1]  ;;  %v11515_v37 = vld [vmem:[#allocation2 + $0x138] sm:$0xe]  ;;  %v974_v60 = vor.u32 %v972_v63, %v971_v11 }
 0x129   :  { %13673 = vst [vmem:[#allocation44_spill] sm:$0xff] %v11509_v14  ;;  %v11517_v51 = vcombine.low %v1810_v25, %v1820_v43  ;;  %v1178_v1 = vld [vmem:[#allocation2 + $0x14c] sm:$0x1]  ;;  %v982_v44 = vor.u32 %v980_v26, %v11506_v46  ;;  %v1837_v48 = vrot.slane %v1835_v7, 4  ;;  %v11522_v8 = vrot.slane %v3199_v32, 4 }
 0x12a   :  { %4893 = vmatmul.mubr.bf16.gmra.mrb[80].mxu0 %v11477_v61  ;;  %v13675_v42 = vrot.slane %v11386_v27, 4  ;;  %v1828_v56 = vor.u32 %v1827_v15, %v1824_v0  ;;  %v1841_v9 = vshll.u32 %v1628_v52, 16  ;;  %v3195_v25 = vrot.slane %v11503_v23, 5  ;;  %v1629_v26 = vld [vmem:[#allocation2 + $0x3c] sm:$0xf]  ;;  %v10294_v27 = vld [vmem:[#allocation12 + $0xc0] sm:$0xff]  }
 0x12b   :  { %13674 = vst [vmem:[#allocation45_spill] sm:$0xff] %v11517_v51  ;;  %4900 = vmatprep.mubr.bf16.mxu0 %v10148_v41  ;;  %4467 = vmatprep.mubr.bf16.mxu1 %v11517_v51  ;;  %v983_v63 = vsel %vm10638_vm5, %v975_v53, %v982_v44  ;;  %v1838_v41 = vor.u32 %v1837_v48, %v1833_v30  ;;  %v778_v11 = vsel %vm10644_vm7, 0, %v777_v12  ;;  %v1630_v7 = vld [vmem:[#allocation2 + $0x40] sm:$0xf]  ;;  %v13676_v0 = vrot.slane %v11494_v29, 5  ;;  %v10295_v23 = vld [vmem:[#allocation2 + $0x24] sm:$0xff]  }
 0x12c   :  { %v1179_v6 = vsel %vm10627_vm2, %v13675_v42, %v1178_v1  ;;  %9682 = vmatpush1.bf16.msra.mxu1 %v10294_v27  ;;  %v1188_v15 = vld [vmem:[#allocation2 + $0x15c] sm:$0xf]  ;;  %1191 = vst [vmem:[#allocation2 + $0x160] sm:$0xf] %v983_v63  ;;  %v1829_v1 = vrot.slane %v1828_v56, 4  ;;  %v1843_v53 = vrot.slane %v1841_v9, 5 }
 0x12d   :  { %1180 = vst [vmem:[#allocation2 + $0x14c] sm:$0x1] %v1179_v6  ;;  %v11537_v52 = vrot.slane %v13676_v0, 4  ;;  %4468 = vmatmul.mubr.bf16.gmra.mrb[12].mxu1 %v10295_v23  ;;  %779 = vst [vmem:[#allocation2 + $0x158] sm:$0x1] %v778_v11  ;;  %9667 = vmatprep.subr.bf16.mxu1 %v13655_v22  ;;  %v10151_v12 = vld [vmem:[#allocation2 + $0x12c] sm:$0xff]   ;;  %v1189_v48 = vsel %vm10656_vm8, %v974_v60, %v1188_v15 }
 0x12e   :  { %v2906_v44 = vld [vmem:[#allocation2 + $0x134] sm:$0x1]  ;;  %v1839_v42 = vrot.slane %v1838_v41, 4  ;;  %v1631_v6 = vld [vmem:[#allocation2 + $0x44] sm:$0x1]  ;;  %v1846_v27 = vshrl.u32 %v1629_v26, 16  ;;  %v1834_v63 = vsel %vm11302_vm14, %v1829_v1, %v1833_v30 }
 0x12f   :  { %v1849_v43 = vshll.u32 %v1629_v26, 16  ;;  %v13677_v0 = vrot.slane %v11433_v45, 9  ;;  %v967_v9 = vrot.slane %v11439_v38, 4  ;;  %1190 = vst [vmem:[#allocation2 + $0x15c] sm:$0xf] %v1189_v48  ;;  %v1855_v11 = vshll.u32 %v1630_v7, 16 }
 0x130   :  { %v1844_v60 = vsel %vm11302_vm14, %v1839_v42, %v1843_v53  ;;  %v1848_v41 = vrot.slane %v1846_v27, 4  ;;  %v1859_v23 = vshrl.u32 %v1630_v7, 16  ;;  %v1632_v59 = vld [vmem:[#allocation2 + $0x48] sm:$0xf]  ;;  %v10296_v15 = vld [vmem:[#allocation12 + $0xc8] sm:$0xff]   ;;  %v3196_v45 = vsel %vm10748_vm11, %v11458_v16, %v3195_v25 }
 0x131   :  { %v11548_v56 = vsel %vm10748_vm11, %v13677_v0, %v3199_v32  ;;  %v1851_v26 = vrot.slane %v1849_v43, 5  ;;  %9683 = vmatpush1.bf16.msra.mxu1 %v10296_v15  ;;  %v11558_v32 = vcombine.low %v1834_v63, %v1844_v60  ;;  %v1857_v38 = vrot.slane %v1855_v11, 5  ;;  %v1633_v0 = vld [vmem:[#allocation2 + $0x4c] sm:$0xf]  ;;  %v1634_v30 = vld [vmem:[#allocation2 + $0x50] sm:$0x1] }
 0x132   :  { %v1865_v48 = vshll.u32 %v1631_v6, 16  ;;  %9668 = vmatprep.subr.bf16.mxu1 %v13655_v22  ;;  %4901 = vmatmul.mubr.bf16.gmra.mrb[84].mxu0 %v11509_v14  ;;  %v11562_v1 = vld [vmem:[#allocation2 + $0x140] sm:$0x1]  ;;  %v1861_v43 = vrot.slane %v1859_v23, 4  ;;  %v1870_v53 = vshrl.u32 %v1632_v59, 16  ;;  %v1873_v42 = vshll.u32 %v1632_v59, 16 }
 0x133   :  { %13678 = vst [vmem:[#allocation46_spill] sm:$0xff] %v11558_v32  ;;  %v1852_v7 = vor.u32 %v1851_v26, %v1848_v41  ;;  %4908 = vmatprep.mubr.bf16.mxu0 %v10151_v12  ;;  %v3202_v27 = vrot.slane %v2906_v44, 5  ;;  %4475 = vmatprep.mubr.bf16.mxu1 %v11558_v32  ;;  %v1879_v16 = vshll.u32 %v1633_v0, 16  ;;  %v1883_v25 = vshrl.u32 %v1633_v0, 16  ;;  %v1635_v6 = vld [vmem:[#allocation2 + $0x54] sm:$0xf] }
 0x134   :  { %v1889_v63 = vshll.u32 %v1634_v30, 16  ;;  %v11566_v11 = vcombine.low %v11492_v34, %v3196_v45  ;;  %v1185_v60 = vld [vmem:[#allocation2 + $0x158] sm:$0x1]  ;;  %v1862_v14 = vor.u32 %v1861_v43, %v1857_v38  ;;  %v1867_v61 = vrot.slane %v1865_v48, 5  ;;  %v10298_v12 = vld [vmem:[#allocation2 + $0x30] sm:$0xff]   ;;  %v10299_v34 = vld [vmem:[#allocation12 + $0xd8] sm:$0xff]  }
 0x135   :  { %v1853_v15 = vrot.slane %v1852_v7, 4  ;;  %9684 = vmatpush1.bf16.msra.mxu1 %v10297_v4  ;;  %v1186_v41 = vsel %vm10627_vm2, %v967_v9, %v1185_v60  ;;  %v1872_v44 = vrot.slane %v1870_v53, 4  ;;  %v1875_v26 = vrot.slane %v1873_v42, 5  ;;  %v1636_v59 = vld [vmem:[#allocation2 + $0x58] sm:$0xf] }
 0x136   :  { %13679 = vst [vmem:[#allocation47_spill] sm:$0xff] %v11566_v11  ;;  %4476 = vmatmul.mubr.bf16.gmra.mrb[16].mxu1 %v10298_v12  ;;  %v1881_v23 = vrot.slane %v1879_v16, 5  ;;  %9669 = vmatprep.subr.bf16.mxu1 %v13655_v22  ;;  %v10154_v0 = vld [vmem:[#allocation2 + $0x138] sm:$0xff]   ;;  %1187 = vst [vmem:[#allocation2 + $0x158] sm:$0x1] %v1186_v41  ;;  %v1863_v48 = vrot.slane %v1862_v14, 4  ;;  %v3203_v9 = vsel %vm10748_vm11, %v11522_v8, %v3202_v27 }
 0x137   :  { %v1858_v45 = vsel %vm11302_vm14, %v1853_v15, %v1857_v38  ;;  %v1885_v4 = vrot.slane %v1883_v25, 4  ;;  %v1876_v30 = vor.u32 %v1875_v26, %v1872_v44  ;;  %v1891_v7 = vrot.slane %v1889_v63, 5  ;;  %v1637_v43 = vld [vmem:[#allocation2 + $0x5c] sm:$0x1]  ;;  %v1638_v41 = vld [vmem:[#allocation2 + $0x60] sm:$0xf] }
 0x138   :  { %v1894_v53 = vshrl.u32 %v1635_v6, 16  ;;  %v1868_v42 = vsel %vm11302_vm14, %v1863_v48, %v1867_v61  ;;  %v1897_v60 = vshll.u32 %v1635_v6, 16  ;;  %v1903_v12 = vshll.u32 %v1636_v59, 16 }
 0x139   :  { %v1886_v16 = vor.u32 %v1885_v4, %v1881_v23  ;;  %9685 = vmatpush1.bf16.msra.mxu1 %v10299_v34  ;;  %v11579_v38 = vcombine.low %v1858_v45, %v1868_v42  ;;  %v1877_v14 = vrot.slane %v1876_v30, 4  ;;  %v1907_v15 = vshrl.u32 %v1636_v59, 16  ;;  %v1640_v4 = vld [vmem:[#allocation2 + $0x68] sm:$0x1]  ;;  %v10300_v42 = vld [vmem:[#allocation12 + $0xe0] sm:$0xff]  }
 0x13a   :  { %v1896_v25 = vrot.slane %v1894_v53, 4  ;;  %9670 = vmatprep.subr.bf16.mxu1 %v13655_v22  ;;  %4909 = vmatmul.mubr.bf16.gmra.mrb[88].mxu0 %v11566_v11  ;;  %v1899_v27 = vrot.slane %v1897_v60, 5  ;;  %v1905_v63 = vrot.slane %v1903_v12, 5  ;;  %v1913_v61 = vshll.u32 %v1637_v43, 16  ;;  %v1641_v53 = vld [vmem:[#allocation2 + $0x6c] sm:$0xf] }
 0x13b   :  { %13680 = vst [vmem:[#allocation48_spill] sm:$0xff] %v11579_v38  ;;  %v1887_v8 = vrot.slane %v1886_v16, 4  ;;  %4916 = vmatprep.mubr.bf16.mxu0 %v10154_v0  ;;  %4483 = vmatprep.mubr.bf16.mxu1 %v11579_v38  ;;  %v1882_v6 = vsel %vm11302_vm14, %v1877_v14, %v1881_v23  ;;  %v1909_v44 = vrot.slane %v1907_v15, 4  ;;  %v1918_v26 = vshrl.u32 %v1638_v41, 16  ;;  %v11588_v43 = vld [vmem:[#allocation2 + $0x148] sm:$0xf] }
 0x13c   :  { %v1921_v34 = vshll.u32 %v1638_v41, 16  ;;  %v1900_v45 = vor.u32 %v1899_v27, %v1896_v25  ;;  %v1915_v48 = vrot.slane %v1913_v61, 5  ;;  %v1927_v30 = vshll.u32 %v1639_v55, 16  ;;  %v10301_v0 = vld [vmem:[#allocation2 + $0x3c] sm:$0xff]   ;;  %v10156_v15 = vld [vmem:[#allocation2 + $0x144] sm:$0xff]  }
 0x13d   :  { %v1892_v59 = vsel %vm11302_vm14, %v1887_v8, %v1891_v7  ;;  %9686 = vmatpush1.bf16.msra.mxu1 %v10300_v42  ;;  %v1910_v23 = vor.u32 %v1909_v44, %v1905_v63  ;;  %v1920_v60 = vrot.slane %v1918_v26, 4  ;;  %v11594_v7 = vcombine.low %v11548_v56, %v3203_v9  ;;  %v11598_v8 = vld [vmem:[#allocation2 + $0x144] sm:$0xe]  ;;  %v1642_v9 = vld [vmem:[#allocation2 + $0x70] sm:$0xf] }
 0x13e   :  { %4484 = vmatmul.mubr.bf16.gmra.mrb[20].mxu1 %v10301_v0  ;;  %v11590_v16 = vcombine.low %v1882_v6, %v1892_v59  ;;  %v1923_v12 = vrot.slane %v1921_v34, 5  ;;  %9671 = vmatprep.subr.bf16.mxu1 %v13655_v22  ;;  %v1901_v41 = vrot.slane %v1900_v45, 4  ;;  %v11596_v14 = vrot.slane %v1927_v30, 5  ;;  %v10302_v45 = vld [vmem:[#allocation12 + $0xe8] sm:$0xff]   ;;  %v2912_v0 = vld [vmem:[#allocation2 + $0x14c] sm:$0x1] }
 0x13f   :  { %13682 = vst [vmem:[#allocation50_spill] sm:$0xff] %v11594_v7  ;;  %v1931_v25 = vshrl.u32 %v1639_v55, 16  ;;  %v1911_v27 = vrot.slane %v1910_v23, 4  ;;  %v1937_v6 = vshll.u32 %v1640_v4, 16  ;;  %v1942_v44 = vshrl.u32 %v1641_v53, 16 }
 0x140   :  { %13681 = vst [vmem:[#allocation49_spill] sm:$0xff] %v11590_v16  ;;  %4491 = vmatprep.mubr.bf16.mxu1 %v11590_v16  ;;  %v1924_v61 = vor.u32 %v1923_v12, %v1920_v60  ;;  %v3213_v26 = vrot.slane %v11588_v43, 5  ;;  %v1906_v34 = vsel %vm11302_vm14, %v1901_v41, %v1905_v63  ;;  %v1945_v59 = vshll.u32 %v1641_v53, 16  ;;  %v1643_v23 = vld [vmem:[#allocation2 + $0x74] sm:$0x1] }
 0x141   :  { %v1933_v56 = vrot.slane %v1931_v25, 4  ;;  %9687 = vmatpush1.bf16.msra.mxu1 %v10302_v45  ;;  %v13683_v55 = vrot.slane %v11494_v29, 5  ;;  %v13684_v30 = vrot.slane %v11515_v37, 9  ;;  %v13685_v4 = vrot.slane %v11562_v1, 5  ;;  %v1644_v12 = vld [vmem:[#allocation2 + $0x78] sm:$0xf] }
 0x142   :  { %v1916_v63 = vsel %vm11302_vm14, %v1911_v27, %v1915_v48  ;;  %v1925_v53 = vrot.slane %v1924_v61, 4  ;;  %9672 = vmatprep.subr.bf16.mxu1 %v13655_v22  ;;  %4917 = vmatmul.mubr.bf16.gmra.mrb[92].mxu0 %v11594_v7  ;;  %v1944_v60 = vrot.slane %v1942_v44, 4  ;;  %v1947_v1 = vrot.slane %v1945_v59, 5 }
 0x143   :  { %v3207_v42 = vsel %vm10748_vm11, %v13684_v30, %v13683_v55  ;;  %v3210_v43 = vsel %vm10748_vm11, %v11537_v52, %v13685_v4  ;;  %v11619_v29 = vcombine.low %v1906_v34, %v1916_v63  ;;  %v1934_v37 = vor.u32 %v1933_v56, %v11596_v14  ;;  %4924 = vmatprep.mubr.bf16.mxu0 %v10156_v15  ;;  %v1645_v55 = vld [vmem:[#allocation2 + $0x7c] sm:$0xf]  ;;  %v10303_v30 = vld [vmem:[#allocation12 + $0xf0] sm:$0xff]   ;;  %v10304_v34 = vld [vmem:[#allocation2 + $0x48] sm:$0xff]  }
 0x144   :  { %v1939_v41 = vrot.slane %v1937_v6, 5  ;;  %v1951_v52 = vshll.u32 %v1642_v9, 16  ;;  %v1955_v25 = vshrl.u32 %v1642_v9, 16  ;;  %v11622_v45 = vcombine.low %v3207_v42, %v3210_v43  ;;  %v2914_v6 = vld [vmem:[#allocation2 + $0x154] sm:$0xf] }
 0x145   :  { %13686 = vst [vmem:[#allocation51_spill] sm:$0xff] %v11619_v29  ;;  %v8896_v48 = vrot.slane %v11598_v8, 9  ;;  %v3215_v27 = vrot.slane %v3213_v26, 4  ;;  %v1935_v61 = vrot.slane %v1934_v37, 4  ;;  %9688 = vmatpush1.bf16.msra.mxu1 %v10303_v30  ;;  %v1966_v44 = vshrl.u32 %v1644_v12, 16  ;;  %v10157_v43 = vld [vmem:[#allocation2 + $0x150] sm:$0xff]  }
 0x146   :  { %13687 = vst [vmem:[#allocation52_spill] sm:$0xff] %v11622_v45  ;;  %4492 = vmatmul.mubr.bf16.gmra.mrb[24].mxu1 %v10304_v34  ;;  %v1953_v4 = vrot.slane %v1951_v52, 5  ;;  %v1957_v56 = vrot.slane %v1955_v25, 4  ;;  %v1969_v59 = vshll.u32 %v1644_v12, 16  ;;  %9673 = vmatprep.subr.bf16.mxu1 %v13655_v22  ;;  %v3216_v15 = vrot.slane %v2912_v0, 5  ;;  %v10305_v30 = vld [vmem:[#allocation12 + $0xf8] sm:$0xff]  }
 0x147   :  { %4499 = vmatprep.mubr.bf16.mxu1 %v11619_v29  ;;  %v1930_v8 = vsel %vm11302_vm14, %v1925_v53, %v11596_v14  ;;  %v1948_v9 = vor.u32 %v1947_v1, %v1944_v60  ;;  %v1961_v42 = vshll.u32 %v1643_v23, 16  ;;  %v1940_v63 = vsel %vm11302_vm14, %v1935_v61, %v1939_v41  ;;  %v2913_v12 = vld [vmem:[#allocation2 + $0x150] sm:$0xe]  ;;  %v2915_v23 = vld [vmem:[#allocation2 + $0x158] sm:$0x1] }
 0x148   :  { %v1958_v37 = vor.u32 %v1957_v56, %v1953_v4  ;;  %v1975_v52 = vshll.u32 %v1645_v55, 16  ;;  %v1979_v25 = vshrl.u32 %v1645_v55, 16  ;;  %v3220_v0 = vrot.slane %v2914_v6, 5  ;;  %v1646_v41 = vld [vmem:[#allocation2 + $0x80] sm:$0x1] }
 0x149   :  { %9689 = vmatpush1.bf16.msra.mxu1 %v10305_v30  ;;  %v1968_v34 = vrot.slane %v1966_v44, 4  ;;  %v1971_v7 = vrot.slane %v1969_v59, 5  ;;  %v3214_v14 = vsel %vm10748_vm11, %v8896_v48, %v3213_v26  ;;  %v3217_v53 = vsel %vm10748_vm11, %v3215_v27, %v3216_v15  ;;  %v1647_v44 = vld [vmem:[#allocation2 + $0x84] sm:$0xf]  ;;  %v1648_v30 = vld [vmem:[#allocation2 + $0x88] sm:$0xf] }
 0x14a   :  { %4925 = vmatmul.mubr.bf16.gmra.mrb[96].mxu0 %v11622_v45  ;;  %v11637_v60 = vcombine.low %v1930_v8, %v1940_v63  ;;  %v1949_v1 = vrot.slane %v1948_v9, 4  ;;  %v1959_v61 = vrot.slane %v1958_v37, 4  ;;  %v1963_v55 = vrot.slane %v1961_v42, 5  ;;  %v10306_v48 = vld [vmem:[#allocation2 + $0x54] sm:$0xff]  }
 0x14b   :  { %4932 = vmatprep.mubr.bf16.mxu0 %v10157_v43  ;;  %v1977_v56 = vrot.slane %v1975_v52, 5  ;;  %v1981_v6 = vrot.slane %v1979_v25, 4  ;;  %v8897_v59 = vrot.slane %v2913_v12, 9  ;;  %v11639_v45 = vcombine.low %v3214_v14, %v3217_v53  ;;  %v10159_v43 = vld [vmem:[#allocation2 + $0x15c] sm:$0xff]  }
 0x14c   :  { %13688 = vst [vmem:[#allocation53_spill] sm:$0xff] %v11637_v60  ;;  %v3222_v11 = vrot.slane %v3220_v0, 4  ;;  %v3223_v26 = vrot.slane %v2915_v23, 5  ;;  %v1972_v27 = vor.u32 %v1971_v7, %v1968_v34  ;;  %v1954_v15 = vsel %vm11302_vm14, %v1949_v1, %v1953_v4  ;;  %v1649_v7 = vld [vmem:[#allocation2 + $0x8c] sm:$0x1] }
 0x14d   :  { %13689 = vst [vmem:[#allocation54_spill] sm:$0xff] %v11639_v45  ;;  %v1985_v8 = vshll.u32 %v1646_v41, 16  ;;  %v1990_v9 = vshrl.u32 %v1647_v44, 16  ;;  %v1993_v42 = vshll.u32 %v1647_v44, 16  ;;  %v1964_v63 = vsel %vm11302_vm14, %v1959_v61, %v1963_v55  ;;  %v1651_v44 = vld [vmem:[#allocation2 + $0x94] sm:$0xf] }
 0x14e   :  { %4500 = vmatmul.mubr.bf16.gmra.mrb[28].mxu1 %v10306_v48  ;;  %v1982_v37 = vor.u32 %v1981_v6, %v1977_v56  ;;  %v1999_v52 = vshll.u32 %v1648_v30, 16  ;;  %v2003_v25 = vshrl.u32 %v1648_v30, 16  ;;  %v3221_v12 = vsel %vm10748_vm11, %v8897_v59, %v3220_v0  ;;  %v1650_v6 = vld [vmem:[#allocation2 + $0x90] sm:$0xf]  ;;  %v10307_v0 = vld [vmem:[#allocation2 + $0x60] sm:$0xff]  }
 0x14f   :  { %4507 = vmatprep.mubr.bf16.mxu1 %v11637_v60  ;;  %v1973_v14 = vrot.slane %v1972_v27, 4  ;;  %v3224_v4 = vsel %vm10748_vm11, %v3222_v11, %v3223_v26  ;;  %v11651_v34 = vcombine.low %v1954_v15, %v1964_v63  ;;  %v1992_v53 = vrot.slane %v1990_v9, 4 }
 0x150   :  { %v1995_v23 = vrot.slane %v1993_v42, 5  ;;  %v1983_v1 = vrot.slane %v1982_v37, 4  ;;  %v1987_v41 = vrot.slane %v1985_v8, 5  ;;  %v2001_v61 = vrot.slane %v1999_v52, 5 }
 0x151   :  { %13690 = vst [vmem:[#allocation55_spill] sm:$0xff] %v11651_v34  ;;  %v2005_v55 = vrot.slane %v2003_v25, 4  ;;  %v11653_v30 = vcombine.low %v3221_v12, %v3224_v4  ;;  %v2009_v59 = vshll.u32 %v1649_v7, 16  ;;  %v1978_v11 = vsel %vm11302_vm14, %v1973_v14, %v1977_v56  ;;  %v1654_v12 = vld [vmem:[#allocation2 + $0xa0] sm:$0xf] }
 0x152   :  { %4933 = vmatmul.mubr.bf16.gmra.mrb[100].mxu0 %v11639_v45  ;;  %v1996_v26 = vor.u32 %v1995_v23, %v1992_v53  ;;  %v2014_v48 = vshrl.u32 %v1650_v6, 16  ;;  %v2017_v27 = vshll.u32 %v1650_v6, 16  ;;  %v1988_v15 = vsel %vm11302_vm14, %v1983_v1, %v1987_v41  ;;  %v1652_v53 = vld [vmem:[#allocation2 + $0x98] sm:$0x1]  ;;  %v10308_v41 = vld [vmem:[#allocation2 + $0x6c] sm:$0xff]  }
 0x153   :  { %4940 = vmatprep.mubr.bf16.mxu0 %v10159_v43  ;;  %13691 = vst [vmem:[#allocation56_spill] sm:$0xff] %v11653_v30  ;;  %v2006_v8 = vor.u32 %v2005_v55, %v2001_v61  ;;  %v2023_v9 = vshll.u32 %v1651_v44, 16  ;;  %v2027_v42 = vshrl.u32 %v1651_v44, 16  ;;  %v1653_v43 = vld [vmem:[#allocation2 + $0x9c] sm:$0xf]  ;;  %v11661_v63 = vcombine.low %v1978_v11, %v1988_v15 }
 0x154   :  { %v2011_v37 = vrot.slane %v2009_v59, 5  ;;  %v2016_v52 = vrot.slane %v2014_v48, 4  ;;  %v2019_v25 = vrot.slane %v2017_v27, 5  ;;  %v1997_v56 = vrot.slane %v1996_v26, 4  ;;  %v1656_v15 = vld [vmem:[#allocation2 + $0xa8] sm:$0xf] }
 0x155   :  { %13692 = vst [vmem:[#allocation57_spill] sm:$0xff] %v11661_v63  ;;  %v2007_v14 = vrot.slane %v2006_v8, 4  ;;  %v2025_v7 = vrot.slane %v2023_v9, 5  ;;  %v2029_v4 = vrot.slane %v2027_v42, 4  ;;  %v2038_v23 = vshrl.u32 %v1653_v43, 16 }
 0x156   :  { %4508 = vmatmul.mubr.bf16.gmra.mrb[32].mxu1 %v10307_v0  ;;  %v2041_v1 = vshll.u32 %v1653_v43, 16  ;;  %v2047_v55 = vshll.u32 %v1654_v12, 16  ;;  %v2051_v6 = vshrl.u32 %v1654_v12, 16  ;;  %v2020_v44 = vor.u32 %v2019_v25, %v2016_v52  ;;  %v10160_v0 = vld [vmem:[#allocation12 + $0x180] sm:$0xff]   ;;  %v1655_v52 = vld [vmem:[#allocation2 + $0xa4] sm:$0x1] }
 0x157   :  { %4515 = vmatprep.mubr.bf16.mxu1 %v11651_v34  ;;  %v2002_v59 = vsel %vm11302_vm14, %v1997_v56, %v2001_v61  ;;  %v2030_v11 = vor.u32 %v2029_v4, %v2025_v7  ;;  %v2033_v26 = vshll.u32 %v1652_v53, 16  ;;  %v2040_v48 = vrot.slane %v2038_v23, 4  ;;  %v1657_v25 = vld [vmem:[#allocation2 + $0xac] sm:$0xf]  ;;  %v10161_v61 = vld [vmem:[#allocation12 + $0x188] sm:$0xff]  }
 0x158   :  { %v2043_v27 = vrot.slane %v2041_v1, 5  ;;  %v11669_v8 = vrot.slane %v2047_v55, 5  ;;  %v2053_v9 = vrot.slane %v2051_v6, 4  ;;  %v2021_v43 = vrot.slane %v2020_v44, 4  ;;  %v10309_v53 = vld [vmem:[#allocation2 + $0x78] sm:$0xff]   ;;  %v10162_v55 = vld [vmem:[#allocation12 + $0x190] sm:$0xff]  }
 0x159   :  { %v2035_v12 = vrot.slane %v2033_v26, 5  ;;  %v2062_v56 = vshrl.u32 %v1656_v15, 16  ;;  %v2057_v23 = vshll.u32 %v1655_v52, 16  ;;  %v2071_v1 = vshll.u32 %v1657_v25, 16  ;;  %v1659_v26 = vld [vmem:[#allocation2 + $0xb4] sm:$0xf] }
 0x15a   :  { %4941 = vmatmul.mubr.bf16.gmra.mrb[104].mxu0 %v11653_v30  ;;  %v2044_v4 = vor.u32 %v2043_v27, %v2040_v48  ;;  %v2026_v6 = vsel %vm11302_vm14, %v2021_v43, %v2025_v7  ;;  %v1660_v52 = vld [vmem:[#allocation2 + $0xb8] sm:$0xf]  ;;  %v1669_v43 = vld [vmem:[#allocation2 + $0xdc] sm:$0xf] }
 0x15b   :  { %5021 = vmatprep.mubr.bf16.mxu0 %v10820_v54  ;;  %v2012_v54 = vsel %vm11302_vm14, %v2007_v14, %v2011_v37  ;;  %v2031_v37 = vrot.slane %v2030_v11, 4  ;;  %v2065_v14 = vshll.u32 %v1656_v15, 16  ;;  %v1658_v11 = vld [vmem:[#allocation2 + $0xb0] sm:$0x1]  ;;  %v2059_v27 = vrot.slane %v2057_v23, 5  ;;  %v10310_v23 = vld [vmem:[#allocation2 + $0x84] sm:$0xff]  }
 0x15c   :  { %v11672_v42 = vcombine.low %v2002_v59, %v2012_v54  ;;  %v2045_v54 = vrot.slane %v2044_v4, 4  ;;  %v11683_v15 = vrot.slane %v2071_v1, 5  ;;  %v1668_v7 = vld [vmem:[#allocation2 + $0xd8] sm:$0xf]  ;;  %v2086_v4 = vshrl.u32 %v1659_v26, 16 }
 0x15d   :  { %v2036_v44 = vsel %vm11302_vm14, %v2031_v37, %v2035_v12  ;;  %v2067_v59 = vrot.slane %v2065_v14, 5  ;;  %v2081_v12 = vshll.u32 %v1658_v11, 16  ;;  %v10164_v11 = vld [vmem:[#allocation12 + $0x1a0] sm:$0xff]  }
 0x15e   :  { %4516 = vmatmul.mubr.bf16.gmra.mrb[36].mxu1 %v10308_v41  ;;  %13693 = vst [vmem:[#allocation58_spill] sm:$0xff] %v11672_v42  ;;  %v2075_v41 = vshrl.u32 %v1657_v25, 16  ;;  %v11686_v25 = vcombine.low %v2026_v6, %v2036_v44  ;;  %v2050_v14 = vsel %vm11302_vm14, %v2045_v54, %v11669_v8  ;;  %v2110_v6 = vshrl.u32 %v1668_v7, 16 }
 0x15f   :  { %4523 = vmatprep.mubr.bf16.mxu1 %v11661_v63  ;;  %v2113_v44 = vshll.u32 %v1668_v7, 16  ;;  %v497_v54 = vrot.slane %v11046_v2, 4 }
 0x160   :  { %13694 = vst [vmem:[#allocation59_spill] sm:$0xff] %v11686_v25  ;;  %v2112_v2 = vrot.slane %v2110_v6, 4 }
 0x162   :  { %5022 = vmatmul.mubr.bf16.vlgmr.msra.gmra.mrb[0].mxu0 %v11390_v3  ;;  %v2054_v3 = vor.u32 %v2053_v9, %v11669_v8  ;;  %v2077_v9 = vrot.slane %v2075_v41, 4 }
 0x163   :  { %5279 = vmatpush1.bf16.msra.mxu0 %v10160_v0  ;;  %5029 = vmatprep.mubr.bf16.mxu0 %v10856_v21  ;;  %v2064_v0 = vrot.slane %v2062_v56, 4  ;;  %v221_v56 = vld [vmem:[#allocation2 + $0xc8] sm:$0x1]  ;;  %v1662_v21 = vld [vmem:[#allocation2 + $0xc0] sm:$0xf] }
 0x164   :  { %5280 = vmatprep.subr.bf16.mxu0 %v13655_v22  ;;  %v2055_v48 = vrot.slane %v2054_v3, 4  ;;  %v2095_v3 = vshll.u32 %v1660_v52, 16  ;;  %v2078_v41 = vor.u32 %v2077_v9, %v11683_v15  ;;  %v222_v8 = vsel %vm10644_vm7, 0, %v221_v56 }
 0x165   :  { %v2068_v37 = vor.u32 %v2067_v59, %v2064_v0  ;;  %v2119_v0 = vshll.u32 %v1669_v43, 16  ;;  %v2123_v59 = vshrl.u32 %v1669_v43, 16  ;;  %223 = vst [vmem:[#allocation2 + $0xc8] sm:$0x1] %v222_v8  ;;  %v2088_v9 = vrot.slane %v2086_v4, 4 }
 0x166   :  { %4524 = vmatmul.mubr.bf16.gmra.mrb[40].mxu1 %v10309_v53  ;;  %v2089_v53 = vshll.u32 %v1659_v26, 16  ;;  %v2060_v1 = vsel %vm11302_vm14, %v2055_v48, %v2059_v27  ;;  %v2083_v48 = vrot.slane %v2081_v12, 5  ;;  %v1661_v27 = vld [vmem:[#allocation2 + $0xbc] sm:$0x1]  ;;  %v2079_v43 = vrot.slane %v2078_v41, 4 }
 0x167   :  { %4531 = vmatprep.mubr.bf16.mxu1 %v11672_v42  ;;  %5281 = vmatpush1.bf16.msra.mxu0 %v10161_v61  ;;  %v10163_v61 = vld [vmem:[#allocation12 + $0x198] sm:$0xff]   ;;  %v2069_v26 = vrot.slane %v2068_v37, 4  ;;  %v11703_v7 = vcombine.low %v2050_v14, %v2060_v1  ;;  %v11706_v56 = vrot.slane %v2119_v0, 5  ;;  %v2125_v37 = vrot.slane %v2123_v59, 4  ;;  %v1670_v12 = vld [vmem:[#allocation2 + $0xe0] sm:$0x1] }
 0x168   :  { %5282 = vmatprep.subr.bf16.mxu0 %v13655_v22  ;;  %v1671_v4 = vld [vmem:[#allocation2 + $0xe4] sm:$0xf]  ;;  %v1672_v14 = vld [vmem:[#allocation2 + $0xe8] sm:$0xf]  ;;  %v2084_v41 = vsel %vm11302_vm14, %v2079_v43, %v2083_v48  ;;  %v2105_v6 = vshll.u32 %v1661_v27, 16  ;;  %v2129_v59 = vshll.u32 %v1670_v12, 16 }
 0x169   :  { %13695 = vst [vmem:[#allocation60_spill] sm:$0xff] %v11703_v7  ;;  %v2074_v1 = vsel %vm11302_vm14, %v2069_v26, %v11683_v15  ;;  %v2126_v0 = vor.u32 %v2125_v37, %v11706_v56  ;;  %v2134_v8 = vshrl.u32 %v1671_v4, 16  ;;  %v10167_v15 = vld [vmem:[#allocation12 + $0x1b0] sm:$0xff]   ;;  %v10168_v37 = vld [vmem:[#allocation12 + $0x1b8] sm:$0xff]  }
 0x16a   :  { %5030 = vmatmul.mubr.bf16.gmra.mrb[4].mxu0 %v11461_v47  ;;  %v11721_v27 = vcombine.low %v2074_v1, %v2084_v41  ;;  %v2107_v43 = vrot.slane %v2105_v6, 5  ;;  %v1676_v1 = vld [vmem:[#allocation2 + $0xf8] sm:$0x1]  ;;  %v1677_v41 = vld [vmem:[#allocation2 + $0xfc] sm:$0xf] }
 0x16b   :  { %5037 = vmatprep.mubr.bf16.mxu0 %v10893_v10  ;;  %5283 = vmatpush1.bf16.msra.mxu0 %v10162_v55  ;;  %v2099_v55 = vshrl.u32 %v1660_v52, 16  ;;  %v2091_v52 = vrot.slane %v2089_v53, 5  ;;  %v10165_v10 = vld [vmem:[#allocation12 + $0x1a8] sm:$0xff]  }
 0x16c   :  { %5284 = vmatprep.subr.bf16.mxu0 %v13655_v22  ;;  %13696 = vst [vmem:[#allocation61_spill] sm:$0xff] %v11721_v27 }
 0x16d   :  { %v2101_v47 = vrot.slane %v2099_v55, 4  ;;  %v2092_v53 = vor.u32 %v2091_v52, %v2088_v9  ;;  %v657_v9 = vld [vmem:[#allocation2 + $0xc8] sm:$0x1]  ;;  %v2137_v52 = vshll.u32 %v1671_v4, 16  ;;  %v2131_v4 = vrot.slane %v2129_v59, 5 }
 0x16e   :  { %4532 = vmatmul.mubr.bf16.gmra.mrb[44].mxu1 %v10310_v23  ;;  %v11701_v23 = vrot.slane %v2095_v3, 5  ;;  %v10311_v3 = vld [vmem:[#allocation2 + $0x90] sm:$0xff]   ;;  %v658_v26 = vsel %vm10627_vm2, %v497_v54, %v657_v9  ;;  %v2127_v54 = vrot.slane %v2126_v0, 4 }
 0x16f   :  { %4539 = vmatprep.mubr.bf16.mxu1 %v11686_v25  ;;  %5285 = vmatpush1.bf16.msra.mxu0 %v10163_v61  ;;  %v2115_v61 = vrot.slane %v2113_v44, 5  ;;  %v2093_v48 = vrot.slane %v2092_v53, 4  ;;  %659 = vst [vmem:[#allocation2 + $0xc8] sm:$0x1] %v658_v26  ;;  %v2139_v53 = vrot.slane %v2137_v52, 5 }
 0x170   :  { %5286 = vmatprep.subr.bf16.mxu0 %v13655_v22  ;;  %v2102_v55 = vor.u32 %v2101_v47, %v11701_v23  ;;  %v1675_v47 = vld [vmem:[#allocation2 + $0xf4] sm:$0xf] }
 0x171   :  { %v2116_v44 = vor.u32 %v2115_v61, %v2112_v2  ;;  %v2167_v6 = vshll.u32 %v1675_v47, 16  ;;  %v2171_v59 = vshrl.u32 %v1675_v47, 16  ;;  %v2098_v0 = vsel %vm11302_vm14, %v2093_v48, %v11701_v23 }
 0x172   :  { %5038 = vmatmul.mubr.bf16.gmra.mrb[8].mxu0 %v11517_v51  ;;  %v2147_v51 = vshrl.u32 %v1672_v14, 16  ;;  %v2132_v47 = vsel %vm11302_vm14, %v2127_v54, %v2131_v4  ;;  %v2177_v23 = vshll.u32 %v1676_v1, 16  ;;  %v2182_v48 = vshrl.u32 %v1677_v41, 16 }
 0x173   :  { %5045 = vmatprep.mubr.bf16.mxu0 %v10926_v57  ;;  %5287 = vmatpush1.bf16.msra.mxu0 %v10164_v11  ;;  %v1674_v11 = vld [vmem:[#allocation2 + $0xf0] sm:$0xf]  ;;  %v2117_v12 = vrot.slane %v2116_v44, 4  ;;  %v2136_v57 = vrot.slane %v2134_v8, 4 }
 0x174   :  { %5288 = vmatprep.subr.bf16.mxu0 %v13655_v22  ;;  %v2158_v2 = vshrl.u32 %v1674_v11, 16  ;;  %v2161_v61 = vshll.u32 %v1674_v11, 16  ;;  %v2149_v26 = vrot.slane %v2147_v51, 4  ;;  %v10312_v11 = vld [vmem:[#allocation2 + $0x9c] sm:$0xff]   ;;  %v10169_v8 = vld [vmem:[#allocation12 + $0x1c0] sm:$0xff]  }
 0x176   :  { %4540 = vmatmul.mubr.bf16.gmra.mrb[48].mxu1 %v10311_v3  ;;  %v2143_v3 = vshll.u32 %v1672_v14, 16  ;;  %v1673_v14 = vld [vmem:[#allocation2 + $0xec] sm:$0x1]  ;;  %v2163_v44 = vrot.slane %v2161_v61, 5 }
 0x177   :  { %4547 = vmatprep.mubr.bf16.mxu1 %v11703_v7  ;;  %5289 = vmatpush1.bf16.msra.mxu0 %v10165_v10  ;;  %v2103_v10 = vrot.slane %v2102_v55, 4  ;;  %v2160_v55 = vrot.slane %v2158_v2, 4  ;;  %v2153_v52 = vshll.u32 %v1673_v14, 16  ;;  %v2140_v2 = vor.u32 %v2139_v53, %v2136_v57  ;;  %v1663_v53 = vld [vmem:[#allocation2 + $0xc4] sm:$0xf] }
 0x178   :  { %5290 = vmatprep.subr.bf16.mxu0 %v13655_v22  ;;  %v11725_v9 = vrot.slane %v2143_v3, 5  ;;  %v1678_v3 = vld [vmem:[#allocation2 + $0x100] sm:$0xf]  ;;  %v2663_v13 = vshll.u32 %v1663_v53, 16  ;;  %v2667_v35 = vshrl.u32 %v1663_v53, 16 }
 0x179   :  { %v2108_v51 = vsel %vm11302_vm14, %v2103_v10, %v2107_v43  ;;  %v2185_v43 = vshll.u32 %v1677_v41, 16  ;;  %v1681_v10 = vld [vmem:[#allocation2 + $0x10c] sm:$0xf]  ;;  %v2164_v14 = vor.u32 %v2163_v44, %v2160_v55  ;;  %v11752_v1 = vrot.slane %v2140_v2, 4  ;;  %v1683_v55 = vld [vmem:[#allocation2 + $0x114] sm:$0xf] }
 0x17a   :  { %5046 = vmatmul.mubr.bf16.gmra.mrb[12].mxu0 %v11558_v32  ;;  %v2150_v61 = vor.u32 %v2149_v26, %v11725_v9  ;;  %v11741_v32 = vrot.slane %v2167_v6, 5  ;;  %v11745_v57 = vcombine.low %v2098_v0, %v2108_v51  ;;  %v2215_v41 = vshll.u32 %v1681_v10, 16  ;;  %v10170_v44 = vld [vmem:[#allocation12 + $0x1c8] sm:$0xff]   ;;  %v1679_v51 = vld [vmem:[#allocation2 + $0x104] sm:$0x1] }
 0x17b   :  { %5053 = vmatprep.mubr.bf16.mxu0 %v10967_v39  ;;  %5291 = vmatpush1.bf16.msra.mxu0 %v10167_v15  ;;  %v2122_v15 = vsel %vm11302_vm14, %v2117_v12, %v11706_v56  ;;  %v2173_v39 = vrot.slane %v2171_v59, 4  ;;  %v2191_v56 = vshll.u32 %v1678_v3, 16  ;;  %v2195_v12 = vshrl.u32 %v1678_v3, 16 }
 0x17c   :  { %5292 = vmatprep.subr.bf16.mxu0 %v13655_v22  ;;  %13697 = vst [vmem:[#allocation62_spill] sm:$0xff] %v11745_v57  ;;  %v11750_v26 = vcombine.low %v2122_v15, %v2132_v47  ;;  %v2219_v6 = vshrl.u32 %v1681_v10, 16  ;;  %v11754_v59 = vrot.slane %v2150_v61, 4  ;;  %v11756_v0 = vrot.slane %v2177_v23, 5  ;;  %v10313_v15 = vld [vmem:[#allocation2 + $0xa8] sm:$0xff]  }
 0x17d   :  { %v2187_v3 = vrot.slane %v2185_v43, 5  ;;  %v11761_v47 = vrot.slane %v2164_v14, 4  ;;  %v2174_v2 = vor.u32 %v2173_v39, %v11741_v32  ;;  %v2197_v61 = vrot.slane %v2195_v12, 4  ;;  %v1682_v23 = vld [vmem:[#allocation2 + $0x110] sm:$0x1]  ;;  %v10171_v14 = vld [vmem:[#allocation12 + $0x1d0] sm:$0xff]  }
 0x17e   :  { %4548 = vmatmul.mubr.bf16.gmra.mrb[52].mxu1 %v10312_v11  ;;  %v1680_v11 = vld [vmem:[#allocation2 + $0x108] sm:$0xf]  ;;  %v2654_v43 = vshrl.u32 %v1662_v21, 16  ;;  %v11767_v30 = vrot.slane %v2215_v41, 5  ;;  %v2221_v45 = vrot.slane %v2219_v6, 4  ;;  %v2233_v58 = vshll.u32 %v1683_v55, 16 }
 0x17f   :  { %4555 = vmatprep.mubr.bf16.mxu1 %v11721_v27  ;;  %5293 = vmatpush1.bf16.msra.mxu0 %v10168_v37  ;;  %v11747_v37 = vrot.slane %v2153_v52, 5  ;;  %v2206_v4 = vshrl.u32 %v1680_v11, 16  ;;  %v2209_v54 = vshll.u32 %v1680_v11, 16  ;;  %v2184_v52 = vrot.slane %v2182_v48, 4  ;;  %v11758_v11 = vld [vmem:[#allocation2 + $0xc4] sm:$0xf] }
 0x180   :  { %5294 = vmatprep.subr.bf16.mxu0 %v13655_v22  ;;  %v11770_v12 = vrot.slane %v2174_v2, 4  ;;  %v2225_v6 = vshll.u32 %v1682_v23, 16  ;;  %v11779_v27 = vrot.slane %v2663_v13, 5  ;;  %v10314_v23 = vld [vmem:[#allocation2 + $0xb4] sm:$0xff]  }
 0x181   :  { %v2208_v10 = vrot.slane %v2206_v4, 4  ;;  %v2211_v48 = vrot.slane %v2209_v54, 5  ;;  %v2201_v4 = vshll.u32 %v1679_v51, 16  ;;  %v11772_v54 = vld [vmem:[#allocation2 + $0xc0] sm:$0xe]  ;;  %v2669_v51 = vrot.slane %v2667_v35, 4 }
 0x182   :  { %5054 = vmatmul.mubr.bf16.gmra.mrb[16].mxu0 %v11579_v38  ;;  %v1684_v38 = vld [vmem:[#allocation2 + $0x118] sm:$0xf]  ;;  %v2156_v35 = vsel %vm11302_vm14, %v11754_v59, %v11747_v37 }
 0x183   :  { %5061 = vmatprep.mubr.bf16.mxu0 %v10999_v24  ;;  %5295 = vmatpush1.bf16.msra.mxu0 %v10169_v8  ;;  %v11764_v8 = vrot.slane %v2191_v56, 5  ;;  %v2657_v24 = vshll.u32 %v1662_v21, 16  ;;  %v2239_v39 = vshll.u32 %v1684_v38, 16  ;;  %v2243_v56 = vshrl.u32 %v1684_v38, 16  ;;  %v10166_v37 = vld [vmem:[#allocation2 + $0xd8] sm:$0xff]  }
 0x184   :  { %5296 = vmatprep.subr.bf16.mxu0 %v13655_v22  ;;  %v2212_v41 = vor.u32 %v2211_v48, %v2208_v10  ;;  %v2222_v38 = vor.u32 %v2221_v45, %v11767_v30  ;;  %v2235_v21 = vrot.slane %v2233_v58, 5  ;;  %v2203_v10 = vrot.slane %v2201_v4, 5  ;;  %v780_v4 = vld [vmem:[#allocation2 + $0x164] sm:$0x1] }
 0x185   :  { %v2198_v53 = vor.u32 %v2197_v61, %v11764_v8  ;;  %v2659_v2 = vrot.slane %v2657_v24, 5  ;;  %v11781_v50 = vrot.slane %v2239_v39, 5  ;;  %v1687_v61 = vld [vmem:[#allocation2 + $0x124] sm:$0xf]  ;;  %v2146_v24 = vsel %vm11302_vm14, %v11752_v1, %v11725_v9 }
 0x186   :  { %4556 = vmatmul.mubr.bf16.gmra.mrb[56].mxu1 %v10313_v15  ;;  %v2230_v15 = vshrl.u32 %v1683_v55, 16  ;;  %v1685_v55 = vld [vmem:[#allocation2 + $0x11c] sm:$0x1]  ;;  %v13698_v48 = vrot.slane %v11758_v11, 5  ;;  %v2670_v1 = vor.u32 %v2669_v51, %v11779_v27 }
 0x187   :  { %4563 = vmatprep.mubr.bf16.mxu1 %v11745_v57  ;;  %5297 = vmatpush1.bf16.msra.mxu0 %v10170_v44  ;;  %v2188_v57 = vor.u32 %v2187_v3, %v2184_v52  ;;  %v2656_v44 = vrot.slane %v2654_v43, 4  ;;  %v1686_v52 = vld [vmem:[#allocation2 + $0x120] sm:$0xf]  ;;  %v2199_v45 = vrot.slane %v2198_v53, 4  ;;  %v2249_v39 = vshll.u32 %v1685_v55, 16  ;;  %v10172_v55 = vld [vmem:[#allocation12 + $0x1d8] sm:$0xff]  }
 0x188   :  { %5298 = vmatprep.subr.bf16.mxu0 %v13655_v22  ;;  %v2232_v3 = vrot.slane %v2230_v15, 4  ;;  %v11796_v43 = vrot.slane %v13698_v48, 4  ;;  %v11800_v15 = vrot.slane %v2212_v41, 4  ;;  %v11806_v53 = vld [vmem:[#allocation2 + $0xc8] sm:$0x1]  ;;  %v2263_v48 = vshll.u32 %v1687_v61, 16 }
 0x189   :  { %v2189_v13 = vrot.slane %v2188_v57, 4  ;;  %v2660_v9 = vor.u32 %v2659_v2, %v2656_v44  ;;  %v11803_v57 = vrot.slane %v2222_v38, 4  ;;  %v11809_v41 = vcombine.low %v2146_v24, %v2156_v35 }
 0x18a   :  { %5062 = vmatmul.mubr.bf16.gmra.mrb[20].mxu0 %v11590_v16  ;;  %v2245_v16 = vrot.slane %v2243_v56, 4  ;;  %v2236_v59 = vor.u32 %v2235_v21, %v2232_v3  ;;  %v2254_v56 = vshrl.u32 %v1686_v52, 16  ;;  %v2267_v44 = vshrl.u32 %v1687_v61, 16  ;;  %v735_v61 = vld [vmem:[#allocation2 + $0x168] sm:$0x1] }
 0x18b   :  { %5069 = vmatprep.mubr.bf16.mxu0 %v11024_v62  ;;  %5299 = vmatpush1.bf16.msra.mxu0 %v10171_v14  ;;  %v11798_v14 = vrot.slane %v2225_v6, 5  ;;  %13699 = vst [vmem:[#allocation63_spill] sm:$0xff] %v11809_v41  ;;  %v11811_v6 = vld [vmem:[#allocation2 + $0xc8] sm:$0x1]  ;;  %v11814_v38 = vrot.slane %v2660_v9, 4  ;;  %v11816_v21 = vrot.slane %v2670_v1, 4  ;;  %v2170_v35 = vsel %vm11302_vm14, %v11761_v47, %v11741_v32 }
 0x18c   :  { %5300 = vmatprep.subr.bf16.mxu0 %v13655_v22  ;;  %v781_v2 = vsel %vm10644_vm7, 0, %v780_v4  ;;  %v11827_v24 = vrot.slane %v2254_v56, 4  ;;  %v2180_v9 = vsel %vm11302_vm14, %v11770_v12, %v11756_v0  ;;  %v2204_v32 = vsel %vm11302_vm14, %v2199_v45, %v2203_v10  ;;  %v11847_v47 = vld [vmem:[#allocation2 + $0x128] sm:$0x1]  ;;  %v684_v56 = vld [vmem:[#allocation9 + $0xdc] sm:$0xf] }
 0x18d   :  { %782 = vst [vmem:[#allocation2 + $0x164] sm:$0x1] %v781_v2  ;;  %v11851_v0 = vrot.slane %v2267_v44, 4  ;;  %v683_v12 = vld [vmem:[#allocation9 + $0xd8] sm:$0xf]  ;;  %v11857_v51 = vcombine.low %v2170_v35, %v2180_v9  ;;  %v994_v35 = vshrl.u32 %v684_v56, 16  ;;  %v2666_v18 = vsel %vm11302_vm14, %v11814_v38, %v11779_v27 }
 0x18e   :  { %4564 = vmatmul.mubr.bf16.gmra.mrb[60].mxu1 %v10314_v23  ;;  %v2257_v23 = vshll.u32 %v1686_v52, 16  ;;  %v11823_v52 = vrot.slane %v2236_v59, 4  ;;  %v783_v59 = vld [vmem:[#allocation2 + $0x170] sm:$0x1]  ;;  %v986_v10 = vshrl.u32 %v683_v12, 16  ;;  %v997_v9 = vshll.u32 %v684_v56, 16 }
 0x18f   :  { %4571 = vmatprep.mubr.bf16.mxu1 %v11750_v26  ;;  %v2246_v26 = vor.u32 %v2245_v16, %v11781_v50  ;;  %v11818_v16 = vrot.slane %v2249_v39, 5  ;;  %5301 = vmatpush1.bf16.msra.mxu0 %v10172_v55  ;;  %v685_v4 = vld [vmem:[#allocation9 + $0xe0] sm:$0xf]  ;;  %v736_v55 = vsel %vm10627_vm2, 0, %v735_v61  ;;  %v784_v2 = vsel %vm10644_vm7, 0, %v783_v59  ;;  %13700 = vst [vmem:[#allocation64_spill] sm:$0xff] %v11857_v51 }
 0x190   :  { %v11838_v39 = vrot.slane %v2257_v23, 5  ;;  %5302 = vmatprep.subr.bf16.mxu0 %v13655_v22  ;;  %v738_v23 = vld [vmem:[#allocation2 + $0x174] sm:$0x1]  ;;  %737 = vst [vmem:[#allocation2 + $0x168] sm:$0x1] %v736_v55  ;;  %v13701_v61 = vrot.slane %v11506_v46, 4 }
 0x191   :  { %v11825_v3 = vrot.slane %v2246_v26, 4  ;;  %v11849_v26 = vrot.slane %v2263_v48, 5  ;;  %785 = vst [vmem:[#allocation2 + $0x170] sm:$0x1] %v784_v2  ;;  %v989_v48 = vshll.u32 %v683_v12, 16  ;;  %v988_v2 = vrot.slane %v986_v10, 7 }
 0x192   :  { %5070 = vmatmul.mubr.bf16.gmra.mrb[24].mxu0 %v11619_v29  ;;  %v11870_v59 = vld [vmem:[#allocation9 + $0xe8] sm:$0xf]  ;;  %v739_v58 = vsel %vm10627_vm2, 0, %v738_v23  ;;  %v1003_v10 = vshrl.u32 %v685_v4, 16  ;;  %v10315_v12 = vld [vmem:[#allocation2 + $0xe4] sm:$0xff]  }
 0x193   :  { %5077 = vmatprep.mubr.bf16.mxu0 %v11056_v40  ;;  %740 = vst [vmem:[#allocation2 + $0x174] sm:$0x1] %v739_v58  ;;  %v991_v23 = vor.u32 %v989_v48, %v988_v2  ;;  %v992_v29 = vrot.slane %v988_v2, 4  ;;  %v11886_v40 = vld [vmem:[#allocation9 + $0xec] sm:$0xf]  ;;  %v1020_v48 = vshrl.u32 %v11870_v59, 16 }
 0x194   :  { %v1192_v55 = vld [vmem:[#allocation2 + $0x164] sm:$0x1]  ;;  %v744_v62 = vld [vmem:[#allocation2 + $0x18c] sm:$0x1]  ;;  %v792_v58 = vld [vmem:[#allocation2 + $0x194] sm:$0x1] }
 0x195   :  { %v1193_v1 = vsel %vm10627_vm2, %v13701_v61, %v1192_v55 }
 0x196   :  { %4572 = vmatmul.mubr.bf16.gmra.mrb[64].mxu1 %v10166_v37  ;;  %v2194_v37 = vsel %vm11302_vm14, %v2189_v13, %v11764_v8  ;;  %v686_v8 = vld [vmem:[#allocation9 + $0xe4] sm:$0xf]  ;;  %v786_v13 = vld [vmem:[#allocation2 + $0x17c] sm:$0x1]  ;;  %1194 = vst [vmem:[#allocation2 + $0x164] sm:$0x1] %v1193_v1 }
 0x197   :  { %4579 = vmatprep.mubr.bf16.mxu1 %v11809_v41  ;;  %v11859_v45 = vcombine.low %v2194_v37, %v2204_v32  ;;  %v741_v37 = vld [vmem:[#allocation2 + $0x180] sm:$0x1]  ;;  %v789_v32 = vld [vmem:[#allocation2 + $0x188] sm:$0x1]  ;;  %v787_v44 = vsel %vm10644_vm7, 0, %v786_v13  ;;  %v1006_v13 = vshll.u32 %v685_v4, 16 }
 0x198   :  { %788 = vst [vmem:[#allocation2 + $0x17c] sm:$0x1] %v787_v44  ;;  %v1005_v41 = vrot.slane %v1003_v10, 7  ;;  %v1014_v61 = vshll.u32 %v686_v8, 16  ;;  %v742_v1 = vsel %vm10627_vm2, 0, %v741_v37  ;;  %v790_v4 = vsel %vm10644_vm7, 0, %v789_v32 }
 0x199   :  { %v1195_v55 = vld [vmem:[#allocation2 + $0x168] sm:$0xf]  ;;  %743 = vst [vmem:[#allocation2 + $0x180] sm:$0x1] %v742_v1  ;;  %791 = vst [vmem:[#allocation2 + $0x188] sm:$0x1] %v790_v4 }
 0x19a   :  { %5078 = vmatmul.mubr.bf16.gmra.mrb[28].mxu0 %v11637_v60  ;;  %v996_v60 = vrot.slane %v994_v35, 7  ;;  %v11889_v35 = vld [vmem:[#allocation9 + $0xf0] sm:$0xf]  ;;  %v1009_v2 = vrot.slane %v1005_v41, 4  ;;  %v793_v4 = vsel %vm10644_vm7, 0, %v792_v58  ;;  %v2260_v58 = vor.u32 %v11838_v39, %v11827_v24 }
 0x19b   :  { %5085 = vmatprep.mubr.bf16.mxu0 %v11084_v17  ;;  %v1011_v17 = vshrl.u32 %v686_v8, 16  ;;  %v1023_v8 = vshll.u32 %v11870_v59, 16  ;;  %v1028_v59 = vshrl.u32 %v11886_v40, 16  ;;  %794 = vst [vmem:[#allocation2 + $0x194] sm:$0x1] %v793_v4  ;;  %v13705_v24 = vsel %vm11302_vm14, %v11800_v15, %v11767_v30 }
 0x19c   :  { %v999_v46 = vor.u32 %v997_v9, %v996_v60  ;;  %v1001_v56 = vrot.slane %v996_v60, 4  ;;  %v1199_v9 = vld [vmem:[#allocation2 + $0x170] sm:$0x1]  ;;  %v1008_v60 = vor.u32 %v1006_v13, %v1005_v41  ;;  %v1022_v13 = vrot.slane %v1020_v48, 7 }
 0x19d   :  { %v1013_v44 = vrot.slane %v1011_v17, 7  ;;  %v1196_v17 = vsel %vm10656_vm8, %v991_v23, %v1195_v55  ;;  %v10175_v41 = vld [vmem:[#allocation12 + $0x1e0] sm:$0xff]   ;;  %v1031_v23 = vshll.u32 %v11886_v40, 16  ;;  %v1037_v40 = vshrl.u32 %v11889_v35, 16 }
 0x19e   :  { %4580 = vmatmul.mubr.bf16.gmra.mrb[68].mxu1 %v10315_v12  ;;  %v1000_v12 = vsel %vm10638_vm5, %v992_v29, %v999_v46  ;;  %v1200_v37 = vsel %vm10627_vm2, %v1001_v56, %v1199_v9  ;;  %v11906_v29 = vld [vmem:[#allocation2 + $0x12c] sm:$0xf]  ;;  %1197 = vst [vmem:[#allocation2 + $0x168] sm:$0xf] %v1196_v17  ;;  %v745_v46 = vsel %vm10627_vm2, 0, %v744_v62  ;;  %v2252_v56 = vsel %vm11302_vm14, %v11825_v3, %v11818_v16  ;;  %v10316_v9 = vld [vmem:[#allocation2 + $0xf0] sm:$0xff]  }
 0x19f   :  { %4587 = vmatprep.mubr.bf16.mxu1 %v11857_v51  ;;  %1198 = vst [vmem:[#allocation2 + $0x16c] sm:$0xf] %v1000_v12  ;;  %v1016_v32 = vor.u32 %v1014_v61, %v1013_v44  ;;  %v1018_v10 = vrot.slane %v1013_v44, 4  ;;  %v11903_v51 = vld [vmem:[#allocation9 + $0xf4] sm:$0xf]  ;;  %v13702_v62 = vshll.u32 %v11811_v6, 16  ;;  %5303 = vmatpush1.bf16.msra.mxu0 %v10175_v41  ;;  %v1025_v3 = vor.u32 %v1023_v8, %v1022_v13 }
 0x1a0   :  { %1201 = vst [vmem:[#allocation2 + $0x170] sm:$0x1] %v1200_v37  ;;  %v1202_v44 = vld [vmem:[#allocation2 + $0x174] sm:$0xf]  ;;  %v1206_v1 = vld [vmem:[#allocation2 + $0x17c] sm:$0x1]  ;;  %5304 = vmatprep.subr.bf16.mxu0 %v13655_v22  ;;  %v13704_v8 = vsel %vm11302_vm14, %v11803_v57, %v11798_v14  ;;  %v13706_v30 = vsel %vm11302_vm14, %v11823_v52, %v11781_v50 }
 0x1a1   :  { %v1017_v61 = vsel %vm10638_vm5, %v1009_v2, %v1016_v32  ;;  %746 = vst [vmem:[#allocation2 + $0x18c] sm:$0x1] %v745_v46  ;;  %v11924_v48 = vrot.slane %v13702_v62, 5  ;;  %v1690_v12 = vld [vmem:[#allocation2 + $0x130] sm:$0xf]  ;;  %v1203_v55 = vsel %vm10656_vm8, %v1008_v60, %v1202_v44  ;;  %v1207_v16 = vsel %vm10627_vm2, %v1018_v10, %v1206_v1 }
 0x1a2   :  { %5086 = vmatmul.mubr.bf16.gmra.mrb[32].mxu0 %v11651_v34  ;;  %1205 = vst [vmem:[#allocation2 + $0x178] sm:$0xf] %v1017_v61  ;;  %v13703_v6 = vshll.u32 %v11847_v47, 16  ;;  %v1692_v17 = vld [vmem:[#allocation2 + $0x138] sm:$0xf]  ;;  %v1026_v60 = vrot.slane %v1022_v13, 4  ;;  %v11948_v39 = vcombine.low %v13705_v24, %v13704_v8  ;;  %v2270_v47 = vor.u32 %v11851_v0, %v11849_v26 }
 0x1a3   :  { %5093 = vmatprep.mubr.bf16.mxu0 %v11105_v49  ;;  %1204 = vst [vmem:[#allocation2 + $0x174] sm:$0xf] %v1203_v55  ;;  %1208 = vst [vmem:[#allocation2 + $0x17c] sm:$0x1] %v1207_v16  ;;  %v1030_v37 = vrot.slane %v1028_v59, 7  ;;  %v11952_v10 = vrot.slane %v1037_v40, 7  ;;  %v11962_v15 = vcombine.low %v13706_v30, %v2252_v56 }
 0x1a4   :  { %v11934_v2 = vrot.slane %v13703_v6, 5  ;;  %v1693_v32 = vld [vmem:[#allocation2 + $0x13c] sm:$0xf]  ;;  %v1045_v41 = vshrl.u32 %v11903_v51, 16  ;;  %v2278_v13 = vshrl.u32 %v11906_v29, 16  ;;  %v1048_v61 = vshll.u32 %v11903_v51, 16 }
 0x1a5   :  { %v1695_v59 = vld [vmem:[#allocation2 + $0x144] sm:$0xf]  ;;  %v1033_v46 = vor.u32 %v1031_v23, %v1030_v37  ;;  %v1035_v14 = vrot.slane %v1030_v37, 4  ;;  %v1209_v57 = vld [vmem:[#allocation2 + $0x180] sm:$0xf]  ;;  %v2281_v0 = vshll.u32 %v11906_v29, 16 }
 0x1a6   :  { %4588 = vmatmul.mubr.bf16.gmra.mrb[72].mxu1 %v10316_v9  ;;  %v1210_v44 = vsel %vm10656_vm8, %v1025_v3, %v1209_v57  ;;  %v1213_v1 = vld [vmem:[#allocation2 + $0x188] sm:$0x1]  ;;  %v11967_v4 = vrot.slane %v1045_v41, 7  ;;  %v11969_v23 = vrot.slane %v2260_v58, 4  ;;  %v1691_v40 = vld [vmem:[#allocation2 + $0x134] sm:$0x1] }
 0x1a7   :  { %4595 = vmatprep.mubr.bf16.mxu1 %v11859_v45  ;;  %v2287_v62 = vshll.u32 %v1690_v12, 16  ;;  %v2291_v51 = vshrl.u32 %v1690_v12, 16  ;;  %v1696_v55 = vld [vmem:[#allocation2 + $0x148] sm:$0xf]  ;;  %v1034_v16 = vsel %vm10638_vm5, %v1026_v60, %v1033_v46  ;;  %1211 = vst [vmem:[#allocation2 + $0x180] sm:$0xf] %v1210_v44  ;;  %v1214_v12 = vsel %vm10627_vm2, %v1035_v14, %v1213_v1 }
 0x1a8   :  { %v11974_v50 = vrot.slane %v2270_v47, 4  ;;  %v2302_v52 = vshrl.u32 %v1692_v17, 16  ;;  %v2305_v29 = vshll.u32 %v1692_v17, 16  ;;  %1212 = vst [vmem:[#allocation2 + $0x184] sm:$0xf] %v1034_v16  ;;  %v1043_v56 = vrot.slane %v11952_v10, 4 }
 0x1a9   :  { %v2311_v3 = vshll.u32 %v1693_v32, 16  ;;  %v2315_v9 = vshrl.u32 %v1693_v32, 16  ;;  %v1698_v58 = vld [vmem:[#allocation2 + $0x150] sm:$0xf]  ;;  %v1050_v6 = vor.u32 %v1048_v61, %v11967_v4  ;;  %v2280_v60 = vrot.slane %v2278_v13, 4  ;;  %v10317_v47 = vld [vmem:[#allocation2 + $0xfc] sm:$0xff]  }
 0x1aa   :  { %5094 = vmatmul.mubr.bf16.gmra.mrb[36].mxu0 %v11661_v63  ;;  %v2283_v37 = vrot.slane %v2281_v0, 5  ;;  %v2326_v8 = vshrl.u32 %v1695_v59, 16  ;;  %v2329_v24 = vshll.u32 %v1695_v59, 16  ;;  %1215 = vst [vmem:[#allocation2 + $0x188] sm:$0x1] %v1214_v12  ;;  %v11981_v17 = vrot.slane %v2287_v62, 5 }
 0x1ab   :  { %5101 = vmatprep.mubr.bf16.mxu0 %v11133_v33  ;;  %v2293_v41 = vrot.slane %v2291_v51, 4  ;;  %v1694_v46 = vld [vmem:[#allocation2 + $0x140] sm:$0x1]  ;;  %v2335_v57 = vshll.u32 %v1696_v55, 16  ;;  %v2339_v30 = vshrl.u32 %v1696_v55, 16  ;;  %v2297_v32 = vshll.u32 %v1691_v40, 16 }
 0x1ac   :  { %v2350_v44 = vshrl.u32 %v1698_v58, 16  ;;  %v2353_v14 = vshll.u32 %v1698_v58, 16  ;;  %v1051_v13 = vsel %vm10638_vm5, %v1043_v56, %v1050_v6  ;;  %v2304_v61 = vrot.slane %v2302_v52, 4  ;;  %v1697_v16 = vld [vmem:[#allocation2 + $0x14c] sm:$0x1] }
 0x1ad   :  { %v2307_v0 = vrot.slane %v2305_v29, 5  ;;  %v11986_v59 = vrot.slane %v2311_v3, 5  ;;  %v2317_v1 = vrot.slane %v2315_v9, 4  ;;  %1219 = vst [vmem:[#allocation2 + $0x190] sm:$0xf] %v1051_v13  ;;  %v2266_v62 = vsel %vm11302_vm14, %v11969_v23, %v11849_v26  ;;  %v13707_v34 = vld [vmem:[#allocation37_spill] sm:$0xff] }
 0x1ae   :  { %4596 = vmatmul.mubr.bf16.gmra.mrb[76].mxu1 %v10317_v47  ;;  %v2328_v51 = vrot.slane %v2326_v8, 4  ;;  %v2331_v55 = vrot.slane %v2329_v24, 5  ;;  %v1040_v40 = vshll.u32 %v11889_v35, 16  ;;  %v2284_v58 = vor.u32 %v2283_v37, %v2280_v60  ;;  %v1699_v29 = vld [vmem:[#allocation2 + $0x154] sm:$0xf]  ;;  %v10178_v8 = vld [vmem:[#allocation12 + $0x1e8] sm:$0xff]  }
 0x1af   :  { %4603 = vmatprep.mubr.bf16.mxu1 %v11948_v39  ;;  %v2294_v12 = vor.u32 %v2293_v41, %v11981_v17  ;;  %v11994_v56 = vrot.slane %v2335_v57, 5  ;;  %v2341_v52 = vrot.slane %v2339_v30, 4  ;;  %v2276_v3 = vsel %vm11302_vm14, %v11974_v50, %v11934_v2  ;;  %v1700_v26 = vld [vmem:[#allocation2 + $0x158] sm:$0x1]  ;;  %v1701_v47 = vld [vmem:[#allocation2 + $0x15c] sm:$0xf]  ;;  %5305 = vmatpush1.bf16.msra.mxu0 %v10178_v8 }
 0x1b0   :  { %v2321_v9 = vshll.u32 %v1694_v46, 16  ;;  %v2352_v23 = vrot.slane %v2350_v44, 4  ;;  %v2355_v6 = vrot.slane %v2353_v14, 5  ;;  %v12002_v35 = vrot.slane %v2297_v32, 5  ;;  %v10318_v2 = vld [vmem:[#allocation2 + $0x108] sm:$0xff]   ;;  %5306 = vmatprep.subr.bf16.mxu0 %v13655_v22 }
 0x1b1   :  { %v2308_v60 = vor.u32 %v2307_v0, %v2304_v61  ;;  %v2318_v37 = vor.u32 %v2317_v1, %v11986_v59  ;;  %v2345_v24 = vshll.u32 %v1697_v16, 16  ;;  %v2332_v41 = vor.u32 %v2331_v55, %v2328_v51  ;;  %v1216_v32 = vld [vmem:[#allocation2 + $0x18c] sm:$0xf]  ;;  %v1709_v27 = vld [vmem:[#allocation2 + $0x17c] sm:$0x1] }
 0x1b2   :  { %5102 = vmatmul.mubr.bf16.gmra.mrb[40].mxu0 %v11672_v42  ;;  %v2359_v57 = vshll.u32 %v1699_v29, 16  ;;  %v2363_v30 = vshrl.u32 %v1699_v29, 16  ;;  %v1042_v13 = vor.u32 %v1040_v40, %v11952_v10  ;;  %v2285_v50 = vrot.slane %v2284_v58, 4  ;;  %v1220_v10 = vld [vmem:[#allocation2 + $0x194] sm:$0x1] }
 0x1b3   :  { %5109 = vmatprep.mubr.bf16.mxu0 %v11165_v19  ;;  %v2295_v46 = vrot.slane %v2294_v12, 4  ;;  %v2342_v44 = vor.u32 %v2341_v52, %v11994_v56  ;;  %v2369_v14 = vshll.u32 %v1700_v26, 16  ;;  %v12009_v61 = vcombine.low %v2266_v62, %v2276_v3  ;;  %v1702_v58 = vld [vmem:[#allocation2 + $0x160] sm:$0xf] }
 0x1b4   :  { %v12011_v0 = vrot.slane %v2321_v9, 5  ;;  %v2356_v1 = vor.u32 %v2355_v6, %v2352_v23  ;;  %v2374_v16 = vshrl.u32 %v1701_v47, 16  ;;  %v12013_v51 = vrot.slane %v2308_v60, 4 }
 0x1b5   :  { %v12015_v55 = vrot.slane %v2318_v37, 4  ;;  %v12017_v40 = vrot.slane %v2345_v24, 5  ;;  %v1052_v12 = vrot.slane %v11967_v4, 4  ;;  %v12020_v52 = vrot.slane %v2332_v41, 4  ;;  %v1704_v24 = vld [vmem:[#allocation2 + $0x168] sm:$0xf] }
 0x1b6   :  { %4604 = vmatmul.mubr.bf16.gmra.mrb[80].mxu1 %v10318_v2  ;;  %v12022_v29 = vrot.slane %v2359_v57, 5  ;;  %v2365_v62 = vrot.slane %v2363_v30, 4  ;;  %v1217_v3 = vsel %vm10656_vm8, %v1042_v13, %v1216_v32  ;;  %v12026_v9 = vrot.slane %v2342_v44, 4  ;;  %v1705_v41 = vld [vmem:[#allocation2 + $0x16c] sm:$0xf] }
 0x1b7   :  { %4611 = vmatprep.mubr.bf16.mxu1 %v11962_v15  ;;  %v12028_v26 = vrot.slane %v2369_v14, 5  ;;  %v2377_v23 = vshll.u32 %v1701_v47, 16  ;;  %1218 = vst [vmem:[#allocation2 + $0x18c] sm:$0xf] %v1217_v3  ;;  %v1221_v6 = vsel %vm10627_vm2, %v1052_v12, %v1220_v10  ;;  %v12033_v4 = vrot.slane %v2356_v1, 4  ;;  %v10319_v1 = vld [vmem:[#allocation2 + $0x114] sm:$0xff]  }
 0x1b8   :  { %v12035_v8 = vrot.slane %v2374_v16, 4  ;;  %v2383_v60 = vshll.u32 %v1702_v58, 16  ;;  %v2387_v37 = vshrl.u32 %v1702_v58, 16  ;;  %1222 = vst [vmem:[#allocation2 + $0x194] sm:$0x1] %v1221_v6  ;;  %v2290_v47 = vsel %vm11302_vm14, %v2285_v50, %v11981_v17 }
 0x1b9   :  { %v2300_v57 = vsel %vm11302_vm14, %v2295_v46, %v12002_v35  ;;  %v2366_v30 = vor.u32 %v2365_v62, %v12022_v29  ;;  %v12045_v13 = vld [vmem:[#allocation2 + $0x164] sm:$0x1]  ;;  %v12047_v2 = vld [vmem:[#allocation2 + $0x170] sm:$0x1]  ;;  %v1707_v44 = vld [vmem:[#allocation2 + $0x174] sm:$0xf] }
 0x1ba   :  { %5110 = vmatmul.mubr.bf16.gmra.mrb[44].mxu0 %v11686_v25  ;;  %v1708_v14 = vld [vmem:[#allocation2 + $0x178] sm:$0xf]  ;;  %v12049_v16 = vrot.slane %v2377_v23, 5  ;;  %v2407_v50 = vshll.u32 %v1705_v41, 16  ;;  %v2411_v35 = vshrl.u32 %v1705_v41, 16  ;;  %v12054_v46 = vcombine.low %v2290_v47, %v2300_v57 }
 0x1bb   :  { %5117 = vmatprep.mubr.bf16.mxu0 %v11192_v28  ;;  %v747_v32 = vld [vmem:[#allocation2 + $0x198] sm:$0x1]  ;;  %v2398_v10 = vshrl.u32 %v1704_v24, 16  ;;  %v2401_v58 = vshll.u32 %v1704_v24, 16  ;;  %v691_v12 = vld [vmem:[#allocation9 + $0xf8] sm:$0xf] }
 0x1bc   :  { %v748_v17 = vsel %vm10627_vm2, 0, %v747_v32  ;;  %v692_v62 = vld [vmem:[#allocation9 + $0xfc] sm:$0xf]  ;;  %v12056_v3 = vrot.slane %v2366_v30, 4  ;;  %v2422_v6 = vshrl.u32 %v1707_v44, 16  ;;  %v1054_v23 = vshrl.u32 %v691_v12, 16 }
 0x1bd   :  { %749 = vst [vmem:[#allocation2 + $0x198] sm:$0x1] %v748_v17  ;;  %v12058_v25 = vrot.slane %v2383_v60, 5  ;;  %v12060_v42 = vrot.slane %v2387_v37, 4  ;;  %v12064_v17 = vld [vmem:[#allocation12 + $0x200] sm:$0xff]   ;;  %v12067_v24 = vrot.slane %v2407_v50, 5 }
 0x1be   :  { %4612 = vmatmul.mubr.bf16.gmra.mrb[84].mxu1 %v10319_v1  ;;  %v2431_v1 = vshll.u32 %v1708_v14, 16  ;;  %v12069_v47 = vrot.slane %v2411_v35, 4  ;;  %v2425_v57 = vshll.u32 %v1707_v44, 16  ;;  %v10179_v30 = vld [vmem:[#allocation12 + $0x1f0] sm:$0xff]   ;;  %v1062_v63 = vshrl.u32 %v692_v62, 16  ;;  %9526 = vmatprep.subr.bf16.mxu1 %v12064_v17 }
 0x1bf   :  { %4619 = vmatprep.mubr.bf16.mxu1 %v12009_v61  ;;  %v12072_v60 = vrot.slane %v2398_v10, 4  ;;  %v12074_v37 = vrot.slane %v2401_v58, 5  ;;  %v2435_v32 = vshrl.u32 %v1708_v14, 16  ;;  %v1056_v41 = vrot.slane %v1054_v23, 7  ;;  %v1710_v50 = vld [vmem:[#allocation2 + $0x180] sm:$0xf]  ;;  %5307 = vmatpush1.bf16.msra.mxu0 %v10179_v30 }
 0x1c0   :  { %v12077_v28 = vrot.slane %v2422_v6, 4  ;;  %v795_v35 = vld [vmem:[#allocation2 + $0x1a0] sm:$0x1]  ;;  %v2314_v10 = vsel %vm11302_vm14, %v12013_v51, %v11986_v59  ;;  %v2324_v14 = vsel %vm11302_vm14, %v12015_v55, %v12011_v0  ;;  %v1711_v58 = vld [vmem:[#allocation2 + $0x184] sm:$0xf]  ;;  %5308 = vmatprep.subr.bf16.mxu0 %v13655_v22  ;;  %v12093_v30 = vrot.slane %v2425_v57, 5 }
 0x1c1   :  { %v10320_v44 = vld [vmem:[#allocation2 + $0x120] sm:$0xff]   ;;  %v796_v6 = vsel %vm10644_vm7, 0, %v795_v35  ;;  %v1060_v51 = vrot.slane %v1056_v41, 4  ;;  %v12095_v19 = vcombine.low %v2314_v10, %v2324_v14  ;;  %v1714_v0 = vld [vmem:[#allocation2 + $0x190] sm:$0xf]  ;;  %v12097_v55 = vrot.slane %v2435_v32, 4 }
 0x1c2   :  { %5118 = vmatmul.mubr.bf16.gmra.mrb[48].mxu0 %v11703_v7  ;;  %v12079_v7 = vrot.slane %v2431_v1, 5  ;;  %v1057_v1 = vshll.u32 %v691_v12, 16  ;;  %797 = vst [vmem:[#allocation2 + $0x1a0] sm:$0x1] %v796_v6  ;;  %v2446_v22 = vshrl.u32 %v1710_v50, 16  ;;  %v13708_v35 = vld [vmem:[#allocation61_spill] sm:$0xff] }
 0x1c3   :  { %5125 = vmatprep.mubr.bf16.mxu0 %v13707_v34  ;;  %v1065_v34 = vshll.u32 %v692_v62, 16  ;;  %v1713_v33 = vld [vmem:[#allocation2 + $0x18c] sm:$0xf]  ;;  %v2449_v57 = vshll.u32 %v1710_v50, 16  ;;  %v2455_v49 = vshll.u32 %v1711_v58, 16  ;;  %v2459_v6 = vshrl.u32 %v1711_v58, 16 }
 0x1c4   :  { %v1223_v23 = vld [vmem:[#allocation2 + $0x198] sm:$0xf]  ;;  %v1059_v59 = vor.u32 %v1057_v1, %v1056_v41  ;;  %v2479_v62 = vshll.u32 %v1714_v0, 16  ;;  %v2483_v10 = vshrl.u32 %v1714_v0, 16  ;;  %v13710_v14 = vrot.slane %v11758_v11, 5  ;;  %v10321_v11 = vld [vmem:[#allocation2 + $0x12c] sm:$0xff]  }
 0x1c5   :  { %v13709_v41 = vld [vmem:[#allocation38_spill] sm:$0xff]  ;;  %v13713_v50 = vrot.slane %v11806_v53, 5  ;;  %v2448_v0 = vrot.slane %v2446_v22, 4 }
 0x1c6   :  { %4620 = vmatmul.mubr.bf16.gmra.mrb[88].mxu1 %v10320_v44  ;;  %v1064_v44 = vrot.slane %v1062_v63, 7  ;;  %v1224_v12 = vsel %vm10656_vm8, %v1059_v59, %v1223_v23  ;;  %v2473_v59 = vshll.u32 %v1713_v33, 16 }
 0x1c7   :  { %4627 = vmatprep.mubr.bf16.mxu1 %v12054_v46  ;;  %1225 = vst [vmem:[#allocation2 + $0x198] sm:$0xf] %v1224_v12  ;;  %v3432_v58 = vsel %vm10748_vm11, %v11796_v43, %v13713_v50  ;;  %v2451_v12 = vrot.slane %v2449_v57, 5  ;;  %v2428_v57 = vor.u32 %v12093_v30, %v12077_v28  ;;  %v13716_v30 = vshll.u32 %v12047_v2, 16  ;;  %v13717_v2 = vld [vmem:[#allocation39_spill] sm:$0xff] }
 0x1c8   :  { %v1067_v20 = vor.u32 %v1065_v34, %v1064_v44  ;;  %v1069_v63 = vrot.slane %v1064_v44, 4  ;;  %v13711_v34 = vrot.slane %v11772_v54, 9  ;;  %v2470_v44 = vshrl.u32 %v1713_v33, 16 }
 0x1c9   :  { %v2338_v54 = vsel %vm11302_vm14, %v12020_v52, %v11994_v56  ;;  %v2348_v33 = vsel %vm11302_vm14, %v12026_v9, %v12017_v40  ;;  %v1227_v43 = vld [vmem:[#allocation2 + $0x1a0] sm:$0x1]  ;;  %v2380_v56 = vor.u32 %v12049_v16, %v12035_v8  ;;  %v2390_v40 = vor.u32 %v12060_v42, %v12058_v25  ;;  %v10184_v42 = vld [vmem:[#allocation12 + $0x1f8] sm:$0xff]  }
 0x1ca   :  { %5126 = vmatmul.mubr.bf16.gmra.mrb[52].mxu0 %v13708_v35  ;;  %v1068_v32 = vsel %vm10638_vm5, %v1060_v51, %v1067_v20  ;;  %v3429_v23 = vsel %vm10748_vm11, %v13711_v34, %v13710_v14  ;;  %v2676_v20 = vsel %vm11302_vm14, %v11816_v21, %v11924_v48  ;;  %v1228_v53 = vsel %vm10627_vm2, %v1069_v63, %v1227_v43  ;;  %v1712_v51 = vld [vmem:[#allocation2 + $0x188] sm:$0x1]  ;;  %v13714_v63 = vld [vmem:[#allocation62_spill] sm:$0xff] }
 0x1cb   :  { %5133 = vmatprep.mubr.bf16.mxu0 %v13709_v41  ;;  %1226 = vst [vmem:[#allocation2 + $0x19c] sm:$0xf] %v1068_v32  ;;  %v12135_v38 = vcombine.low %v3429_v23, %v3432_v58  ;;  %1229 = vst [vmem:[#allocation2 + $0x1a0] sm:$0x1] %v1228_v53  ;;  %v12137_v21 = vcombine.low %v2666_v18, %v2676_v20  ;;  %v12139_v48 = vcombine.low %v2338_v54, %v2348_v33 }
 0x1cc   :  { %v2362_v52 = vsel %vm11302_vm14, %v12033_v4, %v12022_v29  ;;  %v2414_v9 = vor.u32 %v12069_v47, %v12067_v24  ;;  %v12152_v32 = vrot.slane %v2455_v49, 5  ;;  %v2461_v14 = vrot.slane %v2459_v6, 4  ;;  %v1715_v6 = vld [vmem:[#allocation2 + $0x194] sm:$0x1]  ;;  %5309 = vmatpush1.bf16.msra.mxu0 %v10184_v42 }
 0x1cd   :  { %v12154_v8 = vrot.slane %v2479_v62, 5  ;;  %v2485_v16 = vrot.slane %v2483_v10, 4  ;;  %v2404_v29 = vor.u32 %v12074_v37, %v12072_v60  ;;  %v2441_v4 = vshll.u32 %v1709_v27, 16  ;;  %v10322_v62 = vld [vmem:[#allocation2 + $0x138] sm:$0xff]  }
 0x1ce   :  { %4628 = vmatmul.mubr.bf16.gmra.mrb[92].mxu1 %v10321_v11  ;;  %v2472_v34 = vrot.slane %v2470_v44, 4  ;;  %v2475_v47 = vrot.slane %v2473_v59, 5  ;;  %v2381_v23 = vrot.slane %v2380_v56, 4  ;;  %v2391_v22 = vrot.slane %v2390_v40, 4 }
 0x1cf   :  { %4635 = vmatprep.mubr.bf16.mxu1 %v12095_v19  ;;  %v2438_v49 = vor.u32 %v12097_v55, %v12079_v7  ;;  %v2372_v60 = vsel %vm11302_vm14, %v12056_v3, %v12028_v26  ;;  %v13715_v37 = vshll.u32 %v12045_v13, 16  ;;  %v2452_v50 = vor.u32 %v2451_v12, %v2448_v0  ;;  %v13718_v12 = vld [vmem:[#allocation63_spill] sm:$0xff] }
 0x1d0   :  { %v2465_v58 = vshll.u32 %v1712_v51, 16  ;;  %v2415_v28 = vrot.slane %v2414_v9, 4  ;;  %v2419_v55 = vrot.slane %v13716_v30, 5  ;;  %v2462_v44 = vor.u32 %v2461_v14, %v12152_v32  ;;  %v10323_v9 = vld [vmem:[#allocation2 + $0x144] sm:$0xff]   ;;  %v13724_v30 = vld [vmem:[#allocation47_spill] sm:$0xff] }
 0x1d1   :  { %v2395_v10 = vrot.slane %v13715_v37, 5  ;;  %v2486_v59 = vor.u32 %v2485_v16, %v12154_v8  ;;  %v2405_v18 = vrot.slane %v2404_v29, 4  ;;  %v2443_v20 = vrot.slane %v2441_v4, 5  ;;  %v13719_v14 = vld [vmem:[#allocation40_spill] sm:$0xff]  ;;  %v10324_v16 = vld [vmem:[#allocation2 + $0x150] sm:$0xff]  }
 0x1d2   :  { %5134 = vmatmul.mubr.bf16.gmra.mrb[56].mxu0 %v13714_v63  ;;  %v2476_v11 = vor.u32 %v2475_v47, %v2472_v34  ;;  %v2489_v54 = vshll.u32 %v1715_v6, 16  ;;  %v2429_v26 = vrot.slane %v2428_v57, 4  ;;  %v2439_v3 = vrot.slane %v2438_v49, 4  ;;  %v13720_v29 = vld [vmem:[#allocation64_spill] sm:$0xff]  ;;  %v13721_v34 = vld [vmem:[#allocation41_spill] sm:$0xff]  ;;  %v13722_v49 = vld [vmem:[#allocation43_spill] sm:$0xff] }
 0x1d3   :  { %5141 = vmatprep.mubr.bf16.mxu0 %v12135_v38  ;;  %v2453_v13 = vrot.slane %v2452_v50, 4  ;;  %v2467_v33 = vrot.slane %v2465_v58, 5  ;;  %v12175_v43 = vcombine.low %v2362_v52, %v2372_v60  ;;  %v2463_v27 = vrot.slane %v2462_v44, 4  ;;  %v10325_v47 = vld [vmem:[#allocation2 + $0x15c] sm:$0xff]   ;;  %v10174_v6 = vld [vmem:[#allocation2 + $0x174] sm:$0xff]  }
 0x1d4   :  { %v2487_v53 = vrot.slane %v2486_v59, 4  ;;  %v2477_v56 = vrot.slane %v2476_v11, 4  ;;  %v2491_v40 = vrot.slane %v2489_v54, 5  ;;  %v2386_v51 = vsel %vm11302_vm14, %v2381_v23, %v12058_v25  ;;  %v10173_v23 = vld [vmem:[#allocation2 + $0x168] sm:$0xff]   ;;  %v2917_v59 = vld [vmem:[#allocation2 + $0x160] sm:$0xf] }
 0x1d5   :  { %v2396_v0 = vsel %vm11302_vm14, %v2391_v22, %v2395_v10  ;;  %v2410_v42 = vsel %vm11302_vm14, %v2405_v18, %v12067_v24  ;;  %v2420_v25 = vsel %vm11302_vm14, %v2415_v28, %v2419_v55  ;;  %v2434_v22 = vsel %vm11302_vm14, %v2429_v26, %v12079_v7  ;;  %v13723_v37 = vld [vmem:[#allocation44_spill] sm:$0xff]  ;;  %v12236_v54 = vld [vmem:[#allocation2 + $0x18c] sm:$0xff]  }
 0x1d6   :  { %4636 = vmatmul.mubr.bf16.gmra.mrb[96].mxu1 %v10322_v62  ;;  %v12185_v52 = vcombine.low %v2386_v51, %v2396_v0  ;;  %v12195_v4 = vcombine.low %v2410_v42, %v2420_v25  ;;  %v2444_v24 = vsel %vm11302_vm14, %v2439_v3, %v2443_v20  ;;  %v2458_v62 = vsel %vm11302_vm14, %v2453_v13, %v12152_v32  ;;  %v12224_v32 = vld [vmem:[#allocation2 + $0x180] sm:$0xff]   ;;  %v2916_v20 = vld [vmem:[#allocation2 + $0x15c] sm:$0xe]  ;;  %v13725_v3 = vld [vmem:[#allocation50_spill] sm:$0xff] }
 0x1d7   :  { %4643 = vmatprep.mubr.bf16.mxu1 %v12139_v48  ;;  %v12205_v57 = vcombine.low %v2434_v22, %v2444_v24  ;;  %v2468_v7 = vsel %vm11302_vm14, %v2463_v27, %v2467_v33  ;;  %v2482_v10 = vsel %vm11302_vm14, %v2477_v56, %v12154_v8  ;;  %v2492_v50 = vsel %vm11302_vm14, %v2487_v53, %v2491_v40  ;;  %v12229_v28 = vpop.f32.mrb[0].mxu1  ;;  %v2918_v11 = vld [vmem:[#allocation2 + $0x164] sm:$0x1]  ;;  %v2920_v56 = vld [vmem:[#allocation2 + $0x16c] sm:$0xf]  ;;  %v10181_v22 = vld [vmem:[#allocation12 + $0x208] sm:$0xff]  }
 0x1d8   :  { %v12215_v60 = vcombine.low %v2458_v62, %v2468_v7  ;;  %v12227_v58 = vcombine.low %v2482_v10, %v2492_v50  ;;  %v4447_v55 = vpop.f32.mrb[1].mxu1  ;;  %v3227_v18 = vrot.slane %v2917_v59, 5  ;;  %v8898_v33 = vrot.slane %v2916_v20, 9  ;;  %v13726_v25 = vld [vmem:[#allocation52_spill] sm:$0xff]  ;;  %v2923_v50 = vld [vmem:[#allocation2 + $0x178] sm:$0xf] }
 0x1d9   :  { %v12232_v44 = vpop.f32.mrb[2].mxu1  ;;  %v3230_v53 = vrot.slane %v2918_v11, 5  ;;  %v3234_v0 = vrot.slane %v2920_v56, 5  ;;  %v10182_v59 = vld [vmem:[#allocation12 + $0x210] sm:$0xff]   ;;  %v3241_v20 = vrot.slane %v2923_v50, 5 }
 0x1da   :  { %5142 = vmatmul.mubr.bf16.gmra.mrb[60].mxu0 %v12137_v21  ;;  %v4450_v8 = vpop.f32.mrb[3].mxu1  ;;  %v3229_v27 = vrot.slane %v3227_v18, 4  ;;  %v2922_v11 = vld [vmem:[#allocation2 + $0x174] sm:$0xe] }
 0x1db   :  { %5149 = vmatprep.mubr.bf16.mxu0 %v13717_v2  ;;  %v3236_v62 = vrot.slane %v3234_v0, 4  ;;  %v8900_v56 = vrot.slane %v2922_v11, 9 }
 0x1dc   :  { %v3231_v51 = vsel %vm10748_vm11, %v3229_v27, %v3230_v53  ;;  %v13728_v27 = vld [vmem:[#allocation54_spill] sm:$0xff] }
 0x1de   :  { %4644 = vmatmul.mubr.bf16.gmra.mrb[100].mxu1 %v10323_v9  ;;  %v3228_v9 = vsel %vm10748_vm11, %v8898_v33, %v3227_v18 }
 0x1df   :  { %4651 = vmatprep.mubr.bf16.mxu1 %v12175_v43 }
 0x1e2   :  { %5150 = vmatmul.mubr.bf16.gmra.mrb[64].mxu0 %v13718_v12  ;;  %v2919_v12 = vld [vmem:[#allocation2 + $0x168] sm:$0xe] }
 0x1e3   :  { %5157 = vmatprep.mubr.bf16.mxu0 %v13719_v14 }
 0x1e6   :  { %4652 = vmatmul.mubr.bf16.gmra.mrb[104].mxu1 %v10324_v16  ;;  %v2921_v16 = vld [vmem:[#allocation2 + $0x170] sm:$0x1] }
 0x1e7   :  { %4659 = vmatprep.mubr.bf16.mxu1 %v12185_v52  ;;  %v3237_v7 = vrot.slane %v2921_v16, 5  ;;  %v10185_v16 = vld [vmem:[#allocation12 + $0x220] sm:$0xff]  }
 0x1e8   :  { %v12239_v26 = vpop.f32.mrb[4].mxu1 }
 0x1e9   :  { %v4455_v13 = vpop.f32.mrb[5].mxu1  ;;  %v3238_v18 = vsel %vm10748_vm11, %v3236_v62, %v3237_v7  ;;  %v2925_v62 = vld [vmem:[#allocation2 + $0x180] sm:$0xe]  ;;  %v2927_v7 = vld [vmem:[#allocation2 + $0x188] sm:$0x1] }
 0x1ea   :  { %5158 = vmatmul.mubr.bf16.gmra.mrb[68].mxu0 %v13720_v29  ;;  %v12242_v2 = vpop.f32.mrb[6].mxu1  ;;  %v2924_v13 = vld [vmem:[#allocation2 + $0x17c] sm:$0x1]  ;;  %v3251_v11 = vrot.slane %v2927_v7, 5 }
 0x1eb   :  { %5165 = vmatprep.mubr.bf16.mxu0 %v13721_v34  ;;  %v4458_v40 = vpop.f32.mrb[7].mxu1 }
 0x1ec   :  { %v3243_v40 = vrot.slane %v3241_v20, 4 }
 0x1ee   :  { %4660 = vmatmul.mubr.bf16.gmra.mrb[108].mxu1 %v10325_v47  ;;  %v12253_v47 = vcombine.low %v3228_v9, %v3231_v51  ;;  %v3244_v9 = vrot.slane %v2924_v13, 5 }
 0x1ef   :  { %4667 = vmatprep.mubr.bf16.mxu1 %v12195_v4 }
 0x1f2   :  { %5166 = vmatmul.mubr.bf16.gmra.mrb[72].mxu0 %v11859_v45 }
 0x1f3   :  { %5173 = vmatprep.mubr.bf16.mxu0 %v13722_v49 }
 0x1f4   :  { %v12250_v42 = vpop.f32.mrb[8].mxu1 }
 0x1f5   :  { %v4463_v24 = vpop.f32.mrb[9].mxu1 }
 0x1f6   :  { %4668 = vmatmul.mubr.bf16.gmra.mrb[112].mxu1 %v10173_v23  ;;  %v12255_v10 = vpop.f32.mrb[10].mxu1  ;;  %v3245_v24 = vsel %vm10748_vm11, %v3243_v40, %v3244_v9 }
 0x1f7   :  { %4675 = vmatprep.mubr.bf16.mxu1 %v12205_v57  ;;  %v4466_v55 = vpop.f32.mrb[11].mxu1 }
 0x1f8   :  { %v13731_v55 = vld [vmem:[#allocation56_spill] sm:$0xff] }
 0x1fa   :  { %5174 = vmatmul.mubr.bf16.gmra.mrb[76].mxu0 %v11948_v39 }
 0x1fb   :  { %5181 = vmatprep.mubr.bf16.mxu0 %v13723_v37 }
 0x1fe   :  { %4676 = vmatmul.mubr.bf16.gmra.mrb[116].mxu1 %v10174_v6 }
 0x1ff   :  { %4683 = vmatprep.mubr.bf16.mxu1 %v12215_v60 }
 0x200   :  { %v12264_v33 = vpop.f32.mrb[12].mxu1 }
 0x201   :  { %13727 = vst [vmem:[#allocation61_spill] sm:$0xff] %v12264_v33  ;;  %v4471_v53 = vpop.f32.mrb[13].mxu1  ;;  %v1718_v33 = vld [vmem:[#allocation2 + $0x1a0] sm:$0x1] }
 0x202   :  { %5182 = vmatmul.mubr.bf16.gmra.mrb[80].mxu0 %v11962_v15  ;;  %v12269_v51 = vpop.f32.mrb[14].mxu1  ;;  %v2929_v53 = vld [vmem:[#allocation2 + $0x190] sm:$0xf] }
 0x203   :  { %5189 = vmatprep.mubr.bf16.mxu0 %v13724_v30  ;;  %13729 = vst [vmem:[#allocation38_spill] sm:$0xff] %v12269_v51 }
 0x206   :  { %4684 = vmatmul.mubr.bf16.gmra.mrb[120].mxu1 %v12224_v32 }
 0x207   :  { %4691 = vmatprep.mubr.bf16.mxu1 %v12227_v58 }
 0x20a   :  { %5190 = vmatmul.mubr.bf16.gmra.mrb[84].mxu0 %v12009_v61 }
 0x20b   :  { %5197 = vmatprep.mubr.bf16.mxu0 %v13725_v3 }
 0x20e   :  { %4692 = vmatmul.mubr.bf16.gmra.mrb[124].mxu1 %v12236_v54 }
 0x20f   :  { %4948 = vmatprep.mubr.bf16.mxu1 %v10173_v23  ;;  %v8899_v23 = vrot.slane %v2919_v12, 9  ;;  %v4474_v12 = vpop.f32.mrb[15].mxu1 }
 0x210   :  { %v12278_v50 = vpop.f32.mrb[16].mxu1  ;;  %v2928_v12 = vld [vmem:[#allocation2 + $0x18c] sm:$0xe] }
 0x211   :  { %v3235_v8 = vsel %vm10748_vm11, %v8899_v23, %v3234_v0  ;;  %v2926_v0 = vld [vmem:[#allocation2 + $0x184] sm:$0xf]  ;;  %13730 = vst [vmem:[#allocation62_spill] sm:$0xff] %v12278_v50  ;;  %v8902_v7 = vrot.slane %v2928_v12, 9 }
 0x212   :  { %5198 = vmatmul.mubr.bf16.gmra.mrb[88].mxu0 %v12054_v46  ;;  %v3248_v23 = vrot.slane %v2926_v0, 5  ;;  %v3255_v0 = vrot.slane %v2929_v53, 5 }
 0x213   :  { %5205 = vmatprep.mubr.bf16.mxu0 %v13726_v25 }
 0x216   :  { %4949 = vmatmul.mubr.bf16.vlgmr.msra.gmra.mrb[108].mxu1 %v12253_v47 }
 0x217   :  { %4956 = vmatprep.mubr.bf16.mxu1 %v10174_v6  ;;  %9527 = vmatpush3.bf16.msra.mxu1 %v12064_v17  ;;  %v12267_v6 = vcombine.low %v3235_v8, %v3238_v18  ;;  %v10183_v17 = vld [vmem:[#allocation12 + $0x218] sm:$0xff]   ;;  %v4479_v8 = vpop.f32.mrb[17].mxu1  ;;  %v8901_v18 = vrot.slane %v2925_v62, 9 }
 0x218   :  { %9528 = vmatprep.subr.bf16.mxu1 %v10181_v22  ;;  %v12283_v13 = vpop.f32.mrb[18].mxu1  ;;  %v3257_v8 = vrot.slane %v3255_v0, 4 }
 0x219   :  { %13732 = vst [vmem:[#allocation39_spill] sm:$0xff] %v12283_v13  ;;  %v3249_v40 = vsel %vm10748_vm11, %v8901_v18, %v3248_v23 }
 0x21a   :  { %5206 = vmatmul.mubr.bf16.gmra.mrb[92].mxu0 %v12095_v19 }
 0x21b   :  { %9529 = vmatpush3.bf16.msra.mxu1 %v10181_v22  ;;  %5213 = vmatprep.mubr.bf16.mxu0 %v13728_v27  ;;  %v3242_v22 = vsel %vm10748_vm11, %v8900_v56, %v3241_v20  ;;  %v3250_v20 = vrot.slane %v3248_v23, 4  ;;  %v4482_v56 = vpop.f32.mrb[19].mxu1 }
 0x21c   :  { %9530 = vmatprep.subr.bf16.mxu1 %v10182_v59  ;;  %v12294_v62 = vpop.f32.mrb[20].mxu1 }
 0x21d   :  { %v3252_v9 = vsel %vm10748_vm11, %v3250_v20, %v3251_v11  ;;  %13734 = vst [vmem:[#allocation40_spill] sm:$0xff] %v12294_v62  ;;  %v4487_v23 = vpop.f32.mrb[21].mxu1  ;;  %v13745_v62 = vld [vmem:[#allocation29_spill] sm:$0xff] }
 0x21e   :  { %4957 = vmatmul.mubr.bf16.gmra.mrb[112].mxu1 %v12267_v6  ;;  %v12299_v20 = vpop.f32.mrb[22].mxu1 }
 0x21f   :  { %4964 = vmatprep.mubr.bf16.mxu1 %v12224_v32  ;;  %9531 = vmatpush3.bf16.msra.mxu1 %v10182_v59  ;;  %v12281_v32 = vcombine.low %v3242_v22, %v3245_v24  ;;  %v10186_v59 = vld [vmem:[#allocation12 + $0x228] sm:$0xff]   ;;  %v2930_v22 = vld [vmem:[#allocation2 + $0x194] sm:$0x1]  ;;  %13735 = vst [vmem:[#allocation64_spill] sm:$0xff] %v12299_v20  ;;  %v4490_v11 = vpop.f32.mrb[23].mxu1 }
 0x220   :  { %9532 = vmatprep.subr.bf16.mxu1 %v10183_v17  ;;  %v12292_v24 = vld [vmem:[#allocation2 + $0x198] sm:$0xff]   ;;  %v3258_v18 = vrot.slane %v2930_v22, 5  ;;  %v12308_v56 = vpop.f32.mrb[24].mxu1  ;;  %v13738_v22 = vld [vmem:[#allocation25_spill] sm:$0xff] }
 0x221   :  { %13733 = vst [vmem:[#allocation63_spill] sm:$0xff] %v12292_v24  ;;  %13736 = vst [vmem:[#allocation41_spill] sm:$0xff] %v12308_v56  ;;  %v1716_v11 = vld [vmem:[#allocation2 + $0x198] sm:$0xf] }
 0x222   :  { %5214 = vmatmul.mubr.bf16.gmra.mrb[96].mxu0 %v12139_v48  ;;  %v3259_v53 = vsel %vm10748_vm11, %v3257_v8, %v3258_v18  ;;  %v13742_v18 = vld [vmem:[#allocation27_spill] sm:$0xff] }
 0x223   :  { %9533 = vmatpush3.bf16.msra.mxu1 %v10183_v17  ;;  %5221 = vmatprep.mubr.bf16.mxu0 %v13731_v55  ;;  %v10188_v17 = vld [vmem:[#allocation12 + $0x230] sm:$0xff]  }
 0x224   :  { %9534 = vmatprep.subr.bf16.mxu1 %v10185_v16 }
 0x226   :  { %4965 = vmatmul.mubr.bf16.gmra.mrb[116].mxu1 %v12281_v32 }
 0x227   :  { %4972 = vmatprep.mubr.bf16.mxu1 %v12236_v54  ;;  %9535 = vmatpush3.bf16.msra.mxu1 %v10185_v16  ;;  %v12297_v54 = vcombine.low %v3249_v40, %v3252_v9  ;;  %v10189_v16 = vld [vmem:[#allocation12 + $0x238] sm:$0xff]   ;;  %v4495_v9 = vpop.f32.mrb[25].mxu1 }
 0x228   :  { %9536 = vmatprep.subr.bf16.mxu1 %v10186_v59  ;;  %v12313_v12 = vpop.f32.mrb[26].mxu1 }
 0x229   :  { %13737 = vst [vmem:[#allocation43_spill] sm:$0xff] %v12313_v12 }
 0x22a   :  { %5222 = vmatmul.mubr.bf16.gmra.mrb[100].mxu0 %v12175_v43 }
 0x22b   :  { %9537 = vmatpush3.bf16.msra.mxu1 %v10186_v59  ;;  %5229 = vmatprep.mubr.bf16.mxu0 %v12253_v47  ;;  %v3256_v59 = vsel %vm10748_vm11, %v8902_v7, %v3255_v0  ;;  %v13741_v7 = vld [vmem:[#allocation26_spill] sm:$0xff] }
 0x22c   :  { %9538 = vmatprep.subr.bf16.mxu1 %v10188_v17  ;;  %v12311_v40 = vcombine.low %v3256_v59, %v3259_v53  ;;  %v1717_v59 = vld [vmem:[#allocation2 + $0x19c] sm:$0xf] }
 0x22d   :  { %v2932_v53 = vld [vmem:[#allocation2 + $0x19c] sm:$0xf] }
 0x22e   :  { %4973 = vmatmul.mubr.bf16.gmra.mrb[120].mxu1 %v12297_v54 }
 0x22f   :  { %4980 = vmatprep.mubr.bf16.mxu1 %v12292_v24  ;;  %9539 = vmatpush3.bf16.msra.mxu1 %v10188_v17  ;;  %v4498_v17 = vpop.f32.mrb[27].mxu1 }
 0x230   :  { %9540 = vmatprep.subr.bf16.mxu1 %v10189_v16  ;;  %v12318_v0 = vpop.f32.mrb[28].mxu1  ;;  %v2678_v17 = vshrl.u32 %v1716_v11, 16 }
 0x231   :  { %13739 = vst [vmem:[#allocation44_spill] sm:$0xff] %v12318_v0  ;;  %v2687_v0 = vshll.u32 %v1717_v59, 16 }
 0x232   :  { %5230 = vmatmul.mubr.bf16.gmra.mrb[104].mxu0 %v12185_v52  ;;  %v2680_v31 = vrot.slane %v2678_v17, 4 }
 0x233   :  { %9541 = vmatpush3.bf16.msra.mxu1 %v10189_v16  ;;  %5237 = vmatprep.mubr.bf16.mxu0 %v12267_v6  ;;  %v4503_v16 = vpop.f32.mrb[29].mxu1 }
 0x234   :  { %v12321_v23 = vpop.f32.mrb[30].mxu1  ;;  %v2691_v16 = vshrl.u32 %v1717_v59, 16 }
 0x235   :  { %13740 = vst [vmem:[#allocation47_spill] sm:$0xff] %v12321_v23  ;;  %v4506_v8 = vpop.f32.mrb[31].mxu1  ;;  %v3435_v23 = vrot.slane %v2932_v53, 5 }
 0x236   :  { %4981 = vmatmul.mubr.bf16.gmra.mrb[124].mxu1 %v12311_v40  ;;  %v12326_v9 = vpop.f32.mrb[32].mxu1  ;;  %v2933_v8 = vld [vmem:[#allocation2 + $0x1a0] sm:$0x1]  ;;  %v2693_v50 = vrot.slane %v2691_v16, 4 }
 0x237   :  { %9542 = vmatprep.mubr.bf16.mxu1 %v13738_v22  ;;  %13743 = vst [vmem:[#allocation50_spill] sm:$0xff] %v12326_v9  ;;  %v2681_v22 = vshll.u32 %v1716_v11, 16  ;;  %v4511_v12 = vpop.f32.mrb[33].mxu1  ;;  %v2689_v9 = vrot.slane %v2687_v0, 5  ;;  %v3437_v51 = vrot.slane %v3435_v23, 4  ;;  %v3438_v11 = vrot.slane %v2933_v8, 5 }
 0x238   :  { %v12329_v56 = vpop.f32.mrb[34].mxu1 }
 0x239   :  { %v4514_v20 = vpop.f32.mrb[35].mxu1  ;;  %v2683_v13 = vrot.slane %v2681_v22, 5  ;;  %v2694_v53 = vor.u32 %v2693_v50, %v2689_v9  ;;  %v3439_v0 = vsel %vm10748_vm11, %v3437_v51, %v3438_v11  ;;  %v13747_v22 = vld [vmem:[#allocation30_spill] sm:$0xff]  ;;  %v13749_v11 = vld [vmem:[#allocation32_spill] sm:$0xff] }
 0x23a   :  { %5238 = vmatmul.mubr.bf16.gmra.mrb[108].mxu0 %v12195_v4  ;;  %v12334_v12 = vpop.f32.mrb[36].mxu1 }
 0x23b   :  { %5245 = vmatprep.mubr.bf16.mxu0 %v12281_v32  ;;  %13746 = vst [vmem:[#allocation52_spill] sm:$0xff] %v12334_v12  ;;  %v2684_v59 = vor.u32 %v2683_v13, %v2680_v31  ;;  %v4519_v20 = vpop.f32.mrb[37].mxu1  ;;  %v2695_v31 = vrot.slane %v2694_v53, 4 }
 0x23c   :  { %v12341_v17 = vpop.f32.mrb[38].mxu1 }
 0x23d   :  { %v4522_v16 = vpop.f32.mrb[39].mxu1  ;;  %v2685_v12 = vrot.slane %v2684_v59, 4 }
 0x23e   :  { %9543 = vmatmul.mubr.bf16.vlgmr.msra.gmra.mrb[128].mxu1 %v13741_v7  ;;  %v2931_v7 = vld [vmem:[#allocation2 + $0x198] sm:$0xe] }
 0x23f   :  { %9546 = vmatprep.mubr.bf16.mxu1 %v13742_v18  ;;  %v13744_v18 = vld [vmem:[#allocation28_spill] sm:$0xff]  ;;  %v8936_v24 = vrot.slane %v2931_v7, 9  ;;  %v13748_v7 = vld [vmem:[#allocation31_spill] sm:$0xff]  ;;  %v2690_v51 = vsel %vm11302_vm14, %v2685_v12, %v2689_v9 }
 0x240   :  { %v13755_v16 = vld [vmem:[#allocation35_spill] sm:$0xff] }
 0x242   :  { %5246 = vmatmul.mubr.bf16.gmra.mrb[112].mxu0 %v12205_v57 }
 0x243   :  { %5253 = vmatprep.mubr.bf16.mxu0 %v12297_v54 }
 0x246   :  { %9547 = vmatmul.mubr.bf16.gmra.mrb[132].mxu1 %v13744_v18  ;;  %v2697_v18 = vshll.u32 %v1718_v33, 16  ;;  %v12348_v33 = vpop.f32.mrb[40].mxu1 }
 0x247   :  { %9550 = vmatprep.mubr.bf16.mxu1 %v13745_v62  ;;  %v3436_v62 = vsel %vm10748_vm11, %v8936_v24, %v3435_v23  ;;  %v4527_v24 = vpop.f32.mrb[41].mxu1 }
 0x248   :  { %v12345_v8 = vcombine.low %v3436_v62, %v3439_v0  ;;  %v2699_v50 = vrot.slane %v2697_v18, 5  ;;  %v12355_v23 = vpop.f32.mrb[42].mxu1  ;;  %v13750_v18 = vld [vmem:[#allocation33_spill] sm:$0xff]  ;;  %v13752_v62 = vld [vmem:[#allocation42_spill] sm:$0xff] }
 0x249   :  { %v4530_v59 = vpop.f32.mrb[43].mxu1  ;;  %v13754_v0 = vld [vmem:[#allocation34_spill] sm:$0xff] }
 0x24a   :  { %5254 = vmatmul.mubr.bf16.gmra.mrb[116].mxu0 %v12215_v60  ;;  %v2700_v13 = vsel %vm11302_vm14, %v2695_v31, %v2699_v50  ;;  %v12362_v20 = vpop.f32.mrb[44].mxu1  ;;  %v13757_v50 = vld [vmem:[#allocation45_spill] sm:$0xff] }
 0x24b   :  { %5261 = vmatprep.mubr.bf16.mxu0 %v12311_v40  ;;  %v12358_v53 = vcombine.low %v2690_v51, %v2700_v13  ;;  %13751 = vst [vmem:[#allocation54_spill] sm:$0xff] %v12362_v20  ;;  %v4535_v9 = vpop.f32.mrb[45].mxu1  ;;  %v2881_v51 = vld [vmem:[#allocation2 + $0xd0] sm:$0xf] }
 0x24c   :  { %v12365_v12 = vpop.f32.mrb[46].mxu1 }
 0x24d   :  { %13753 = vst [vmem:[#allocation56_spill] sm:$0xff] %v12365_v12 }
 0x24e   :  { %9551 = vmatmul.mubr.bf16.gmra.mrb[136].mxu1 %v13747_v22  ;;  %v4538_v22 = vpop.f32.mrb[47].mxu1 }
 0x24f   :  { %9554 = vmatprep.mubr.bf16.mxu1 %v13748_v7  ;;  %v10326_v7 = vld [vmem:[#allocation2 + $0x18] sm:$0xff]   ;;  %v12369_v31 = vpop.f32.mrb[48].mxu1  ;;  %v2882_v22 = vld [vmem:[#allocation2 + $0xd4] sm:$0x1] }
 0x250   :  { %13756 = vst [vmem:[#allocation25_spill] sm:$0xff] %v12369_v31  ;;  %v4543_v13 = vpop.f32.mrb[49].mxu1 }
 0x251   :  { %v12372_v24 = vpop.f32.mrb[50].mxu1  ;;  %v13761_v13 = vld [vmem:[#allocation46_spill] sm:$0xff] }
 0x252   :  { %5262 = vmatmul.mubr.bf16.gmra.mrb[120].mxu0 %v12227_v58  ;;  %13758 = vst [vmem:[#allocation26_spill] sm:$0xff] %v12372_v24  ;;  %v4546_v59 = vpop.f32.mrb[51].mxu1 }
 0x253   :  { %5269 = vmatprep.mubr.bf16.mxu0 %v12345_v8  ;;  %v12376_v9 = vpop.f32.mrb[52].mxu1 }
 0x256   :  { %9555 = vmatmul.mubr.bf16.gmra.mrb[140].mxu1 %v13749_v11  ;;  %v13759_v11 = vld [vmem:[#allocation36_spill] sm:$0xff] }
 0x257   :  { %9558 = vmatprep.mubr.bf16.mxu1 %v13750_v18  ;;  %v13760_v18 = vld [vmem:[#allocation37_spill] sm:$0xff] }
 0x25a   :  { %5270 = vmatmul.mubr.bf16.gmra.mrb[124].mxu0 %v12358_v53 }
 0x25b   :  { %5310 = vmatprep.mubr.bf16.mxu0 %v13752_v62  ;;  %v3488_v62 = vrot.slane %v2881_v51, 5 }
 0x25d   :  { %v3490_v12 = vrot.slane %v3488_v62, 4 }
 0x25e   :  { %9559 = vmatmul.mubr.bf16.gmra.mrb[144].mxu1 %v13754_v0  ;;  %v2880_v0 = vld [vmem:[#allocation2 + $0xcc] sm:$0xe] }
 0x25f   :  { %9562 = vmatprep.mubr.bf16.mxu1 %v13755_v16  ;;  %v4551_v16 = vpop.f32.mrb[53].mxu1  ;;  %v8939_v31 = vrot.slane %v2880_v0, 9 }
 0x260   :  { %v12378_v20 = vpop.f32.mrb[54].mxu1 }
 0x261   :  { %v4554_v24 = vpop.f32.mrb[55].mxu1  ;;  %v3489_v59 = vsel %vm10748_vm11, %v8939_v31, %v3488_v62 }
 0x262   :  { %5311 = vmatmul.mubr.bf16.vlgmr.msra.gmra.mrb[0].mxu0 %v10326_v7  ;;  %v10327_v7 = vld [vmem:[#allocation2 + $0x24] sm:$0xff]  }
 0x263   :  { %5318 = vmatprep.mubr.bf16.mxu0 %v13757_v50  ;;  %v3491_v50 = vrot.slane %v2882_v22, 5 }
 0x266   :  { %9563 = vmatmul.mubr.bf16.gmra.mrb[148].mxu1 %v13759_v11  ;;  %v12381_v11 = vpop.f32.mrb[56].mxu1 }
 0x267   :  { %9566 = vmatprep.mubr.bf16.mxu1 %v13760_v18  ;;  %13762 = vst [vmem:[#allocation27_spill] sm:$0xff] %v12381_v11  ;;  %v4559_v51 = vpop.f32.mrb[57].mxu1  ;;  %v3492_v18 = vsel %vm10748_vm11, %v3490_v12, %v3491_v50 }
 0x268   :  { %v12389_v0 = vpop.f32.mrb[58].mxu1 }
 0x269   :  { %v4562_v22 = vpop.f32.mrb[59].mxu1 }
 0x26a   :  { %5319 = vmatmul.mubr.bf16.gmra.mrb[4].mxu0 %v10327_v7  ;;  %v12391_v16 = vpop.f32.mrb[60].mxu1  ;;  %v8941_v7 = vcombine.low %v3489_v59, %v3492_v18  ;;  %v10329_v18 = vld [vmem:[#allocation2 + $0x3c] sm:$0xff]  }
 0x26b   :  { %5326 = vmatprep.mubr.bf16.mxu0 %v13761_v13  ;;  %v4567_v24 = vpop.f32.mrb[61].mxu1  ;;  %v10328_v13 = vld [vmem:[#allocation2 + $0x30] sm:$0xff]  }
 0x26c   :  { %v12393_v11 = vpop.f32.mrb[62].mxu1  ;;  %v13767_v24 = vld [vmem:[#allocation49_spill] sm:$0xff] }
 0x26e   :  { %9567 = vmatmul.mubr.bf16.gmra.mrb[152].mxu1 %v13709_v41  ;;  %v13763_v41 = vld [vmem:[#allocation48_spill] sm:$0xff] }
 0x26f   :  { %9570 = vmatprep.mubr.bf16.mxu1 %v12135_v38  ;;  %v4570_v38 = vpop.f32.mrb[63].mxu1 }
 0x270   :  { %v12396_v51 = vpop.f32.mrb[64].mxu1 }
 0x271   :  { %v4575_v31 = vpop.f32.mrb[65].mxu1 }
 0x272   :  { %5327 = vmatmul.mubr.bf16.gmra.mrb[8].mxu0 %v10328_v13  ;;  %v12399_v12 = vpop.f32.mrb[66].mxu1 }
 0x273   :  { %5334 = vmatprep.mubr.bf16.mxu0 %v13763_v41  ;;  %13764 = vst [vmem:[#allocation28_spill] sm:$0xff] %v12399_v12  ;;  %v4578_v62 = vpop.f32.mrb[67].mxu1 }
 0x274   :  { %v12401_v50 = vpop.f32.mrb[68].mxu1 }
 0x275   :  { %13765 = vst [vmem:[#allocation29_spill] sm:$0xff] %v12401_v50  ;;  %v4583_v59 = vpop.f32.mrb[69].mxu1 }
 0x276   :  { %9571 = vmatmul.mubr.bf16.gmra.mrb[156].mxu1 %v8941_v7  ;;  %v12403_v22 = vpop.f32.mrb[70].mxu1  ;;  %v10330_v59 = vld [vmem:[#allocation2 + $0x48] sm:$0xff]  }
 0x277   :  { %9574 = vmatprep.mubr.bf16.mxu1 %v13719_v14  ;;  %13766 = vst [vmem:[#allocation30_spill] sm:$0xff] %v12403_v22  ;;  %v4586_v13 = vpop.f32.mrb[71].mxu1  ;;  %v13772_v22 = vld [vmem:[#allocation51_spill] sm:$0xff] }
 0x278   :  { %v10331_v13 = vld [vmem:[#allocation2 + $0x54] sm:$0xff]  }
 0x279   :  { %v12406_v41 = vpop.f32.mrb[72].mxu1 }
 0x27a   :  { %5335 = vmatmul.mubr.bf16.gmra.mrb[12].mxu0 %v10329_v18  ;;  %13768 = vst [vmem:[#allocation31_spill] sm:$0xff] %v12406_v41  ;;  %v4591_v7 = vpop.f32.mrb[73].mxu1 }
 0x27b   :  { %5342 = vmatprep.mubr.bf16.mxu0 %v13767_v24  ;;  %v12410_v14 = vpop.f32.mrb[74].mxu1 }
 0x27c   :  { %13769 = vst [vmem:[#allocation32_spill] sm:$0xff] %v12410_v14  ;;  %v4594_v38 = vpop.f32.mrb[75].mxu1 }
 0x27d   :  { %v13775_v38 = vld [vmem:[#allocation53_spill] sm:$0xff] }
 0x27e   :  { %9575 = vmatmul.mubr.bf16.gmra.mrb[160].mxu1 %v13721_v34 }
 0x27f   :  { %9578 = vmatprep.mubr.bf16.mxu1 %v13722_v49 }
 0x281   :  { %v12412_v31 = vpop.f32.mrb[76].mxu1 }
 0x282   :  { %13770 = vst [vmem:[#allocation33_spill] sm:$0xff] %v12412_v31  ;;  %v4599_v62 = vpop.f32.mrb[77].mxu1  ;;  %5343 = vmatmul.mubr.bf16.gmra.mrb[16].mxu0 %v10330_v59  ;;  %v10352_v31 = vld [vmem:[#allocation2 + $0x174] sm:$0xff]  }
 0x283   :  { %v12414_v18 = vpop.f32.mrb[78].mxu1  ;;  %5350 = vmatprep.mubr.bf16.mxu0 %v13772_v22 }
 0x284   :  { %13771 = vst [vmem:[#allocation42_spill] sm:$0xff] %v12414_v18  ;;  %v4602_v24 = vpop.f32.mrb[79].mxu1 }
 0x285   :  { %v13778_v24 = vld [vmem:[#allocation55_spill] sm:$0xff] }
 0x286   :  { %9579 = vmatmul.mubr.bf16.gmra.mrb[164].mxu1 %v13723_v37  ;;  %v10332_v37 = vld [vmem:[#allocation2 + $0x60] sm:$0xff]  }
 0x287   :  { %9582 = vmatprep.mubr.bf16.mxu1 %v13724_v30 }
 0x289   :  { %v12419_v34 = vpop.f32.mrb[80].mxu1 }
 0x28a   :  { %13773 = vst [vmem:[#allocation34_spill] sm:$0xff] %v12419_v34  ;;  %v4607_v49 = vpop.f32.mrb[81].mxu1  ;;  %5351 = vmatmul.mubr.bf16.gmra.mrb[20].mxu0 %v10331_v13 }
 0x28b   :  { %v12421_v7 = vpop.f32.mrb[82].mxu1  ;;  %5358 = vmatprep.mubr.bf16.mxu0 %v13775_v38 }
 0x28c   :  { %13774 = vst [vmem:[#allocation35_spill] sm:$0xff] %v12421_v7  ;;  %v4610_v62 = vpop.f32.mrb[83].mxu1 }
 0x28d   :  { %v13781_v62 = vld [vmem:[#allocation57_spill] sm:$0xff] }
 0x28e   :  { %9583 = vmatmul.mubr.bf16.gmra.mrb[168].mxu1 %v13725_v3  ;;  %v10333_v3 = vld [vmem:[#allocation2 + $0x6c] sm:$0xff]  }
 0x28f   :  { %9586 = vmatprep.mubr.bf16.mxu1 %v13726_v25 }
 0x291   :  { %v12426_v22 = vpop.f32.mrb[84].mxu1 }
 0x292   :  { %13776 = vst [vmem:[#allocation45_spill] sm:$0xff] %v12426_v22  ;;  %v4615_v59 = vpop.f32.mrb[85].mxu1  ;;  %5359 = vmatmul.mubr.bf16.gmra.mrb[24].mxu0 %v10332_v37 }
 0x293   :  { %v12428_v30 = vpop.f32.mrb[86].mxu1  ;;  %5366 = vmatprep.mubr.bf16.mxu0 %v13778_v24 }
 0x294   :  { %13777 = vst [vmem:[#allocation36_spill] sm:$0xff] %v12428_v30  ;;  %v4618_v49 = vpop.f32.mrb[87].mxu1 }
 0x295   :  { %v13784_v49 = vld [vmem:[#allocation58_spill] sm:$0xff] }
 0x296   :  { %9587 = vmatmul.mubr.bf16.gmra.mrb[172].mxu1 %v13728_v27  ;;  %v10334_v27 = vld [vmem:[#allocation2 + $0x78] sm:$0xff]  }
 0x297   :  { %9590 = vmatprep.mubr.bf16.mxu1 %v13731_v55 }
 0x299   :  { %v12433_v13 = vpop.f32.mrb[88].mxu1 }
 0x29a   :  { %13779 = vst [vmem:[#allocation37_spill] sm:$0xff] %v12433_v13  ;;  %v4623_v38 = vpop.f32.mrb[89].mxu1  ;;  %5367 = vmatmul.mubr.bf16.gmra.mrb[28].mxu0 %v10333_v3 }
 0x29b   :  { %v12435_v25 = vpop.f32.mrb[90].mxu1  ;;  %5374 = vmatprep.mubr.bf16.mxu0 %v13781_v62 }
 0x29c   :  { %13780 = vst [vmem:[#allocation46_spill] sm:$0xff] %v12435_v25  ;;  %v4626_v59 = vpop.f32.mrb[91].mxu1  ;;  %v1667_v25 = vld [vmem:[#allocation2 + $0xd4] sm:$0x1] }
 0x29d   :  { %v13787_v59 = vld [vmem:[#allocation59_spill] sm:$0xff]  ;;  %v2761_v13 = vshll.u32 %v1667_v25, 16 }
 0x29e   :  { %9591 = vmatmul.mubr.bf16.gmra.mrb[176].mxu1 %v12253_v47  ;;  %v10335_v47 = vld [vmem:[#allocation2 + $0x84] sm:$0xff]  }
 0x29f   :  { %9594 = vmatprep.mubr.bf16.mxu1 %v12267_v6 }
 0x2a1   :  { %v12440_v37 = vpop.f32.mrb[92].mxu1 }
 0x2a2   :  { %13782 = vst [vmem:[#allocation48_spill] sm:$0xff] %v12440_v37  ;;  %v4631_v24 = vpop.f32.mrb[93].mxu1  ;;  %5375 = vmatmul.mubr.bf16.gmra.mrb[32].mxu0 %v10334_v27 }
 0x2a3   :  { %v12442_v55 = vpop.f32.mrb[94].mxu1  ;;  %5382 = vmatprep.mubr.bf16.mxu0 %v13784_v49 }
 0x2a4   :  { %13783 = vst [vmem:[#allocation49_spill] sm:$0xff] %v12442_v55  ;;  %v4634_v38 = vpop.f32.mrb[95].mxu1 }
 0x2a5   :  { %v13790_v38 = vld [vmem:[#allocation60_spill] sm:$0xff] }
 0x2a6   :  { %9595 = vmatmul.mubr.bf16.gmra.mrb[180].mxu1 %v12281_v32  ;;  %v10336_v32 = vld [vmem:[#allocation2 + $0x90] sm:$0xff]  }
 0x2a7   :  { %9598 = vmatprep.mubr.bf16.mxu1 %v12297_v54 }
 0x2a9   :  { %v12447_v3 = vpop.f32.mrb[96].mxu1 }
 0x2aa   :  { %13785 = vst [vmem:[#allocation51_spill] sm:$0xff] %v12447_v3  ;;  %v4639_v62 = vpop.f32.mrb[97].mxu1  ;;  %5383 = vmatmul.mubr.bf16.gmra.mrb[36].mxu0 %v10335_v47  ;;  %v1666_v3 = vld [vmem:[#allocation2 + $0xd0] sm:$0xf] }
 0x2ab   :  { %v12449_v6 = vpop.f32.mrb[98].mxu1  ;;  %5390 = vmatprep.mubr.bf16.mxu0 %v13787_v59  ;;  %v2755_v55 = vshrl.u32 %v1666_v3, 16 }
 0x2ac   :  { %13786 = vst [vmem:[#allocation53_spill] sm:$0xff] %v12449_v6  ;;  %v4642_v24 = vpop.f32.mrb[99].mxu1  ;;  %v1665_v6 = vld [vmem:[#allocation2 + $0xcc] sm:$0xf] }
 0x2ad   :  { %v10337_v24 = vld [vmem:[#allocation2 + $0x9c] sm:$0xff]  }
 0x2ae   :  { %9599 = vmatmul.mubr.bf16.gmra.mrb[184].mxu1 %v12311_v40 }
 0x2af   :  { %9602 = vmatprep.mubr.bf16.mxu1 %v12345_v8 }
 0x2b1   :  { %v12454_v27 = vpop.f32.mrb[100].mxu1 }
 0x2b2   :  { %13788 = vst [vmem:[#allocation55_spill] sm:$0xff] %v12454_v27  ;;  %v4647_v49 = vpop.f32.mrb[101].mxu1  ;;  %5391 = vmatmul.mubr.bf16.gmra.mrb[40].mxu0 %v10336_v32  ;;  %v2745_v27 = vshll.u32 %v1665_v6, 16  ;;  %v2751_v32 = vshll.u32 %v1666_v3, 16  ;;  %v2935_v3 = vld [vmem:[#allocation2 + $0x1a8] sm:$0xf] }
 0x2b3   :  { %v12456_v54 = vpop.f32.mrb[102].mxu1  ;;  %5398 = vmatprep.mubr.bf16.mxu0 %v13790_v38  ;;  %v2742_v49 = vshrl.u32 %v1665_v6, 16 }
 0x2b4   :  { %13789 = vst [vmem:[#allocation57_spill] sm:$0xff] %v12456_v54  ;;  %v4650_v62 = vpop.f32.mrb[103].mxu1  ;;  %v2747_v37 = vrot.slane %v2745_v27, 5  ;;  %v2753_v38 = vrot.slane %v2751_v32, 5  ;;  %v3495_v27 = vrot.slane %v2935_v3, 5  ;;  %v10191_v32 = vld [vmem:[#allocation14 + $0x40] sm:$0xff]  }
 0x2b5   :  { %v2744_v54 = vrot.slane %v2742_v49, 4  ;;  %v2757_v62 = vrot.slane %v2755_v55, 4  ;;  %9244 = vmatprep.subr.bf16.mxu1 %v10191_v32  ;;  %v6184_v32 = vld [vmem:[#allocation5 + $0x10] sm:$0x1] }
 0x2b9   :  { %v12459_v47 = vpop.f32.mrb[104].mxu1 }
 0x2ba   :  { %13791 = vst [vmem:[#allocation58_spill] sm:$0xff] %v12459_v47  ;;  %v4655_v59 = vpop.f32.mrb[105].mxu1  ;;  %5399 = vmatmul.mubr.bf16.gmra.mrb[44].mxu0 %v10337_v24  ;;  %v10338_v47 = vld [vmem:[#allocation2 + $0xa8] sm:$0xff]   ;;  %v2758_v24 = vor.u32 %v2757_v62, %v2753_v38 }
 0x2bb   :  { %v12461_v40 = vpop.f32.mrb[106].mxu1  ;;  %5406 = vmatprep.mubr.bf16.mxu0 %v13708_v35  ;;  %v2748_v59 = vor.u32 %v2747_v37, %v2744_v54  ;;  %v2763_v35 = vrot.slane %v2761_v13, 5  ;;  %v3497_v54 = vrot.slane %v3495_v27, 4  ;;  %v10192_v13 = vld [vmem:[#allocation14] sm:$0xff]  }
 0x2bc   :  { %13792 = vst [vmem:[#allocation59_spill] sm:$0xff] %v12461_v40  ;;  %v4658_v8 = vpop.f32.mrb[107].mxu1  ;;  %v2759_v30 = vrot.slane %v2758_v24, 4  ;;  %9245 = vmatpush3.bf16.msra.mxu1 %v10192_v13  ;;  %v6185_v13 = vsel %vm10627_vm2, 0, %v6184_v32 }
 0x2bd   :  { %v2749_v40 = vrot.slane %v2748_v59, 4  ;;  %v10339_v8 = vld [vmem:[#allocation2 + $0xb4] sm:$0xff]   ;;  %v6205_v59 = vld [vmem:[#allocation5 + $0xc] sm:$0x1]  ;;  %6186 = vst [vmem:[#allocation5 + $0x10] sm:$0x1] %v6185_v13 }
 0x2be   :  { %v2764_v55 = vsel %vm11302_vm14, %v2759_v30, %v2763_v35  ;;  %v6181_v30 = vld [vmem:[#allocation5 + $0x8] sm:$0x1]  ;;  %v6206_v3 = vsel %vm10644_vm7, 0, %v6205_v59  ;;  %v10205_v59 = vld [vmem:[#allocation14 + $0x30] sm:$0xff]  }
 0x2bf   :  { %v2754_v6 = vsel %vm11302_vm14, %v2749_v40, %v2753_v38  ;;  %v10340_v38 = vld [vmem:[#allocation2 + $0xc0] sm:$0xff]   ;;  %v6182_v24 = vsel %vm10627_vm2, 0, %v6181_v30  ;;  %v10193_v35 = vld [vmem:[#allocation14 + $0x48] sm:$0xff]   ;;  %6207 = vst [vmem:[#allocation5 + $0xc] sm:$0x1] %v6206_v3 }
 0x2c0   :  { %v8869_v49 = vcombine.low %v2754_v6, %v2764_v55  ;;  %6183 = vst [vmem:[#allocation5 + $0x8] sm:$0x1] %v6182_v24  ;;  %v10194_v6 = vld [vmem:[#allocation14 + $0x8] sm:$0xff]   ;;  %9246 = vmatprep.subr.bf16.mxu1 %v10193_v35  ;;  %v10190_v55 = vld [vmem:[#allocation2 + $0xcc] sm:$0xff]  }
 0x2c1   :  { %9247 = vmatpush3.bf16.msra.mxu1 %v10194_v6  ;;  %v10206_v6 = vld [vmem:[#allocation14 + $0x78] sm:$0xff]  }
 0x2c2   :  { %5407 = vmatmul.mubr.bf16.gmra.mrb[48].mxu0 %v10338_v47  ;;  %v2934_v47 = vld [vmem:[#allocation2 + $0x1a4] sm:$0xe] }
 0x2c3   :  { %5414 = vmatprep.mubr.bf16.mxu0 %v13714_v63  ;;  %v2936_v63 = vld [vmem:[#allocation2 + $0x1ac] sm:$0x1]  ;;  %v8940_v37 = vrot.slane %v2934_v47, 9  ;;  %v10197_v47 = vld [vmem:[#allocation14 + $0x10] sm:$0xff]  }
 0x2c4   :  { %v3498_v25 = vrot.slane %v2936_v63, 5  ;;  %v10198_v63 = vld [vmem:[#allocation14 + $0x58] sm:$0xff]  }
 0x2c5   :  { %v3496_v62 = vsel %vm10748_vm11, %v8940_v37, %v3495_v27  ;;  %v10195_v27 = vld [vmem:[#allocation14 + $0x50] sm:$0xff]   ;;  %v10199_v37 = vld [vmem:[#allocation14 + $0x18] sm:$0xff]  }
 0x2c6   :  { %9248 = vmatprep.subr.bf16.mxu1 %v10195_v27 }
 0x2c7   :  { %9249 = vmatpush3.bf16.msra.mxu1 %v10197_v47 }
 0x2c8   :  { %9250 = vmatprep.subr.bf16.mxu1 %v10198_v63  ;;  %v10343_v63 = vld [vmem:[#allocation2 + $0x108] sm:$0xff]  }
 0x2ca   :  { %5415 = vmatmul.mubr.bf16.gmra.mrb[52].mxu0 %v10339_v8 }
 0x2cb   :  { %5422 = vmatprep.mubr.bf16.mxu0 %v12137_v21  ;;  %v3499_v21 = vsel %vm10748_vm11, %v3497_v54, %v3498_v25  ;;  %9251 = vmatpush3.bf16.msra.mxu1 %v10199_v37  ;;  %v10200_v54 = vld [vmem:[#allocation14 + $0x60] sm:$0xff]  }
 0x2cc   :  { %v8942_v40 = vcombine.low %v3496_v62, %v3499_v21  ;;  %v10201_v25 = vld [vmem:[#allocation14 + $0x20] sm:$0xff]   ;;  %9252 = vmatprep.subr.bf16.mxu1 %v10200_v54  ;;  %v10202_v62 = vld [vmem:[#allocation14 + $0x68] sm:$0xff]   ;;  %v6187_v54 = vld [vmem:[#allocation5 + $0x18] sm:$0x1] }
 0x2cd   :  { %v10203_v21 = vld [vmem:[#allocation14 + $0x28] sm:$0xff]  }
 0x2ce   :  { %9603 = vmatmul.mubr.bf16.gmra.mrb[188].mxu1 %v8942_v40 }
 0x2cf   :  { %9253 = vmatpush3.bf16.msra.mxu1 %v10201_v25 }
 0x2d0   :  { %9254 = vmatprep.subr.bf16.mxu1 %v10202_v62 }
 0x2d2   :  { %5423 = vmatmul.mubr.bf16.gmra.mrb[56].mxu0 %v10340_v38  ;;  %v10204_v38 = vld [vmem:[#allocation14 + $0x70] sm:$0xff]  }
 0x2d3   :  { %5430 = vmatprep.mubr.bf16.mxu0 %v8869_v49  ;;  %v10341_v49 = vld [vmem:[#allocation2 + $0xf0] sm:$0xff]   ;;  %9255 = vmatpush3.bf16.msra.mxu1 %v10203_v21 }
 0x2d4   :  { %9256 = vmatprep.subr.bf16.mxu1 %v10204_v38  ;;  %v10344_v21 = vld [vmem:[#allocation2 + $0x114] sm:$0xff]  }
 0x2d7   :  { %9257 = vmatpush3.bf16.msra.mxu1 %v10205_v59  ;;  %v10345_v59 = vld [vmem:[#allocation2 + $0x120] sm:$0xff]  }
 0x2d8   :  { %9258 = vmatprep.subr.bf16.mxu1 %v10206_v6 }
 0x2da   :  { %5431 = vmatmul.mubr.bf16.gmra.mrb[60].mxu0 %v10190_v55  ;;  %v10207_v55 = vld [vmem:[#allocation14 + $0x38] sm:$0xff]  }
 0x2db   :  { %5438 = vmatprep.mubr.bf16.mxu0 %v13720_v29  ;;  %v6208_v29 = vld [vmem:[#allocation5 + $0x14] sm:$0x1]  ;;  %9259 = vmatpush3.bf16.msra.mxu1 %v10207_v55  ;;  %v6214_v55 = vld [vmem:[#allocation5 + $0x24] sm:$0x1] }
 0x2dc   :  { %v6209_v40 = vsel %vm10644_vm7, 0, %v6208_v29 }
 0x2dd   :  { %6210 = vst [vmem:[#allocation5 + $0x14] sm:$0x1] %v6209_v40 }
 0x2e2   :  { %5439 = vmatmul.mubr.bf16.gmra.mrb[64].mxu0 %v10341_v49  ;;  %v6188_v49 = vsel %vm10627_vm2, 0, %v6187_v54  ;;  %v10346_v54 = vld [vmem:[#allocation2 + $0x12c] sm:$0xff]  }
 0x2e3   :  { %5446 = vmatprep.mubr.bf16.mxu0 %v11859_v45  ;;  %v10342_v45 = vld [vmem:[#allocation2 + $0xfc] sm:$0xff]   ;;  %6189 = vst [vmem:[#allocation5 + $0x18] sm:$0x1] %v6188_v49 }
 0x2e9   :  { %v12484_v30 = vpop.f32.mrb[108].mxu1 }
 0x2ea   :  { %13794 = vst [vmem:[#allocation60_spill] sm:$0xff] %v12484_v30  ;;  %v4952_v24 = vpop.f32.mrb[109].mxu1  ;;  %5447 = vmatmul.mubr.bf16.gmra.mrb[68].mxu0 %v10342_v45  ;;  %v6190_v45 = vld [vmem:[#allocation5 + $0x20] sm:$0x1] }
 0x2eb   :  { %v12486_v35 = vpop.f32.mrb[110].mxu1  ;;  %5454 = vmatprep.mubr.bf16.mxu0 %v11948_v39  ;;  %v6211_v39 = vld [vmem:[#allocation5 + $0x1c] sm:$0x1]  ;;  %v6191_v6 = vsel %vm10627_vm2, 0, %v6190_v45 }
 0x2ec   :  { %13795 = vst [vmem:[#allocation22_spill] sm:$0xff] %v12486_v35  ;;  %v4955_v3 = vpop.f32.mrb[111].mxu1  ;;  %v6212_v32 = vsel %vm10644_vm7, 0, %v6211_v39  ;;  %6192 = vst [vmem:[#allocation5 + $0x20] sm:$0x1] %v6191_v6  ;;  %v10348_v6 = vld [vmem:[#allocation2 + $0x144] sm:$0xff]  }
 0x2ed   :  { %6213 = vst [vmem:[#allocation5 + $0x1c] sm:$0x1] %v6212_v32  ;;  %v10347_v32 = vld [vmem:[#allocation2 + $0x138] sm:$0xff]  }
 0x2f1   :  { %v12489_v27 = vpop.f32.mrb[112].mxu1 }
 0x2f2   :  { %13796 = vst [vmem:[#allocation65_spill] sm:$0xff] %v12489_v27  ;;  %v4960_v47 = vpop.f32.mrb[113].mxu1  ;;  %5455 = vmatmul.mubr.bf16.gmra.mrb[72].mxu0 %v10343_v63 }
 0x2f3   :  { %v12491_v37 = vpop.f32.mrb[114].mxu1  ;;  %5462 = vmatprep.mubr.bf16.mxu0 %v11962_v15 }
 0x2f4   :  { %13797 = vst [vmem:[#allocation66_spill] sm:$0xff] %v12491_v37  ;;  %v4963_v25 = vpop.f32.mrb[115].mxu1 }
 0x2f9   :  { %v12498_v13 = vpop.f32.mrb[116].mxu1 }
 0x2fa   :  { %13798 = vst [vmem:[#allocation67_spill] sm:$0xff] %v12498_v13  ;;  %v4968_v62 = vpop.f32.mrb[117].mxu1  ;;  %5463 = vmatmul.mubr.bf16.gmra.mrb[76].mxu0 %v10344_v21  ;;  %v6193_v21 = vld [vmem:[#allocation5 + $0x28] sm:$0x1] }
 0x2fb   :  { %v12500_v29 = vpop.f32.mrb[118].mxu1  ;;  %5470 = vmatprep.mubr.bf16.mxu0 %v12009_v61  ;;  %v6215_v61 = vsel %vm10644_vm7, 0, %v6214_v55 }
 0x2fc   :  { %13799 = vst [vmem:[#allocation68_spill] sm:$0xff] %v12500_v29  ;;  %v4971_v15 = vpop.f32.mrb[119].mxu1  ;;  %6216 = vst [vmem:[#allocation5 + $0x24] sm:$0x1] %v6215_v61 }
 0x301   :  { %v12503_v40 = vpop.f32.mrb[120].mxu1 }
 0x302   :  { %13800 = vst [vmem:[#allocation69_spill] sm:$0xff] %v12503_v40  ;;  %v4976_v38 = vpop.f32.mrb[121].mxu1  ;;  %5471 = vmatmul.mubr.bf16.gmra.mrb[80].mxu0 %v10345_v59  ;;  %v6217_v59 = vld [vmem:[#allocation5 + $0x2c] sm:$0x1]  ;;  %v6223_v40 = vld [vmem:[#allocation5 + $0x3c] sm:$0x1] }
 0x303   :  { %v12505_v24 = vpop.f32.mrb[122].mxu1  ;;  %5478 = vmatprep.mubr.bf16.mxu0 %v12054_v46  ;;  %v6194_v38 = vsel %vm10627_vm2, 0, %v6193_v21  ;;  %v6224_v13 = vsel %vm10644_vm7, 0, %v6223_v40 }
 0x304   :  { %13801 = vst [vmem:[#allocation70_spill] sm:$0xff] %v12505_v24  ;;  %v4979_v3 = vpop.f32.mrb[123].mxu1  ;;  %6195 = vst [vmem:[#allocation5 + $0x28] sm:$0x1] %v6194_v38 }
 0x305   :  { %6225 = vst [vmem:[#allocation5 + $0x3c] sm:$0x1] %v6224_v13 }
 0x309   :  { %v12512_v47 = vpop.f32.mrb[124].mxu1 }
 0x30a   :  { %13802 = vst [vmem:[#allocation71_spill] sm:$0xff] %v12512_v47  ;;  %v4984_v63 = vpop.f32.mrb[125].mxu1  ;;  %5479 = vmatmul.mubr.bf16.gmra.mrb[84].mxu0 %v10346_v54  ;;  %v10349_v54 = vld [vmem:[#allocation2 + $0x150] sm:$0xff]  }
 0x30b   :  { %v12514_v25 = vpop.f32.mrb[126].mxu1  ;;  %5486 = vmatprep.mubr.bf16.mxu0 %v12095_v19  ;;  %v6218_v19 = vsel %vm10644_vm7, 0, %v6217_v59 }
 0x30c   :  { %13803 = vst [vmem:[#allocation72_spill] sm:$0xff] %v12514_v25  ;;  %v4987_v46 = vpop.f32.mrb[127].mxu1  ;;  %6219 = vst [vmem:[#allocation5 + $0x2c] sm:$0x1] %v6218_v19 }
 0x311   :  { %v12517_v49 = vpop.f32.mrb[128].mxu1 }
 0x312   :  { %v5601_v39 = vpop.f32.mrb[129].mxu1  ;;  %5487 = vmatmul.mubr.bf16.gmra.mrb[88].mxu0 %v10347_v32  ;;  %v6196_v32 = vld [vmem:[#allocation5 + $0x30] sm:$0x1] }
 0x313   :  { %v12519_v62 = vpop.f32.mrb[130].mxu1  ;;  %5494 = vmatprep.mubr.bf16.mxu0 %v12139_v48  ;;  %v6197_v38 = vsel %vm10627_vm2, 0, %v6196_v32  ;;  %v12562_v32 = vld [vmem:[%s13544_s2] ss:$0 sm:$0xff] }
 0x314   :  { %v5604_v15 = vpop.f32.mrb[131].mxu1  ;;  %6198 = vst [vmem:[#allocation5 + $0x30] sm:$0x1] %v6197_v38  ;;  %v4446_v24 = vadd.f32 %v12562_v32, %v12229_v28  ;;  %v4449_v27 = vadd.f32 %v12562_v32, %v12232_v44  ;;  %v1720_v28 = vld [vmem:[#allocation2 + $0x1a8] sm:$0xf] }
 0x315   :  { %v2775_v40 = vshll.u32 %v1720_v28, 16 }
 0x317   :  { %v2777_v14 = vrot.slane %v2775_v40, 5 }
 0x319   :  { %v12526_v45 = vpop.f32.mrb[132].mxu1 }
 0x31a   :  { %v12528_v3 = vpop.f32.mrb[133].mxu1  ;;  %5495 = vmatmul.mubr.bf16.gmra.mrb[92].mxu0 %v10348_v6 }
 0x31b   :  { %v12530_v55 = vpop.f32.mrb[134].mxu1  ;;  %5502 = vmatprep.mubr.bf16.mxu0 %v12175_v43  ;;  %v6220_v43 = vld [vmem:[#allocation5 + $0x34] sm:$0x1] }
 0x31c   :  { %v12533_v48 = vpop.f32.mrb[135].mxu1  ;;  %v6221_v59 = vsel %vm10644_vm7, 0, %v6220_v43  ;;  %v10351_v43 = vld [vmem:[#allocation2 + $0x168] sm:$0xff]  }
 0x31d   :  { %6222 = vst [vmem:[#allocation5 + $0x34] sm:$0x1] %v6221_v59 }
 0x321   :  { %v12535_v61 = vpop.f32.mrb[136].mxu1 }
 0x322   :  { %v12537_v63 = vpop.f32.mrb[137].mxu1  ;;  %5503 = vmatmul.mubr.bf16.gmra.mrb[96].mxu0 %v10349_v54  ;;  %v10350_v54 = vld [vmem:[#allocation2 + $0x15c] sm:$0xff]  }
 0x323   :  { %v12539_v46 = vpop.f32.mrb[138].mxu1  ;;  %5510 = vmatprep.mubr.bf16.mxu0 %v12185_v52 }
 0x324   :  { %v12542_v21 = vpop.f32.mrb[139].mxu1 }
 0x329   :  { %v12548_v19 = vpop.f32.mrb[140].mxu1 }
 0x32a   :  { %v12550_v6 = vpop.f32.mrb[141].mxu1  ;;  %5511 = vmatmul.mubr.bf16.gmra.mrb[100].mxu0 %v10350_v54  ;;  %v6199_v54 = vld [vmem:[#allocation5 + $0x38] sm:$0x1] }
 0x32b   :  { %v12552_v1 = vpop.f32.mrb[142].mxu1  ;;  %5518 = vmatprep.mubr.bf16.mxu0 %v12195_v4  ;;  %v6200_v4 = vsel %vm10627_vm2, 0, %v6199_v54  ;;  %v1719_v54 = vld [vmem:[#allocation2 + $0x1a4] sm:$0xf] }
 0x32c   :  { %v12555_v52 = vpop.f32.mrb[143].mxu1  ;;  %6201 = vst [vmem:[#allocation5 + $0x38] sm:$0x1] %v6200_v4  ;;  %v2766_v44 = vshrl.u32 %v1719_v54, 16 }
 0x331   :  { %v12557_v25 = vpop.f32.mrb[144].mxu1 }
 0x332   :  { %v12564_v38 = vpop.f32.mrb[145].mxu1  ;;  %5519 = vmatmul.mubr.bf16.gmra.mrb[104].mxu0 %v10351_v43 }
 0x333   :  { %v12566_v59 = vpop.f32.mrb[146].mxu1  ;;  %5526 = vmatprep.mubr.bf16.mxu0 %v12205_v57 }
 0x334   :  { %v12569_v47 = vpop.f32.mrb[147].mxu1 }
 0x335   :  { %v5312_v29 = vpop.f32.mrb[0].mxu0 }
 0x336   :  { %v9691_v43 = vadd.f32 %v5312_v29, %v4446_v24  ;;  %v5314_v37 = vpop.f32.mrb[1].mxu0  ;;  %v2779_v24 = vshrl.u32 %v1720_v28, 16 }
 0x337   :  { %v5315_v57 = vpop.f32.mrb[2].mxu0  ;;  %v2769_v37 = vshll.u32 %v1719_v54, 16 }
 0x338   :  { %v9693_v35 = vadd.f32 %v5315_v57, %v4449_v27  ;;  %v5602_v30 = vadd.f32 %v9691_v43, %v5601_v39  ;;  %v5317_v22 = vpop.f32.mrb[3].mxu0  ;;  %v4454_v27 = vadd.f32 %v12562_v32, %v12239_v26  ;;  %v2781_v41 = vrot.slane %v2779_v24, 4 }
 0x339   :  { %v12579_v7 = vpop.f32.mrb[148].mxu1  ;;  %v2771_v43 = vrot.slane %v2769_v37, 5  ;;  %v6226_v37 = vld [vmem:[#allocation5 + $0x44] sm:$0x1] }
 0x33a   :  { %v12581_v4 = vpop.f32.mrb[149].mxu1  ;;  %v5856_v34 = vmax.f32 %v5602_v30, 0.0  ;;  %v5605_v18 = vadd.f32 %v9693_v35, %v5604_v15  ;;  %5527 = vmatmul.mubr.bf16.gmra.mrb[108].mxu0 %v10352_v31  ;;  %v4457_v31 = vadd.f32 %v12562_v32, %v12242_v2  ;;  %v6227_v24 = vsel %vm10644_vm7, 0, %v6226_v37 }
 0x33b   :  { %v12583_v29 = vpop.f32.mrb[150].mxu1  ;;  %5534 = vmatprep.mubr.bf16.mxu0 %v12215_v60  ;;  %v2768_v60 = vrot.slane %v2766_v44, 4  ;;  %v6202_v44 = vld [vmem:[#allocation5 + $0x40] sm:$0x1]  ;;  %6228 = vst [vmem:[#allocation5 + $0x44] sm:$0x1] %v6227_v24 }
 0x33c   :  { %v12586_v13 = vpop.f32.mrb[151].mxu1  ;;  %5920 = vst [vmem:[#allocation4] sm:$0xff] %v5856_v34  ;;  %v5857_v22 = vmax.f32 %v5605_v18, 0.0  ;;  %v1721_v18 = vld [vmem:[#allocation2 + $0x1ac] sm:$0x1]  ;;  %v6203_v40 = vsel %vm10627_vm2, 0, %v6202_v44 }
 0x33d   :  { %v5320_v39 = vpop.f32.mrb[4].mxu0  ;;  %6204 = vst [vmem:[#allocation5 + $0x40] sm:$0x1] %v6203_v40  ;;  %v10354_v40 = vld [vmem:[#allocation2 + $0x18c] sm:$0xff]  }
 0x33e   :  { %5921 = vst [vmem:[#allocation4 + $0x8] sm:$0xff] %v5857_v22  ;;  %v9695_v30 = vadd.f32 %v5320_v39, %v4454_v27  ;;  %v5322_v35 = vpop.f32.mrb[5].mxu0  ;;  %v10353_v39 = vld [vmem:[#allocation2 + $0x180] sm:$0xff]  }
 0x33f   :  { %v5323_v15 = vpop.f32.mrb[6].mxu0 }
 0x340   :  { %v5610_v57 = vadd.f32 %v9695_v30, %v12517_v49  ;;  %v9697_v54 = vadd.f32 %v5323_v15, %v4457_v31  ;;  %v5325_v34 = vpop.f32.mrb[7].mxu0  ;;  %v2785_v49 = vshll.u32 %v1721_v18, 16  ;;  %v2772_v31 = vor.u32 %v2771_v43, %v2768_v60 }
 0x341   :  { %v12593_v26 = vpop.f32.mrb[152].mxu1  ;;  %v2782_v15 = vor.u32 %v2781_v41, %v2777_v14  ;;  %v4465_v34 = vadd.f32 %v12562_v32, %v12255_v10 }
 0x342   :  { %v12595_v28 = vpop.f32.mrb[153].mxu1  ;;  %v5858_v22 = vmax.f32 %v5610_v57, 0.0  ;;  %v5613_v27 = vadd.f32 %v9697_v54, %v12519_v62  ;;  %5535 = vmatmul.mubr.bf16.gmra.mrb[112].mxu0 %v10353_v39  ;;  %v4462_v62 = vadd.f32 %v12562_v32, %v12250_v42  ;;  %v2787_v39 = vrot.slane %v2785_v49, 5 }
 0x343   :  { %v12598_v2 = vpop.f32.mrb[154].mxu1  ;;  %5542 = vmatprep.mubr.bf16.mxu0 %v12227_v58  ;;  %v2773_v37 = vrot.slane %v2772_v31, 4  ;;  %v2783_v50 = vrot.slane %v2782_v15, 4 }
 0x344   :  { %v12601_v30 = vpop.f32.mrb[155].mxu1  ;;  %5922 = vst [vmem:[#allocation4 + $0x10] sm:$0xff] %v5858_v22  ;;  %v5859_v35 = vmax.f32 %v5613_v27, 0.0 }
 0x345   :  { %v5328_v57 = vpop.f32.mrb[8].mxu0  ;;  %v5984_v10 = vld [vmem:[#allocation4] ss:$2 sm:$0xff]  ;;  %v2778_v15 = vsel %vm11302_vm14, %v2773_v37, %v2777_v14 }
 0x346   :  { %5923 = vst [vmem:[#allocation4 + $0x18] sm:$0xff] %v5859_v35  ;;  %v9699_v58 = vadd.f32 %v5328_v57, %v4462_v62  ;;  %v5330_v54 = vpop.f32.mrb[9].mxu0  ;;  %v6048_v35 = vld [vmem:[#allocation4 + $0x1] ss:$2 sm:$0xff] }
 0x347   :  { %v5331_v18 = vpop.f32.mrb[10].mxu0  ;;  %v13804_v62 = vld [vmem:[#allocation61_spill] sm:$0xff] }
 0x348   :  { %v9701_v44 = vadd.f32 %v5331_v18, %v4465_v34  ;;  %v5618_v22 = vadd.f32 %v9699_v58, %v12528_v3  ;;  %v5333_v27 = vpop.f32.mrb[11].mxu0  ;;  %v4470_v31 = vadd.f32 %v12562_v32, %v13804_v62  ;;  %v6111_v34 = vadd.f32 %v6048_v35, %v5984_v10 }
 0x349   :  { %v12612_v42 = vpop.f32.mrb[156].mxu1 }
 0x34a   :  { %v12614_v41 = vpop.f32.mrb[157].mxu1  ;;  %v5860_v60 = vmax.f32 %v5618_v22, 0.0  ;;  %v5621_v43 = vadd.f32 %v9701_v44, %v12533_v48  ;;  %5543 = vmatmul.mubr.bf16.gmra.mrb[116].mxu0 %v10354_v40  ;;  %v2788_v48 = vsel %vm11302_vm14, %v2783_v50, %v2787_v39  ;;  %v13805_v22 = vld [vmem:[#allocation38_spill] sm:$0xff] }
 0x34b   :  { %v12617_v24 = vpop.f32.mrb[158].mxu1  ;;  %5550 = vmatprep.mubr.bf16.mxu0 %v12358_v53  ;;  %v4473_v27 = vadd.f32 %v12562_v32, %v13805_v22 }
 0x34c   :  { %v12620_v49 = vpop.f32.mrb[159].mxu1  ;;  %5924 = vst [vmem:[#allocation4 + $0x20] sm:$0xff] %v5860_v60  ;;  %v5861_v3 = vmax.f32 %v5621_v43, 0.0  ;;  %v8870_v43 = vcombine.low %v2778_v15, %v2788_v48 }
 0x34d   :  { %v5986_v57 = vld [vmem:[#allocation4 + $0x10] ss:$2 sm:$0xff]  ;;  %v6050_v58 = vld [vmem:[#allocation4 + $0x11] ss:$2 sm:$0xff]  ;;  %v5336_v54 = vpop.f32.mrb[12].mxu0 }
 0x34e   :  { %v6112_v18 = vadd.f32 %v6050_v58, %v5986_v57  ;;  %5925 = vst [vmem:[#allocation4 + $0x28] sm:$0xff] %v5861_v3  ;;  %v9703_v53 = vadd.f32 %v5336_v54, %v4470_v31  ;;  %v5338_v44 = vpop.f32.mrb[13].mxu0  ;;  %v13807_v3 = vld [vmem:[#allocation63_spill] sm:$0xff]  ;;  %v6396_v57 = vld [vmem:[#allocation5 + $0x58] sm:$0x1]  ;;  %v13810_v54 = vld [vmem:[#allocation62_spill] sm:$0xff] }
 0x34f   :  { %v5339_v60 = vpop.f32.mrb[14].mxu0 }
 0x350   :  { %v6143_v40 = vadd.f32 %v6112_v18, %v6111_v34  ;;  %v5626_v62 = vadd.f32 %v9703_v53, %v12526_v45  ;;  %v9705_v14 = vadd.f32 %v5339_v60, %v4473_v27  ;;  %v5341_v37 = vpop.f32.mrb[15].mxu0  ;;  %v6397_v45 = vsel %vm10627_vm2, 0, %v6396_v57  ;;  %v6420_v18 = vld [vmem:[#allocation5 + $0x5c] sm:$0x1]  ;;  %v13811_v60 = vld [vmem:[#allocation39_spill] sm:$0xff] }
 0x351   :  { %v12631_v12 = vpop.f32.mrb[160].mxu1  ;;  %v4478_v34 = vadd.f32 %v12562_v32, %v13810_v54  ;;  %6398 = vst [vmem:[#allocation5 + $0x58] sm:$0x1] %v6397_v45  ;;  %v6421_v53 = vsel %vm10644_vm7, 0, %v6420_v18  ;;  %v6344_v54 = vld [vmem:[#allocation5 + $0xc] sm:$0x1] }
 0x352   :  { %13806 = vst [vmem:[#allocation61_spill] sm:$0xff] %v12631_v12  ;;  %v12633_v50 = vpop.f32.mrb[161].mxu1  ;;  %v6159_v39 = vmul.f32 0.25, %v6143_v40  ;;  %v5862_v10 = vmax.f32 %v5626_v62, 0.0  ;;  %v5629_v35 = vadd.f32 %v9705_v14, %v12530_v55  ;;  %5551 = vmatmul.mubr.bf16.gmra.mrb[120].mxu0 %v13807_v3  ;;  %v10196_v40 = vld [vmem:[#allocation2 + $0x1a4] sm:$0xff]  }
 0x353   :  { %v12637_v31 = vpop.f32.mrb[162].mxu1  ;;  %5558 = vmatprep.mubr.bf16.mxu0 %v8870_v43  ;;  %v4481_v43 = vadd.f32 %v12562_v32, %v13811_v60  ;;  %v6724_v62 = vld [vmem:[#allocation5] sm:$0xf]  ;;  %6422 = vst [vmem:[#allocation5 + $0x5c] sm:$0x1] %v6421_v53 }
 0x354   :  { %13808 = vst [vmem:[#allocation38_spill] sm:$0xff] %v12637_v31  ;;  %v12639_v15 = vpop.f32.mrb[163].mxu1  ;;  %v9188_v48 = vpack.c.bf16 %v6159_v39, %v6159_v39  ;;  %5926 = vst [vmem:[#allocation4 + $0x30] sm:$0xff] %v5862_v10  ;;  %v5863_v58 = vmax.f32 %v5629_v35, 0.0  ;;  %v6341_v10 = vld [vmem:[#allocation5 + $0x8] sm:$0xf] }
 0x355   :  { %13809 = vst [vmem:[#allocation63_spill] sm:$0xff] %v12639_v15  ;;  %v5344_v55 = vpop.f32.mrb[16].mxu0 }
 0x356   :  { %v6262_v44 = vshrl.u32 %v9188_v48, 16  ;;  %5927 = vst [vmem:[#allocation4 + $0x38] sm:$0xff] %v5863_v58  ;;  %v9707_v22 = vadd.f32 %v5344_v55, %v4478_v34  ;;  %v5346_v27 = vpop.f32.mrb[17].mxu0  ;;  %v6265_v39 = vshll.u32 %v9188_v48, 16  ;;  %v6765_v58 = vshrl.u32 %v6724_v62, 16 }
 0x357   :  { %v5347_v14 = vpop.f32.mrb[18].mxu0  ;;  %v6768_v34 = vshll.u32 %v6724_v62, 16  ;;  %v5988_v48 = vld [vmem:[#allocation4 + $0x20] ss:$2 sm:$0xff]  ;;  %v13817_v62 = vld [vmem:[#allocation40_spill] sm:$0xff] }
 0x358   :  { %v6264_v37 = vrot.slane %v6262_v44, 7  ;;  %v9709_v35 = vadd.f32 %v5347_v14, %v4481_v43  ;;  %v5634_v3 = vadd.f32 %v9707_v22, %v12537_v63  ;;  %v5349_v57 = vpop.f32.mrb[19].mxu0  ;;  %v6052_v43 = vld [vmem:[#allocation4 + $0x21] ss:$2 sm:$0xff] }
 0x359   :  { %v12650_v45 = vpop.f32.mrb[164].mxu1 }
 0x35a   :  { %13812 = vst [vmem:[#allocation62_spill] sm:$0xff] %v12650_v45  ;;  %v12652_v18 = vpop.f32.mrb[165].mxu1  ;;  %v6267_v55 = vor.u32 %v6265_v39, %v6264_v37  ;;  %v6268_v27 = vrot.slane %v6264_v37, 4  ;;  %v5864_v60 = vmax.f32 %v5634_v3, 0.0  ;;  %v5637_v53 = vadd.f32 %v9709_v35, %v12542_v21  ;;  %5559 = vmatmul.mubr.bf16.gmra.mrb[124].mxu0 %v10196_v40  ;;  %v13818_v35 = vld [vmem:[#allocation64_spill] sm:$0xff] }
 0x35b   :  { %13813 = vst [vmem:[#allocation39_spill] sm:$0xff] %v12652_v18  ;;  %v12655_v44 = vpop.f32.mrb[166].mxu1  ;;  %v4486_v45 = vadd.f32 %v12562_v32, %v13817_v62  ;;  %v4489_v3 = vadd.f32 %v12562_v32, %v13818_v35 }
 0x35c   :  { %13814 = vst [vmem:[#allocation73_spill] sm:$0xff] %v12655_v44  ;;  %v12657_v14 = vpop.f32.mrb[167].mxu1  ;;  %v6342_v22 = vsel %vm10656_vm8, %v6267_v55, %v6341_v10  ;;  %5928 = vst [vmem:[#allocation4 + $0x40] sm:$0xff] %v5864_v60  ;;  %v5865_v57 = vmax.f32 %v5637_v53, 0.0  ;;  %v6345_v37 = vsel %vm10627_vm2, %v6268_v27, %v6344_v54  ;;  %v6767_v44 = vrot.slane %v6765_v58, 4 }
 0x35d   :  { %13815 = vst [vmem:[#allocation74_spill] sm:$0xff] %v12657_v14  ;;  %6343 = vst [vmem:[#allocation5 + $0x8] sm:$0xf] %v6342_v22  ;;  %v5990_v21 = vld [vmem:[#allocation4 + $0x30] ss:$2 sm:$0xff]  ;;  %v5352_v39 = vpop.f32.mrb[20].mxu0  ;;  %v6113_v14 = vadd.f32 %v6052_v43, %v5988_v48 }
 0x35e   :  { %v6054_v40 = vld [vmem:[#allocation4 + $0x31] ss:$2 sm:$0xff]  ;;  %6346 = vst [vmem:[#allocation5 + $0xc] sm:$0x1] %v6345_v37  ;;  %5929 = vst [vmem:[#allocation4 + $0x48] sm:$0xff] %v5865_v57  ;;  %v9711_v10 = vadd.f32 %v5352_v39, %v4486_v45  ;;  %v5354_v55 = vpop.f32.mrb[21].mxu0 }
 0x35f   :  { %v6114_v18 = vadd.f32 %v6054_v40, %v5990_v21  ;;  %v6770_v60 = vrot.slane %v6768_v34, 5  ;;  %v5355_v53 = vpop.f32.mrb[22].mxu0  ;;  %v6725_v22 = vld [vmem:[#allocation5 + $0x4] sm:$0x1]  ;;  %v6399_v43 = vld [vmem:[#allocation5 + $0x60] sm:$0x1] }
 0x360   :  { %v5642_v31 = vadd.f32 %v9711_v10, %v12535_v61  ;;  %v9713_v54 = vadd.f32 %v5355_v53, %v4489_v3  ;;  %v5357_v27 = vpop.f32.mrb[23].mxu0  ;;  %v6774_v34 = vshll.u32 %v6725_v22, 16  ;;  %v13822_v21 = vld [vmem:[#allocation41_spill] sm:$0xff] }
 0x361   :  { %v6144_v62 = vadd.f32 %v6114_v18, %v6113_v14  ;;  %v12668_v12 = vpop.f32.mrb[168].mxu1  ;;  %v6771_v48 = vor.u32 %v6770_v60, %v6767_v44  ;;  %v6400_v18 = vsel %vm10627_vm2, 0, %v6399_v43  ;;  %v4494_v40 = vadd.f32 %v12562_v32, %v13822_v21  ;;  %v13823_v60 = vld [vmem:[#allocation43_spill] sm:$0xff] }
 0x362   :  { %13819 = vst [vmem:[#allocation23_spill] sm:$0xff] %v12668_v12  ;;  %v12670_v15 = vpop.f32.mrb[169].mxu1  ;;  %v5866_v37 = vmax.f32 %v5642_v31, 0.0  ;;  %v5645_v58 = vadd.f32 %v9713_v54, %v12539_v46  ;;  %6401 = vst [vmem:[#allocation5 + $0x60] sm:$0x1] %v6400_v18  ;;  %v4497_v53 = vadd.f32 %v12562_v32, %v13823_v60  ;;  %v6776_v27 = vrot.slane %v6774_v34, 5 }
 0x363   :  { %v6160_v35 = vmul.f32 0.25, %v6144_v62  ;;  %v12673_v45 = vpop.f32.mrb[170].mxu1  ;;  %v6772_v62 = vrot.slane %v6771_v48, 4  ;;  %v6347_v21 = vld [vmem:[#allocation5 + $0x10] sm:$0xf] }
 0x364   :  { %13820 = vst [vmem:[#allocation40_spill] sm:$0xff] %v12673_v45  ;;  %v12677_v61 = vpop.f32.mrb[171].mxu1  ;;  %5930 = vst [vmem:[#allocation4 + $0x50] sm:$0xff] %v5866_v37  ;;  %v5867_v57 = vmax.f32 %v5645_v58, 0.0  ;;  %v6726_v39 = vld [vmem:[#allocation5 + $0x8] sm:$0xf] }
 0x365   :  { %13821 = vst [vmem:[#allocation64_spill] sm:$0xff] %v12677_v61  ;;  %v9189_v14 = vpack.c.bf16 %v6160_v35, %v6160_v35  ;;  %v6727_v31 = vld [vmem:[#allocation5 + $0xc] sm:$0x1]  ;;  %v5360_v46 = vpop.f32.mrb[24].mxu0  ;;  %v6779_v44 = vshrl.u32 %v6726_v39, 16  ;;  %v6782_v35 = vshll.u32 %v6726_v39, 16 }
 0x366   :  { %5931 = vst [vmem:[#allocation4 + $0x58] sm:$0xff] %v5867_v57  ;;  %v9715_v10 = vadd.f32 %v5360_v46, %v4494_v40  ;;  %v5362_v55 = vpop.f32.mrb[25].mxu0  ;;  %v6788_v37 = vshll.u32 %v6727_v31, 16  ;;  %v6350_v40 = vld [vmem:[#allocation5 + $0x14] sm:$0x1] }
 0x367   :  { %v6270_v3 = vshrl.u32 %v9189_v14, 16  ;;  %v5363_v54 = vpop.f32.mrb[26].mxu0  ;;  %v6781_v22 = vrot.slane %v6779_v44, 4  ;;  %v6273_v43 = vshll.u32 %v9189_v14, 16  ;;  %v6784_v57 = vrot.slane %v6782_v35, 5 }
 0x368   :  { %v9717_v45 = vadd.f32 %v5363_v54, %v4497_v53  ;;  %v5650_v18 = vadd.f32 %v9715_v10, %v12550_v6  ;;  %v5365_v12 = vpop.f32.mrb[27].mxu0  ;;  %v6423_v55 = vld [vmem:[#allocation5 + $0x64] sm:$0x1]  ;;  %v6056_v44 = vld [vmem:[#allocation4 + $0x41] ss:$2 sm:$0xff]  ;;  %v6790_v10 = vrot.slane %v6788_v37, 5 }
 0x369   :  { %v6272_v58 = vrot.slane %v6270_v3, 7  ;;  %v12684_v61 = vpop.f32.mrb[172].mxu1  ;;  %v5992_v14 = vld [vmem:[#allocation4 + $0x40] ss:$2 sm:$0xff]  ;;  %v13824_v3 = vld [vmem:[#allocation44_spill] sm:$0xff]  ;;  %v6785_v12 = vor.u32 %v6784_v57, %v6781_v22  ;;  %v6777_v22 = vsel %vm11302_vm14, %v6772_v62, %v6776_v27 }
 0x36a   :  { %v12686_v46 = vpop.f32.mrb[173].mxu1  ;;  %v5868_v34 = vmax.f32 %v5650_v18, 0.0  ;;  %v5653_v39 = vadd.f32 %v9717_v45, %v12555_v52  ;;  %v4502_v6 = vadd.f32 %v12562_v32, %v13824_v3  ;;  %v6424_v52 = vsel %vm10644_vm7, 0, %v6423_v55  ;;  %v12705_v55 = vld [vmem:[#allocation5 + $0x8] sm:$0xf] }
 0x36b   :  { %v6275_v48 = vor.u32 %v6273_v43, %v6272_v58  ;;  %v6276_v60 = vrot.slane %v6272_v58, 4  ;;  %v12689_v31 = vpop.f32.mrb[174].mxu1  ;;  %v6786_v37 = vrot.slane %v6785_v12, 4  ;;  %6425 = vst [vmem:[#allocation5 + $0x64] sm:$0x1] %v6424_v52  ;;  %v6115_v57 = vadd.f32 %v6056_v44, %v5992_v14 }
 0x36c   :  { %v12693_v53 = vpop.f32.mrb[175].mxu1  ;;  %5932 = vst [vmem:[#allocation4 + $0x60] sm:$0xff] %v5868_v34  ;;  %v5869_v35 = vmax.f32 %v5653_v39, 0.0  ;;  %v13825_v39 = vld [vmem:[#allocation47_spill] sm:$0xff] }
 0x36d   :  { %v6348_v54 = vsel %vm10656_vm8, %v6275_v48, %v6347_v21  ;;  %v6351_v58 = vsel %vm10627_vm2, %v6276_v60, %v6350_v40  ;;  %v5994_v45 = vld [vmem:[#allocation4 + $0x50] ss:$2 sm:$0xff]  ;;  %v6058_v43 = vld [vmem:[#allocation4 + $0x51] ss:$2 sm:$0xff]  ;;  %v5368_v18 = vpop.f32.mrb[28].mxu0  ;;  %v4505_v40 = vadd.f32 %v12562_v32, %v13825_v39 }
 0x36e   :  { %6349 = vst [vmem:[#allocation5 + $0x10] sm:$0xf] %v6348_v54  ;;  %6352 = vst [vmem:[#allocation5 + $0x14] sm:$0x1] %v6351_v58  ;;  %v6116_v21 = vadd.f32 %v6058_v43, %v5994_v45  ;;  %v9719_v48 = vadd.f32 %v5368_v18, %v4502_v6  ;;  %v5370_v34 = vpop.f32.mrb[29].mxu0  ;;  %v12709_v54 = vsel %vm11302_vm14, %v6786_v37, %v6790_v10 }
 0x36f   :  { %5933 = vst [vmem:[#allocation4 + $0x68] sm:$0xff] %v5869_v35  ;;  %v6604_v60 = vld [vmem:[#allocation5] sm:$0xf]  ;;  %v5371_v3 = vpop.f32.mrb[30].mxu0  ;;  %v9050_v44 = vcombine.low %v6777_v22, %v12709_v54  ;;  %v6402_v45 = vld [vmem:[#allocation5 + $0x68] sm:$0x1] }
 0x370   :  { %v6145_v62 = vadd.f32 %v6116_v21, %v6115_v57  ;;  %v5658_v27 = vadd.f32 %v9719_v48, %v12548_v19  ;;  %v9721_v12 = vadd.f32 %v5371_v3, %v4505_v40  ;;  %v5373_v14 = vpop.f32.mrb[31].mxu0  ;;  %v9032_v6 = vcombine.low %v6604_v60, %v12705_v55  ;;  %v13826_v19 = vld [vmem:[#allocation50_spill] sm:$0xff] }
 0x371   :  { %8051 = vmatprep.mubr.bf16.mxu1 %v9050_v44  ;;  %v6403_v10 = vsel %vm10627_vm2, 0, %v6402_v45  ;;  %v4510_v37 = vadd.f32 %v12562_v32, %v13826_v19  ;;  %v4513_v60 = vadd.f32 %v12562_v32, %v12329_v56  ;;  %v6426_v44 = vld [vmem:[#allocation5 + $0x6c] sm:$0x1] }
 0x372   :  { %v6161_v35 = vmul.f32 0.25, %v6145_v62  ;;  %v5870_v58 = vmax.f32 %v5658_v27, 0.0  ;;  %v5661_v52 = vadd.f32 %v9721_v12, %v12552_v1  ;;  %8052 = vmatmul.mubr.bf16.vlgmr.msra.gmra.mrb[192].mxu1 %v9032_v6  ;;  %6404 = vst [vmem:[#allocation5 + $0x68] sm:$0x1] %v6403_v10  ;;  %v12726_v10 = vpop.f32.mrb[176].mxu1  ;;  %v6427_v56 = vsel %vm10644_vm7, 0, %v6426_v44 }
 0x373   :  { %6428 = vst [vmem:[#allocation5 + $0x6c] sm:$0x1] %v6427_v56 }
 0x374   :  { %v9190_v43 = vpack.c.bf16 %v6161_v35, %v6161_v35  ;;  %5934 = vst [vmem:[#allocation4 + $0x70] sm:$0xff] %v5870_v58  ;;  %v5871_v18 = vmax.f32 %v5661_v52, 0.0 }
 0x375   :  { %v6728_v57 = vld [vmem:[#allocation5 + $0x10] sm:$0xf]  ;;  %v6729_v22 = vld [vmem:[#allocation5 + $0x14] sm:$0x1]  ;;  %v5376_v21 = vpop.f32.mrb[32].mxu0 }
 0x376   :  { %v6793_v48 = vshrl.u32 %v6728_v57, 16  ;;  %v6278_v34 = vshrl.u32 %v9190_v43, 16  ;;  %v6281_v39 = vshll.u32 %v9190_v43, 16  ;;  %5935 = vst [vmem:[#allocation4 + $0x78] sm:$0xff] %v5871_v18  ;;  %v9723_v1 = vadd.f32 %v5376_v21, %v4510_v37  ;;  %v5378_v40 = vpop.f32.mrb[33].mxu0  ;;  %v12730_v37 = vpop.f32.mrb[177].mxu1 }
 0x377   :  { %v12721_v3 = vld [vmem:[#allocation5 + $0x10] sm:$0xf]  ;;  %v5379_v62 = vpop.f32.mrb[34].mxu0  ;;  %v6796_v12 = vshll.u32 %v6728_v57, 16  ;;  %v6802_v14 = vshll.u32 %v6729_v22, 16 }
 0x378   :  { %v6795_v27 = vrot.slane %v6793_v48, 4  ;;  %v6280_v35 = vrot.slane %v6278_v34, 7  ;;  %v9725_v58 = vadd.f32 %v5379_v62, %v4513_v60  ;;  %v5666_v52 = vadd.f32 %v9723_v1, %v12564_v38  ;;  %v5381_v45 = vpop.f32.mrb[35].mxu0  ;;  %v6353_v43 = vld [vmem:[#allocation5 + $0x18] sm:$0xf]  ;;  %v12733_v34 = vpop.f32.mrb[178].mxu1 }
 0x379   :  { %v6356_v18 = vld [vmem:[#allocation5 + $0x1c] sm:$0x1]  ;;  %v6798_v19 = vrot.slane %v6796_v12, 5  ;;  %v5996_v38 = vld [vmem:[#allocation4 + $0x60] ss:$2 sm:$0xff]  ;;  %v13827_v40 = vld [vmem:[#allocation52_spill] sm:$0xff] }
 0x37a   :  { %v6283_v57 = vor.u32 %v6281_v39, %v6280_v35  ;;  %v6284_v22 = vrot.slane %v6280_v35, 4  ;;  %v5872_v21 = vmax.f32 %v5666_v52, 0.0  ;;  %v5669_v48 = vadd.f32 %v9725_v58, %v12569_v47  ;;  %v6060_v1 = vld [vmem:[#allocation4 + $0x61] ss:$2 sm:$0xff]  ;;  %v12737_v44 = vpop.f32.mrb[179].mxu1 }
 0x37b   :  { %v4518_v60 = vadd.f32 %v12562_v32, %v13827_v40  ;;  %v6799_v62 = vor.u32 %v6798_v19, %v6795_v27  ;;  %v6804_v35 = vrot.slane %v6802_v14, 5  ;;  %v6117_v6 = vadd.f32 %v6060_v1, %v5996_v38 }
 0x37c   :  { %v6354_v12 = vsel %vm10656_vm8, %v6283_v57, %v6353_v43  ;;  %5936 = vst [vmem:[#allocation4 + $0x80] sm:$0xff] %v5872_v21  ;;  %v5873_v45 = vmax.f32 %v5669_v48, 0.0  ;;  %v6357_v39 = vsel %vm10627_vm2, %v6284_v22, %v6356_v18  ;;  %v4521_v43 = vadd.f32 %v12562_v32, %v12341_v17 }
 0x37d   :  { %6355 = vst [vmem:[#allocation5 + $0x18] sm:$0xf] %v6354_v12  ;;  %v5998_v47 = vld [vmem:[#allocation4 + $0x70] ss:$2 sm:$0xff]  ;;  %v6062_v58 = vld [vmem:[#allocation4 + $0x71] ss:$2 sm:$0xff] }
 0x37e   :  { %v5384_v52 = vpop.f32.mrb[36].mxu0  ;;  %6358 = vst [vmem:[#allocation5 + $0x1c] sm:$0x1] %v6357_v39  ;;  %v6800_v56 = vrot.slane %v6799_v62, 4  ;;  %v6118_v40 = vadd.f32 %v6062_v58, %v5998_v47  ;;  %5937 = vst [vmem:[#allocation4 + $0x88] sm:$0xff] %v5873_v45 }
 0x37f   :  { %v9727_v27 = vadd.f32 %v5384_v52, %v4518_v60  ;;  %v5386_v19 = vpop.f32.mrb[37].mxu0  ;;  %v6405_v12 = vld [vmem:[#allocation5 + $0x70] sm:$0x1] }
 0x380   :  { %v5387_v57 = vpop.f32.mrb[38].mxu0  ;;  %v12747_v21 = vsel %vm11302_vm14, %v6800_v56, %v6804_v35  ;;  %v6146_v14 = vadd.f32 %v6118_v40, %v6117_v6  ;;  %v6406_v17 = vsel %vm10627_vm2, 0, %v6405_v12  ;;  %v4526_v6 = vadd.f32 %v12562_v32, %v12348_v33  ;;  %v6359_v12 = vld [vmem:[#allocation5 + $0x20] sm:$0xf] }
 0x381   :  { %v5674_v18 = vadd.f32 %v9727_v27, %v12557_v25  ;;  %v9729_v22 = vadd.f32 %v5387_v57, %v4521_v43  ;;  %v5389_v48 = vpop.f32.mrb[39].mxu0  ;;  %6407 = vst [vmem:[#allocation5 + $0x70] sm:$0x1] %v6406_v17  ;;  %v4529_v27 = vadd.f32 %v12562_v32, %v12355_v23 }
 0x382   :  { %v6162_v1 = vmul.f32 0.25, %v6146_v14 }
 0x383   :  { %v5874_v62 = vmax.f32 %v5674_v18, 0.0  ;;  %v5677_v60 = vadd.f32 %v9729_v22, %v12566_v59  ;;  %v6429_v18 = vld [vmem:[#allocation5 + $0x74] sm:$0x1] }
 0x384   :  { %v9191_v45 = vpack.c.bf16 %v6162_v1, %v6162_v1  ;;  %v6730_v25 = vld [vmem:[#allocation5 + $0x18] sm:$0xf] }
 0x385   :  { %5938 = vst [vmem:[#allocation4 + $0x90] sm:$0xff] %v5874_v62  ;;  %v5875_v39 = vmax.f32 %v5677_v60, 0.0  ;;  %v6731_v35 = vld [vmem:[#allocation5 + $0x1c] sm:$0x1]  ;;  %v5392_v47 = vpop.f32.mrb[40].mxu0  ;;  %v6807_v58 = vshrl.u32 %v6730_v25, 16 }
 0x386   :  { %v6286_v52 = vshrl.u32 %v9191_v45, 16  ;;  %v6289_v56 = vshll.u32 %v9191_v45, 16  ;;  %v9731_v40 = vadd.f32 %v5392_v47, %v4526_v6  ;;  %v5394_v59 = vpop.f32.mrb[41].mxu0  ;;  %v6810_v57 = vshll.u32 %v6730_v25, 16  ;;  %v12760_v62 = vpop.f32.mrb[180].mxu1 }
 0x387   :  { %5939 = vst [vmem:[#allocation4 + $0x98] sm:$0xff] %v5875_v39  ;;  %v5395_v19 = vpop.f32.mrb[42].mxu0  ;;  %v6809_v43 = vrot.slane %v6807_v58, 4  ;;  %v6816_v14 = vshll.u32 %v6731_v35, 16  ;;  %v6430_v60 = vsel %vm10644_vm7, 0, %v6429_v18  ;;  %v12764_v39 = vpop.f32.mrb[181].mxu1 }
 0x388   :  { %v6288_v22 = vrot.slane %v6286_v52, 7  ;;  %v9733_v33 = vadd.f32 %v5395_v19, %v4529_v27  ;;  %v5682_v48 = vadd.f32 %v9731_v40, %v12581_v4  ;;  %v5397_v1 = vpop.f32.mrb[43].mxu0  ;;  %v6812_v17 = vrot.slane %v6810_v57, 5  ;;  %v6362_v45 = vld [vmem:[#allocation5 + $0x24] sm:$0x1]  ;;  %v12767_v47 = vpop.f32.mrb[182].mxu1 }
 0x389   :  { %6431 = vst [vmem:[#allocation5 + $0x74] sm:$0x1] %v6430_v60  ;;  %v6000_v4 = vld [vmem:[#allocation4 + $0x80] ss:$2 sm:$0xff]  ;;  %v6064_v58 = vld [vmem:[#allocation4 + $0x81] ss:$2 sm:$0xff] }
 0x38a   :  { %v6291_v23 = vor.u32 %v6289_v56, %v6288_v22  ;;  %v6292_v6 = vrot.slane %v6288_v22, 4  ;;  %v5876_v25 = vmax.f32 %v5682_v48, 0.0  ;;  %v5685_v35 = vadd.f32 %v9733_v33, %v12586_v13  ;;  %v13828_v52 = vld [vmem:[#allocation54_spill] sm:$0xff]  ;;  %v12771_v27 = vpop.f32.mrb[183].mxu1 }
 0x38b   :  { %v4534_v40 = vadd.f32 %v12562_v32, %v13828_v52  ;;  %v6813_v59 = vor.u32 %v6812_v17, %v6809_v43  ;;  %v6818_v56 = vrot.slane %v6816_v14, 5  ;;  %v6119_v1 = vadd.f32 %v6064_v58, %v6000_v4  ;;  %v13829_v52 = vld [vmem:[#allocation56_spill] sm:$0xff] }
 0x38c   :  { %v6360_v19 = vsel %vm10656_vm8, %v6291_v23, %v6359_v12  ;;  %5940 = vst [vmem:[#allocation4 + $0xa0] sm:$0xff] %v5876_v25  ;;  %v5877_v57 = vmax.f32 %v5685_v35, 0.0  ;;  %v6363_v18 = vsel %vm10627_vm2, %v6292_v6, %v6362_v45  ;;  %v4537_v12 = vadd.f32 %v12562_v32, %v13829_v52  ;;  %v12779_v23 = vld [vmem:[#allocation5 + $0x18] sm:$0xf] }
 0x38d   :  { %6361 = vst [vmem:[#allocation5 + $0x20] sm:$0xf] %v6360_v19  ;;  %v5400_v33 = vpop.f32.mrb[44].mxu0  ;;  %v6814_v48 = vrot.slane %v6813_v59, 4  ;;  %6364 = vst [vmem:[#allocation5 + $0x24] sm:$0x1] %v6363_v18  ;;  %v12792_v58 = vcombine.low %v12721_v3, %v12779_v23 }
 0x38e   :  { %v6002_v13 = vld [vmem:[#allocation4 + $0x90] ss:$2 sm:$0xff]  ;;  %v6066_v22 = vld [vmem:[#allocation4 + $0x91] ss:$2 sm:$0xff]  ;;  %5941 = vst [vmem:[#allocation4 + $0xa8] sm:$0xff] %v5877_v57  ;;  %v9735_v43 = vadd.f32 %v5400_v33, %v4534_v40  ;;  %v5402_v17 = vpop.f32.mrb[45].mxu0 }
 0x38f   :  { %v6120_v60 = vadd.f32 %v6066_v22, %v6002_v13  ;;  %v5403_v14 = vpop.f32.mrb[46].mxu0  ;;  %v12783_v45 = vsel %vm11302_vm14, %v6814_v48, %v6818_v56  ;;  %13831 = vst [vmem:[#allocation43_spill] sm:$0xff] %v12792_v58  ;;  %v6408_v56 = vld [vmem:[#allocation5 + $0x78] sm:$0x1]  ;;  %v13832_v22 = vld [vmem:[#allocation25_spill] sm:$0xff] }
 0x390   :  { %v5690_v25 = vadd.f32 %v9735_v43, %v12579_v7  ;;  %v9737_v35 = vadd.f32 %v5403_v14, %v4537_v12  ;;  %v5405_v59 = vpop.f32.mrb[47].mxu0  ;;  %v12788_v4 = vcombine.low %v12747_v21, %v12783_v45  ;;  %v6409_v7 = vsel %vm10627_vm2, 0, %v6408_v56  ;;  %v13833_v14 = vld [vmem:[#allocation26_spill] sm:$0xff] }
 0x391   :  { %v6147_v6 = vadd.f32 %v6120_v60, %v6119_v1  ;;  %v4542_v33 = vadd.f32 %v12562_v32, %v13832_v22  ;;  %6410 = vst [vmem:[#allocation5 + $0x78] sm:$0x1] %v6409_v7 }
 0x392   :  { %13830 = vst [vmem:[#allocation41_spill] sm:$0xff] %v12788_v4  ;;  %v5878_v19 = vmax.f32 %v5690_v25, 0.0  ;;  %v5693_v57 = vadd.f32 %v9737_v35, %v12583_v29  ;;  %8059 = vmatprep.mubr.bf16.mxu1 %v12788_v4 }
 0x393   :  { %v6163_v40 = vmul.f32 0.25, %v6147_v6  ;;  %8060 = vmatmul.mubr.bf16.gmra.mrb[196].mxu1 %v12792_v58  ;;  %v4545_v6 = vadd.f32 %v12562_v32, %v13833_v14  ;;  %v6368_v14 = vld [vmem:[#allocation5 + $0x2c] sm:$0x1] }
 0x394   :  { %5942 = vst [vmem:[#allocation4 + $0xb0] sm:$0xff] %v5878_v19  ;;  %v5879_v13 = vmax.f32 %v5693_v57, 0.0  ;;  %v6732_v48 = vld [vmem:[#allocation5 + $0x20] sm:$0xf]  ;;  %v6733_v1 = vld [vmem:[#allocation5 + $0x24] sm:$0x1] }
 0x395   :  { %v9192_v18 = vpack.c.bf16 %v6163_v40, %v6163_v40  ;;  %v5408_v60 = vpop.f32.mrb[48].mxu0  ;;  %v6821_v43 = vshrl.u32 %v6732_v48, 16  ;;  %v12803_v25 = vld [vmem:[#allocation5 + $0x20] sm:$0xf]  ;;  %v6824_v40 = vshll.u32 %v6732_v48, 16  ;;  %v6830_v19 = vshll.u32 %v6733_v1, 16 }
 0x396   :  { %5943 = vst [vmem:[#allocation4 + $0xb8] sm:$0xff] %v5879_v13  ;;  %v9739_v52 = vadd.f32 %v5408_v60, %v4542_v33  ;;  %v5410_v12 = vpop.f32.mrb[49].mxu0  ;;  %v6432_v57 = vld [vmem:[#allocation5 + $0x7c] sm:$0x1]  ;;  %v12808_v33 = vpop.f32.mrb[184].mxu1 }
 0x397   :  { %v6294_v29 = vshrl.u32 %v9192_v18, 16  ;;  %v6297_v17 = vshll.u32 %v9192_v18, 16  ;;  %v5411_v35 = vpop.f32.mrb[50].mxu0  ;;  %v6823_v59 = vrot.slane %v6821_v43, 4  ;;  %v6433_v60 = vsel %vm10644_vm7, 0, %v6432_v57  ;;  %v12812_v43 = vpop.f32.mrb[185].mxu1 }
 0x398   :  { %v9741_v22 = vadd.f32 %v5411_v35, %v4545_v6  ;;  %v5698_v18 = vadd.f32 %v9739_v52, %v12595_v28  ;;  %v5413_v13 = vpop.f32.mrb[51].mxu0  ;;  %v6365_v12 = vld [vmem:[#allocation5 + $0x28] sm:$0xf]  ;;  %v6826_v38 = vrot.slane %v6824_v40, 5  ;;  %6434 = vst [vmem:[#allocation5 + $0x7c] sm:$0x1] %v6433_v60  ;;  %v4550_v35 = vadd.f32 %v12562_v32, %v12376_v9 }
 0x399   :  { %v6296_v7 = vrot.slane %v6294_v29, 7  ;;  %v12815_v6 = vpop.f32.mrb[186].mxu1  ;;  %v6004_v28 = vld [vmem:[#allocation4 + $0xa0] ss:$2 sm:$0xff]  ;;  %v6068_v52 = vld [vmem:[#allocation4 + $0xa1] ss:$2 sm:$0xff] }
 0x39a   :  { %v5880_v58 = vmax.f32 %v5698_v18, 0.0  ;;  %v5701_v29 = vadd.f32 %v9741_v22, %v12601_v30  ;;  %v6827_v13 = vor.u32 %v6826_v38, %v6823_v59  ;;  %v12819_v57 = vpop.f32.mrb[187].mxu1  ;;  %v6121_v4 = vadd.f32 %v6068_v52, %v6004_v28 }
 0x39b   :  { %v6299_v48 = vor.u32 %v6297_v17, %v6296_v7  ;;  %v6300_v1 = vrot.slane %v6296_v7, 4  ;;  %v6832_v7 = vrot.slane %v6830_v19, 5 }
 0x39c   :  { %5944 = vst [vmem:[#allocation4 + $0xc0] sm:$0xff] %v5880_v58  ;;  %v5881_v60 = vmax.f32 %v5701_v29, 0.0  ;;  %v6828_v56 = vrot.slane %v6827_v13, 4 }
 0x39d   :  { %v6366_v40 = vsel %vm10656_vm8, %v6299_v48, %v6365_v12  ;;  %v6369_v17 = vsel %vm10627_vm2, %v6300_v1, %v6368_v14  ;;  %v6006_v30 = vld [vmem:[#allocation4 + $0xb0] ss:$2 sm:$0xff]  ;;  %v6070_v22 = vld [vmem:[#allocation4 + $0xb1] ss:$2 sm:$0xff]  ;;  %v5416_v18 = vpop.f32.mrb[52].mxu0  ;;  %v4553_v12 = vadd.f32 %v12562_v32, %v12378_v20 }
 0x39e   :  { %6367 = vst [vmem:[#allocation5 + $0x28] sm:$0xf] %v6366_v40  ;;  %6370 = vst [vmem:[#allocation5 + $0x2c] sm:$0x1] %v6369_v17  ;;  %v6122_v9 = vadd.f32 %v6070_v22, %v6006_v30  ;;  %v9743_v38 = vadd.f32 %v5416_v18, %v4550_v35  ;;  %v5418_v59 = vpop.f32.mrb[53].mxu0  ;;  %v12829_v48 = vsel %vm11302_vm14, %v6828_v56, %v6832_v7  ;;  %v13834_v17 = vld [vmem:[#allocation27_spill] sm:$0xff] }
 0x39f   :  { %5945 = vst [vmem:[#allocation4 + $0xc8] sm:$0xff] %v5881_v60  ;;  %v5419_v58 = vpop.f32.mrb[54].mxu0  ;;  %v6411_v40 = vld [vmem:[#allocation5 + $0x80] sm:$0x1]  ;;  %v4561_v59 = vadd.f32 %v12562_v32, %v12389_v0 }
 0x3a0   :  { %v6148_v19 = vadd.f32 %v6122_v9, %v6121_v4  ;;  %v5706_v14 = vadd.f32 %v9743_v38, %v12593_v26  ;;  %v9745_v1 = vadd.f32 %v5419_v58, %v4553_v12  ;;  %v5421_v29 = vpop.f32.mrb[55].mxu0  ;;  %v6412_v20 = vsel %vm10627_vm2, 0, %v6411_v40 }
 0x3a1   :  { %v4558_v4 = vadd.f32 %v12562_v32, %v13834_v17  ;;  %6413 = vst [vmem:[#allocation5 + $0x80] sm:$0x1] %v6412_v20  ;;  %v12842_v40 = vpop.f32.mrb[188].mxu1  ;;  %v6374_v17 = vld [vmem:[#allocation5 + $0x34] sm:$0x1] }
 0x3a2   :  { %v6164_v52 = vmul.f32 0.25, %v6148_v19  ;;  %v5882_v13 = vmax.f32 %v5706_v14, 0.0  ;;  %v5709_v35 = vadd.f32 %v9745_v1, %v12598_v2  ;;  %v6435_v1 = vld [vmem:[#allocation5 + $0x84] sm:$0x1] }
 0x3a3   :  { %v6436_v20 = vsel %vm10644_vm7, 0, %v6435_v1 }
 0x3a4   :  { %v9193_v60 = vpack.c.bf16 %v6164_v52, %v6164_v52  ;;  %5946 = vst [vmem:[#allocation4 + $0xd0] sm:$0xff] %v5882_v13  ;;  %v5883_v56 = vmax.f32 %v5709_v35, 0.0  ;;  %6437 = vst [vmem:[#allocation5 + $0x84] sm:$0x1] %v6436_v20 }
 0x3a5   :  { %v6734_v26 = vld [vmem:[#allocation5 + $0x28] sm:$0xf]  ;;  %v6735_v7 = vld [vmem:[#allocation5 + $0x2c] sm:$0x1]  ;;  %v5424_v30 = vpop.f32.mrb[56].mxu0 }
 0x3a6   :  { %v6835_v22 = vshrl.u32 %v6734_v26, 16  ;;  %v6302_v18 = vshrl.u32 %v9193_v60, 16  ;;  %v6305_v9 = vshll.u32 %v9193_v60, 16  ;;  %5947 = vst [vmem:[#allocation4 + $0xd8] sm:$0xff] %v5883_v56  ;;  %v9747_v38 = vadd.f32 %v5424_v30, %v4558_v4  ;;  %v5426_v2 = vpop.f32.mrb[57].mxu0  ;;  %v12846_v4 = vpop.f32.mrb[189].mxu1 }
 0x3a7   :  { %v5427_v12 = vpop.f32.mrb[58].mxu0  ;;  %v6838_v19 = vshll.u32 %v6734_v26, 16  ;;  %v6844_v14 = vshll.u32 %v6735_v7, 16  ;;  %v6371_v60 = vld [vmem:[#allocation5 + $0x30] sm:$0xf]  ;;  %v12849_v30 = vpop.f32.mrb[190].mxu1 }
 0x3a8   :  { %v6837_v58 = vrot.slane %v6835_v22, 4  ;;  %v6304_v29 = vrot.slane %v6302_v18, 7  ;;  %v9749_v52 = vadd.f32 %v5427_v12, %v4561_v59  ;;  %v5714_v13 = vadd.f32 %v9747_v38, %v12614_v41  ;;  %v5429_v35 = vpop.f32.mrb[59].mxu0  ;;  %v6008_v41 = vld [vmem:[#allocation4 + $0xc0] ss:$2 sm:$0xff]  ;;  %v12858_v59 = vpop.f32.mrb[191].mxu1 }
 0x3a9   :  { %v6840_v56 = vrot.slane %v6838_v19, 5  ;;  %v6072_v22 = vld [vmem:[#allocation4 + $0xc1] ss:$2 sm:$0xff]  ;;  %v12854_v18 = vld [vmem:[%s13544_s2] ss:$0 sm:$0xff]  ;;  %v6846_v12 = vrot.slane %v6844_v14, 5 }
 0x3aa   :  { %v6307_v0 = vor.u32 %v6305_v9, %v6304_v29  ;;  %v6308_v32 = vrot.slane %v6304_v29, 4  ;;  %v5884_v26 = vmax.f32 %v5714_v13, 0.0  ;;  %v5717_v7 = vadd.f32 %v9749_v52, %v12620_v49  ;;  %v10214_v14 = vld [vmem:[#allocation14 + $0xc0] sm:$0xff]  }
 0x3ab   :  { %v4566_v38 = vadd.f32 %v12854_v18, %v12391_v16  ;;  %v6841_v2 = vor.u32 %v6840_v56, %v6837_v58  ;;  %v6123_v35 = vadd.f32 %v6072_v22, %v6008_v41  ;;  %v12866_v56 = vld [vmem:[#allocation5 + $0x28] sm:$0xf]  ;;  %9308 = vmatprep.subr.bf16.mxu1 %v10214_v14  ;;  %v13838_v14 = vld [vmem:[#allocation28_spill] sm:$0xff] }
 0x3ac   :  { %v6372_v9 = vsel %vm10656_vm8, %v6307_v0, %v6371_v60  ;;  %5948 = vst [vmem:[#allocation4 + $0xe0] sm:$0xff] %v5884_v26  ;;  %v5885_v49 = vmax.f32 %v5717_v7, 0.0  ;;  %v6375_v19 = vsel %vm10627_vm2, %v6308_v32, %v6374_v17  ;;  %v4569_v60 = vadd.f32 %v12854_v18, %v12393_v11  ;;  %v10215_v0 = vld [vmem:[#allocation14 + $0x80] sm:$0xff]  }
 0x3ad   :  { %6373 = vst [vmem:[#allocation5 + $0x30] sm:$0xf] %v6372_v9  ;;  %v6010_v1 = vld [vmem:[#allocation4 + $0xd0] ss:$2 sm:$0xff]  ;;  %v6074_v29 = vld [vmem:[#allocation4 + $0xd1] ss:$2 sm:$0xff]  ;;  %v12879_v11 = vcombine.low %v12803_v25, %v12866_v56  ;;  %9309 = vmatpush3.bf16.msra.mxu1 %v10215_v0  ;;  %v4577_v0 = vadd.f32 %v12854_v18, %v13838_v14 }
 0x3ae   :  { %v5432_v52 = vpop.f32.mrb[60].mxu0  ;;  %v6842_v13 = vrot.slane %v6841_v2, 4  ;;  %6376 = vst [vmem:[#allocation5 + $0x34] sm:$0x1] %v6375_v19  ;;  %v6124_v16 = vadd.f32 %v6074_v29, %v6010_v1  ;;  %5949 = vst [vmem:[#allocation4 + $0xe8] sm:$0xff] %v5885_v49  ;;  %v4574_v29 = vadd.f32 %v12854_v18, %v12396_v51 }
 0x3af   :  { %v9751_v58 = vadd.f32 %v5432_v52, %v4566_v38  ;;  %v5434_v20 = vpop.f32.mrb[61].mxu0  ;;  %13837 = vst [vmem:[#allocation50_spill] sm:$0xff] %v12879_v11  ;;  %v6438_v51 = vld [vmem:[#allocation5 + $0x8c] sm:$0x1] }
 0x3b0   :  { %v5435_v26 = vpop.f32.mrb[62].mxu0  ;;  %v12870_v17 = vsel %vm11302_vm14, %v6842_v13, %v6846_v12  ;;  %v6149_v32 = vadd.f32 %v6124_v16, %v6123_v35  ;;  %v6414_v12 = vld [vmem:[#allocation5 + $0x88] sm:$0x1] }
 0x3b1   :  { %13835 = vst [vmem:[#allocation44_spill] sm:$0xff] %v12870_v17  ;;  %v5722_v7 = vadd.f32 %v9751_v58, %v12612_v42  ;;  %v9753_v41 = vadd.f32 %v5435_v26, %v4569_v60  ;;  %v5437_v22 = vpop.f32.mrb[63].mxu0  ;;  %v12875_v38 = vcombine.low %v12829_v48, %v12870_v17  ;;  %v6415_v42 = vsel %vm10627_vm2, 0, %v6414_v12 }
 0x3b2   :  { %v6165_v2 = vmul.f32 0.25, %v6149_v32  ;;  %6416 = vst [vmem:[#allocation5 + $0x88] sm:$0x1] %v6415_v42 }
 0x3b3   :  { %13836 = vst [vmem:[#allocation47_spill] sm:$0xff] %v12875_v38  ;;  %v5886_v9 = vmax.f32 %v5722_v7, 0.0  ;;  %v5725_v49 = vadd.f32 %v9753_v41, %v12617_v24  ;;  %8067 = vmatprep.mubr.bf16.mxu1 %v12875_v38 }
 0x3b4   :  { %8068 = vmatmul.mubr.bf16.gmra.mrb[200].mxu1 %v12879_v11  ;;  %v9194_v19 = vpack.c.bf16 %v6165_v2, %v6165_v2  ;;  %v6736_v52 = vld [vmem:[#allocation5 + $0x30] sm:$0xf]  ;;  %v13840_v2 = vld [vmem:[#allocation29_spill] sm:$0xff] }
 0x3b5   :  { %5950 = vst [vmem:[#allocation4 + $0xf0] sm:$0xff] %v5886_v9  ;;  %v5887_v1 = vmax.f32 %v5725_v49, 0.0  ;;  %v6737_v13 = vld [vmem:[#allocation5 + $0x34] sm:$0x1]  ;;  %v5440_v35 = vpop.f32.mrb[64].mxu0  ;;  %v6849_v16 = vshrl.u32 %v6736_v52, 16 }
 0x3b6   :  { %v6310_v24 = vshrl.u32 %v9194_v19, 16  ;;  %v6313_v58 = vshll.u32 %v9194_v19, 16  ;;  %v9755_v20 = vadd.f32 %v5440_v35, %v4574_v29  ;;  %v5442_v60 = vpop.f32.mrb[65].mxu0  ;;  %v12890_v26 = vld [vmem:[#allocation5 + $0x30] sm:$0xf]  ;;  %v6852_v41 = vshll.u32 %v6736_v52, 16 }
 0x3b7   :  { %5951 = vst [vmem:[#allocation4 + $0xf8] sm:$0xff] %v5887_v1  ;;  %v5443_v32 = vpop.f32.mrb[66].mxu0  ;;  %v6851_v7 = vrot.slane %v6849_v16, 4  ;;  %v6858_v22 = vshll.u32 %v6737_v13, 16  ;;  %v6439_v19 = vsel %vm10644_vm7, 0, %v6438_v51  ;;  %v13839_v13 = vld [vmem:[#allocation63_spill] sm:$0xff] }
 0x3b8   :  { %v6312_v9 = vrot.slane %v6310_v24, 7  ;;  %v9757_v49 = vadd.f32 %v5443_v32, %v4577_v0  ;;  %v5730_v12 = vadd.f32 %v9755_v20, %v12633_v50  ;;  %v5445_v42 = vpop.f32.mrb[67].mxu0  ;;  %v6377_v1 = vld [vmem:[#allocation5 + $0x38] sm:$0xf]  ;;  %v6380_v29 = vld [vmem:[#allocation5 + $0x3c] sm:$0x1]  ;;  %v4582_v24 = vadd.f32 %v12854_v18, %v13840_v2 }
 0x3b9   :  { %v6854_v35 = vrot.slane %v6852_v41, 5  ;;  %6440 = vst [vmem:[#allocation5 + $0x8c] sm:$0x1] %v6439_v19  ;;  %v6012_v28 = vld [vmem:[#allocation4 + $0xe0] ss:$2 sm:$0xff]  ;;  %v6860_v41 = vrot.slane %v6858_v22, 5 }
 0x3ba   :  { %v6315_v60 = vor.u32 %v6313_v58, %v6312_v9  ;;  %v6316_v16 = vrot.slane %v6312_v9, 4  ;;  %v5888_v52 = vmax.f32 %v5730_v12, 0.0  ;;  %v5733_v14 = vadd.f32 %v9757_v49, %v13839_v13  ;;  %v6076_v11 = vld [vmem:[#allocation4 + $0xe1] ss:$2 sm:$0xff] }
 0x3bb   :  { %v6855_v0 = vor.u32 %v6854_v35, %v6851_v7  ;;  %v6125_v12 = vadd.f32 %v6076_v11, %v6012_v28  ;;  %v13841_v19 = vld [vmem:[#allocation30_spill] sm:$0xff] }
 0x3bc   :  { %v6378_v50 = vsel %vm10656_vm8, %v6315_v60, %v6377_v1  ;;  %5952 = vst [vmem:[#allocation4 + $0x100] sm:$0xff] %v5888_v52  ;;  %v5889_v20 = vmax.f32 %v5733_v14, 0.0  ;;  %v6381_v32 = vsel %vm10627_vm2, %v6316_v16, %v6380_v29  ;;  %v4585_v1 = vadd.f32 %v12854_v18, %v13841_v19  ;;  %v10216_v35 = vld [vmem:[#allocation14 + $0xc8] sm:$0xff]   ;;  %v10218_v52 = vld [vmem:[#allocation14 + $0xd0] sm:$0xff]   ;;  %v13842_v16 = vld [vmem:[#allocation61_spill] sm:$0xff] }
 0x3bd   :  { %6379 = vst [vmem:[#allocation5 + $0x38] sm:$0xf] %v6378_v50  ;;  %v5448_v9 = vpop.f32.mrb[68].mxu0  ;;  %6382 = vst [vmem:[#allocation5 + $0x3c] sm:$0x1] %v6381_v32  ;;  %v6856_v49 = vrot.slane %v6855_v0, 4  ;;  %9310 = vmatprep.subr.bf16.mxu1 %v10216_v35 }
 0x3be   :  { %v6014_v58 = vld [vmem:[#allocation4 + $0xf0] ss:$2 sm:$0xff]  ;;  %v6078_v51 = vld [vmem:[#allocation4 + $0xf1] ss:$2 sm:$0xff]  ;;  %5953 = vst [vmem:[#allocation4 + $0x108] sm:$0xff] %v5889_v20  ;;  %v9759_v2 = vadd.f32 %v5448_v9, %v4582_v24  ;;  %v5450_v7 = vpop.f32.mrb[69].mxu0 }
 0x3bf   :  { %v6126_v42 = vadd.f32 %v6078_v51, %v6014_v58  ;;  %v10217_v60 = vld [vmem:[#allocation14 + $0x88] sm:$0xff]   ;;  %v5451_v13 = vpop.f32.mrb[70].mxu0  ;;  %v12908_v22 = vsel %vm11302_vm14, %v6856_v49, %v6860_v41  ;;  %v10219_v24 = vld [vmem:[#allocation14 + $0x90] sm:$0xff]  }
 0x3c0   :  { %v5738_v14 = vadd.f32 %v9759_v2, %v13842_v16  ;;  %v9761_v0 = vadd.f32 %v5451_v13, %v4585_v1  ;;  %v5453_v28 = vpop.f32.mrb[71].mxu0  ;;  %9311 = vmatpush3.bf16.msra.mxu1 %v10217_v60  ;;  %v13843_v32 = vld [vmem:[#allocation38_spill] sm:$0xff]  ;;  %v6417_v51 = vld [vmem:[#allocation5 + $0x90] sm:$0x1]  ;;  %v6441_v9 = vld [vmem:[#allocation5 + $0x94] sm:$0x1] }
 0x3c1   :  { %v6150_v29 = vadd.f32 %v6126_v42, %v6125_v12  ;;  %9312 = vmatprep.subr.bf16.mxu1 %v10218_v52  ;;  %v6418_v41 = vsel %vm10627_vm2, 0, %v6417_v51  ;;  %v6442_v49 = vsel %vm10644_vm7, 0, %v6441_v9  ;;  %v13844_v2 = vld [vmem:[#allocation31_spill] sm:$0xff]  ;;  %v13845_v16 = vld [vmem:[#allocation32_spill] sm:$0xff] }
 0x3c2   :  { %v5890_v20 = vmax.f32 %v5738_v14, 0.0  ;;  %v5741_v58 = vadd.f32 %v9761_v0, %v13843_v32  ;;  %v4590_v7 = vadd.f32 %v12854_v18, %v13844_v2  ;;  %6419 = vst [vmem:[#allocation5 + $0x90] sm:$0x1] %v6418_v41  ;;  %6443 = vst [vmem:[#allocation5 + $0x94] sm:$0x1] %v6442_v49  ;;  %v4593_v8 = vadd.f32 %v12854_v18, %v13845_v16  ;;  %v10221_v14 = vld [vmem:[#allocation14 + $0xd8] sm:$0xff]  }
 0x3c3   :  { %v6166_v50 = vmul.f32 0.25, %v6150_v29  ;;  %v10222_v32 = vld [vmem:[#allocation14 + $0x98] sm:$0xff]   ;;  %v13846_v9 = vld [vmem:[#allocation39_spill] sm:$0xff] }
 0x3c4   :  { %5954 = vst [vmem:[#allocation4 + $0x110] sm:$0xff] %v5890_v20  ;;  %v5891_v42 = vmax.f32 %v5741_v58, 0.0  ;;  %v6738_v19 = vld [vmem:[#allocation5 + $0x38] sm:$0xf]  ;;  %v6739_v35 = vld [vmem:[#allocation5 + $0x3c] sm:$0x1]  ;;  %9313 = vmatpush3.bf16.msra.mxu1 %v10219_v24 }
 0x3c5   :  { %v9195_v12 = vpack.c.bf16 %v6166_v50, %v6166_v50  ;;  %v5456_v1 = vpop.f32.mrb[72].mxu0  ;;  %v6863_v60 = vshrl.u32 %v6738_v19, 16  ;;  %v6866_v20 = vshll.u32 %v6738_v19, 16  ;;  %v6872_v2 = vshll.u32 %v6739_v35, 16  ;;  %9314 = vmatprep.subr.bf16.mxu1 %v10221_v14  ;;  %v6383_v24 = vld [vmem:[#allocation5 + $0x40] sm:$0xf] }
 0x3c6   :  { %5955 = vst [vmem:[#allocation4 + $0x118] sm:$0xff] %v5891_v42  ;;  %v9763_v13 = vadd.f32 %v5456_v1, %v4590_v7  ;;  %v5458_v29 = vpop.f32.mrb[73].mxu0  ;;  %v6386_v42 = vld [vmem:[#allocation5 + $0x44] sm:$0x1]  ;;  %v6080_v17 = vld [vmem:[#allocation4 + $0x101] ss:$2 sm:$0xff] }
 0x3c7   :  { %v6318_v52 = vshrl.u32 %v9195_v12, 16  ;;  %v6321_v0 = vshll.u32 %v9195_v12, 16  ;;  %v5459_v28 = vpop.f32.mrb[74].mxu0  ;;  %v6865_v50 = vrot.slane %v6863_v60, 4  ;;  %v6868_v7 = vrot.slane %v6866_v20, 5  ;;  %v10223_v1 = vld [vmem:[#allocation14 + $0xe0] sm:$0xff]  }
 0x3c8   :  { %v9765_v51 = vadd.f32 %v5459_v28, %v4593_v8  ;;  %v5746_v41 = vadd.f32 %v9763_v13, %v13846_v9  ;;  %v5461_v49 = vpop.f32.mrb[75].mxu0  ;;  %9315 = vmatpush3.bf16.msra.mxu1 %v10222_v32  ;;  %v13847_v12 = vld [vmem:[#allocation74_spill] sm:$0xff]  ;;  %v6874_v28 = vrot.slane %v6872_v2, 5  ;;  %v6611_v20 = vld [vmem:[#allocation5 + $0x38] sm:$0xf] }
 0x3c9   :  { %v6320_v58 = vrot.slane %v6318_v52, 7  ;;  %v10224_v60 = vld [vmem:[#allocation14 + $0xa0] sm:$0xff]   ;;  %v6869_v13 = vor.u32 %v6868_v7, %v6865_v50  ;;  %9316 = vmatprep.subr.bf16.mxu1 %v10223_v1 }
 0x3ca   :  { %v5892_v11 = vmax.f32 %v5746_v41, 0.0  ;;  %v5749_v38 = vadd.f32 %v9765_v51, %v13847_v12  ;;  %v6016_v19 = vld [vmem:[#allocation4 + $0x100] ss:$2 sm:$0xff] }
 0x3cb   :  { %v6323_v29 = vor.u32 %v6321_v0, %v6320_v58  ;;  %v6324_v16 = vrot.slane %v6320_v58, 4  ;;  %v13848_v52 = vld [vmem:[#allocation33_spill] sm:$0xff]  ;;  %v6870_v9 = vrot.slane %v6869_v13, 4  ;;  %v6127_v41 = vadd.f32 %v6080_v17, %v6016_v19  ;;  %v13851_v12 = vld [vmem:[#allocation62_spill] sm:$0xff]  ;;  %v10228_v13 = vld [vmem:[#allocation14 + $0xb0] sm:$0xff]  }
 0x3cc   :  { %v4598_v8 = vadd.f32 %v12854_v18, %v13848_v52  ;;  %5956 = vst [vmem:[#allocation4 + $0x120] sm:$0xff] %v5892_v11  ;;  %v5893_v0 = vmax.f32 %v5749_v38, 0.0  ;;  %9317 = vmatpush3.bf16.msra.mxu1 %v10224_v60  ;;  %v10226_v11 = vld [vmem:[#allocation14 + $0xa8] sm:$0xff]   ;;  %v10227_v38 = vld [vmem:[#allocation14 + $0xf0] sm:$0xff]  }
 0x3cd   :  { %v6384_v35 = vsel %vm10656_vm8, %v6323_v29, %v6383_v24  ;;  %v6387_v14 = vsel %vm10627_vm2, %v6324_v16, %v6386_v42  ;;  %v6018_v32 = vld [vmem:[#allocation4 + $0x110] ss:$2 sm:$0xff]  ;;  %v6082_v58 = vld [vmem:[#allocation4 + $0x111] ss:$2 sm:$0xff]  ;;  %v5464_v51 = vpop.f32.mrb[76].mxu0  ;;  %v13849_v24 = vld [vmem:[#allocation42_spill] sm:$0xff]  ;;  %v12934_v29 = vsel %vm11302_vm14, %v6870_v9, %v6874_v28 }
 0x3ce   :  { %6385 = vst [vmem:[#allocation5 + $0x40] sm:$0xf] %v6384_v35  ;;  %6388 = vst [vmem:[#allocation5 + $0x44] sm:$0x1] %v6387_v14  ;;  %v6128_v50 = vadd.f32 %v6082_v58, %v6018_v32  ;;  %v9767_v49 = vadd.f32 %v5464_v51, %v4598_v8  ;;  %v5466_v7 = vpop.f32.mrb[77].mxu0  ;;  %v4601_v1 = vadd.f32 %v12854_v18, %v13849_v24  ;;  %v10225_v42 = vld [vmem:[#allocation14 + $0xe8] sm:$0xff]  }
 0x3cf   :  { %5957 = vst [vmem:[#allocation4 + $0x128] sm:$0xff] %v5893_v0  ;;  %v5467_v2 = vpop.f32.mrb[78].mxu0  ;;  %13850 = vst [vmem:[#allocation52_spill] sm:$0xff] %v12934_v29  ;;  %v12939_v19 = vcombine.low %v12908_v22, %v12934_v29  ;;  %9318 = vmatprep.subr.bf16.mxu1 %v10225_v42  ;;  %v12942_v8 = vcombine.low %v12890_v26, %v6611_v20  ;;  %v13854_v0 = vld [vmem:[#allocation73_spill] sm:$0xff]  ;;  %v13855_v51 = vld [vmem:[#allocation34_spill] sm:$0xff] }
 0x3d0   :  { %v6151_v16 = vadd.f32 %v6128_v50, %v6127_v41  ;;  %v5754_v52 = vadd.f32 %v9767_v49, %v13851_v12  ;;  %v9769_v60 = vadd.f32 %v5467_v2, %v4601_v1  ;;  %v5469_v17 = vpop.f32.mrb[79].mxu0  ;;  %9319 = vmatpush3.bf16.msra.mxu1 %v10226_v11  ;;  %v4606_v9 = vadd.f32 %v12854_v18, %v13855_v51  ;;  %v10230_v50 = vld [vmem:[#allocation14 + $0xf8] sm:$0xff]   ;;  %v13856_v1 = vld [vmem:[#allocation35_spill] sm:$0xff] }
 0x3d1   :  { %13852 = vst [vmem:[#allocation54_spill] sm:$0xff] %v12939_v19  ;;  %13853 = vst [vmem:[#allocation56_spill] sm:$0xff] %v12942_v8  ;;  %8075 = vmatprep.mubr.bf16.mxu1 %v12939_v19  ;;  %9320 = vmatprep.subr.bf16.mxu1 %v10227_v38  ;;  %v10231_v49 = vld [vmem:[#allocation14 + $0xb8] sm:$0xff]   ;;  %v4609_v42 = vadd.f32 %v12854_v18, %v13856_v1  ;;  %v6744_v11 = vld [vmem:[#allocation5 + $0x50] sm:$0xf] }
 0x3d2   :  { %v6167_v35 = vmul.f32 0.25, %v6151_v16  ;;  %v5894_v14 = vmax.f32 %v5754_v52, 0.0  ;;  %v5757_v28 = vadd.f32 %v9769_v60, %v13854_v0  ;;  %8076 = vmatmul.mubr.bf16.gmra.mrb[204].mxu1 %v12942_v8  ;;  %v6556_v12 = vld [vmem:[#allocation5 + $0x58] sm:$0xf]  ;;  %v6877_v0 = vshrl.u32 %v6744_v11, 16 }
 0x3d3   :  { %v13861_v19 = vld [vmem:[#allocation40_spill] sm:$0xff] }
 0x3d4   :  { %v9196_v32 = vpack.c.bf16 %v6167_v35, %v6167_v35  ;;  %5958 = vst [vmem:[#allocation4 + $0x130] sm:$0xff] %v5894_v14  ;;  %v5895_v58 = vmax.f32 %v5757_v28, 0.0  ;;  %9321 = vmatpush3.bf16.msra.mxu1 %v10228_v13  ;;  %v6559_v13 = vld [vmem:[#allocation5 + $0x5c] sm:$0x1] }
 0x3d5   :  { %v5472_v41 = vpop.f32.mrb[80].mxu0  ;;  %9322 = vmatprep.subr.bf16.mxu1 %v10230_v50 }
 0x3d6   :  { %v6477_v20 = vshrl.u32 %v9196_v32, 16  ;;  %5959 = vst [vmem:[#allocation4 + $0x138] sm:$0xff] %v5895_v58  ;;  %v9771_v7 = vadd.f32 %v5472_v41, %v4606_v9  ;;  %v5474_v24 = vpop.f32.mrb[81].mxu0  ;;  %v6480_v2 = vshll.u32 %v9196_v32, 16  ;;  %v6020_v28 = vld [vmem:[#allocation4 + $0x120] ss:$2 sm:$0xff] }
 0x3d7   :  { %v5475_v16 = vpop.f32.mrb[82].mxu0  ;;  %v6084_v58 = vld [vmem:[#allocation4 + $0x121] ss:$2 sm:$0xff]  ;;  %v13857_v9 = vld [vmem:[#allocation64_spill] sm:$0xff]  ;;  %v6880_v24 = vshll.u32 %v6744_v11, 16 }
 0x3d8   :  { %v6479_v38 = vrot.slane %v6477_v20, 7  ;;  %v9773_v52 = vadd.f32 %v5475_v16, %v4609_v42  ;;  %v5762_v60 = vadd.f32 %v9771_v7, %v12670_v15  ;;  %v5477_v17 = vpop.f32.mrb[83].mxu0  ;;  %9323 = vmatpush3.bf16.msra.mxu1 %v10231_v49  ;;  %v13858_v20 = vld [vmem:[#allocation45_spill] sm:$0xff]  ;;  %v6129_v11 = vadd.f32 %v6084_v58, %v6020_v28 }
 0x3d9   :  { %v4614_v32 = vadd.f32 %v12854_v18, %v13858_v20  ;;  %v10232_v17 = vld [vmem:[#allocation14 + $0x140] sm:$0xff]   ;;  %v13860_v20 = vld [vmem:[#allocation23_spill] sm:$0xff] }
 0x3da   :  { %v6482_v35 = vor.u32 %v6480_v2, %v6479_v38  ;;  %v6483_v14 = vrot.slane %v6479_v38, 4  ;;  %v5896_v51 = vmax.f32 %v5762_v60, 0.0  ;;  %v5765_v41 = vadd.f32 %v9773_v52, %v13857_v9  ;;  %v13859_v38 = vld [vmem:[#allocation36_spill] sm:$0xff]  ;;  %9372 = vmatprep.subr.bf16.mxu1 %v10232_v17 }
 0x3db   :  { %v4617_v2 = vadd.f32 %v12854_v18, %v13859_v38  ;;  %v6879_v9 = vrot.slane %v6877_v0, 4 }
 0x3dc   :  { %v6557_v50 = vsel %vm10656_vm8, %v6482_v35, %v6556_v12  ;;  %v6560_v15 = vsel %vm10627_vm2, %v6483_v14, %v6559_v13  ;;  %5960 = vst [vmem:[#allocation4 + $0x140] sm:$0xff] %v5896_v51  ;;  %v5897_v1 = vmax.f32 %v5765_v41, 0.0  ;;  %v6745_v35 = vld [vmem:[#allocation5 + $0x54] sm:$0x1]  ;;  %v6882_v13 = vrot.slane %v6880_v24, 5 }
 0x3dd   :  { %6558 = vst [vmem:[#allocation5 + $0x58] sm:$0xf] %v6557_v50  ;;  %v6022_v49 = vld [vmem:[#allocation4 + $0x130] ss:$2 sm:$0xff]  ;;  %v6086_v7 = vld [vmem:[#allocation4 + $0x131] ss:$2 sm:$0xff] }
 0x3de   :  { %v5480_v42 = vpop.f32.mrb[84].mxu0  ;;  %6561 = vst [vmem:[#allocation5 + $0x5c] sm:$0x1] %v6560_v15  ;;  %v6130_v16 = vadd.f32 %v6086_v7, %v6022_v49  ;;  %5961 = vst [vmem:[#allocation4 + $0x148] sm:$0xff] %v5897_v1  ;;  %v6886_v28 = vshll.u32 %v6745_v35, 16  ;;  %v6883_v58 = vor.u32 %v6882_v13, %v6879_v9 }
 0x3df   :  { %v9775_v52 = vadd.f32 %v5480_v42, %v4614_v32  ;;  %v5482_v60 = vpop.f32.mrb[85].mxu0  ;;  %v13862_v32 = vld [vmem:[#allocation37_spill] sm:$0xff] }
 0x3e0   :  { %v5483_v12 = vpop.f32.mrb[86].mxu0  ;;  %v6152_v14 = vadd.f32 %v6130_v16, %v6129_v11  ;;  %v4622_v49 = vadd.f32 %v12854_v18, %v13862_v32  ;;  %v6884_v35 = vrot.slane %v6883_v58, 4 }
 0x3e1   :  { %v5770_v50 = vadd.f32 %v9775_v52, %v13860_v20  ;;  %v9777_v51 = vadd.f32 %v5483_v12, %v4617_v2  ;;  %v5485_v41 = vpop.f32.mrb[87].mxu0  ;;  %v13863_v2 = vld [vmem:[#allocation46_spill] sm:$0xff] }
 0x3e2   :  { %v6168_v15 = vmul.f32 0.25, %v6152_v14  ;;  %v4625_v52 = vadd.f32 %v12854_v18, %v13863_v2  ;;  %v6562_v41 = vld [vmem:[#allocation5 + $0x60] sm:$0xf] }
 0x3e3   :  { %v5898_v8 = vmax.f32 %v5770_v50, 0.0  ;;  %v5773_v38 = vadd.f32 %v9777_v51, %v13861_v19  ;;  %v6888_v19 = vrot.slane %v6886_v28, 5 }
 0x3e4   :  { %v9197_v7 = vpack.c.bf16 %v6168_v15, %v6168_v15  ;;  %v6746_v0 = vld [vmem:[#allocation5 + $0x58] sm:$0xf] }
 0x3e5   :  { %5962 = vst [vmem:[#allocation4 + $0x150] sm:$0xff] %v5898_v8  ;;  %v5899_v1 = vmax.f32 %v5773_v38, 0.0  ;;  %v6747_v24 = vld [vmem:[#allocation5 + $0x5c] sm:$0x1]  ;;  %v5488_v42 = vpop.f32.mrb[88].mxu0  ;;  %v6891_v11 = vshrl.u32 %v6746_v0, 16 }
 0x3e6   :  { %v6894_v16 = vshll.u32 %v6746_v0, 16  ;;  %v6485_v60 = vshrl.u32 %v9197_v7, 16  ;;  %v9779_v17 = vadd.f32 %v5488_v42, %v4622_v49  ;;  %v5490_v12 = vpop.f32.mrb[89].mxu0  ;;  %v6900_v14 = vshll.u32 %v6747_v24, 16  ;;  %v6565_v0 = vld [vmem:[#allocation5 + $0x64] sm:$0x1] }
 0x3e7   :  { %5963 = vst [vmem:[#allocation4 + $0x158] sm:$0xff] %v5899_v1  ;;  %v6893_v9 = vrot.slane %v6891_v11, 4  ;;  %v6488_v8 = vshll.u32 %v9197_v7, 16  ;;  %v5491_v50 = vpop.f32.mrb[90].mxu0  ;;  %v6024_v49 = vld [vmem:[#allocation4 + $0x140] ss:$2 sm:$0xff]  ;;  %v6889_v24 = vsel %vm11302_vm14, %v6884_v35, %v6888_v19 }
 0x3e8   :  { %v6896_v13 = vrot.slane %v6894_v16, 5  ;;  %v6487_v20 = vrot.slane %v6485_v60, 7  ;;  %v5778_v51 = vadd.f32 %v9779_v17, %v12686_v46  ;;  %v9781_v15 = vadd.f32 %v5491_v50, %v4625_v52  ;;  %v5493_v38 = vpop.f32.mrb[91].mxu0  ;;  %v6088_v28 = vld [vmem:[#allocation4 + $0x141] ss:$2 sm:$0xff]  ;;  %v13864_v11 = vld [vmem:[#allocation48_spill] sm:$0xff] }
 0x3e9   :  { %v6902_v7 = vrot.slane %v6900_v14, 5  ;;  %v4630_v46 = vadd.f32 %v12854_v18, %v13864_v11  ;;  %v6614_v52 = vld [vmem:[#allocation5 + $0x50] sm:$0xf]  ;;  %v12975_v60 = vld [vmem:[#allocation5 + $0x58] sm:$0xf] }
 0x3ea   :  { %v6897_v32 = vor.u32 %v6896_v13, %v6893_v9  ;;  %v6490_v2 = vor.u32 %v6488_v8, %v6487_v20  ;;  %v6491_v29 = vrot.slane %v6487_v20, 4  ;;  %v5900_v1 = vmax.f32 %v5778_v51, 0.0  ;;  %v13865_v12 = vld [vmem:[#allocation49_spill] sm:$0xff] }
 0x3eb   :  { %v5781_v58 = vadd.f32 %v9781_v15, %v12693_v53  ;;  %v4633_v53 = vadd.f32 %v12854_v18, %v13865_v12  ;;  %v6131_v20 = vadd.f32 %v6088_v28, %v6024_v49  ;;  %v9036_v15 = vcombine.low %v6614_v52, %v12975_v60  ;;  %v13866_v28 = vld [vmem:[#allocation51_spill] sm:$0xff] }
 0x3ec   :  { %v6898_v42 = vrot.slane %v6897_v32, 4  ;;  %v6563_v16 = vsel %vm10656_vm8, %v6490_v2, %v6562_v41  ;;  %5964 = vst [vmem:[#allocation4 + $0x160] sm:$0xff] %v5900_v1  ;;  %v6566_v17 = vsel %vm10627_vm2, %v6491_v29, %v6565_v0 }
 0x3ed   :  { %6564 = vst [vmem:[#allocation5 + $0x60] sm:$0xf] %v6563_v16  ;;  %v5901_v9 = vmax.f32 %v5781_v58, 0.0  ;;  %v5496_v13 = vpop.f32.mrb[92].mxu0  ;;  %6567 = vst [vmem:[#allocation5 + $0x64] sm:$0x1] %v6566_v17 }
 0x3ee   :  { %v6026_v19 = vld [vmem:[#allocation4 + $0x150] ss:$2 sm:$0xff]  ;;  %v6090_v35 = vld [vmem:[#allocation4 + $0x151] ss:$2 sm:$0xff]  ;;  %v12983_v14 = vsel %vm11302_vm14, %v6898_v42, %v6902_v7  ;;  %v9783_v50 = vadd.f32 %v5496_v13, %v4630_v46  ;;  %v5498_v51 = vpop.f32.mrb[93].mxu0  ;;  %v4638_v42 = vadd.f32 %v12854_v18, %v13866_v28 }
 0x3ef   :  { %v6132_v8 = vadd.f32 %v6090_v35, %v6026_v19  ;;  %v9054_v41 = vcombine.low %v6889_v24, %v12983_v14  ;;  %5965 = vst [vmem:[#allocation4 + $0x168] sm:$0xff] %v5901_v9  ;;  %v5499_v29 = vpop.f32.mrb[94].mxu0 }
 0x3f0   :  { %v5786_v32 = vadd.f32 %v9783_v50, %v12684_v61  ;;  %v9785_v0 = vadd.f32 %v5499_v29, %v4633_v53  ;;  %v5501_v2 = vpop.f32.mrb[95].mxu0 }
 0x3f1   :  { %v6153_v38 = vadd.f32 %v6132_v8, %v6131_v20  ;;  %8083 = vmatprep.mubr.bf16.mxu1 %v9054_v41 }
 0x3f2   :  { %8084 = vmatmul.mubr.bf16.gmra.mrb[208].mxu1 %v9036_v15  ;;  %v5902_v58 = vmax.f32 %v5786_v32, 0.0  ;;  %v5789_v49 = vadd.f32 %v9785_v0, %v12689_v31  ;;  %v13867_v31 = vld [vmem:[#allocation53_spill] sm:$0xff]  ;;  %v6568_v15 = vld [vmem:[#allocation5 + $0x68] sm:$0xf]  ;;  %v6571_v0 = vld [vmem:[#allocation5 + $0x6c] sm:$0x1] }
 0x3f3   :  { %v6169_v1 = vmul.f32 0.25, %v6153_v38  ;;  %v4641_v35 = vadd.f32 %v12854_v18, %v13867_v31 }
 0x3f4   :  { %5966 = vst [vmem:[#allocation4 + $0x170] sm:$0xff] %v5902_v58  ;;  %v5903_v24 = vmax.f32 %v5789_v49, 0.0  ;;  %v6748_v11 = vld [vmem:[#allocation5 + $0x60] sm:$0xf]  ;;  %v6749_v46 = vld [vmem:[#allocation5 + $0x64] sm:$0x1] }
 0x3f5   :  { %v9198_v7 = vpack.c.bf16 %v6169_v1, %v6169_v1  ;;  %v5504_v16 = vpop.f32.mrb[96].mxu0  ;;  %v6905_v52 = vshrl.u32 %v6748_v11, 16  ;;  %v6908_v17 = vshll.u32 %v6748_v11, 16  ;;  %v12991_v61 = vld [vmem:[#allocation5 + $0x60] sm:$0xf]  ;;  %v6914_v8 = vshll.u32 %v6749_v46, 16 }
 0x3f6   :  { %5967 = vst [vmem:[#allocation4 + $0x178] sm:$0xff] %v5903_v24  ;;  %v9787_v53 = vadd.f32 %v5504_v16, %v4638_v42  ;;  %v9044_v19 = vcombine.low %v12975_v60, %v12991_v61  ;;  %v5506_v9 = vpop.f32.mrb[97].mxu0  ;;  %v6028_v28 = vld [vmem:[#allocation4 + $0x160] ss:$2 sm:$0xff]  ;;  %v6092_v42 = vld [vmem:[#allocation4 + $0x161] ss:$2 sm:$0xff] }
 0x3f7   :  { %v6493_v12 = vshrl.u32 %v9198_v7, 16  ;;  %v6907_v13 = vrot.slane %v6905_v52, 4  ;;  %v6910_v20 = vrot.slane %v6908_v17, 5  ;;  %v6496_v51 = vshll.u32 %v9198_v7, 16  ;;  %v5507_v41 = vpop.f32.mrb[98].mxu0  ;;  %v13868_v46 = vld [vmem:[#allocation55_spill] sm:$0xff] }
 0x3f8   :  { %v5794_v29 = vadd.f32 %v9787_v53, %v12730_v37  ;;  %v9789_v38 = vadd.f32 %v5507_v41, %v4641_v35  ;;  %v5509_v32 = vpop.f32.mrb[99].mxu0  ;;  %v6916_v16 = vrot.slane %v6914_v8, 5  ;;  %v4646_v7 = vadd.f32 %v12854_v18, %v13868_v46  ;;  %v13869_v17 = vld [vmem:[#allocation57_spill] sm:$0xff] }
 0x3f9   :  { %v6495_v50 = vrot.slane %v6493_v12, 7  ;;  %v6911_v2 = vor.u32 %v6910_v20, %v6907_v13  ;;  %v4649_v12 = vadd.f32 %v12854_v18, %v13869_v17  ;;  %v6133_v13 = vadd.f32 %v6092_v42, %v6028_v28 }
 0x3fa   :  { %v5904_v49 = vmax.f32 %v5794_v29, 0.0  ;;  %v5797_v24 = vadd.f32 %v9789_v38, %v12737_v44 }
 0x3fb   :  { %v6498_v1 = vor.u32 %v6496_v51, %v6495_v50  ;;  %v6499_v58 = vrot.slane %v6495_v50, 4  ;;  %v6912_v11 = vrot.slane %v6911_v2, 4 }
 0x3fc   :  { %5968 = vst [vmem:[#allocation4 + $0x180] sm:$0xff] %v5904_v49  ;;  %v5905_v35 = vmax.f32 %v5797_v24, 0.0 }
 0x3fd   :  { %v6569_v37 = vsel %vm10656_vm8, %v6498_v1, %v6568_v15  ;;  %v6572_v52 = vsel %vm10627_vm2, %v6499_v58, %v6571_v0  ;;  %v6030_v53 = vld [vmem:[#allocation4 + $0x170] ss:$2 sm:$0xff]  ;;  %v6094_v31 = vld [vmem:[#allocation4 + $0x171] ss:$2 sm:$0xff]  ;;  %v5512_v44 = vpop.f32.mrb[100].mxu0  ;;  %v13009_v9 = vsel %vm11302_vm14, %v6912_v11, %v6916_v16  ;;  %v13870_v58 = vld [vmem:[#allocation58_spill] sm:$0xff] }
 0x3fe   :  { %6570 = vst [vmem:[#allocation5 + $0x68] sm:$0xf] %v6569_v37  ;;  %6573 = vst [vmem:[#allocation5 + $0x6c] sm:$0x1] %v6572_v52  ;;  %v6134_v20 = vadd.f32 %v6094_v31, %v6030_v53  ;;  %v9791_v8 = vadd.f32 %v5512_v44, %v4646_v7  ;;  %v5514_v50 = vpop.f32.mrb[101].mxu0  ;;  %v9062_v51 = vcombine.low %v12983_v14, %v13009_v9  ;;  %v13871_v52 = vld [vmem:[#allocation59_spill] sm:$0xff] }
 0x3ff   :  { %5969 = vst [vmem:[#allocation4 + $0x188] sm:$0xff] %v5905_v35  ;;  %v5515_v41 = vpop.f32.mrb[102].mxu0  ;;  %v4654_v49 = vadd.f32 %v12854_v18, %v13870_v58  ;;  %v4657_v17 = vadd.f32 %v12854_v18, %v13871_v52 }
 0x400   :  { %v6154_v29 = vadd.f32 %v6134_v20, %v6133_v13  ;;  %v5802_v15 = vadd.f32 %v9791_v8, %v12726_v10  ;;  %v9793_v38 = vadd.f32 %v5515_v41, %v4649_v12  ;;  %v5517_v32 = vpop.f32.mrb[103].mxu0  ;;  %v6574_v8 = vld [vmem:[#allocation5 + $0x70] sm:$0xf] }
 0x402   :  { %v6170_v0 = vmul.f32 0.25, %v6154_v29  ;;  %v5906_v2 = vmax.f32 %v5802_v15, 0.0  ;;  %v5805_v1 = vadd.f32 %v9793_v38, %v12733_v34  ;;  %v6577_v15 = vld [vmem:[#allocation5 + $0x74] sm:$0x1] }
 0x404   :  { %v9199_v28 = vpack.c.bf16 %v6170_v0, %v6170_v0  ;;  %5970 = vst [vmem:[#allocation4 + $0x190] sm:$0xff] %v5906_v2  ;;  %v5907_v42 = vmax.f32 %v5805_v1, 0.0 }
 0x405   :  { %v6750_v24 = vld [vmem:[#allocation5 + $0x68] sm:$0xf]  ;;  %v6751_v11 = vld [vmem:[#allocation5 + $0x6c] sm:$0x1]  ;;  %v5520_v16 = vpop.f32.mrb[104].mxu0 }
 0x406   :  { %v6919_v46 = vshrl.u32 %v6750_v24, 16  ;;  %v6922_v7 = vshll.u32 %v6750_v24, 16  ;;  %v6501_v37 = vshrl.u32 %v9199_v28, 16  ;;  %5971 = vst [vmem:[#allocation4 + $0x198] sm:$0xff] %v5907_v42  ;;  %v9795_v10 = vadd.f32 %v5520_v16, %v4654_v49  ;;  %v5522_v12 = vpop.f32.mrb[105].mxu0  ;;  %v13872_v24 = vld [vmem:[#allocation60_spill] sm:$0xff] }
 0x407   :  { %v6928_v31 = vshll.u32 %v6751_v11, 16  ;;  %v6504_v44 = vshll.u32 %v9199_v28, 16  ;;  %v5523_v13 = vpop.f32.mrb[106].mxu0  ;;  %v6032_v2 = vld [vmem:[#allocation4 + $0x180] ss:$2 sm:$0xff]  ;;  %v9798_v28 = vadd.f32 %v12854_v18, %v13872_v24 }
 0x408   :  { %v6921_v53 = vrot.slane %v6919_v46, 4  ;;  %v6924_v34 = vrot.slane %v6922_v7, 5  ;;  %v6503_v35 = vrot.slane %v6501_v37, 7  ;;  %v5810_v20 = vadd.f32 %v9795_v10, %v12764_v39  ;;  %v5525_v41 = vpop.f32.mrb[107].mxu0  ;;  %v6096_v1 = vld [vmem:[#allocation4 + $0x181] ss:$2 sm:$0xff] }
 0x409   :  { %v9797_v50 = vadd.f32 %v5523_v13, %v4657_v17  ;;  %v6930_v42 = vrot.slane %v6928_v31, 5  ;;  %v13025_v11 = vld [vmem:[#allocation5 + $0x68] sm:$0xf]  ;;  %v6135_v12 = vadd.f32 %v6096_v1, %v6032_v2 }
 0x40a   :  { %v6925_v29 = vor.u32 %v6924_v34, %v6921_v53  ;;  %v6506_v38 = vor.u32 %v6504_v44, %v6503_v35  ;;  %v6507_v32 = vrot.slane %v6503_v35, 4  ;;  %v5908_v0 = vmax.f32 %v5810_v20, 0.0  ;;  %v13873_v46 = vld [vmem:[#allocation22_spill] sm:$0xff] }
 0x40b   :  { %v5813_v58 = vadd.f32 %v9797_v50, %v12771_v27  ;;  %v9800_v7 = vadd.f32 %v12854_v18, %v13873_v46  ;;  %v13041_v13 = vcombine.low %v12991_v61, %v13025_v11 }
 0x40c   :  { %v6926_v49 = vrot.slane %v6925_v29, 4  ;;  %v6575_v39 = vsel %vm10656_vm8, %v6506_v38, %v6574_v8  ;;  %5972 = vst [vmem:[#allocation4 + $0x1a0] sm:$0xff] %v5908_v0  ;;  %v6578_v16 = vsel %vm10627_vm2, %v6507_v32, %v6577_v15  ;;  %v13874_v32 = vld [vmem:[#allocation65_spill] sm:$0xff] }
 0x40d   :  { %6576 = vst [vmem:[#allocation5 + $0x70] sm:$0xf] %v6575_v39  ;;  %v6034_v37 = vld [vmem:[#allocation4 + $0x190] ss:$2 sm:$0xff]  ;;  %v6098_v27 = vld [vmem:[#allocation4 + $0x191] ss:$2 sm:$0xff]  ;;  %v9802_v0 = vadd.f32 %v12854_v18, %v13874_v32 }
 0x40e   :  { %v5909_v10 = vmax.f32 %v5813_v58, 0.0  ;;  %v5528_v52 = vpop.f32.mrb[108].mxu0  ;;  %v13033_v17 = vsel %vm11302_vm14, %v6926_v49, %v6930_v42  ;;  %6579 = vst [vmem:[#allocation5 + $0x74] sm:$0x1] %v6578_v16  ;;  %v6136_v53 = vadd.f32 %v6098_v27, %v6034_v37 }
 0x40f   :  { %v9799_v34 = vadd.f32 %v9798_v28, %v5528_v52  ;;  %v5530_v31 = vpop.f32.mrb[109].mxu0  ;;  %v13037_v35 = vcombine.low %v13009_v9, %v13033_v17 }
 0x410   :  { %5973 = vst [vmem:[#allocation4 + $0x1a8] sm:$0xff] %v5909_v10  ;;  %v5531_v44 = vpop.f32.mrb[110].mxu0  ;;  %v6155_v20 = vadd.f32 %v6136_v53, %v6135_v12 }
 0x411   :  { %v5818_v8 = vadd.f32 %v9799_v34, %v12760_v62  ;;  %v9801_v50 = vadd.f32 %v9800_v7, %v5531_v44  ;;  %v5533_v41 = vpop.f32.mrb[111].mxu0  ;;  %8091 = vmatprep.mubr.bf16.mxu1 %v13037_v35  ;;  %v6580_v44 = vld [vmem:[#allocation5 + $0x78] sm:$0xf] }
 0x412   :  { %8092 = vmatmul.mubr.bf16.gmra.mrb[212].mxu1 %v13041_v13  ;;  %v6171_v29 = vmul.f32 0.25, %v6155_v20 }
 0x413   :  { %v5910_v15 = vmax.f32 %v5818_v8, 0.0  ;;  %v5821_v38 = vadd.f32 %v9801_v50, %v12767_v47  ;;  %v13875_v47 = vld [vmem:[#allocation66_spill] sm:$0xff]  ;;  %v6583_v50 = vld [vmem:[#allocation5 + $0x7c] sm:$0x1] }
 0x414   :  { %v9200_v2 = vpack.c.bf16 %v6171_v29, %v6171_v29  ;;  %v6752_v58 = vld [vmem:[#allocation5 + $0x70] sm:$0xf]  ;;  %v9804_v7 = vadd.f32 %v12854_v18, %v13875_v47 }
 0x415   :  { %5974 = vst [vmem:[#allocation4 + $0x1b0] sm:$0xff] %v5910_v15  ;;  %v5911_v1 = vmax.f32 %v5821_v38, 0.0  ;;  %v6753_v49 = vld [vmem:[#allocation5 + $0x74] sm:$0x1]  ;;  %v5536_v42 = vpop.f32.mrb[112].mxu0  ;;  %v6933_v62 = vshrl.u32 %v6752_v58, 16 }
 0x416   :  { %v6936_v24 = vshll.u32 %v6752_v58, 16  ;;  %v13049_v28 = vld [vmem:[#allocation5 + $0x70] sm:$0xf]  ;;  %v6509_v39 = vshrl.u32 %v9200_v2, 16  ;;  %v9803_v16 = vadd.f32 %v9802_v0, %v5536_v42  ;;  %v5538_v37 = vpop.f32.mrb[113].mxu0  ;;  %v6942_v52 = vshll.u32 %v6753_v49, 16 }
 0x417   :  { %5975 = vst [vmem:[#allocation4 + $0x1b8] sm:$0xff] %v5911_v1  ;;  %v9045_v46 = vcombine.low %v13025_v11, %v13049_v28  ;;  %v6935_v27 = vrot.slane %v6933_v62, 4  ;;  %v6512_v53 = vshll.u32 %v9200_v2, 16  ;;  %v5539_v34 = vpop.f32.mrb[114].mxu0  ;;  %v6036_v32 = vld [vmem:[#allocation4 + $0x1a0] ss:$2 sm:$0xff] }
 0x418   :  { %v6938_v10 = vrot.slane %v6936_v24, 5  ;;  %v6511_v12 = vrot.slane %v6509_v39, 7  ;;  %v5826_v31 = vadd.f32 %v9803_v16, %v12812_v43  ;;  %v9805_v20 = vadd.f32 %v9804_v7, %v5539_v34  ;;  %v5541_v8 = vpop.f32.mrb[115].mxu0  ;;  %v6100_v0 = vld [vmem:[#allocation4 + $0x1a1] ss:$2 sm:$0xff]  ;;  %v13877_v24 = vld [vmem:[#allocation68_spill] sm:$0xff] }
 0x419   :  { %v6944_v42 = vrot.slane %v6942_v52, 5  ;;  %v13876_v49 = vld [vmem:[#allocation67_spill] sm:$0xff]  ;;  %v9808_v39 = vadd.f32 %v12854_v18, %v13877_v24 }
 0x41a   :  { %v6939_v41 = vor.u32 %v6938_v10, %v6935_v27  ;;  %v6514_v29 = vor.u32 %v6512_v53, %v6511_v12  ;;  %v6515_v15 = vrot.slane %v6511_v12, 4  ;;  %v5912_v38 = vmax.f32 %v5826_v31, 0.0 }
 0x41b   :  { %v5829_v1 = vadd.f32 %v9805_v20, %v12819_v57  ;;  %v9806_v2 = vadd.f32 %v12854_v18, %v13876_v49  ;;  %v6137_v27 = vadd.f32 %v6100_v0, %v6036_v32 }
 0x41c   :  { %v6940_v58 = vrot.slane %v6939_v41, 4  ;;  %v6581_v43 = vsel %vm10656_vm8, %v6514_v29, %v6580_v44  ;;  %5976 = vst [vmem:[#allocation4 + $0x1c0] sm:$0xff] %v5912_v38  ;;  %v6584_v62 = vsel %vm10627_vm2, %v6515_v15, %v6583_v50  ;;  %v10356_v29 = vld [vmem:[%s13544_s2] ss:$0 sm:$0xff]  ;;  %v13878_v15 = vld [vmem:[#allocation69_spill] sm:$0xff] }
 0x41d   :  { %6582 = vst [vmem:[#allocation5 + $0x78] sm:$0xf] %v6581_v43  ;;  %v5913_v7 = vmax.f32 %v5829_v1, 0.0  ;;  %v5544_v57 = vpop.f32.mrb[116].mxu0  ;;  %6585 = vst [vmem:[#allocation5 + $0x7c] sm:$0x1] %v6584_v62  ;;  %v9810_v38 = vadd.f32 %v10356_v29, %v13878_v15 }
 0x41e   :  { %v6038_v16 = vld [vmem:[#allocation4 + $0x1b0] ss:$2 sm:$0xff]  ;;  %v6102_v47 = vld [vmem:[#allocation4 + $0x1b1] ss:$2 sm:$0xff]  ;;  %v13067_v37 = vsel %vm11302_vm14, %v6940_v58, %v6944_v42  ;;  %v9807_v52 = vadd.f32 %v9806_v2, %v5544_v57  ;;  %v5546_v12 = vpop.f32.mrb[117].mxu0  ;;  %v13879_v62 = vld [vmem:[#allocation70_spill] sm:$0xff] }
 0x41f   :  { %v6138_v10 = vadd.f32 %v6102_v47, %v6038_v16  ;;  %v9063_v53 = vcombine.low %v13033_v17, %v13067_v37  ;;  %5977 = vst [vmem:[#allocation4 + $0x1c8] sm:$0xff] %v5913_v7  ;;  %v5547_v34 = vpop.f32.mrb[118].mxu0  ;;  %v9812_v24 = vadd.f32 %v10356_v29, %v13879_v62 }
 0x420   :  { %v5834_v31 = vadd.f32 %v9807_v52, %v12808_v33  ;;  %v9809_v44 = vadd.f32 %v9808_v39, %v5547_v34  ;;  %v5549_v20 = vpop.f32.mrb[119].mxu0  ;;  %v6586_v52 = vld [vmem:[#allocation5 + $0x80] sm:$0xf] }
 0x421   :  { %v6156_v18 = vadd.f32 %v6138_v10, %v6137_v27 }
 0x422   :  { %v5914_v50 = vmax.f32 %v5834_v31, 0.0  ;;  %v5837_v41 = vadd.f32 %v9809_v44, %v12815_v6  ;;  %v6589_v31 = vld [vmem:[#allocation5 + $0x84] sm:$0x1] }
 0x423   :  { %v6172_v8 = vmul.f32 0.25, %v6156_v18 }
 0x424   :  { %5978 = vst [vmem:[#allocation4 + $0x1d0] sm:$0xff] %v5914_v50  ;;  %v5915_v0 = vmax.f32 %v5837_v41, 0.0  ;;  %v6754_v1 = vld [vmem:[#allocation5 + $0x78] sm:$0xf]  ;;  %v6755_v58 = vld [vmem:[#allocation5 + $0x7c] sm:$0x1] }
 0x425   :  { %v9201_v32 = vpack.c.bf16 %v6172_v8, %v6172_v8  ;;  %v5552_v42 = vpop.f32.mrb[120].mxu0  ;;  %v6947_v49 = vshrl.u32 %v6754_v1, 16  ;;  %v6950_v33 = vshll.u32 %v6754_v1, 16  ;;  %v6956_v47 = vshll.u32 %v6755_v58, 16  ;;  %v13880_v1 = vld [vmem:[#allocation71_spill] sm:$0xff] }
 0x426   :  { %5979 = vst [vmem:[#allocation4 + $0x1d8] sm:$0xff] %v5915_v0  ;;  %v9811_v43 = vadd.f32 %v9810_v38, %v5552_v42  ;;  %v5554_v6 = vpop.f32.mrb[121].mxu0  ;;  %v6040_v50 = vld [vmem:[#allocation4 + $0x1c0] ss:$2 sm:$0xff]  ;;  %v6104_v41 = vld [vmem:[#allocation4 + $0x1c1] ss:$2 sm:$0xff]  ;;  %v9814_v58 = vadd.f32 %v10356_v29, %v13880_v1 }
 0x427   :  { %v6517_v2 = vshrl.u32 %v9201_v32, 16  ;;  %v6949_v39 = vrot.slane %v6947_v49, 4  ;;  %v6952_v16 = vrot.slane %v6950_v33, 5  ;;  %v6520_v57 = vshll.u32 %v9201_v32, 16  ;;  %v5555_v27 = vpop.f32.mrb[122].mxu0  ;;  %v13881_v49 = vld [vmem:[#allocation72_spill] sm:$0xff] }
 0x428   :  { %v5842_v10 = vadd.f32 %v9811_v43, %v12846_v4  ;;  %v9813_v12 = vadd.f32 %v9812_v24, %v5555_v27  ;;  %v5557_v34 = vpop.f32.mrb[123].mxu0  ;;  %v6958_v0 = vrot.slane %v6956_v47, 5  ;;  %v13083_v4 = vld [vmem:[#allocation5 + $0x78] sm:$0xf]  ;;  %v9816_v33 = vadd.f32 %v10356_v29, %v13881_v49  ;;  %v6595_v49 = vld [vmem:[#allocation5 + $0x8c] sm:$0x1] }
 0x429   :  { %v6519_v7 = vrot.slane %v6517_v2, 7  ;;  %v6953_v18 = vor.u32 %v6952_v16, %v6949_v39  ;;  %v6139_v6 = vadd.f32 %v6104_v41, %v6040_v50 }
 0x42a   :  { %v5916_v8 = vmax.f32 %v5842_v10, 0.0  ;;  %v5845_v15 = vadd.f32 %v9813_v12, %v12858_v59 }
 0x42b   :  { %v6522_v44 = vor.u32 %v6520_v57, %v6519_v7  ;;  %v6523_v20 = vrot.slane %v6519_v7, 4  ;;  %v6954_v38 = vrot.slane %v6953_v18, 4  ;;  %v13098_v57 = vcombine.low %v13049_v28, %v13083_v4 }
 0x42c   :  { %5980 = vst [vmem:[#allocation4 + $0x1e0] sm:$0xff] %v5916_v8  ;;  %v5917_v62 = vmax.f32 %v5845_v15, 0.0 }
 0x42d   :  { %v6587_v32 = vsel %vm10656_vm8, %v6522_v44, %v6586_v52  ;;  %v6590_v42 = vsel %vm10627_vm2, %v6523_v20, %v6589_v31  ;;  %v6042_v2 = vld [vmem:[#allocation4 + $0x1d0] ss:$2 sm:$0xff]  ;;  %v6106_v43 = vld [vmem:[#allocation4 + $0x1d1] ss:$2 sm:$0xff]  ;;  %v5560_v59 = vpop.f32.mrb[124].mxu0  ;;  %v13090_v24 = vsel %vm11302_vm14, %v6954_v38, %v6958_v0 }
 0x42e   :  { %6588 = vst [vmem:[#allocation5 + $0x80] sm:$0xf] %v6587_v32  ;;  %6591 = vst [vmem:[#allocation5 + $0x84] sm:$0x1] %v6590_v42  ;;  %v6140_v39 = vadd.f32 %v6106_v43, %v6042_v2  ;;  %v9815_v16 = vadd.f32 %v9814_v58, %v5560_v59  ;;  %v5562_v47 = vpop.f32.mrb[125].mxu0  ;;  %v13094_v7 = vcombine.low %v13067_v37, %v13090_v24 }
 0x42f   :  { %5981 = vst [vmem:[#allocation4 + $0x1e8] sm:$0xff] %v5917_v62  ;;  %v5563_v29 = vpop.f32.mrb[126].mxu0  ;;  %v6592_v42 = vld [vmem:[#allocation5 + $0x88] sm:$0xf] }
 0x430   :  { %v6157_v27 = vadd.f32 %v6140_v39, %v6139_v6  ;;  %v5850_v10 = vadd.f32 %v9815_v16, %v12842_v40  ;;  %v9817_v52 = vadd.f32 %v9816_v33, %v5563_v29  ;;  %v5565_v12 = vpop.f32.mrb[127].mxu0  ;;  %8099 = vmatprep.mubr.bf16.mxu1 %v13094_v7 }
 0x431   :  { %8100 = vmatmul.mubr.bf16.gmra.mrb[216].mxu1 %v13098_v57 }
 0x432   :  { %v6173_v34 = vmul.f32 0.25, %v6157_v27  ;;  %v5918_v18 = vmax.f32 %v5850_v10, 0.0  ;;  %v5853_v31 = vadd.f32 %v9817_v52, %v12849_v30 }
 0x434   :  { %v9202_v44 = vpack.c.bf16 %v6173_v34, %v6173_v34  ;;  %5982 = vst [vmem:[#allocation4 + $0x1f0] sm:$0xff] %v5918_v18  ;;  %v5919_v20 = vmax.f32 %v5853_v31, 0.0 }
 0x435   :  { %v6756_v8 = vld [vmem:[#allocation5 + $0x80] sm:$0xf]  ;;  %v6757_v50 = vld [vmem:[#allocation5 + $0x84] sm:$0x1] }
 0x436   :  { %v6961_v41 = vshrl.u32 %v6756_v8, 16  ;;  %v6964_v15 = vshll.u32 %v6756_v8, 16  ;;  %v6525_v38 = vshrl.u32 %v9202_v44, 16  ;;  %5983 = vst [vmem:[#allocation4 + $0x1f8] sm:$0xff] %v5919_v20  ;;  %v6970_v1 = vshll.u32 %v6757_v50, 16 }
 0x437   :  { %v6528_v32 = vshll.u32 %v9202_v44, 16  ;;  %v6044_v30 = vld [vmem:[#allocation4 + $0x1e0] ss:$2 sm:$0xff]  ;;  %v6108_v62 = vld [vmem:[#allocation4 + $0x1e1] ss:$2 sm:$0xff] }
 0x438   :  { %v6963_v40 = vrot.slane %v6961_v41, 4  ;;  %v6966_v0 = vrot.slane %v6964_v15, 5  ;;  %v6527_v58 = vrot.slane %v6525_v38, 7  ;;  %v6972_v6 = vrot.slane %v6970_v1, 5  ;;  %v13132_v63 = vld [vmem:[#allocation5 + $0x80] sm:$0xf] }
 0x439   :  { %v6141_v10 = vadd.f32 %v6108_v62, %v6044_v30  ;;  %v9046_v11 = vcombine.low %v13083_v4, %v13132_v63 }
 0x43a   :  { %v6967_v33 = vor.u32 %v6966_v0, %v6963_v40  ;;  %v6530_v2 = vor.u32 %v6528_v32, %v6527_v58  ;;  %v6531_v43 = vrot.slane %v6527_v58, 4 }
 0x43c   :  { %v6968_v59 = vrot.slane %v6967_v33, 4  ;;  %v6593_v39 = vsel %vm10656_vm8, %v6530_v2, %v6592_v42  ;;  %v6596_v16 = vsel %vm10627_vm2, %v6531_v43, %v6595_v49  ;;  %v6598_v33 = vld [vmem:[#allocation5 + $0x90] sm:$0xf]  ;;  %v6601_v2 = vld [vmem:[#allocation5 + $0x94] sm:$0x1] }
 0x43d   :  { %6594 = vst [vmem:[#allocation5 + $0x88] sm:$0xf] %v6593_v39  ;;  %v6046_v47 = vld [vmem:[#allocation4 + $0x1f0] ss:$2 sm:$0xff]  ;;  %v6110_v29 = vld [vmem:[#allocation4 + $0x1f1] ss:$2 sm:$0xff] }
 0x43e   :  { %6597 = vst [vmem:[#allocation5 + $0x8c] sm:$0x1] %v6596_v16  ;;  %v13110_v27 = vsel %vm11302_vm14, %v6968_v59, %v6972_v6  ;;  %v6142_v52 = vadd.f32 %v6110_v29, %v6046_v47 }
 0x43f   :  { %v9064_v12 = vcombine.low %v13090_v24, %v13110_v27 }
 0x440   :  { %v6158_v34 = vadd.f32 %v6142_v52, %v6141_v10  ;;  %v7124_v52 = vld [vmem:[#allocation5] sm:$0xe] }
 0x442   :  { %v6174_v18 = vmul.f32 0.25, %v6158_v34 }
 0x444   :  { %v9203_v31 = vpack.c.bf16 %v6174_v18, %v6174_v18  ;;  %v6758_v44 = vld [vmem:[#allocation5 + $0x88] sm:$0xf]  ;;  %v7125_v18 = vld [vmem:[#allocation5 + $0x4] sm:$0x1] }
 0x445   :  { %v6759_v20 = vld [vmem:[#allocation5 + $0x8c] sm:$0x1]  ;;  %v6975_v8 = vshrl.u32 %v6758_v44, 16  ;;  %v6978_v50 = vshll.u32 %v6758_v44, 16  ;;  %v9260_v15 = vpop.f32.mrb[192].mxu1 }
 0x446   :  { %v6533_v41 = vshrl.u32 %v9203_v31, 16  ;;  %v9261_v38 = vpop.f32.mrb[193].mxu1  ;;  %v6984_v1 = vshll.u32 %v6759_v20, 16  ;;  %v6536_v32 = vshll.u32 %v9203_v31, 16  ;;  %v13122_v10 = vld [vmem:[#allocation5 + $0x88] sm:$0xf] }
 0x447   :  { %v6977_v40 = vrot.slane %v6975_v8, 4  ;;  %v6980_v0 = vrot.slane %v6978_v50, 5  ;;  %v13114_v42 = vadd.f32 %v9261_v38, %v9260_v15  ;;  %v9263_v49 = vpop.f32.mrb[194].mxu1  ;;  %v7126_v31 = vld [vmem:[#allocation5 + $0x8] sm:$0xe]  ;;  %v13136_v5 = vcombine.low %v13132_v63, %v13122_v10 }
 0x448   :  { %v6535_v58 = vrot.slane %v6533_v41, 7  ;;  %v9264_v43 = vpop.f32.mrb[195].mxu1  ;;  %v6986_v16 = vrot.slane %v6984_v1, 5  ;;  %v7127_v44 = vld [vmem:[#allocation5 + $0xc] sm:$0x1]  ;;  %v9068_v8 = vrot.slane %v7124_v52, 9  ;;  %v13882_v38 = vcombine.low %v12705_v55, %v12721_v3 }
 0x449   :  { %v6981_v30 = vor.u32 %v6980_v0, %v6977_v40  ;;  %v13116_v6 = vadd.f32 %v9264_v43, %v9263_v49  ;;  %v7198_v50 = vrot.slane %v7125_v18, 5  ;;  %v9069_v41 = vrot.slane %v7126_v31, 9  ;;  %v10233_v49 = vld [vmem:[#allocation14 + $0x100] sm:$0xff]   ;;  %v7129_v43 = vld [vmem:[#allocation5 + $0x14] sm:$0x1] }
 0x44a   :  { %v6538_v62 = vor.u32 %v6536_v32, %v6535_v58  ;;  %v6539_v59 = vrot.slane %v6535_v58, 4  ;;  %v7202_v15 = vrot.slane %v7127_v44, 5  ;;  %v7130_v58 = vld [vmem:[#allocation5 + $0x18] sm:$0xe]  ;;  %v7131_v32 = vld [vmem:[#allocation5 + $0x1c] sm:$0x1]  ;;  %v13884_v55 = vcombine.low %v12779_v23, %v12803_v25 }
 0x44b   :  { %v6982_v39 = vrot.slane %v6981_v30, 4  ;;  %v7199_v0 = vsel %vm10748_vm11, %v9068_v8, %v7198_v50  ;;  %v10234_v30 = vld [vmem:[#allocation14 + $0x148] sm:$0xff]   ;;  %v10239_v44 = vld [vmem:[#allocation14 + $0x110] sm:$0xff]   ;;  %v7132_v25 = vld [vmem:[#allocation5 + $0x20] sm:$0xe] }
 0x44c   :  { %v6599_v47 = vsel %vm10656_vm8, %v6538_v62, %v6598_v33  ;;  %v6602_v29 = vsel %vm10627_vm2, %v6539_v59, %v6601_v2  ;;  %v13147_v1 = vsel %vm10748_vm11, %v9069_v41, %v7202_v15  ;;  %v7128_v2 = vld [vmem:[#allocation5 + $0x10] sm:$0xe]  ;;  %v9071_v62 = vrot.slane %v7130_v58, 9  ;;  %v7134_v52 = vld [vmem:[#allocation5 + $0x28] sm:$0xe]  ;;  %v10240_v50 = vld [vmem:[#allocation14 + $0x158] sm:$0xff]  }
 0x44d   :  { %6600 = vst [vmem:[#allocation5 + $0x90] sm:$0xf] %v6599_v47  ;;  %6603 = vst [vmem:[#allocation5 + $0x94] sm:$0x1] %v6602_v29  ;;  %v13126_v34 = vsel %vm11302_vm14, %v6982_v39, %v6986_v16  ;;  %v9084_v33 = vcombine.low %v7199_v0, %v13147_v1  ;;  %v7210_v59 = vrot.slane %v7131_v32, 5  ;;  %v9070_v3 = vrot.slane %v7128_v2, 9 }
 0x44e   :  { %v13130_v20 = vcombine.low %v13110_v27, %v13126_v34  ;;  %v7206_v39 = vrot.slane %v7129_v43, 5  ;;  %v10235_v16 = vld [vmem:[#allocation14 + $0x108] sm:$0xff]   ;;  %v10236_v47 = vld [vmem:[#allocation14 + $0x150] sm:$0xff]   ;;  %v7133_v8 = vld [vmem:[#allocation5 + $0x24] sm:$0x1]  ;;  %v9073_v41 = vrot.slane %v7134_v52, 9 }
 0x44f   :  { %v13155_v29 = vsel %vm10748_vm11, %v9071_v62, %v7210_v59  ;;  %v7135_v18 = vld [vmem:[#allocation5 + $0x2c] sm:$0x1]  ;;  %v9072_v0 = vrot.slane %v7132_v25, 9  ;;  %v7214_v58 = vrot.slane %v7133_v8, 5  ;;  %v10241_v32 = vld [vmem:[#allocation14 + $0x118] sm:$0xff]  }
 0x450   :  { %8107 = vmatprep.mubr.bf16.mxu1 %v13130_v20  ;;  %v13159_v31 = vsel %vm10748_vm11, %v9070_v3, %v7206_v39  ;;  %v7218_v15 = vrot.slane %v7135_v18, 5  ;;  %v13173_v2 = vld [vmem:[#allocation5 + $0x40] sm:$0xf]  ;;  %v7138_v43 = vld [vmem:[#allocation5 + $0x38] sm:$0xe] }
 0x451   :  { %8108 = vmatmul.mubr.bf16.gmra.mrb[220].mxu1 %v13136_v5  ;;  %v13163_v23 = vcombine.low %v13159_v31, %v13155_v29  ;;  %v13177_v59 = vsel %vm10748_vm11, %v9072_v0, %v7214_v58  ;;  %v7136_v3 = vld [vmem:[#allocation5 + $0x30] sm:$0xe]  ;;  %v7137_v39 = vld [vmem:[#allocation5 + $0x34] sm:$0x1]  ;;  %v10357_v18 = vld [vmem:[#allocation5 + $0x38] sm:$0xf] }
 0x452   :  { %8148 = vmatprep.mubr.bf16.mxu1 %v13882_v38  ;;  %v13885_v38 = vcombine.low %v12866_v56, %v12890_v26  ;;  %v10243_v56 = vld [vmem:[#allocation14 + $0x120] sm:$0xff]   ;;  %v9075_v25 = vrot.slane %v7138_v43, 9  ;;  %v10245_v0 = vld [vmem:[#allocation14 + $0x128] sm:$0xff]   ;;  %v10246_v58 = vld [vmem:[#allocation14 + $0x170] sm:$0xff]  }
 0x453   :  { %v7146_v43 = vld [vmem:[#allocation5 + $0x58] sm:$0xe] }
 0x459   :  { %8149 = vmatmul.mubr.bf16.vlgmr.msra.gmra.mrb[224].mxu1 %v9084_v33  ;;  %v13171_v33 = vsel %vm10748_vm11, %v9073_v41, %v7218_v15  ;;  %v9074_v15 = vrot.slane %v7136_v3, 9  ;;  %v10250_v3 = vld [vmem:[#allocation14 + $0x178] sm:$0xff]  }
 0x45a   :  { %8156 = vmatprep.mubr.bf16.mxu1 %v13884_v55  ;;  %9373 = vmatpush3.bf16.msra.mxu1 %v10233_v49  ;;  %v10242_v49 = vld [vmem:[#allocation14 + $0x160] sm:$0xff]   ;;  %v13181_v55 = vcombine.low %v13177_v59, %v13171_v33 }
 0x45b   :  { %9374 = vmatprep.subr.bf16.mxu1 %v10234_v30  ;;  %v7139_v30 = vld [vmem:[#allocation5 + $0x3c] sm:$0x1] }
 0x45c   :  { %v7226_v8 = vrot.slane %v7139_v30, 5  ;;  %v7147_v30 = vld [vmem:[#allocation5 + $0x5c] sm:$0x1] }
 0x45e   :  { %9375 = vmatpush3.bf16.msra.mxu1 %v10235_v16  ;;  %v10244_v16 = vld [vmem:[#allocation14 + $0x168] sm:$0xff]  }
 0x45f   :  { %9376 = vmatprep.subr.bf16.mxu1 %v10236_v47 }
 0x461   :  { %8157 = vmatmul.mubr.bf16.gmra.mrb[228].mxu1 %v13163_v23 }
 0x462   :  { %8164 = vmatprep.mubr.bf16.mxu1 %v13885_v38  ;;  %9377 = vmatpush3.bf16.msra.mxu1 %v10239_v44  ;;  %v9043_v44 = vcombine.low %v10357_v18, %v13173_v2  ;;  %v7222_v38 = vrot.slane %v7137_v39, 5  ;;  %v9077_v18 = vrot.slane %v7146_v43, 9 }
 0x463   :  { %9378 = vmatprep.subr.bf16.mxu1 %v10240_v50 }
 0x466   :  { %v9266_v62 = vpop.f32.mrb[196].mxu1  ;;  %9379 = vmatpush3.bf16.msra.mxu1 %v10241_v32  ;;  %v13191_v32 = vsel %vm10748_vm11, %v9075_v25, %v7226_v8  ;;  %v10251_v25 = vld [vmem:[#allocation14 + $0x138] sm:$0xff]   ;;  %v10252_v8 = vld [vmem:[#allocation14 + $0x1c0] sm:$0xff]  }
 0x467   :  { %v9267_v26 = vpop.f32.mrb[197].mxu1  ;;  %9380 = vmatprep.subr.bf16.mxu1 %v10242_v49  ;;  %v7144_v49 = vld [vmem:[#allocation5 + $0x50] sm:$0xe] }
 0x468   :  { %v13183_v47 = vadd.f32 %v9267_v26, %v9266_v62  ;;  %v9269_v52 = vpop.f32.mrb[198].mxu1  ;;  %v7145_v62 = vld [vmem:[#allocation5 + $0x54] sm:$0x1]  ;;  %v13195_v26 = vsel %vm10748_vm11, %v9074_v15, %v7222_v38  ;;  %v9076_v39 = vrot.slane %v7144_v49, 9  ;;  %v7150_v38 = vld [vmem:[#allocation5 + $0x68] sm:$0xe] }
 0x469   :  { %v9270_v50 = vpop.f32.mrb[199].mxu1  ;;  %8165 = vmatmul.mubr.bf16.gmra.mrb[232].mxu1 %v13181_v55  ;;  %v7148_v49 = vld [vmem:[#allocation5 + $0x60] sm:$0xe]  ;;  %v9079_v60 = vrot.slane %v7150_v38, 9  ;;  %v13234_v38 = vld [vmem:[#allocation5 + $0x90] sm:$0xf] }
 0x46a   :  { %v13187_v41 = vadd.f32 %v9270_v50, %v9269_v52  ;;  %8172 = vmatprep.mubr.bf16.mxu1 %v9043_v44  ;;  %9381 = vmatpush3.bf16.msra.mxu1 %v10243_v56  ;;  %v10249_v52 = vld [vmem:[#allocation14 + $0x130] sm:$0xff]   ;;  %v13199_v56 = vcombine.low %v13195_v26, %v13191_v32  ;;  %v7234_v44 = vrot.slane %v7147_v30, 5 }
 0x46b   :  { %9382 = vmatprep.subr.bf16.mxu1 %v10244_v16  ;;  %v7230_v16 = vrot.slane %v7145_v62, 5  ;;  %v7149_v62 = vld [vmem:[#allocation5 + $0x64] sm:$0x1] }
 0x46c   :  { %v13209_v15 = vsel %vm10748_vm11, %v9077_v18, %v7234_v44  ;;  %v7238_v43 = vrot.slane %v7149_v62, 5  ;;  %v7152_v18 = vld [vmem:[#allocation5 + $0x70] sm:$0xe]  ;;  %v7153_v44 = vld [vmem:[#allocation5 + $0x74] sm:$0x1] }
 0x46d   :  { %v7231_v50 = vsel %vm10748_vm11, %v9076_v39, %v7230_v16 }
 0x46e   :  { %9383 = vmatpush3.bf16.msra.mxu1 %v10245_v0  ;;  %v7151_v0 = vld [vmem:[#allocation5 + $0x6c] sm:$0x1] }
 0x46f   :  { %9384 = vmatprep.subr.bf16.mxu1 %v10246_v58  ;;  %v9088_v58 = vcombine.low %v7231_v50, %v13209_v15  ;;  %v7242_v61 = vrot.slane %v7151_v0, 5  ;;  %v7158_v0 = vld [vmem:[#allocation5 + $0x88] sm:$0xe] }
 0x471   :  { %8173 = vmatmul.mubr.bf16.gmra.mrb[236].mxu1 %v13199_v56  ;;  %v13217_v30 = vsel %vm10748_vm11, %v9079_v60, %v7242_v61  ;;  %v7156_v60 = vld [vmem:[#allocation5 + $0x80] sm:$0xe]  ;;  %v7157_v61 = vld [vmem:[#allocation5 + $0x84] sm:$0x1] }
 0x472   :  { %8180 = vmatprep.mubr.bf16.mxu1 %v9044_v19  ;;  %9385 = vmatpush3.bf16.msra.mxu1 %v10249_v52  ;;  %v9078_v19 = vrot.slane %v7148_v49, 9  ;;  %v7154_v52 = vld [vmem:[#allocation5 + $0x78] sm:$0xe] }
 0x473   :  { %9386 = vmatprep.subr.bf16.mxu1 %v10250_v3  ;;  %v7155_v3 = vld [vmem:[#allocation5 + $0x7c] sm:$0x1]  ;;  %v9081_v28 = vrot.slane %v7154_v52, 9  ;;  %v9047_v52 = vcombine.low %v13122_v10, %v13234_v38 }
 0x474   :  { %v13221_v39 = vsel %vm10748_vm11, %v9078_v19, %v7238_v43 }
 0x475   :  { %v13225_v16 = vcombine.low %v13221_v39, %v13217_v30 }
 0x476   :  { %9387 = vmatpush3.bf16.msra.mxu1 %v10251_v25  ;;  %v9080_v25 = vrot.slane %v7152_v18, 9 }
 0x477   :  { %9436 = vmatprep.subr.bf16.mxu1 %v10252_v8  ;;  %v7246_v8 = vrot.slane %v7153_v44, 5 }
 0x479   :  { %8181 = vmatmul.mubr.bf16.gmra.mrb[240].mxu1 %v9088_v58  ;;  %v7159_v58 = vld [vmem:[#allocation5 + $0x8c] sm:$0x1]  ;;  %v13238_v62 = vsel %vm10748_vm11, %v9080_v25, %v7246_v8 }
 0x47a   :  { %8188 = vmatprep.mubr.bf16.mxu1 %v9045_v46  ;;  %v7250_v46 = vrot.slane %v7155_v3, 5  ;;  %v9083_v3 = vrot.slane %v7158_v0, 9  ;;  %v7258_v18 = vrot.slane %v7159_v58, 5  ;;  %v9094_v0 = vcombine.low %v13147_v1, %v13159_v31  ;;  %v10253_v58 = vld [vmem:[#allocation14 + $0x180] sm:$0xff]  }
 0x47b   :  { %v7140_v31 = vld [vmem:[#allocation5 + $0x40] sm:$0xe] }
 0x47c   :  { %v13232_v50 = vsel %vm10748_vm11, %v9081_v28, %v7250_v46  ;;  %v9082_v28 = vrot.slane %v7156_v60, 9  ;;  %v7254_v46 = vrot.slane %v7157_v61, 5  ;;  %v13253_v25 = vsel %vm10748_vm11, %v9083_v3, %v7258_v18  ;;  %v6740_v60 = vld [vmem:[#allocation5 + $0x40] sm:$0xf]  ;;  %v7141_v18 = vld [vmem:[#allocation5 + $0x44] sm:$0x1] }
 0x47d   :  { %v13242_v63 = vcombine.low %v13238_v62, %v13232_v50  ;;  %v13886_v61 = vcombine.low %v12709_v54, %v12747_v21  ;;  %v7029_v3 = vshrl.u32 %v6740_v60, 16  ;;  %v7032_v1 = vshll.u32 %v6740_v60, 16 }
 0x47e   :  { %v13257_v8 = vsel %vm10748_vm11, %v9082_v28, %v7254_v46  ;;  %v10258_v28 = vld [vmem:[#allocation14 + $0x1d8] sm:$0xff]   ;;  %v13887_v54 = vcombine.low %v12783_v45, %v12829_v48  ;;  %v9092_v21 = vrot.slane %v7140_v31, 9  ;;  %v10262_v45 = vld [vmem:[#allocation14 + $0x1e8] sm:$0xff]  }
 0x47f   :  { %v13261_v10 = vcombine.low %v13257_v8, %v13253_v25  ;;  %v7031_v46 = vrot.slane %v7029_v3, 4 }
 0x481   :  { %8189 = vmatmul.mubr.bf16.gmra.mrb[244].mxu1 %v13225_v16 }
 0x482   :  { %8196 = vmatprep.mubr.bf16.mxu1 %v9046_v11 }
 0x487   :  { %v9272_v49 = vpop.f32.mrb[200].mxu1 }
 0x488   :  { %v9273_v4 = vpop.f32.mrb[201].mxu1 }
 0x489   :  { %v13244_v19 = vadd.f32 %v9273_v4, %v9272_v49  ;;  %v9275_v43 = vpop.f32.mrb[202].mxu1  ;;  %8197 = vmatmul.mubr.bf16.gmra.mrb[248].mxu1 %v13242_v63  ;;  %v10254_v49 = vld [vmem:[#allocation14 + $0x1c8] sm:$0xff]   ;;  %v9095_v4 = vcombine.low %v13155_v29, %v13177_v59  ;;  %v7034_v29 = vrot.slane %v7032_v1, 5  ;;  %v9096_v59 = vcombine.low %v13171_v33, %v13195_v26  ;;  %v10261_v33 = vld [vmem:[#allocation14 + $0x1a0] sm:$0xff]  }
 0x48a   :  { %v9276_v44 = vpop.f32.mrb[203].mxu1  ;;  %8204 = vmatprep.mubr.bf16.mxu1 %v9047_v52  ;;  %v10256_v52 = vld [vmem:[#allocation14 + $0x1d0] sm:$0xff]  }
 0x48b   :  { %v13249_v11 = vadd.f32 %v9276_v44, %v9275_v43  ;;  %v10255_v43 = vld [vmem:[#allocation14 + $0x188] sm:$0xff]   ;;  %v10257_v44 = vld [vmem:[#allocation14 + $0x190] sm:$0xff]   ;;  %v7035_v60 = vor.u32 %v7034_v29, %v7031_v46 }
 0x48d   :  { %v7036_v48 = vrot.slane %v7035_v60, 4  ;;  %v10268_v60 = vld [vmem:[#allocation14 + $0x200] sm:$0xff]  }
 0x491   :  { %8205 = vmatmul.mubr.bf16.gmra.mrb[252].mxu1 %v13261_v10 }
 0x492   :  { %8245 = vmatprep.mubr.bf16.mxu1 %v9094_v0  ;;  %v7306_v0 = vrot.slane %v7141_v18, 5 }
 0x499   :  { %8246 = vmatmul.mubr.bf16.vlgmr.msra.gmra.mrb[0].mxu1 %v13886_v61  ;;  %v13278_v61 = vsel %vm10748_vm11, %v9092_v21, %v7306_v0  ;;  %v10265_v0 = vld [vmem:[#allocation14 + $0x1b0] sm:$0xff]  }
 0x49a   :  { %8253 = vmatprep.mubr.bf16.mxu1 %v9095_v4  ;;  %9437 = vmatpush3.bf16.msra.mxu1 %v10253_v58  ;;  %v10259_v58 = vld [vmem:[#allocation14 + $0x198] sm:$0xff]   ;;  %v10260_v4 = vld [vmem:[#allocation14 + $0x1e0] sm:$0xff]   ;;  %v9097_v31 = vcombine.low %v13191_v32, %v13278_v61 }
 0x49b   :  { %9438 = vmatprep.subr.bf16.mxu1 %v10254_v49  ;;  %v6741_v49 = vld [vmem:[#allocation5 + $0x44] sm:$0x1]  ;;  %v13890_v32 = vld [vmem:[#allocation52_spill] sm:$0xff] }
 0x49e   :  { %9439 = vmatpush3.bf16.msra.mxu1 %v10255_v43  ;;  %v7038_v43 = vshll.u32 %v6741_v49, 16  ;;  %v9098_v49 = vcombine.low %v13209_v15, %v13221_v39  ;;  %v7160_v15 = vld [vmem:[#allocation5 + $0x90] sm:$0xe]  ;;  %v7161_v39 = vld [vmem:[#allocation5 + $0x94] sm:$0x1] }
 0x49f   :  { %9440 = vmatprep.subr.bf16.mxu1 %v10256_v52 }
 0x4a0   :  { %v7040_v46 = vrot.slane %v7038_v43, 5  ;;  %v9099_v43 = vcombine.low %v13217_v30, %v13238_v62  ;;  %v9093_v30 = vrot.slane %v7160_v15, 9  ;;  %v7310_v62 = vrot.slane %v7161_v39, 5 }
 0x4a1   :  { %8254 = vmatmul.mubr.bf16.gmra.mrb[4].mxu1 %v13887_v54  ;;  %v10264_v54 = vld [vmem:[#allocation14 + $0x1f0] sm:$0xff]  }
 0x4a2   :  { %8261 = vmatprep.mubr.bf16.mxu1 %v9096_v59  ;;  %9441 = vmatpush3.bf16.msra.mxu1 %v10257_v44  ;;  %v13888_v44 = vld [vmem:[#allocation44_spill] sm:$0xff]  ;;  %v10263_v59 = vld [vmem:[#allocation14 + $0x1a8] sm:$0xff]   ;;  %v13291_v21 = vsel %vm11302_vm14, %v7036_v48, %v7040_v46 }
 0x4a3   :  { %9442 = vmatprep.subr.bf16.mxu1 %v10258_v28  ;;  %v13889_v28 = vcombine.low %v13888_v44, %v12908_v22  ;;  %v10266_v22 = vld [vmem:[#allocation14 + $0x1f8] sm:$0xff]  }
 0x4a5   :  { %v9278_v52 = vpop.f32.mrb[204].mxu1 }
 0x4a6   :  { %9443 = vmatpush3.bf16.msra.mxu1 %v10259_v58  ;;  %v9279_v26 = vpop.f32.mrb[205].mxu1  ;;  %v9061_v58 = vcombine.low %v13890_v32, %v13291_v21  ;;  %v6742_v32 = vld [vmem:[#allocation5 + $0x48] sm:$0xf] }
 0x4a7   :  { %9444 = vmatprep.subr.bf16.mxu1 %v10260_v4  ;;  %v13280_v3 = vadd.f32 %v9279_v26, %v9278_v52  ;;  %v9281_v1 = vpop.f32.mrb[206].mxu1  ;;  %v10267_v4 = vld [vmem:[#allocation14 + $0x1b8] sm:$0xff]   ;;  %v6760_v52 = vld [vmem:[#allocation5 + $0x90] sm:$0xf] }
 0x4a8   :  { %v9282_v18 = vpop.f32.mrb[207].mxu1  ;;  %v7046_v26 = vshll.u32 %v6760_v52, 16 }
 0x4a9   :  { %8262 = vmatmul.mubr.bf16.gmra.mrb[8].mxu1 %v13889_v28  ;;  %v13287_v29 = vadd.f32 %v9282_v18, %v9281_v1  ;;  %v9100_v1 = vcombine.low %v13232_v50, %v13257_v8  ;;  %v13309_v18 = vsel %vm10748_vm11, %v9093_v30, %v7310_v62 }
 0x4aa   :  { %8269 = vmatprep.mubr.bf16.mxu1 %v9097_v31  ;;  %9445 = vmatpush3.bf16.msra.mxu1 %v10261_v33  ;;  %v7043_v33 = vshrl.u32 %v6760_v52, 16  ;;  %v7048_v48 = vrot.slane %v7046_v26, 5  ;;  %v6761_v31 = vld [vmem:[#allocation5 + $0x94] sm:$0x1]  ;;  %v9101_v17 = vcombine.low %v13253_v25, %v13309_v18  ;;  %v10269_v25 = vld [vmem:[#allocation14 + $0x208] sm:$0xff]  }
 0x4ab   :  { %9446 = vmatprep.subr.bf16.mxu1 %v10262_v45  ;;  %v7052_v44 = vshll.u32 %v6761_v31, 16  ;;  %v13894_v26 = vld [vmem:[#allocation50_spill] sm:$0xff] }
 0x4ac   :  { %v7045_v45 = vrot.slane %v7043_v33, 4 }
 0x4ad   :  { %v7054_v37 = vrot.slane %v7052_v44, 5 }
 0x4ae   :  { %9447 = vmatpush3.bf16.msra.mxu1 %v10263_v59  ;;  %v7049_v14 = vor.u32 %v7048_v48, %v7045_v45  ;;  %v13895_v45 = vld [vmem:[#allocation54_spill] sm:$0xff] }
 0x4af   :  { %9448 = vmatprep.subr.bf16.mxu1 %v10264_v54  ;;  %v10272_v48 = vld [vmem:[#allocation14 + $0x220] sm:$0xff]  }
 0x4b0   :  { %v7050_v8 = vrot.slane %v7049_v14, 4 }
 0x4b1   :  { %8270 = vmatmul.mubr.bf16.gmra.mrb[12].mxu1 %v9061_v58  ;;  %v7083_v58 = vshrl.u32 %v6742_v32, 16 }
 0x4b2   :  { %8277 = vmatprep.mubr.bf16.mxu1 %v9098_v49  ;;  %9449 = vmatpush3.bf16.msra.mxu1 %v10265_v0  ;;  %v13891_v0 = vld [vmem:[#allocation41_spill] sm:$0xff]  ;;  %v13892_v49 = vld [vmem:[#allocation43_spill] sm:$0xff] }
 0x4b3   :  { %9450 = vmatprep.subr.bf16.mxu1 %v10266_v22  ;;  %v7086_v22 = vshll.u32 %v6742_v32, 16  ;;  %v7085_v24 = vrot.slane %v7083_v58, 4 }
 0x4b5   :  { %v7088_v27 = vrot.slane %v7086_v22, 5  ;;  %v6763_v22 = vld [vmem:[#allocation5 + $0x9c] sm:$0x1] }
 0x4b6   :  { %9451 = vmatpush3.bf16.msra.mxu1 %v10267_v4  ;;  %v6743_v4 = vld [vmem:[#allocation5 + $0x4c] sm:$0x1] }
 0x4b7   :  { %9606 = vmatprep.subr.bf16.mxu1 %v10268_v60  ;;  %v7089_v52 = vor.u32 %v7088_v27, %v7085_v24  ;;  %v7092_v33 = vshll.u32 %v6743_v4, 16 }
 0x4b9   :  { %8278 = vmatmul.mubr.bf16.gmra.mrb[16].mxu1 %v9062_v51  ;;  %v7090_v15 = vrot.slane %v7089_v52, 4  ;;  %v7094_v39 = vrot.slane %v7092_v33, 5 }
 0x4ba   :  { %8285 = vmatprep.mubr.bf16.mxu1 %v9099_v43  ;;  %v10270_v43 = vld [vmem:[#allocation14 + $0x210] sm:$0xff]  }
 0x4c1   :  { %8286 = vmatmul.mubr.bf16.gmra.mrb[20].mxu1 %v9063_v53  ;;  %v13322_v53 = vsel %vm11302_vm14, %v7050_v8, %v7054_v37  ;;  %v6613_v8 = vld [vmem:[#allocation5 + $0x48] sm:$0xf]  ;;  %v10275_v37 = vld [vmem:[#allocation14 + $0x238] sm:$0xff]  }
 0x4c2   :  { %8293 = vmatprep.mubr.bf16.mxu1 %v9100_v1  ;;  %v9065_v54 = vcombine.low %v13126_v34, %v13322_v53  ;;  %v10271_v34 = vld [vmem:[#allocation14 + $0x218] sm:$0xff]  }
 0x4c5   :  { %v9284_v9 = vpop.f32.mrb[208].mxu1 }
 0x4c6   :  { %v9285_v51 = vpop.f32.mrb[209].mxu1 }
 0x4c7   :  { %v13311_v28 = vadd.f32 %v9285_v51, %v9284_v9  ;;  %v9287_v46 = vpop.f32.mrb[210].mxu1  ;;  %v10273_v9 = vld [vmem:[#allocation14 + $0x228] sm:$0xff]  }
 0x4c8   :  { %v9288_v50 = vpop.f32.mrb[211].mxu1 }
 0x4c9   :  { %v13313_v59 = vadd.f32 %v9288_v50, %v9287_v46  ;;  %8294 = vmatmul.mubr.bf16.gmra.mrb[24].mxu1 %v9064_v12  ;;  %v13893_v12 = vld [vmem:[#allocation47_spill] sm:$0xff]  ;;  %v13896_v46 = vld [vmem:[#allocation56_spill] sm:$0xff] }
 0x4ca   :  { %8301 = vmatprep.mubr.bf16.mxu1 %v9101_v17  ;;  %v10274_v50 = vld [vmem:[#allocation14 + $0x230] sm:$0xff]   ;;  %v9048_v17 = vcombine.low %v13173_v2, %v6613_v8  ;;  %v7106_v2 = vshll.u32 %v6763_v22, 16 }
 0x4cc   :  { %v7108_v24 = vrot.slane %v7106_v2, 5 }
 0x4d1   :  { %8302 = vmatmul.mubr.bf16.gmra.mrb[28].mxu1 %v9065_v54  ;;  %v6762_v54 = vld [vmem:[#allocation5 + $0x98] sm:$0xf] }
 0x4d2   :  { %8342 = vmatprep.mubr.bf16.mxu1 %v13891_v0  ;;  %v7097_v0 = vshrl.u32 %v6762_v54, 16 }
 0x4d4   :  { %v7099_v32 = vrot.slane %v7097_v0, 4 }
 0x4d9   :  { %8343 = vmatmul.mubr.bf16.vlgmr.msra.gmra.mrb[32].mxu1 %v13892_v49 }
 0x4da   :  { %8350 = vmatprep.mubr.bf16.mxu1 %v13893_v12  ;;  %9607 = vmatpush3.bf16.msra.mxu1 %v10268_v60  ;;  %v7095_v60 = vsel %vm11302_vm14, %v7090_v15, %v7094_v39  ;;  %v7162_v15 = vld [vmem:[#allocation5 + $0x98] sm:$0xe]  ;;  %v7163_v39 = vld [vmem:[#allocation5 + $0x9c] sm:$0x1] }
 0x4db   :  { %9608 = vmatprep.subr.bf16.mxu1 %v10269_v25  ;;  %v9066_v44 = vcombine.low %v13291_v21, %v7095_v60  ;;  %v7100_v21 = vshll.u32 %v6762_v54, 16 }
 0x4dd   :  { %v7102_v58 = vrot.slane %v7100_v21, 5 }
 0x4de   :  { %9609 = vmatpush3.bf16.msra.mxu1 %v10269_v25 }
 0x4df   :  { %9610 = vmatprep.subr.bf16.mxu1 %v10270_v43  ;;  %v7103_v25 = vor.u32 %v7102_v58, %v7099_v32 }
 0x4e1   :  { %8351 = vmatmul.mubr.bf16.gmra.mrb[36].mxu1 %v13894_v26  ;;  %v7104_v49 = vrot.slane %v7103_v25, 4  ;;  %v7344_v26 = vrot.slane %v7143_v36, 5 }
 0x4e2   :  { %8358 = vmatprep.mubr.bf16.mxu1 %v13895_v45  ;;  %9611 = vmatpush3.bf16.msra.mxu1 %v10270_v43 }
 0x4e3   :  { %9612 = vmatprep.subr.bf16.mxu1 %v10271_v34  ;;  %v7109_v12 = vsel %vm11302_vm14, %v7104_v49, %v7108_v24 }
 0x4e5   :  { %v9290_v1 = vpop.f32.mrb[212].mxu1 }
 0x4e6   :  { %v9291_v30 = vpop.f32.mrb[213].mxu1  ;;  %9613 = vmatpush3.bf16.msra.mxu1 %v10271_v34 }
 0x4e7   :  { %v13333_v62 = vadd.f32 %v9291_v30, %v9290_v1  ;;  %v9293_v31 = vpop.f32.mrb[214].mxu1  ;;  %9614 = vmatprep.subr.bf16.mxu1 %v10272_v48  ;;  %v9103_v30 = vrot.slane %v7162_v15, 9 }
 0x4e8   :  { %v9294_v14 = vpop.f32.mrb[215].mxu1 }
 0x4e9   :  { %v13335_v51 = vadd.f32 %v9294_v14, %v9293_v31  ;;  %8359 = vmatmul.mubr.bf16.gmra.mrb[40].mxu1 %v13896_v46 }
 0x4ea   :  { %8366 = vmatprep.mubr.bf16.mxu1 %v9066_v44  ;;  %9615 = vmatpush3.bf16.msra.mxu1 %v10272_v48 }
 0x4eb   :  { %9616 = vmatprep.subr.bf16.mxu1 %v10273_v9 }
 0x4ee   :  { %9617 = vmatpush3.bf16.msra.mxu1 %v10273_v9 }
 0x4ef   :  { %9618 = vmatprep.subr.bf16.mxu1 %v10274_v50 }
 0x4f1   :  { %8367 = vmatmul.mubr.bf16.gmra.mrb[44].mxu1 %v9048_v17 }
 0x4f2   :  { %8374 = vmatprep.mubr.bf16.mxu1 %v13037_v35  ;;  %9619 = vmatpush3.bf16.msra.mxu1 %v10274_v50 }
 0x4f3   :  { %9620 = vmatprep.subr.bf16.mxu1 %v10275_v37 }
 0x4f6   :  { %9621 = vmatpush3.bf16.msra.mxu1 %v10275_v37 }
 0x4f9   :  { %8375 = vmatmul.mubr.bf16.gmra.mrb[48].mxu1 %v13041_v13 }
 0x4fa   :  { %8382 = vmatprep.mubr.bf16.mxu1 %v13094_v7  ;;  %v9067_v7 = vcombine.low %v13322_v53, %v7109_v12 }
 0x501   :  { %8383 = vmatmul.mubr.bf16.gmra.mrb[52].mxu1 %v13098_v57  ;;  %v6623_v57 = vld [vmem:[#allocation5 + $0x98] sm:$0xf] }
 0x502   :  { %8390 = vmatprep.mubr.bf16.mxu1 %v13130_v20  ;;  %v9049_v33 = vcombine.low %v13234_v38, %v6623_v57  ;;  %v7142_v20 = vld [vmem:[#allocation5 + $0x48] sm:$0xe] }
 0x503   :  { %v9102_v34 = vrot.slane %v7142_v20, 9 }
 0x504   :  { %v9296_v35 = vpop.f32.mrb[216].mxu1 }
 0x505   :  { %v9297_v27 = vpop.f32.mrb[217].mxu1  ;;  %v7345_v53 = vsel %vm10748_vm11, %v9102_v34, %v7344_v26 }
 0x506   :  { %v13347_v4 = vadd.f32 %v9297_v27, %v9296_v35  ;;  %v9299_v13 = vpop.f32.mrb[218].mxu1 }
 0x507   :  { %v9300_v43 = vpop.f32.mrb[219].mxu1 }
 0x508   :  { %v13349_v52 = vadd.f32 %v9300_v43, %v9299_v13 }
 0x509   :  { %8391 = vmatmul.mubr.bf16.gmra.mrb[56].mxu1 %v13136_v5  ;;  %v9104_v5 = vcombine.low %v13278_v61, %v7345_v53 }
 0x50a   :  { %8398 = vmatprep.mubr.bf16.mxu1 %v9067_v7 }
 0x511   :  { %8399 = vmatmul.mubr.bf16.gmra.mrb[60].mxu1 %v9049_v33 }
 0x512   :  { %9622 = vmatprep.mubr.bf16.mxu1 %v13163_v23 }
 0x519   :  { %9623 = vmatmul.mubr.bf16.vlgmr.msra.gmra.mrb[64].mxu1 %v13181_v55  ;;  %v7348_v55 = vrot.slane %v7163_v39, 5 }
 0x51a   :  { %9626 = vmatprep.mubr.bf16.mxu1 %v13199_v56  ;;  %v13370_v56 = vld [vmem:[%s13546_s4] ss:$0 sm:$0xff] }
 0x51b   :  { %v8054_v14 = vadd.f32 %v13114_v42, %v13370_v56  ;;  %v8062_v54 = vadd.f32 %v13183_v47, %v13370_v56  ;;  %v8070_v2 = vadd.f32 %v13244_v19, %v13370_v56  ;;  %v8073_v47 = vadd.f32 %v13249_v11, %v13370_v56 }
 0x51c   :  { %v8078_v7 = vadd.f32 %v13280_v3, %v13370_v56  ;;  %v8081_v19 = vadd.f32 %v13287_v29, %v13370_v56  ;;  %v8089_v3 = vadd.f32 %v13313_v59, %v13370_v56 }
 0x521   :  { %9627 = vmatmul.mubr.bf16.gmra.mrb[68].mxu1 %v9104_v5  ;;  %v8086_v5 = vadd.f32 %v13311_v28, %v13370_v56  ;;  %v8097_v28 = vadd.f32 %v13335_v51, %v13370_v56 }
 0x522   :  { %9630 = vmatprep.mubr.bf16.mxu1 %v13225_v16  ;;  %v7349_v16 = vsel %vm10748_vm11, %v9103_v30, %v7348_v55  ;;  %v8094_v55 = vadd.f32 %v13333_v62, %v13370_v56  ;;  %v8105_v62 = vadd.f32 %v13349_v52, %v13370_v56 }
 0x523   :  { %v9105_v46 = vcombine.low %v13309_v18, %v7349_v16  ;;  %v8065_v18 = vadd.f32 %v13187_v41, %v13370_v56 }
 0x524   :  { %v9302_v38 = vpop.f32.mrb[220].mxu1 }
 0x525   :  { %v9303_v23 = vpop.f32.mrb[221].mxu1 }
 0x526   :  { %v13361_v45 = vadd.f32 %v9303_v23, %v9302_v38  ;;  %v9305_v48 = vpop.f32.mrb[222].mxu1 }
 0x527   :  { %v9306_v1 = vpop.f32.mrb[223].mxu1 }
 0x528   :  { %v13363_v60 = vadd.f32 %v9306_v1, %v9305_v48 }
 0x529   :  { %9631 = vmatmul.mubr.bf16.gmra.mrb[72].mxu1 %v13242_v63 }
 0x52a   :  { %9634 = vmatprep.mubr.bf16.mxu1 %v13261_v10  ;;  %v8057_v10 = vadd.f32 %v13116_v6, %v13370_v56 }
 0x52c   :  { %v9324_v61 = vpop.f32.mrb[224].mxu1 }
 0x52d   :  { %v9325_v31 = vpop.f32.mrb[225].mxu1 }
 0x52e   :  { %v9326_v9 = vadd.f32 %v9325_v31, %v9324_v61  ;;  %v9327_v44 = vpop.f32.mrb[226].mxu1 }
 0x52f   :  { %v9328_v63 = vpop.f32.mrb[227].mxu1 }
 0x530   :  { %v13379_v50 = vadd.f32 %v9326_v9, %v8054_v14  ;;  %v9329_v8 = vadd.f32 %v9328_v63, %v9327_v44  ;;  %v8102_v63 = vadd.f32 %v13347_v4, %v13370_v56  ;;  %v8113_v4 = vadd.f32 %v13363_v60, %v13370_v56 }
 0x531   :  { %9635 = vmatmul.mubr.bf16.gmra.mrb[76].mxu1 %v9105_v46 }
 0x532   :  { %v13381_v17 = vadd.f32 %v9329_v8, %v8057_v10 }
 0x534   :  { %v9330_v40 = vpop.f32.mrb[228].mxu1 }
 0x535   :  { %v9331_v37 = vpop.f32.mrb[229].mxu1 }
 0x536   :  { %v9332_v42 = vadd.f32 %v9331_v37, %v9330_v40  ;;  %v9333_v0 = vpop.f32.mrb[230].mxu1 }
 0x537   :  { %v9334_v21 = vpop.f32.mrb[231].mxu1 }
 0x538   :  { %v13387_v32 = vadd.f32 %v9332_v42, %v8062_v54  ;;  %v9335_v6 = vadd.f32 %v9334_v21, %v9333_v0  ;;  %v8110_v21 = vadd.f32 %v13361_v45, %v13370_v56 }
 0x53a   :  { %v13389_v58 = vadd.f32 %v9335_v6, %v8065_v18 }
 0x53c   :  { %v9336_v22 = vpop.f32.mrb[232].mxu1 }
 0x53d   :  { %v9337_v25 = vpop.f32.mrb[233].mxu1 }
 0x53e   :  { %v9338_v49 = vadd.f32 %v9337_v25, %v9336_v22  ;;  %v9339_v24 = vpop.f32.mrb[234].mxu1 }
 0x53f   :  { %v9340_v35 = vpop.f32.mrb[235].mxu1 }
 0x540   :  { %v13395_v27 = vadd.f32 %v9338_v49, %v8070_v2  ;;  %v9341_v12 = vadd.f32 %v9340_v35, %v9339_v24 }
 0x542   :  { %v13397_v41 = vadd.f32 %v9341_v12, %v8073_v47 }
 0x544   :  { %v9342_v13 = vpop.f32.mrb[236].mxu1 }
 0x545   :  { %v9343_v43 = vpop.f32.mrb[237].mxu1 }
 0x546   :  { %v9344_v57 = vadd.f32 %v9343_v43, %v9342_v13  ;;  %v9345_v33 = vpop.f32.mrb[238].mxu1 }
 0x547   :  { %v9346_v20 = vpop.f32.mrb[239].mxu1 }
 0x548   :  { %v13403_v36 = vadd.f32 %v9344_v57, %v8078_v7  ;;  %v9347_v34 = vadd.f32 %v9346_v20, %v9345_v33 }
 0x54a   :  { %v13405_v11 = vadd.f32 %v9347_v34, %v8081_v19 }
 0x54c   :  { %v9348_v26 = vpop.f32.mrb[240].mxu1 }
 0x54d   :  { %v9349_v53 = vpop.f32.mrb[241].mxu1 }
 0x54e   :  { %v9350_v38 = vadd.f32 %v9349_v53, %v9348_v26  ;;  %v9351_v15 = vpop.f32.mrb[242].mxu1 }
 0x54f   :  { %v9352_v39 = vpop.f32.mrb[243].mxu1 }
 0x550   :  { %v13411_v23 = vadd.f32 %v9350_v38, %v8086_v5  ;;  %v9353_v48 = vadd.f32 %v9352_v39, %v9351_v15 }
 0x552   :  { %v13413_v29 = vadd.f32 %v9353_v48, %v8089_v3 }
 0x554   :  { %v9354_v1 = vpop.f32.mrb[244].mxu1 }
 0x555   :  { %v9355_v30 = vpop.f32.mrb[245].mxu1 }
 0x556   :  { %v9356_v16 = vadd.f32 %v9355_v30, %v9354_v1  ;;  %v9357_v61 = vpop.f32.mrb[246].mxu1 }
 0x557   :  { %v9358_v31 = vpop.f32.mrb[247].mxu1 }
 0x558   :  { %v13419_v14 = vadd.f32 %v9356_v16, %v8094_v55  ;;  %v9359_v9 = vadd.f32 %v9358_v31, %v9357_v61  ;;  %v10276_v16 = vld [vmem:[#allocation15] sm:$0xff]   ;;  %v10277_v31 = vld [vmem:[#allocation15 + $0x8] sm:$0xff]  }
 0x559   :  { %9638 = vmatprep.subr.bf16.mxu1 %v10276_v16 }
 0x55a   :  { %v13421_v59 = vadd.f32 %v9359_v9, %v8097_v28  ;;  %9639 = vmatpush3.bf16.msra.mxu1 %v10276_v16 }
 0x55b   :  { %9640 = vmatprep.subr.bf16.mxu1 %v10277_v31 }
 0x55c   :  { %v9360_v44 = vpop.f32.mrb[248].mxu1 }
 0x55d   :  { %v9361_v46 = vpop.f32.mrb[249].mxu1 }
 0x55e   :  { %v9362_v10 = vadd.f32 %v9361_v46, %v9360_v44  ;;  %v9363_v8 = vpop.f32.mrb[250].mxu1  ;;  %9641 = vmatpush3.bf16.msra.mxu1 %v10277_v31 }
 0x55f   :  { %v9364_v40 = vpop.f32.mrb[251].mxu1 }
 0x560   :  { %v13427_v37 = vadd.f32 %v9362_v10, %v8102_v63  ;;  %v9365_v54 = vadd.f32 %v9364_v40, %v9363_v8  ;;  %v10278_v63 = vld [vmem:[#allocation15 + $0x10] sm:$0xff]   ;;  %v10279_v8 = vld [vmem:[#allocation15 + $0x18] sm:$0xff]  }
 0x561   :  { %9642 = vmatprep.subr.bf16.mxu1 %v10278_v63 }
 0x562   :  { %v13429_v51 = vadd.f32 %v9365_v54, %v8105_v62  ;;  %9643 = vmatpush3.bf16.msra.mxu1 %v10278_v63 }
 0x563   :  { %9644 = vmatprep.subr.bf16.mxu1 %v10279_v8 }
 0x564   :  { %v9366_v42 = vpop.f32.mrb[252].mxu1 }
 0x565   :  { %v9367_v0 = vpop.f32.mrb[253].mxu1 }
 0x566   :  { %v9368_v18 = vadd.f32 %v9367_v0, %v9366_v42  ;;  %v9369_v6 = vpop.f32.mrb[254].mxu1  ;;  %9645 = vmatpush3.bf16.msra.mxu1 %v10279_v8 }
 0x567   :  { %v9370_v22 = vpop.f32.mrb[255].mxu1 }
 0x568   :  { %v13435_v25 = vadd.f32 %v9368_v18, %v8110_v21  ;;  %v9371_v2 = vadd.f32 %v9370_v22, %v9369_v6  ;;  %v10280_v21 = vld [vmem:[#allocation15 + $0x20] sm:$0xff]   ;;  %v10281_v6 = vld [vmem:[#allocation15 + $0x28] sm:$0xff]   ;;  %v10282_v22 = vld [vmem:[#allocation15 + $0x30] sm:$0xff]  }
 0x569   :  { %9646 = vmatprep.subr.bf16.mxu1 %v10280_v21 }
 0x56a   :  { %v13437_v52 = vadd.f32 %v9371_v2, %v8113_v4  ;;  %9647 = vmatpush3.bf16.msra.mxu1 %v10280_v21 }
 0x56b   :  { %9648 = vmatprep.subr.bf16.mxu1 %v10281_v6 }
 0x56c   :  { %v9388_v49 = vpop.f32.mrb[0].mxu1 }
 0x56d   :  { %v9389_v24 = vpop.f32.mrb[1].mxu1 }
 0x56e   :  { %v9390_v35 = vadd.f32 %v9389_v24, %v9388_v49  ;;  %v9391_v47 = vpop.f32.mrb[2].mxu1  ;;  %9649 = vmatpush3.bf16.msra.mxu1 %v10281_v6 }
 0x56f   :  { %v9392_v12 = vpop.f32.mrb[3].mxu1  ;;  %9650 = vmatprep.subr.bf16.mxu1 %v10282_v22 }
 0x570   :  { %v13440_v13 = vadd.f32 %v9390_v35, %v13379_v50  ;;  %v9393_v45 = vadd.f32 %v9392_v12, %v9391_v47  ;;  %v10283_v47 = vld [vmem:[#allocation15 + $0x38] sm:$0xff]  }
 0x572   :  { %v13443_v43 = vadd.f32 %v9393_v45, %v13381_v17  ;;  %9651 = vmatpush3.bf16.msra.mxu1 %v10282_v22 }
 0x573   :  { %9652 = vmatprep.subr.bf16.mxu1 %v10283_v47 }
 0x574   :  { %v9394_v7 = vpop.f32.mrb[4].mxu1 }
 0x575   :  { %v9395_v57 = vpop.f32.mrb[5].mxu1 }
 0x576   :  { %v9396_v60 = vadd.f32 %v9395_v57, %v9394_v7  ;;  %v9397_v56 = vpop.f32.mrb[6].mxu1  ;;  %9653 = vmatpush3.bf16.msra.mxu1 %v10283_v47 }
 0x577   :  { %v9398_v33 = vpop.f32.mrb[7].mxu1 }
 0x578   :  { %v13446_v20 = vadd.f32 %v9396_v60, %v13387_v32  ;;  %v9399_v19 = vadd.f32 %v9398_v33, %v9397_v56 }
 0x57a   :  { %v13449_v34 = vadd.f32 %v9399_v19, %v13389_v58 }
 0x57c   :  { %v9400_v26 = vpop.f32.mrb[8].mxu1 }
 0x57d   :  { %v9401_v53 = vpop.f32.mrb[9].mxu1 }
 0x57e   :  { %v9402_v50 = vadd.f32 %v9401_v53, %v9400_v26  ;;  %v9403_v5 = vpop.f32.mrb[10].mxu1 }
 0x57f   :  { %v9404_v38 = vpop.f32.mrb[11].mxu1 }
 0x580   :  { %v13452_v17 = vadd.f32 %v9402_v50, %v13395_v27  ;;  %v9405_v15 = vadd.f32 %v9404_v38, %v9403_v5 }
 0x582   :  { %v13455_v39 = vadd.f32 %v9405_v15, %v13397_v41 }
 0x584   :  { %v9406_v3 = vpop.f32.mrb[12].mxu1 }
 0x585   :  { %v9407_v48 = vpop.f32.mrb[13].mxu1 }
 0x586   :  { %v9408_v32 = vadd.f32 %v9407_v48, %v9406_v3  ;;  %v9409_v1 = vpop.f32.mrb[14].mxu1 }
 0x587   :  { %v9410_v30 = vpop.f32.mrb[15].mxu1 }
 0x588   :  { %v13458_v58 = vadd.f32 %v9408_v32, %v13403_v36  ;;  %v9411_v55 = vadd.f32 %v9410_v30, %v9409_v1 }
 0x58a   :  { %v13461_v61 = vadd.f32 %v9411_v55, %v13405_v11 }
 0x58c   :  { %v9412_v27 = vpop.f32.mrb[16].mxu1 }
 0x58d   :  { %v9413_v28 = vpop.f32.mrb[17].mxu1 }
 0x58e   :  { %v9414_v41 = vadd.f32 %v9413_v28, %v9412_v27  ;;  %v9415_v9 = vpop.f32.mrb[18].mxu1 }
 0x58f   :  { %v9416_v44 = vpop.f32.mrb[19].mxu1 }
 0x590   :  { %v13464_v46 = vadd.f32 %v9414_v41, %v13411_v23  ;;  %v9417_v36 = vadd.f32 %v9416_v44, %v9415_v9 }
 0x592   :  { %v13467_v10 = vadd.f32 %v9417_v36, %v13413_v29 }
 0x594   :  { %v9418_v11 = vpop.f32.mrb[20].mxu1 }
 0x595   :  { %v9419_v40 = vpop.f32.mrb[21].mxu1 }
 0x596   :  { %v9420_v62 = vadd.f32 %v9419_v40, %v9418_v11  ;;  %v9421_v54 = vpop.f32.mrb[22].mxu1 }
 0x597   :  { %v9422_v42 = vpop.f32.mrb[23].mxu1 }
 0x598   :  { %v13470_v0 = vadd.f32 %v9420_v62, %v13419_v14  ;;  %v9423_v23 = vadd.f32 %v9422_v42, %v9421_v54 }
 0x59a   :  { %v13473_v18 = vadd.f32 %v9423_v23, %v13421_v59 }
 0x59c   :  { %v9424_v29 = vpop.f32.mrb[24].mxu1 }
 0x59d   :  { %v9425_v4 = vpop.f32.mrb[25].mxu1 }
 0x59e   :  { %v9426_v2 = vadd.f32 %v9425_v4, %v9424_v29  ;;  %v9427_v49 = vpop.f32.mrb[26].mxu1 }
 0x59f   :  { %v9428_v24 = vpop.f32.mrb[27].mxu1 }
 0x5a0   :  { %v13476_v35 = vadd.f32 %v9426_v2, %v13427_v37  ;;  %v9429_v14 = vadd.f32 %v9428_v24, %v9427_v49 }
 0x5a2   :  { %v13479_v59 = vadd.f32 %v9429_v14, %v13429_v51 }
 0x5a4   :  { %v9430_v12 = vpop.f32.mrb[28].mxu1 }
 0x5a5   :  { %v9431_v45 = vpop.f32.mrb[29].mxu1 }
 0x5a6   :  { %v9432_v7 = vadd.f32 %v9431_v45, %v9430_v12  ;;  %v9433_v57 = vpop.f32.mrb[30].mxu1 }
 0x5a7   :  { %v9434_v60 = vpop.f32.mrb[31].mxu1 }
 0x5a8   :  { %v13482_v56 = vadd.f32 %v9432_v7, %v13435_v25  ;;  %v9435_v33 = vadd.f32 %v9434_v60, %v9433_v57 }
 0x5aa   :  { %v13485_v37 = vadd.f32 %v9435_v33, %v13437_v52 }
 0x5ac   :  { %v9452_v19 = vpop.f32.mrb[32].mxu1 }
 0x5ad   :  { %v9453_v26 = vpop.f32.mrb[33].mxu1 }
 0x5ae   :  { %v9454_v53 = vadd.f32 %v9453_v26, %v9452_v19  ;;  %v9455_v51 = vpop.f32.mrb[34].mxu1 }
 0x5af   :  { %v9456_v50 = vpop.f32.mrb[35].mxu1 }
 0x5b0   :  { %v9457_v5 = vadd.f32 %v9456_v50, %v9455_v51  ;;  %v8345_v38 = vadd.f32 %v9454_v53, %v13440_v13 }
 0x5b2   :  { %v13489_v15 = vadd.f32 %v9457_v5, %v13443_v43 }
 0x5b4   :  { %v9458_v3 = vpop.f32.mrb[36].mxu1 }
 0x5b5   :  { %v9459_v48 = vpop.f32.mrb[37].mxu1 }
 0x5b6   :  { %v9460_v32 = vadd.f32 %v9459_v48, %v9458_v3  ;;  %v9461_v25 = vpop.f32.mrb[38].mxu1 }
 0x5b7   :  { %v9462_v1 = vpop.f32.mrb[39].mxu1 }
 0x5b8   :  { %v9463_v30 = vadd.f32 %v9462_v1, %v9461_v25  ;;  %v8353_v52 = vadd.f32 %v9460_v32, %v13446_v20 }
 0x5ba   :  { %v8356_v55 = vadd.f32 %v9463_v30, %v13449_v34 }
 0x5bc   :  { %v9464_v16 = vpop.f32.mrb[40].mxu1 }
 0x5bd   :  { %v9465_v27 = vpop.f32.mrb[41].mxu1 }
 0x5be   :  { %v9466_v31 = vadd.f32 %v9465_v27, %v9464_v16  ;;  %v9467_v28 = vpop.f32.mrb[42].mxu1 }
 0x5bf   :  { %v9468_v41 = vpop.f32.mrb[43].mxu1 }
 0x5c0   :  { %v9469_v9 = vadd.f32 %v9468_v41, %v9467_v28  ;;  %v8361_v13 = vadd.f32 %v9466_v31, %v13452_v17 }
 0x5c2   :  { %v13495_v43 = vadd.f32 %v9469_v9, %v13455_v39 }
 0x5c4   :  { %v9470_v44 = vpop.f32.mrb[44].mxu1 }
 0x5c5   :  { %v9471_v36 = vpop.f32.mrb[45].mxu1 }
 0x5c6   :  { %v9472_v63 = vadd.f32 %v9471_v36, %v9470_v44  ;;  %v9473_v11 = vpop.f32.mrb[46].mxu1 }
 0x5c7   :  { %v9474_v8 = vpop.f32.mrb[47].mxu1 }
 0x5c8   :  { %v9475_v40 = vadd.f32 %v9474_v8, %v9473_v11  ;;  %v8369_v20 = vadd.f32 %v9472_v63, %v13458_v58 }
 0x5ca   :  { %v8372_v34 = vadd.f32 %v9475_v40, %v13461_v61 }
 0x5cc   :  { %v9476_v62 = vpop.f32.mrb[48].mxu1 }
 0x5cd   :  { %v9477_v54 = vpop.f32.mrb[49].mxu1 }
 0x5ce   :  { %v9478_v42 = vadd.f32 %v9477_v54, %v9476_v62  ;;  %v9479_v23 = vpop.f32.mrb[50].mxu1 }
 0x5cf   :  { %v9480_v21 = vpop.f32.mrb[51].mxu1 }
 0x5d0   :  { %v9481_v29 = vadd.f32 %v9480_v21, %v9479_v23  ;;  %v13500_v17 = vadd.f32 %v9478_v42, %v13464_v46 }
 0x5d2   :  { %v13503_v39 = vadd.f32 %v9481_v29, %v13467_v10 }
 0x5d4   :  { %v9482_v6 = vpop.f32.mrb[52].mxu1 }
 0x5d5   :  { %v9483_v22 = vpop.f32.mrb[53].mxu1 }
 0x5d6   :  { %v9484_v4 = vadd.f32 %v9483_v22, %v9482_v6  ;;  %v9485_v2 = vpop.f32.mrb[54].mxu1 }
 0x5d7   :  { %v9486_v49 = vpop.f32.mrb[55].mxu1 }
 0x5d8   :  { %v9487_v58 = vadd.f32 %v9486_v49, %v9485_v2  ;;  %v8385_v61 = vadd.f32 %v9484_v4, %v13470_v0 }
 0x5da   :  { %v8388_v24 = vadd.f32 %v9487_v58, %v13473_v18 }
 0x5dc   :  { %v9488_v14 = vpop.f32.mrb[56].mxu1 }
 0x5dd   :  { %v9489_v47 = vpop.f32.mrb[57].mxu1 }
 0x5de   :  { %v9490_v12 = vadd.f32 %v9489_v47, %v9488_v14  ;;  %v9491_v45 = vpop.f32.mrb[58].mxu1 }
 0x5df   :  { %v9492_v7 = vpop.f32.mrb[59].mxu1 }
 0x5e0   :  { %v9493_v46 = vadd.f32 %v9492_v7, %v9491_v45  ;;  %v13508_v57 = vadd.f32 %v9490_v12, %v13476_v35 }
 0x5e2   :  { %v13511_v10 = vadd.f32 %v9493_v46, %v13479_v59 }
 0x5e4   :  { %v9494_v60 = vpop.f32.mrb[60].mxu1 }
 0x5e5   :  { %v9495_v33 = vpop.f32.mrb[61].mxu1 }
 0x5e6   :  { %v9496_v19 = vadd.f32 %v9495_v33, %v9494_v60  ;;  %v9497_v26 = vpop.f32.mrb[62].mxu1 }
 0x5e7   :  { %v9498_v53 = vpop.f32.mrb[63].mxu1 }
 0x5e8   :  { %v9499_v0 = vadd.f32 %v9498_v53, %v9497_v26  ;;  %v13514_v18 = vadd.f32 %v9496_v19, %v13482_v56 }
 0x5ea   :  { %v13517_v51 = vadd.f32 %v9499_v0, %v13485_v37 }
 0x5ec   :  { %v9624_v50 = vpop.f32.mrb[64].mxu1 }
 0x5ed   :  { %v8450_v5 = vadd.f32 %v9624_v50, %v8353_v52  ;;  %v8441_v3 = vpop.f32.mrb[65].mxu1 }
 0x5ee   :  { %v8442_v35 = vadd.f32 %v8441_v3, %v8345_v38  ;;  %v9625_v48 = vpop.f32.mrb[66].mxu1 }
 0x5ef   :  { %v8506_v32 = vmax.f32 %v8450_v5, 0.0  ;;  %v8453_v59 = vadd.f32 %v9625_v48, %v8356_v55  ;;  %v8444_v25 = vpop.f32.mrb[67].mxu1 }
 0x5f0   :  { %v8504_v1 = vmax.f32 %v8442_v35, 0.0  ;;  %v8445_v30 = vadd.f32 %v8444_v25, %v13489_v15 }
 0x5f1   :  { %8522 = vst [vmem:[#allocation7 + $0x10] sm:$0xff] %v8506_v32  ;;  %v8507_v16 = vmax.f32 %v8453_v59, 0.0 }
 0x5f2   :  { %8520 = vst [vmem:[#allocation7] sm:$0xff] %v8504_v1  ;;  %v8505_v27 = vmax.f32 %v8445_v30, 0.0 }
 0x5f3   :  { %8523 = vst [vmem:[#allocation7 + $0x18] sm:$0xff] %v8507_v16 }
 0x5f4   :  { %8521 = vst [vmem:[#allocation7 + $0x8] sm:$0xff] %v8505_v27  ;;  %v9628_v56 = vpop.f32.mrb[68].mxu1 }
 0x5f5   :  { %v8466_v37 = vadd.f32 %v9628_v56, %v8369_v20  ;;  %v8457_v31 = vpop.f32.mrb[69].mxu1 }
 0x5f6   :  { %v8458_v28 = vadd.f32 %v8457_v31, %v8361_v13  ;;  %v9629_v52 = vpop.f32.mrb[70].mxu1 }
 0x5f7   :  { %v8510_v41 = vmax.f32 %v8466_v37, 0.0  ;;  %v8469_v38 = vadd.f32 %v9629_v52, %v8372_v34  ;;  %v8460_v9 = vpop.f32.mrb[71].mxu1 }
 0x5f8   :  { %v8508_v44 = vmax.f32 %v8458_v28, 0.0  ;;  %v8461_v55 = vadd.f32 %v8460_v9, %v13495_v43 }
 0x5f9   :  { %8526 = vst [vmem:[#allocation7 + $0x30] sm:$0xff] %v8510_v41  ;;  %v8511_v36 = vmax.f32 %v8469_v38, 0.0 }
 0x5fa   :  { %8524 = vst [vmem:[#allocation7 + $0x20] sm:$0xff] %v8508_v44  ;;  %v8509_v15 = vmax.f32 %v8461_v55, 0.0  ;;  %v8538_v63 = vld [vmem:[#allocation7 + $0x10] ss:$2 sm:$0xff]  ;;  %v8554_v11 = vld [vmem:[#allocation7 + $0x11] ss:$2 sm:$0xff] }
 0x5fb   :  { %8527 = vst [vmem:[#allocation7 + $0x38] sm:$0xff] %v8511_v36  ;;  %v8536_v8 = vld [vmem:[#allocation7] ss:$2 sm:$0xff]  ;;  %v8552_v40 = vld [vmem:[#allocation7 + $0x1] ss:$2 sm:$0xff]  ;;  %v8568_v62 = vadd.f32 %v8554_v11, %v8538_v63 }
 0x5fc   :  { %8525 = vst [vmem:[#allocation7 + $0x28] sm:$0xff] %v8509_v15  ;;  %v9632_v20 = vpop.f32.mrb[72].mxu1  ;;  %v8567_v13 = vadd.f32 %v8552_v40, %v8536_v8 }
 0x5fd   :  { %v8482_v54 = vadd.f32 %v9632_v20, %v8385_v61  ;;  %v8473_v42 = vpop.f32.mrb[73].mxu1  ;;  %v8584_v6 = vrot.slane %v8568_v62, 4 }
 0x5fe   :  { %v8474_v34 = vadd.f32 %v8473_v42, %v13500_v17  ;;  %v9633_v23 = vpop.f32.mrb[74].mxu1  ;;  %v8583_v2 = vrot.slane %v8567_v13, 4 }
 0x5ff   :  { %v8514_v21 = vmax.f32 %v8482_v54, 0.0  ;;  %v8485_v43 = vadd.f32 %v9633_v23, %v8388_v24  ;;  %v8476_v29 = vpop.f32.mrb[75].mxu1  ;;  %v8600_v17 = vadd.f32 %v8584_v6, %v8568_v62  ;;  %v9179_v6 = vld [vmem:[%s13548_s6] ss:$0 sm:$0xff]  ;;  %s10483_s6 = smov [#allocation17]  }
 0x600   :  { %v8512_v22 = vmax.f32 %v8474_v34, 0.0  ;;  %v8477_v4 = vadd.f32 %v8476_v29, %v13503_v39  ;;  %v8599_v46 = vadd.f32 %v8583_v2, %v8567_v13  ;;  %s8785_s9 = sshll.u32 %s10483_s6, 4  ;;  %s8786_s9 = int_to_ptr.vmem [resolvable:$true] %s8785_s9 }
 0x601   :  { %8530 = vst [vmem:[#allocation7 + $0x50] sm:$0xff] %v8514_v21  ;;  %v8515_v49 = vmax.f32 %v8485_v43, 0.0  ;;  %v8608_v35 = vmul.f32 0.25, %v8600_v17  ;;  %s10446_s10 = scalar_lea.vmem %s8786_s9, 32  ;;  %p10451_p5 = scmp.lt.s32.totalorder %s8786_s9, %s8786_s9 }
 0x602   :  { %8528 = vst [vmem:[#allocation7 + $0x40] sm:$0xff] %v8512_v22  ;;  %v8513_v58 = vmax.f32 %v8477_v4, 0.0  ;;  %v8542_v14 = vld [vmem:[#allocation7 + $0x30] ss:$2 sm:$0xff]  ;;  %v8558_v47 = vld [vmem:[#allocation7 + $0x31] ss:$2 sm:$0xff]  ;;  %p10447_p4 = scmp.ne.s32.totalorder %s8786_s9, %s10446_s10  ;;  %p10452_p6 = scmp.lt.s32.totalorder %s10446_s10, %s10446_s10 }
 0x603   :  { %8531 = vst [vmem:[#allocation7 + $0x58] sm:$0xff] %v8515_v49  ;;  %v8540_v61 = vld [vmem:[#allocation7 + $0x20] ss:$2 sm:$0xff]  ;;  %v8556_v12 = vld [vmem:[#allocation7 + $0x21] ss:$2 sm:$0xff]  ;;  %v8570_v45 = vadd.f32 %v8558_v47, %v8542_v14  ;;  %v8607_v25 = vmul.f32 0.25, %v8599_v46 }
 0x604   :  { %8529 = vst [vmem:[#allocation7 + $0x48] sm:$0xff] %v8513_v58  ;;  %v9636_v7 = vpop.f32.mrb[76].mxu1  ;;  %v8569_v24 = vadd.f32 %v8556_v12, %v8540_v61  ;;  %p10453_p7 = por %p10452_p6, %p10451_p5 }
 0x605   :  { %v8498_v60 = vadd.f32 %v9636_v7, %v13514_v18  ;;  %v8489_v33 = vpop.f32.mrb[77].mxu1  ;;  %v8586_v39 = vrot.slane %v8570_v45, 4  ;;  %v8623_v28 = vcombine.low %v8607_v25, %v8608_v35 }
 0x606   :  { %v8490_v19 = vadd.f32 %v8489_v33, %v13508_v57  ;;  %v9637_v26 = vpop.f32.mrb[78].mxu1  ;;  %v8585_v53 = vrot.slane %v8569_v24, 4  ;;  %p10454_p8 = pnand %p10453_p7, %p10447_p4 }
 0x607   :  { %v8518_v0 = vmax.f32 %v8498_v60, 0.0  ;;  %v8501_v50 = vadd.f32 %v9637_v26, %v13517_v51  ;;  %v8492_v5 = vpop.f32.mrb[79].mxu1  ;;  %v8602_v3 = vadd.f32 %v8586_v39, %v8570_v45 }
 0x608   :  { %v8516_v48 = vmax.f32 %v8490_v19, 0.0  ;;  %v8493_v32 = vadd.f32 %v8492_v5, %v13511_v10  ;;  %v8601_v59 = vadd.f32 %v8585_v53, %v8569_v24 }
 0x609   :  { %8534 = vst [vmem:[#allocation7 + $0x70] sm:$0xff] %v8518_v0  ;;  %v8519_v1 = vmax.f32 %v8501_v50, 0.0  ;;  %v8610_v18 = vmul.f32 0.25, %v8602_v3 }
 0x60a   :  { %v8546_v30 = vld [vmem:[#allocation7 + $0x50] ss:$2 sm:$0xff]  ;;  %v8562_v16 = vld [vmem:[#allocation7 + $0x51] ss:$2 sm:$0xff]  ;;  %8532 = vst [vmem:[#allocation7 + $0x60] sm:$0xff] %v8516_v48  ;;  %v8517_v57 = vmax.f32 %v8493_v32, 0.0 }
 0x60b   :  { %v8609_v27 = vmul.f32 0.25, %v8601_v59  ;;  %v8544_v56 = vld [vmem:[#allocation7 + $0x40] ss:$2 sm:$0xff]  ;;  %v8560_v37 = vld [vmem:[#allocation7 + $0x41] ss:$2 sm:$0xff]  ;;  %8535 = vst [vmem:[#allocation7 + $0x78] sm:$0xff] %v8519_v1  ;;  %v8572_v51 = vadd.f32 %v8562_v16, %v8546_v30 }
 0x60c   :  { %v8571_v31 = vadd.f32 %v8560_v37, %v8544_v56  ;;  %8533 = vst [vmem:[#allocation7 + $0x68] sm:$0xff] %v8517_v57 }
 0x60d   :  { %v8624_v52 = vcombine.low %v8609_v27, %v8610_v18  ;;  %v8588_v10 = vrot.slane %v8572_v51, 4 }
 0x60e   :  { %v8587_v38 = vrot.slane %v8571_v31, 4 }
 0x60f   :  { %v8631_v41 = vpack.c.bf16 %v8624_v52, %v8623_v28  ;;  %v8604_v63 = vadd.f32 %v8588_v10, %v8572_v51 }
 0x610   :  { %v8603_v11 = vadd.f32 %v8587_v38, %v8571_v31 }
 0x611   :  { %9654 = vmatprep.mubr.bf16.mxu1 %v8631_v41  ;;  %v8612_v13 = vmul.f32 0.25, %v8604_v63 }
 0x612   :  { %v8550_v9 = vld [vmem:[#allocation7 + $0x70] ss:$2 sm:$0xff]  ;;  %v8566_v44 = vld [vmem:[#allocation7 + $0x71] ss:$2 sm:$0xff]  ;;  %v8611_v54 = vmul.f32 0.25, %v8603_v11 }
 0x613   :  { %v8574_v55 = vadd.f32 %v8566_v44, %v8550_v9  ;;  %v8548_v36 = vld [vmem:[#allocation7 + $0x60] ss:$2 sm:$0xff]  ;;  %v8564_v15 = vld [vmem:[#allocation7 + $0x61] ss:$2 sm:$0xff] }
 0x614   :  { %v8573_v8 = vadd.f32 %v8564_v15, %v8548_v36  ;;  %v8625_v21 = vcombine.low %v8611_v54, %v8612_v13 }
 0x615   :  { %v8590_v40 = vrot.slane %v8574_v55, 4 }
 0x616   :  { %v8589_v62 = vrot.slane %v8573_v8, 4 }
 0x617   :  { %v8606_v20 = vadd.f32 %v8590_v40, %v8574_v55 }
 0x618   :  { %v8605_v42 = vadd.f32 %v8589_v62, %v8573_v8 }
 0x619   :  { %v8614_v34 = vmul.f32 0.25, %v8606_v20 }
 0x61a   :  { %v8613_v23 = vmul.f32 0.25, %v8605_v42 }
 0x61c   :  { %v8626_v43 = vcombine.low %v8613_v23, %v8614_v34 }
 0x61e   :  { %v8632_v29 = vpack.c.bf16 %v8626_v43, %v8625_v21 }
 0x620   :  { %9655 = vmatmul.mubr.bf16.vlgmr.msra.gmra.mrb[80].mxu1 %v8632_v29 }
 0x6f3   :  { %v9656_v22 = vpop.f32.mrb[80].mxu1 }
 0x6f4   :  { %v8751_v4 = vadd.f32 %v9656_v22, %v9179_v6  ;;  %v8742_v2 = vpop.f32.mrb[81].mxu1 }
 0x6f5   :  { %v8743_v49 = vadd.f32 %v9179_v6, %v8742_v2  ;;  %v9657_v58 = vpop.f32.mrb[82].mxu1 }
 0x6f6   :  { %v8754_v14 = vadd.f32 %v9657_v58, %v9179_v6  ;;  %v8745_v47 = vpop.f32.mrb[83].mxu1  ;;  %v8759_v12 = vmax.f32 %v8751_v4, 0.0 }
 0x6f7   :  { %v8746_v61 = vadd.f32 %v9179_v6, %v8745_v47  ;;  %v8757_v17 = vmax.f32 %v8743_v49, 0.0 }
 0x6f8   :  { %v8760_v45 = vmax.f32 %v8754_v14, 0.0 }
 0x6f9   :  { %v8758_v7 = vmax.f32 %v8746_v61, 0.0 }
 0x6fa   :  { %v8770_v24 = vadd.f32 %v8760_v45, %v8759_v12 }
 0x6fb   :  { %v8761_v46 = vadd.f32 %v8758_v7, %v8757_v17 }
 0x6fc   :  { %v8771_v60 = vrot.slane %v8770_v24, 4 }
 0x6fd   :  { %v8762_v33 = vrot.slane %v8761_v46, 4 }
 0x6fe   :  { %v8772_v39 = vadd.f32 %v8771_v60, %v8770_v24 }
 0x6ff   :  { %v8763_v19 = vadd.f32 %v8762_v33, %v8761_v46 }
 0x700   :  { %v8773_v26 = vrot.slane %v8772_v39, 2 }
 0x701   :  { %v8764_v53 = vrot.slane %v8763_v19, 2 }
 0x702   :  { %v8774_v0 = vadd.f32 %v8773_v26, %v8772_v39 }
 0x703   :  { %v8765_v50 = vadd.f32 %v8764_v53, %v8763_v19 }
 0x704   :  { %v8775_v5 = vrot.slane %v8774_v0, 1 }
 0x705   :  { %v8766_v3 = vrot.slane %v8765_v50, 1 }
 0x706   :  { %v8776_v35 = vadd.f32 %v8775_v5, %v8774_v0 }
 0x707   :  { %v8767_v48 = vadd.f32 %v8766_v3, %v8765_v50 }
 0x708   :  { %v8777_v32 = vmul.f32 0.0625, %v8776_v35 }
 0x709   :  { %v8768_v59 = vmul.f32 0.0625, %v8767_v48 }
 0x70a   :  { %8779 = vst [vmem:[#allocation17 + $0x1] sm:$0x1] %v8777_v32 }
 0x70b   :  { %8769 = vst [vmem:[#allocation17] sm:$0x1] %v8768_v59 }
 0x70c   :  { %10457 = shalt.err (!%p10454_p8)
}
 0x70d   :  { %s10458_s15 = scalar_lea.hbm %s13549_s7, 32 }
 0x70e   :  { %p10459_p9 = scmp.ne.s32.totalorder %s13549_s7, %s10458_s15  ;;  %p10462_p10 = scmp.lt.u32.totalorder %s10458_s15, %s13549_s7 }
 0x710   :  { %p10464_p11 = pnand %p10462_p10, %p10459_p9 }
 0x712   :  { %10467 = shalt.err (!%p10464_p11)
}
 0x713   :  { %s10484_s18 = smov 16   ;;  %s10485_s19 = smov 1  }
 0x714   :  { %8791 = dma.vmem_to_hbm [thread:$0]  %s8786_s9, 32, %s13549_s7, [#allocation11], %s10484_s18, %s10484_s18, %s10485_s19  }
 0x715   :  { %10474 = dma.done.wait [#allocation11], 32  }
 0x716   :  { %10475 = vsyncadd [#allocation11], 4294967264 }
 0x717   :  { %8795 = vsyncpa [#allocation10], 1 }
 0x718   :  { %8796 = vsyncpa [#allocation13], 1 }
 0x719   :  { %8797 = vsyncpa [#allocation16], 1 }
 0x71a   :  { %8798 = vsyncpa [#allocation11], 1 }

</bundles_post_ra>
